<compile_context>
chip_gen: v7x
topology: tpu7x:2x2x1
jax: 0.10.0
libtpu: 0.0.40
codegen_flags: <defaults>
</compile_context>

<pallas_src>
import jax
import jax.numpy as jnp
from jax.experimental import pallas as pl
from jax.experimental.pallas import tpu as pltpu


def _leaky_relu(x, slope=0.2):
    # max(x, slope*x) == LeakyReLU(slope) for 0 < slope < 1; avoids the
    # compare+select mask vreg of jnp.where.
    return jnp.maximum(x, slope * x)


def discriminator_kernel(x_ref, w1_ref, b1_ref, w2_hbm, b2_ref, w3_hbm, b3_ref,
                         w4_ref, b4_ref, o_ref, w2_vmem, w3_vmem, dma_sem):
    f32, bf16 = jnp.float32, jnp.bfloat16
    step = pl.program_id(0)
    first_step = step == 0

    # --- Perf item 1: start streaming w2/w3 HBM->VMEM.  The copies run in the
    # background while the MXU chews on layer 1.  VMEM scratch persists across
    # grid steps, so the fetch happens exactly once (step 0 only).
    @pl.when(first_step)
    def _start_weight_prefetch():
        pltpu.make_async_copy(w2_hbm, w2_vmem, dma_sem.at[0]).start()
        pltpu.make_async_copy(w3_hbm, w3_vmem, dma_sem.at[1]).start()

    # Layer 1: D -> 1024 (bf16 MXU, f32 accumulate), overlapped with the DMAs.
    h = jnp.dot(x_ref[...], w1_ref[...], preferred_element_type=f32)
    h = _leaky_relu(h + b1_ref[...])

    @pl.when(first_step)
    def _wait_w2():
        pltpu.make_async_copy(w2_hbm, w2_vmem, dma_sem.at[0]).wait()

    # Layer 2: 1024 -> 512
    h = jnp.dot(h.astype(bf16), w2_vmem[...], preferred_element_type=f32)
    h = _leaky_relu(h + b2_ref[...])

    @pl.when(first_step)
    def _wait_w3():
        pltpu.make_async_copy(w3_hbm, w3_vmem, dma_sem.at[1]).wait()

    # Layer 3: 512 -> 256
    h = jnp.dot(h.astype(bf16), w3_vmem[...], preferred_element_type=f32)
    h = _leaky_relu(h + b3_ref[...])

    # Layer 4 head (256 -> 1), perf item 3: w4 is an (8, 256) slab (row 0 real,
    # rows 1..7 zero) so the head is an MXU-aligned matmul producing the
    # lane-dense logit row directly (no sublane->lane relayout needed).
    logits8 = jax.lax.dot_general(
        w4_ref[...], h.astype(bf16),
        dimension_numbers=(((1,), (1,)), ((), ())),
        preferred_element_type=f32)                 # (8, tile_b)
    logit = logits8[0:1, :] + b4_ref[...]           # (1, tile_b)

    # Sigmoid: exp on EUP; exact reciprocal so logit -> -inf gives exactly 0.
    sig = 1.0 / (1.0 + jnp.exp(-logit))

    # Resident output block: each step writes its own lane-dense row; one dense
    # writeback DMA happens when the grid finishes.
    o_ref[pl.ds(step, 1), :] = sig


def discriminator_forward(x, params, *, tile_b=256):
    """x: (B, image_dim) bf16/f32 -> (B, 1) f32 probabilities."""
    w1, b1, w2, b2, w3, b3, w4, b4 = params
    B, D = x.shape
    tile_b = min(tile_b, B)
    assert B % tile_b == 0, "batch must be divisible by tile_b"
    # NOTE: for a real 28x28 discriminator (image_dim=784), pad the features to
    # a multiple of 128 (e.g. 896) in the caller so layer 1 feeds the MXU with
    # unmasked lanes (review item 7).
    n_tiles = B // tile_b

    resident = lambda a: pl.BlockSpec(a.shape, lambda i: (0, 0))  # full, constant-index
    hbm = pl.BlockSpec(memory_space=pl.ANY)                       # manual-DMA input

    out = pl.pallas_call(
        discriminator_kernel,
        out_shape=jax.ShapeDtypeStruct((n_tiles, tile_b), jnp.float32),
        grid_spec=pltpu.PrefetchScalarGridSpec(
            num_scalar_prefetch=0,
            grid=(n_tiles,),
            in_specs=[
                pl.BlockSpec((tile_b, D), lambda i: (i, 0)),   # x tile (double-buffered)
                resident(w1), resident(b1),                    # layer 1, resident in VMEM
                hbm,          resident(b2),                    # w2 in HBM -> manual DMA
                hbm,          resident(b3),                    # w3 in HBM -> manual DMA
                resident(w4), resident(b4),                    # head weights / bias
            ],
            out_specs=pl.BlockSpec((n_tiles, tile_b), lambda i: (0, 0)),
            scratch_shapes=[
                pltpu.VMEM(w2.shape, w2.dtype),    # single-buffered w2 landing zone
                pltpu.VMEM(w3.shape, w3.dtype),    # single-buffered w3 landing zone
                pltpu.SemaphoreType.DMA((2,)),
            ],
        ),
        compiler_params=pltpu.CompilerParams(
            # Sequential grid: required by the step-0-gated weight prefetch and
            # avoids duplicating the weight fetch per TensorCore on v7x (the
            # kernel is weight-DMA bound there, not compute bound).
            dimension_semantics=("arbitrary",),
        ),
    )(x, w1, b1, w2, b2, w3, b3, w4, b4)
    return out.reshape(B, 1)


def init_params(key, image_dim):
    """nn.Linear-style init: U(-1/sqrt(fan_in), +1/sqrt(fan_in))."""
    dims = [(image_dim, 1024), (1024, 512), (512, 256), (256, 1)]
    params = []
    for i, (fan_in, fan_out) in enumerate(dims):
        kw, kb, key = jax.random.split(key, 3)
        bound = 1.0 / jnp.sqrt(jnp.float32(fan_in))
        w = jax.random.uniform(kw, (fan_in, fan_out), jnp.float32, -bound, bound)
        b = jax.random.uniform(kb, (1, fan_out), jnp.float32, -bound, bound)
        if i == 3:
            # Head weight stored as an (8, 256) slab: row 0 is the real weight
            # row, rows 1..7 are zero padding for an MXU-aligned M=8 LHS.
            w = jnp.zeros((8, fan_in), jnp.float32).at[0].set(w[:, 0])
        params += [w, b]
    return tuple(params)


def prepare_params(params_f32):
    """Cast weights to bf16 (MXU-native); keep biases in f32."""
    return tuple(p.astype(jnp.bfloat16) if i % 2 == 0 else p
                 for i, p in enumerate(params_f32))


def reference_forward(x, params):
    """Pure-JAX reference mirroring the kernel's bf16/f32 mixed precision."""
    w1, b1, w2, b2, w3, b3, w4, b4 = params
    f32, bf16 = jnp.float32, jnp.bfloat16
    h = jax.nn.leaky_relu(jnp.dot(x, w1, preferred_element_type=f32) + b1, 0.2)
    h = jax.nn.leaky_relu(
        jnp.dot(h.astype(bf16), w2, preferred_element_type=f32) + b2, 0.2)
    h = jax.nn.leaky_relu(
        jnp.dot(h.astype(bf16), w3, preferred_element_type=f32) + b3, 0.2)
    logit = jnp.dot(h.astype(bf16), w4[0], preferred_element_type=f32)[:, None] + b4
    return jax.nn.sigmoid(logit)


if __name__ == "__main__":
    key = jax.random.PRNGKey(0)
    kx, kp = jax.random.split(key)

    IMAGE_DIM = 256   # flattened image dim (multiple of 128 lanes)
    BATCH = 512       # 2 x 256-row tiles -> full-height MXU matmuls, 2-step grid

    x = jax.random.normal(kx, (BATCH, IMAGE_DIM), jnp.float32)
    params = prepare_params(init_params(kp, IMAGE_DIM))
    x_bf16 = x.astype(jnp.bfloat16)

    out = jax.block_until_ready(discriminator_forward(x_bf16, params, tile_b=256))

    ref = reference_forward(x_bf16, params)
    assert out.shape == (BATCH, 1)
    assert bool(jnp.all(jnp.isfinite(out)))
    max_err = float(jnp.max(jnp.abs(out - ref)))
    assert jnp.allclose(out, ref, atol=5e-3, rtol=5e-3), max_err

    print("KERNEL_OK")
</pallas_src>

<mosaic_0001>
module attributes {stable_mosaic.version = 11 : i64} {
  func.func @discriminator_kernel(%arg0: i32, %arg1: memref<256x256xbf16, #tpu.memory_space<vmem>>, %arg2: memref<256x1024xbf16, #tpu.memory_space<vmem>>, %arg3: memref<1x1024xf32, #tpu.memory_space<vmem>>, %arg4: memref<1024x512xbf16, #tpu.memory_space<any>>, %arg5: memref<1x512xf32, #tpu.memory_space<vmem>>, %arg6: memref<512x256xbf16, #tpu.memory_space<any>>, %arg7: memref<1x256xf32, #tpu.memory_space<vmem>>, %arg8: memref<8x256xbf16, #tpu.memory_space<vmem>>, %arg9: memref<1x1xf32, #tpu.memory_space<vmem>>, %arg10: memref<2x256xf32, #tpu.memory_space<vmem>>, %arg11: memref<1024x512xbf16, #tpu.memory_space<vmem>>, %arg12: memref<512x256xbf16, #tpu.memory_space<vmem>>, %arg13: memref<2x!tpu.dma_semaphore, #tpu.memory_space<semaphore_mem>>) attributes {dimension_semantics = [#tpu.dimension_semantics<arbitrary>], iteration_bounds = array<i64: 2>, scalar_prefetch = 0 : i64, scratch_operands = 3 : i64, tpu.core_type = #tpu.core_type<tc>, window_params = [{transform_indices = @transform_0, window_bounds = array<i64: 256, 256>}, {pipeline_mode = #tpu.pipeline_mode<synchronous>, transform_indices = @transform_1, window_bounds = array<i64: 256, 1024>}, {pipeline_mode = #tpu.pipeline_mode<synchronous>, transform_indices = @transform_2, window_bounds = array<i64: 1, 1024>}, {}, {pipeline_mode = #tpu.pipeline_mode<synchronous>, transform_indices = @transform_4, window_bounds = array<i64: 1, 512>}, {}, {pipeline_mode = #tpu.pipeline_mode<synchronous>, transform_indices = @transform_6, window_bounds = array<i64: 1, 256>}, {pipeline_mode = #tpu.pipeline_mode<synchronous>, transform_indices = @transform_7, window_bounds = array<i64: 8, 256>}, {pipeline_mode = #tpu.pipeline_mode<synchronous>, transform_indices = @transform_8, window_bounds = array<i64: 1, 1>}, {pipeline_mode = #tpu.pipeline_mode<synchronous>, transform_indices = @transform_9, window_bounds = array<i64: 2, 256>}]} {
    %c0_i32 = arith.constant 0 : i32
    %0 = arith.cmpi eq, %arg0, %c0_i32 : i32
    %1 = arith.extui %0 : i1 to i32
    %c0_i32_0 = arith.constant 0 : i32
    %2 = arith.cmpi ne, %1, %c0_i32_0 : i32
    scf.if %2 {
      %c0_i32_30 = arith.constant 0 : i32
      %50 = tpu.memref_slice %arg13[%c0_i32_30] : memref<2x!tpu.dma_semaphore, #tpu.memory_space<semaphore_mem>> -> memref<1x!tpu.dma_semaphore, #tpu.memory_space<semaphore_mem>>
      %51 = tpu.memref_squeeze %50 : memref<1x!tpu.dma_semaphore, #tpu.memory_space<semaphore_mem>> -> memref<!tpu.dma_semaphore, #tpu.memory_space<semaphore_mem>>
      tpu.enqueue_dma source(%arg4 : memref<1024x512xbf16, #tpu.memory_space<any>>) target(%arg11 : memref<1024x512xbf16, #tpu.memory_space<vmem>>) target_semaphore(%51 : memref<!tpu.dma_semaphore, #tpu.memory_space<semaphore_mem>>)
      %c1_i32 = arith.constant 1 : i32
      %52 = tpu.memref_slice %arg13[%c1_i32] : memref<2x!tpu.dma_semaphore, #tpu.memory_space<semaphore_mem>> -> memref<1x!tpu.dma_semaphore, #tpu.memory_space<semaphore_mem>>
      %53 = tpu.memref_squeeze %52 : memref<1x!tpu.dma_semaphore, #tpu.memory_space<semaphore_mem>> -> memref<!tpu.dma_semaphore, #tpu.memory_space<semaphore_mem>>
      tpu.enqueue_dma source(%arg6 : memref<512x256xbf16, #tpu.memory_space<any>>) target(%arg12 : memref<512x256xbf16, #tpu.memory_space<vmem>>) target_semaphore(%53 : memref<!tpu.dma_semaphore, #tpu.memory_space<semaphore_mem>>)
    } else {
    }
    %c0 = arith.constant 0 : index
    %c0_1 = arith.constant 0 : index
    %3 = vector.load %arg1[%c0, %c0_1] : memref<256x256xbf16, #tpu.memory_space<vmem>>, vector<256x256xbf16>
    %c0_2 = arith.constant 0 : index
    %c0_3 = arith.constant 0 : index
    %4 = vector.load %arg2[%c0_2, %c0_3] : memref<256x1024xbf16, #tpu.memory_space<vmem>>, vector<256x1024xbf16>
    %cst = arith.constant dense<0.000000e+00> : vector<256x1024xf32>
    %5 = tpu.matmul %3, %4, %cst {dimension_numbers = #tpu.dot_dimension_numbers<[1], [0], [0], [1], [0, 0, 1, 1], [], []>} : vector<256x256xbf16>, vector<256x1024xbf16>, vector<256x1024xf32> -> vector<256x1024xf32>
    %c0_4 = arith.constant 0 : index
    %c0_5 = arith.constant 0 : index
    %6 = vector.load %arg3[%c0_4, %c0_5] : memref<1x1024xf32, #tpu.memory_space<vmem>>, vector<1x1024xf32>
    %7 = vector.broadcast %6 : vector<1x1024xf32> to vector<256x1024xf32>
    %8 = arith.addf %5, %7 : vector<256x1024xf32>
    %cst_6 = arith.constant 2.000000e-01 : f32
    %9 = vector.broadcast %cst_6 : f32 to vector<256x1024xf32>
    %10 = arith.mulf %9, %8 : vector<256x1024xf32>
    %11 = arith.maximumf %8, %10 : vector<256x1024xf32>
    %12 = arith.extui %0 : i1 to i32
    %c0_i32_7 = arith.constant 0 : i32
    %13 = arith.cmpi ne, %12, %c0_i32_7 : i32
    scf.if %13 {
      %c0_i32_30 = arith.constant 0 : i32
      %50 = tpu.memref_slice %arg13[%c0_i32_30] : memref<2x!tpu.dma_semaphore, #tpu.memory_space<semaphore_mem>> -> memref<1x!tpu.dma_semaphore, #tpu.memory_space<semaphore_mem>>
      %51 = tpu.memref_squeeze %50 : memref<1x!tpu.dma_semaphore, #tpu.memory_space<semaphore_mem>> -> memref<!tpu.dma_semaphore, #tpu.memory_space<semaphore_mem>>
      tpu.wait_dma2 semaphore(%51 : memref<!tpu.dma_semaphore, #tpu.memory_space<semaphore_mem>>) src(%arg4 : memref<1024x512xbf16, #tpu.memory_space<any>>) dst(%arg11 : memref<1024x512xbf16, #tpu.memory_space<vmem>>)
    } else {
    }
    %14 = arith.truncf %11 : vector<256x1024xf32> to vector<256x1024xbf16>
    %c0_8 = arith.constant 0 : index
    %c0_9 = arith.constant 0 : index
    %15 = vector.load %arg11[%c0_8, %c0_9] : memref<1024x512xbf16, #tpu.memory_space<vmem>>, vector<1024x512xbf16>
    %cst_10 = arith.constant dense<0.000000e+00> : vector<256x512xf32>
    %16 = tpu.matmul %14, %15, %cst_10 {dimension_numbers = #tpu.dot_dimension_numbers<[1], [0], [0], [1], [0, 0, 1, 1], [], []>} : vector<256x1024xbf16>, vector<1024x512xbf16>, vector<256x512xf32> -> vector<256x512xf32>
    %c0_11 = arith.constant 0 : index
    %c0_12 = arith.constant 0 : index
    %17 = vector.load %arg5[%c0_11, %c0_12] : memref<1x512xf32, #tpu.memory_space<vmem>>, vector<1x512xf32>
    %18 = vector.broadcast %17 : vector<1x512xf32> to vector<256x512xf32>
    %19 = arith.addf %16, %18 : vector<256x512xf32>
    %cst_13 = arith.constant 2.000000e-01 : f32
    %20 = vector.broadcast %cst_13 : f32 to vector<256x512xf32>
    %21 = arith.mulf %20, %19 : vector<256x512xf32>
    %22 = arith.maximumf %19, %21 : vector<256x512xf32>
    %23 = arith.extui %0 : i1 to i32
    %c0_i32_14 = arith.constant 0 : i32
    %24 = arith.cmpi ne, %23, %c0_i32_14 : i32
    scf.if %24 {
      %c1_i32 = arith.constant 1 : i32
      %50 = tpu.memref_slice %arg13[%c1_i32] : memref<2x!tpu.dma_semaphore, #tpu.memory_space<semaphore_mem>> -> memref<1x!tpu.dma_semaphore, #tpu.memory_space<semaphore_mem>>
      %51 = tpu.memref_squeeze %50 : memref<1x!tpu.dma_semaphore, #tpu.memory_space<semaphore_mem>> -> memref<!tpu.dma_semaphore, #tpu.memory_space<semaphore_mem>>
      tpu.wait_dma2 semaphore(%51 : memref<!tpu.dma_semaphore, #tpu.memory_space<semaphore_mem>>) src(%arg6 : memref<512x256xbf16, #tpu.memory_space<any>>) dst(%arg12 : memref<512x256xbf16, #tpu.memory_space<vmem>>)
    } else {
    }
    %25 = arith.truncf %22 : vector<256x512xf32> to vector<256x512xbf16>
    %c0_15 = arith.constant 0 : index
    %c0_16 = arith.constant 0 : index
    %26 = vector.load %arg12[%c0_15, %c0_16] : memref<512x256xbf16, #tpu.memory_space<vmem>>, vector<512x256xbf16>
    %cst_17 = arith.constant dense<0.000000e+00> : vector<256x256xf32>
    %27 = tpu.matmul %25, %26, %cst_17 {dimension_numbers = #tpu.dot_dimension_numbers<[1], [0], [0], [1], [0, 0, 1, 1], [], []>} : vector<256x512xbf16>, vector<512x256xbf16>, vector<256x256xf32> -> vector<256x256xf32>
    %c0_18 = arith.constant 0 : index
    %c0_19 = arith.constant 0 : index
    %28 = vector.load %arg7[%c0_18, %c0_19] : memref<1x256xf32, #tpu.memory_space<vmem>>, vector<1x256xf32>
    %29 = vector.broadcast %28 : vector<1x256xf32> to vector<256x256xf32>
    %30 = arith.addf %27, %29 : vector<256x256xf32>
    %cst_20 = arith.constant 2.000000e-01 : f32
    %31 = vector.broadcast %cst_20 : f32 to vector<256x256xf32>
    %32 = arith.mulf %31, %30 : vector<256x256xf32>
    %33 = arith.maximumf %30, %32 : vector<256x256xf32>
    %c0_21 = arith.constant 0 : index
    %c0_22 = arith.constant 0 : index
    %34 = vector.load %arg8[%c0_21, %c0_22] : memref<8x256xbf16, #tpu.memory_space<vmem>>, vector<8x256xbf16>
    %35 = arith.truncf %33 : vector<256x256xf32> to vector<256x256xbf16>
    %cst_23 = arith.constant dense<0.000000e+00> : vector<8x256xf32>
    %36 = tpu.matmul %34, %35, %cst_23 {dimension_numbers = #tpu.dot_dimension_numbers<[1], [1], [0], [0], [0, 0, 1, 0], [], []>} : vector<8x256xbf16>, vector<256x256xbf16>, vector<8x256xf32> -> vector<8x256xf32>
    %37 = vector.extract_strided_slice %36 {offsets = [0, 0], sizes = [1, 256], strides = [1, 1]} : vector<8x256xf32> to vector<1x256xf32>
    %c0_24 = arith.constant 0 : index
    %c0_25 = arith.constant 0 : index
    %38 = vector.load %arg9[%c0_24, %c0_25] : memref<1x1xf32, #tpu.memory_space<vmem>>, vector<1x1xf32>
    %39 = vector.broadcast %38 : vector<1x1xf32> to vector<1x256xf32>
    %40 = arith.addf %37, %39 : vector<1x256xf32>
    %cst_26 = arith.constant 0.000000e+00 : f32
    %41 = vector.broadcast %cst_26 : f32 to vector<1x256xf32>
    %42 = arith.subf %41, %40 : vector<1x256xf32>
    %43 = math.exp %42 : vector<1x256xf32>
    %cst_27 = arith.constant 1.000000e+00 : f32
    %44 = vector.broadcast %cst_27 : f32 to vector<1x256xf32>
    %45 = arith.addf %44, %43 : vector<1x256xf32>
    %cst_28 = arith.constant 1.000000e+00 : f32
    %46 = vector.broadcast %cst_28 : f32 to vector<1x256xf32>
    %47 = arith.divf %46, %45 : vector<1x256xf32>
    %48 = arith.index_cast %arg0 : i32 to index
    %c0_29 = arith.constant 0 : index
    %49 = vector.load %arg10[%48, %c0_29] : memref<2x256xf32, #tpu.memory_space<vmem>>, vector<1x256xf32>
    tpu.vector_store %arg10[%48, %c0_29], %47 {strides = array<i32>} : memref<2x256xf32, #tpu.memory_space<vmem>>, vector<1x256xf32>,
    return
  }
  func.func @transform_0(%arg0: i32) -> (i32, i32) {
    %c0_i32 = arith.constant 0 : i32
    %c0_i32_0 = arith.constant 0 : i32
    return %arg0, %c0_i32 : i32, i32
  }
  func.func @transform_1(%arg0: i32) -> (i32, i32) {
    %c0_i32 = arith.constant 0 : i32
    %c0_i32_0 = arith.constant 0 : i32
    %c0_i32_1 = arith.constant 0 : i32
    return %c0_i32, %c0_i32_0 : i32, i32
  }
  func.func @transform_2(%arg0: i32) -> (i32, i32) {
    %c0_i32 = arith.constant 0 : i32
    %c0_i32_0 = arith.constant 0 : i32
    %c0_i32_1 = arith.constant 0 : i32
    return %c0_i32, %c0_i32_0 : i32, i32
  }
  func.func @transform_4(%arg0: i32) -> (i32, i32) {
    %c0_i32 = arith.constant 0 : i32
    %c0_i32_0 = arith.constant 0 : i32
    %c0_i32_1 = arith.constant 0 : i32
    return %c0_i32, %c0_i32_0 : i32, i32
  }
  func.func @transform_6(%arg0: i32) -> (i32, i32) {
    %c0_i32 = arith.constant 0 : i32
    %c0_i32_0 = arith.constant 0 : i32
    %c0_i32_1 = arith.constant 0 : i32
    return %c0_i32, %c0_i32_0 : i32, i32
  }
  func.func @transform_7(%arg0: i32) -> (i32, i32) {
    %c0_i32 = arith.constant 0 : i32
    %c0_i32_0 = arith.constant 0 : i32
    %c0_i32_1 = arith.constant 0 : i32
    return %c0_i32, %c0_i32_0 : i32, i32
  }
  func.func @transform_8(%arg0: i32) -> (i32, i32) {
    %c0_i32 = arith.constant 0 : i32
    %c0_i32_0 = arith.constant 0 : i32
    %c0_i32_1 = arith.constant 0 : i32
    return %c0_i32, %c0_i32_0 : i32, i32
  }
  func.func @transform_9(%arg0: i32) -> (i32, i32) {
    %c0_i32 = arith.constant 0 : i32
    %c0_i32_0 = arith.constant 0 : i32
    %c0_i32_1 = arith.constant 0 : i32
    return %c0_i32, %c0_i32_0 : i32, i32
  }
}

</mosaic_0001>

<bundles_post_ra>
// kernel: tpu_custom_call.1
= control target key start
LH: loop header
LB: loop body
LE: loop exit
PB: predicated region body
PF: predicated region fallthrough
CT: control target
= control target key end

     0   :  { %s11916_s0 = inlined_call_operand.hbm [shape: bf16[512,256], index: 0, kind: input, shape index: {}]   ;;  %s11917_s1 = inlined_call_operand.hbm [shape: bf16[256,1024], index: 1, kind: input, shape index: {}]   ;;  %s11918_s2 = inlined_call_operand.vmem [shape: f32[1,1024], index: 2, kind: input, shape index: {}]   ;;  %s11919_s3 = inlined_call_operand.hbm [shape: bf16[1024,512], index: 3, kind: input, shape index: {}]   ;;  %s11920_s4 = inlined_call_operand.hbm [shape: f32[1,512], index: 4, kind: input, shape index: {}]   ;;  %s11921_s5 = inlined_call_operand.hbm [shape: bf16[512,256], index: 5, kind: input, shape index: {}]   ;;  %s11922_s6 = inlined_call_operand.vmem [shape: f32[1,256], index: 6, kind: input, shape index: {}]   ;;  %s11923_s7 = inlined_call_operand.vmem [shape: bf16[8,256], index: 7, kind: input, shape index: {}]   ;;  %s11924_s8 = inlined_call_operand.<no memory space> [shape: f32[1,1], index: 8, kind: input, shape index: {}]   ;;  %s11925_s9 = inlined_call_operand.hbm [shape: f32[2,256], index: 9, kind: output, shape index: {}]  }
   0x1   :  { %v14_v0 = vstv %s11924_s8 }
   0x2   :  { %15 = vst [vmem:[#allocation5] sm:$0x1] %v14_v0 }
   0x3   :  { %16 = vsyncpa [#allocation7], 0 }
   0x4   :  { %18 = vsyncpa [#allocation7 + $0x1], 0 }
   0x5   :  { %19 = vsyncpa [#allocation10], 0 }
   0x6   :  { %20 = vsyncpa [#allocation8], 0  ;;  %s7054_s11 = smov 0   ;;  %s7056_s12 = smov 0  }
   0x7   :  { %s7058_s13 = smov 0   ;;  %s7060_s14 = smov 0  }
   0x8 LB: > { %s7073_s8 = sadd.s32 4294967295, %s6977_s14   ;;  %p46_p0 = scmp.ne.s32.totalorder %s6969_s12, %s6965_s11  ;;  %s6977_s14 = sphi %s7060_s14, %s14353_s14   ;;  %s6973_s13 = sphi %s7058_s13, %s14352_s13   ;;  %s6969_s12 = sphi %s7056_s12, %s14351_s12   ;;  %s6965_s11 = sphi %s7054_s11, %s14350_s11  }
   0x9   : > { %p11926_p1 = scmp.eq.s32.totalorder %s7073_s8, 0  ;;  %p5782_p2 = scmp.ge.s32.totalorder %s6977_s14, 1 }
   0xa   : > { %p204_p3 = scmp.lt.s32.totalorder %s6977_s14, 3  ;;  %s6979_s17 = smov [#allocation9]  }
   0xb   : > { %p7081_p4 = por %p11926_p1, %p46_p0  ;;  %s216_s18 = sshll.u32 %s6979_s17, 4  ;;  %s217_s18 = int_to_ptr.vmem [resolvable:$true] %s216_s18 }
   0xc   : > { %p7085_p5 = pnand %p5782_p2, %p204_p3  ;;  %s6980_s20 = smov [#allocation11]  }
   0xd   : > { %s12598_s15 = scalar_select %p7081_p4, 1, 0 }
   0xe   : > { %s12599_s16 = scalar_select %p7085_p5, 1, 0 }
   0xf   : > { %p6654_p6 = pneg %p7085_p5  ;;  %s233_s21 = sshll.u32 %s6980_s20, 4  ;;  %s7097_s21 = int_to_ptr.vmem [resolvable:$true] %s233_s21 }
  0x10   : > { %s6815_s24 = scalar_lea.hbm %s11917_s1, 16384 }
  0x11   : > { %p7093_p7 = pnand %p6654_p6, %p11926_p1  ;;  %p6816_p8 = scmp.ne.s32.totalorder %s11917_s1, %s6815_s24 }
  0x12   : > { %p6822_p12 = scmp.lt.u32.totalorder %s6815_s24, %s11917_s1 }
  0x13   : > { %p6817_p9 = pneg %p7093_p7 }
  0x15   : > { %p6818_p10 = pnand %p6817_p9, %p6816_p8 }
  0x17   : > { %p6819_p11 = pneg %p6818_p10 }
  0x19   : > { %p6824_p13 = pnand %p6822_p12, %p6819_p11 }
  0x1b   : > { %6827 = shalt.err (!%p6824_p13)
}
  0x1c   : > { %s6828_s29 = scalar_lea.vmem %s217_s18, 16384  ;;  %p6836_p6 = scmp.lt.s32.totalorder %s217_s18, %s217_s18 }
  0x1d   : > { %p6829_p0 = scmp.ne.s32.totalorder %s217_s18, %s6828_s29  ;;  %p6837_p1 = scmp.lt.s32.totalorder %s6828_s29, %s6828_s29 }
  0x1f   : > { %p6831_p2 = pnand %p6829_p0, %p6817_p9  ;;  %p6838_p4 = por %p6837_p1, %p6836_p6 }
  0x21   : > { %p6832_p3 = pneg %p6831_p2 }
  0x23   : > { %p6839_p5 = pnand %p6838_p4, %p6832_p3 }
  0x25   : > { %6842 = shalt.err (!%p6839_p5)
}
  0x26   : > { %s6981_s30 = smov 512   ;;  %s6982_s10 = smov 32  }
  0x27   : > { %6657 = dma.hbm_to_vmem [thread:$0]  (!%p7093_p7), %s11917_s1, 16384, %s217_s18, [#allocation10], %s6981_s30, %s6981_s30, %s6982_s10  }
  0x28   : > { %s6843_s23 = scalar_lea.hbm %s11920_s4, 64 }
  0x29   : > { %p6844_p8 = scmp.ne.s32.totalorder %s11920_s4, %s6843_s23  ;;  %p6850_p5 = scmp.lt.u32.totalorder %s6843_s23, %s11920_s4 }
  0x2b   : > { %p6846_p1 = pnand %p6844_p8, %p6817_p9 }
  0x2d   : > { %p6847_p4 = pneg %p6846_p1 }
  0x2f   : > { %p6852_p10 = pnand %p6850_p5, %p6847_p4 }
  0x31   : > { %6855 = shalt.err (!%p6852_p10)
}
  0x32   : > { %s6856_s18 = scalar_lea.vmem %s7097_s21, 64  ;;  %p6864_p0 = scmp.lt.s32.totalorder %s7097_s21, %s7097_s21 }
  0x33   : > { %p6857_p11 = scmp.ne.s32.totalorder %s7097_s21, %s6856_s18  ;;  %p6865_p2 = scmp.lt.s32.totalorder %s6856_s18, %s6856_s18 }
  0x35   : > { %p6859_p12 = pnand %p6857_p11, %p6817_p9  ;;  %p6866_p3 = por %p6865_p2, %p6864_p0 }
  0x37   : > { %p6860_p13 = pneg %p6859_p12 }
  0x39   : > { %p6867_p6 = pnand %p6866_p3, %p6860_p13 }
  0x3b   : > { %6870 = shalt.err (!%p6867_p6)
}
  0x3c   : > { %6660 = dma.hbm_to_vmem [thread:$0]  (!%p7093_p7), %s11920_s4, 64, %s7097_s21, [#allocation10]  }
  0x3d   : > { %s7147_s30 = sadd.s32 1, %s6977_s14   ;;  %s33_s10 = sadd.s32 1, %s6973_s13 }
  0x3e   : > { %s30_s19 = ssub.s32 %s6977_s14, %s7147_s30  ;;  %p40_p9 = scmp.ne.s32.totalorder %s6973_s13, %s6969_s12 }
  0x3f   : > { %p31_p8 = scmp.eq.s32.totalorder %s30_s19, 0  ;;  %p41_p1 = scmp.eq.s32.totalorder %s6977_s14, 0 }
  0x40   : > { %p6667_p4 = scmp.lt.s32.totalorder %s6977_s14, 2  ;;  %s253_s11 = sand.u32 1, %s6973_s13  }
  0x41   : > { %s7158_s17 = scalar_select %p31_p8, %s6973_s13, %s33_s10  }
  0x42   : > { %p42_p5 = por %p41_p1, %p40_p9  ;;  %s5786_s20 = sshll.u32 %s253_s11, 8 }
  0x43   : > { %s5972_s22 = sshll.u32 %s6977_s14, 12  ;;  %s257_s21 = scalar_lea.vmem [#allocation6], %s5786_s20 }
  0x44   : > { %s7164_s25 = scalar_lea.hbm %s11916_s0, %s5972_s22  ;;  %s265_s26 = sshll.u32 %s257_s21, 4  ;;  %s7170_s26 = int_to_ptr.vmem [resolvable:$true] %s265_s26 }
  0x45   : > { %p7166_p7 = pnand %p6667_p4, %p42_p5  ;;  %s7172_s14 = scalar_lea.sflag [#allocation7], %s253_s11 }
  0x46   : > { %s6871_s18 = scalar_lea.hbm %s7164_s25, 4096  ;;  %s6876_s10 = scalar_lea.hbm %s11916_s0, 8192 }
  0x47   : > { %p6872_p10 = scmp.ne.s32.totalorder %s7164_s25, %s6871_s18  ;;  %p6873_p11 = pneg %p7166_p7 }
  0x48   : > { %p6877_p0 = scmp.lt.u32.totalorder %s7164_s25, %s11916_s0  ;;  %p6878_p2 = scmp.lt.u32.totalorder %s6876_s10, %s6871_s18 }
  0x49   : > { %p6874_p12 = pnand %p6873_p11, %p6872_p10  ;;  %p6880_p6 = scmp.lt.u32.totalorder %s6871_s18, %s7164_s25 }
  0x4a   : > { %p6879_p3 = por %p6878_p2, %p6877_p0 }
  0x4b   : > { %p6875_p13 = pneg %p6874_p12 }
  0x4c   : > { %p6881_p9 = por %p6880_p6, %p6879_p3 }
  0x4e   : > { %p6882_p8 = pnand %p6881_p9, %p6875_p13 }
  0x50   : > { %6885 = shalt.err (!%p6882_p8)
}
  0x51   : > { %s6886_s11 = scalar_lea.vmem %s7170_s26, 4096  ;;  %s6983_s22 = smov [#allocation6]  }
  0x52   : > { %p6887_p1 = scmp.ne.s32.totalorder %s7170_s26, %s6886_s11  ;;  %s6891_s23 = sshll.u32 %s6983_s22, 4  ;;  %s6892_s23 = int_to_ptr.vmem [resolvable:$false] %s6891_s23 }
  0x53   : > { %s6893_s24 = scalar_lea.vmem %s6892_s23, 8192  ;;  %p6894_p10 = scmp.lt.s32.totalorder %s7170_s26, %s6892_s23 }
  0x54   : > { %p6889_p4 = pnand %p6887_p1, %p6873_p11  ;;  %p6895_p12 = scmp.lt.s32.totalorder %s6893_s24, %s6886_s11 }
  0x56   : > { %p6890_p5 = pneg %p6889_p4  ;;  %p6896_p0 = por %p6895_p12, %p6894_p10 }
  0x58   : > { %p6897_p2 = pnand %p6896_p0, %p6890_p5 }
  0x5a   : > { %6900 = shalt.err (!%p6897_p2)
}
  0x5b   : > { %s6984_s21 = smov 128   ;;  %s6985_s18 = smov 8  }
  0x5c   : > { %6664 = dma.hbm_to_vmem [thread:$0]  (!%p7166_p7), %s7164_s25, 4096, %s7170_s26, %s7172_s14, %s6984_s21, %s6984_s21, %s6985_s18  }
  0x5d   : > { %p12602_p11 = scmp.ne.s32.totalorder %s12599_s16, 0 }
  0x5f   : > { %277 = sbr.rel (%p12602_p11) target bundleno = 2407 (0x967), region = 48 }
  0x66   : > { %s279_s28 = sand.u32 1, %s6969_s12   ;;  %p12603_p13 = scmp.ne.s32.totalorder %s12598_s15, 0 }
  0x67   : > { %s5791_s29 = sshll.u32 %s279_s28, 8  ;;  %s280_s10 = scalar_lea.sflag [#allocation7], %s279_s28 }
  0x68   : > { %s7203_s19 = scalar_lea.vmem [#allocation6], %s5791_s29 }
  0x69   : > { %6944 = dma.done.wait (%p12603_p13), %s280_s10, 4096  }
  0x6a   : > { %6946 = vsyncadd (%p12603_p13), %s280_s10, 4294963200  ;;  %p12604_p3 = scmp.eq.s32.totalorder %s7073_s8, 0 }
  0x6c   : > { %6948 = dma.done.wait (%p12604_p3), [#allocation10], 16448   ;;  %p12605_p7 = pmov %p12604_p3 }
  0x6e   : > { %6950 = vsyncadd (%p12605_p7), [#allocation10], 4294950848 }
  0x6f   : > { %p12606_p6 = pmov %p12604_p3  ;;  %s6986_s26 = smov [#allocation2]  }
  0x70   : > { %s334_s27 = sshll.u32 %s6986_s26, 4  ;;  %s6987_s15 = smov 512   ;;  %s335_s27 = int_to_ptr.vmem [resolvable:$true] %s334_s27 }
  0x71   : > { %s6625_s16 = scalar_select %p12606_p6, [#allocation0], [#allocation17] }
  0x72   : > { %p12607_p9 = pmov %p12604_p3  ;;  %p12608_p8 = pmov %p12604_p3 }
  0x73   : > { %s326_s25 = sld [smem:[%s6625_s16]]   ;;  %s6988_s14 = smov 4  }
  0x74   : > { %6626 = sst [smem:[#allocation14]] (%p12607_p9), %s6987_s15  ;;  %p12609_p1 = pmov %p12604_p3 }
  0x75   : > { %6627 = sst [smem:[#allocation14 + $0x1]] (%p12608_p8), %s6987_s15  ;;  %s6989_s20 = smov 64  }
  0x76   : > { %6628 = sst [smem:[#allocation14 + $0x2]] (%p12609_p1), %s6988_s14  ;;  %p12610_p4 = pmov %p12609_p1 }
  0x77   : > { %s6990_s11 = smov 128   ;;  %p12611_p5 = pmov %p12609_p1 }
  0x78   : > { %6629 = sst [smem:[#allocation14 + $0x3]] (%p12610_p4), %s6989_s20  ;;  %s6991_s23 = smov 2  }
  0x79   : > { %6630 = sst [smem:[#allocation14 + $0x4]] (%p12611_p5), %s6990_s11  ;;  %s5795_s22 = sshll.u32 %s326_s25, 26 }
  0x7a   : > { %p12612_p10 = pmov %p12609_p1  ;;  %s5796_s24 = sadd.s32 134217728, %s5795_s22 }
  0x7b   : > { %s6992_s21 = smov 256   ;;  %p12613_p12 = pmov %p12609_p1 }
  0x7c   : > { %6631 = sst [smem:[#allocation14 + $0x5]] (%p12612_p10), %s6991_s23  ;;  %p12614_p0 = pmov %p12609_p1 }
  0x7d   : > { %6632 = sst [smem:[#allocation14 + $0x6]] (%p12613_p12), %s6992_s21  ;;  %s6993_s18 = smov [#allocation4]  }
  0x7e   : > { %6633 = sst [smem:[#allocation14 + $0x7]] (%p12614_p0), %s6989_s20  ;;  %p12615_p2 = pmov %p12614_p0 }
  0x7f   : > { %s6994_s28 = smov [#allocation13]   ;;  %p12616_p11 = pmov %p12614_p0 }
  0x80   : > { %6634 = sst [smem:[#allocation14 + $0x8]] (%p12615_p2), %s6988_s14  ;;  %p12617_p13 = pmov %p12614_p0 }
  0x81   : > { %6635 = dma.general (%p12616_p11), %s11919_s3, 32768, %s335_s27, %s6993_s18, %s6994_s28, [#allocation14], %s5796_s24, 0  }
  0x82   : > { %6636 = sst [smem:[#allocation16]] (%p12617_p13), %s6992_s21  ;;  %p12618_p3 = pmov %p12614_p0 }
  0x83   : > { %s6995_s16 = smov [#allocation3]   ;;  %p12619_p7 = pmov %p12614_p0 }
  0x84   : > { %6637 = sst [smem:[#allocation16 + $0x1]] (%p12618_p3), %s6992_s21  ;;  %s369_s25 = sshll.u32 %s6995_s16, 4  ;;  %s370_s25 = int_to_ptr.vmem [resolvable:$true] %s369_s25 }
  0x85   : > { %6638 = sst [smem:[#allocation16 + $0x2]] (%p12619_p7), %s6991_s23  ;;  %p12620_p6 = pmov %p12614_p0 }
  0x86   : > { %p12621_p9 = pmov %p12614_p0  ;;  %p12622_p8 = pmov %p12614_p0 }
  0x87   : > { %6639 = sst [smem:[#allocation16 + $0x3]] (%p12620_p6), %s6989_s20  ;;  %p12623_p1 = pmov %p12614_p0 }
  0x88   : > { %6640 = sst [smem:[#allocation16 + $0x4]] (%p12621_p9), %s6990_s11  ;;  %p12624_p4 = pmov %p12614_p0 }
  0x89   : > { %6641 = sst [smem:[#allocation16 + $0x5]] (%p12622_p8), %s6991_s23  ;;  %p12625_p5 = pmov %p12614_p0 }
  0x8a   : > { %6642 = sst [smem:[#allocation16 + $0x6]] (%p12623_p1), %s6990_s11  ;;  %s6996_s26 = smov [#allocation4 + $0x1]  }
  0x8b   : > { %6643 = sst [smem:[#allocation16 + $0x7]] (%p12624_p4), %s6989_s20  ;;  %s6997_s27 = smov [#allocation15]  }
  0x8c   : > { %6644 = sst [smem:[#allocation16 + $0x8]] (%p12625_p5), %s6988_s14  ;;  %p12626_p10 = pmov %p12614_p0 }
  0x8d   : > { %p13091_p12 = pmov %p12614_p0 }
  0x8e   : > { %6645 = dma.general (%p12626_p10), %s11921_s5, 8192, %s370_s25, %s6996_s26, %s6997_s27, [#allocation16], %s5796_s24, 0  }
  0x8f   : > { %v424_v1 = vld [vmem:[#allocation9] sm:$0xff] }
  0x90   : > { %v428_v2 = vld [vmem:[#allocation9 + $0x20] sm:$0xff] }
  0x91   : > { %v432_v3 = vld [vmem:[#allocation9 + $0x40] sm:$0xff]  ;;  %v5832_v4 = vcombine.high %v424_v1, %v428_v2  ;;  %v5831_v5 = vcombine.low %v424_v1, %v428_v2  ;;  %v425_v1 = vld [vmem:[#allocation9 + $0x8] sm:$0xff] }
  0x92   : > { %v436_v6 = vld [vmem:[#allocation9 + $0x60] sm:$0xff]  ;;  %v429_v2 = vld [vmem:[#allocation9 + $0x28] sm:$0xff] }
  0x93   : > { %v5840_v7 = vcombine.high %v432_v3, %v436_v6  ;;  %v440_v8 = vld [vmem:[#allocation9 + $0x80] sm:$0xff]  ;;  %1394 = vmatprep.subr.bf16.mxu1 %v5832_v4  ;;  %v5839_v10 = vcombine.low %v432_v3, %v436_v6  ;;  %v5834_v4 = vcombine.high %v425_v1, %v429_v2  ;;  %v437_v6 = vld [vmem:[#allocation9 + $0x68] sm:$0xff] }
  0x94   : > { %v444_v9 = vld [vmem:[#allocation9 + $0xa0] sm:$0xff]  ;;  %1395 = vmatpush1.bf16.msra.mxu1 %v5831_v5  ;;  %v433_v5 = vld [vmem:[#allocation9 + $0x48] sm:$0xff] }
  0x95   : > { %1396 = vmatprep.subr.bf16.mxu1 %v5840_v7  ;;  %v5848_v11 = vcombine.high %v440_v8, %v444_v9  ;;  %v448_v12 = vld [vmem:[#allocation9 + $0xc0] sm:$0xff]  ;;  %v5847_v14 = vcombine.low %v440_v8, %v444_v9  ;;  %v5833_v8 = vcombine.low %v425_v1, %v429_v2  ;;  %v7270_v9 = vld [vmem:[%s7203_s19 + $0x14] ss:$8 sps:$4 sm:$0xff]   ;;  %v521_v1 = vld [vmem:[#allocation9 + $0x308] sm:$0xff] }
  0x96   : > { %v452_v13 = vld [vmem:[#allocation9 + $0xe0] sm:$0xff]  ;;  %v525_v2 = vld [vmem:[#allocation9 + $0x328] sm:$0xff] }
  0x97   : > { %v5856_v15 = vcombine.high %v448_v12, %v452_v13  ;;  %v456_v16 = vld [vmem:[#allocation9 + $0x100] sm:$0xff]  ;;  %v5855_v19 = vcombine.low %v448_v12, %v452_v13  ;;  %v445_v12 = vld [vmem:[#allocation9 + $0xa8] sm:$0xff]  ;;  %v7273_v13 = vld [vmem:[#allocation9 + $0x18] sm:$0xff] }
  0x98   : > { %1397 = vmatpush1.bf16.msra.mxu1 %v5839_v10  ;;  %v460_v17 = vld [vmem:[#allocation9 + $0x120] sm:$0xff]  ;;  %v5842_v10 = vcombine.high %v433_v5, %v437_v6 }
  0x99   : > { %1398 = vmatprep.subr.bf16.mxu1 %v5848_v11  ;;  %v7262_v18 = vld [vmem:[%s7203_s19 + $0x4] ss:$8 sps:$4 sm:$0xff]   ;;  %v5864_v20 = vcombine.high %v456_v16, %v460_v17  ;;  %v5863_v23 = vcombine.low %v456_v16, %v460_v17  ;;  %v7267_v7 = vld [vmem:[%s7203_s19] ss:$8 sps:$4 sm:$0xff]  }
  0x9a   : > { %1426 = vmatprep.mubr.bf16.mxu1 %v7262_v18  ;;  %v464_v21 = vld [vmem:[#allocation9 + $0x140] sm:$0xff]  ;;  %1812 = vmatprep.mubr.bf16.mxu0 %v7262_v18  ;;  %v441_v11 = vld [vmem:[#allocation9 + $0x88] sm:$0xff] }
  0x9b   : > { %v468_v22 = vld [vmem:[#allocation9 + $0x160] sm:$0xff]  ;;  %v5850_v17 = vcombine.high %v441_v11, %v445_v12 }
  0x9c   : > { %1399 = vmatpush1.bf16.msra.mxu1 %v5847_v14  ;;  %v5872_v24 = vcombine.high %v464_v21, %v468_v22  ;;  %v472_v25 = vld [vmem:[#allocation9 + $0x180] sm:$0xff]  ;;  %v5871_v27 = vcombine.low %v464_v21, %v468_v22  ;;  %v7275_v14 = vld [vmem:[#allocation9 + $0x38] sm:$0xff] }
  0x9d   : > { %1400 = vmatprep.subr.bf16.mxu1 %v5856_v15  ;;  %v476_v26 = vld [vmem:[#allocation9 + $0x1a0] sm:$0xff]  ;;  %v5841_v15 = vcombine.low %v433_v5, %v437_v6  ;;  %v5837_v16 = vcombine.low %v7273_v13, %v7275_v14  ;;  %v7281_v21 = vld [vmem:[%s7203_s19 + $0x10] ss:$8 sps:$4 sm:$0xff]   ;;  %v529_v5 = vld [vmem:[#allocation9 + $0x348] sm:$0xff] }
  0x9e   : > { %v5880_v28 = vcombine.high %v472_v25, %v476_v26  ;;  %v480_v29 = vld [vmem:[#allocation9 + $0x1c0] sm:$0xff]  ;;  %v5879_v31 = vcombine.low %v472_v25, %v476_v26  ;;  %v457_v25 = vld [vmem:[#allocation9 + $0x108] sm:$0xff] }
  0x9f   : > { %v484_v30 = vld [vmem:[#allocation9 + $0x1e0] sm:$0xff]  ;;  %v461_v26 = vld [vmem:[#allocation9 + $0x128] sm:$0xff] }
  0xa0   : > { %1401 = vmatpush1.bf16.msra.mxu1 %v5855_v19  ;;  %v5888_v32 = vcombine.high %v480_v29, %v484_v30  ;;  %v488_v33 = vld [vmem:[#allocation9 + $0x200] sm:$0xff]  ;;  %v5887_v35 = vcombine.low %v480_v29, %v484_v30  ;;  %v449_v19 = vld [vmem:[#allocation9 + $0xc8] sm:$0xff] }
  0xa1   : > { %1402 = vmatprep.subr.bf16.mxu1 %v5864_v20  ;;  %v492_v34 = vld [vmem:[#allocation9 + $0x220] sm:$0xff]  ;;  %v453_v20 = vld [vmem:[#allocation9 + $0xe8] sm:$0xff] }
  0xa2   : > { %v5896_v36 = vcombine.high %v488_v33, %v492_v34  ;;  %v496_v37 = vld [vmem:[#allocation9 + $0x240] sm:$0xff]  ;;  %v5895_v39 = vcombine.low %v488_v33, %v492_v34  ;;  %v465_v29 = vld [vmem:[#allocation9 + $0x148] sm:$0xff]  ;;  %v5865_v33 = vcombine.low %v457_v25, %v461_v26 }
  0xa3   : > { %v500_v38 = vld [vmem:[#allocation9 + $0x260] sm:$0xff]  ;;  %v469_v30 = vld [vmem:[#allocation9 + $0x168] sm:$0xff] }
  0xa4   : > { %1403 = vmatpush1.bf16.msra.mxu1 %v5863_v23  ;;  %v5904_v40 = vcombine.high %v496_v37, %v500_v38  ;;  %v504_v41 = vld [vmem:[#allocation9 + $0x280] sm:$0xff]  ;;  %v5903_v43 = vcombine.low %v496_v37, %v500_v38  ;;  %v5849_v23 = vcombine.low %v441_v11, %v445_v12  ;;  %v5874_v34 = vcombine.high %v465_v29, %v469_v30  ;;  %v533_v6 = vld [vmem:[#allocation9 + $0x368] sm:$0xff] }
  0xa5   : > { %1404 = vmatprep.subr.bf16.mxu1 %v5872_v24  ;;  %v508_v42 = vld [vmem:[#allocation9 + $0x2a0] sm:$0xff]  ;;  %v5858_v24 = vcombine.high %v449_v19, %v453_v20  ;;  %v5873_v37 = vcombine.low %v465_v29, %v469_v30  ;;  %v5929_v11 = vcombine.low %v521_v1, %v525_v2  ;;  %v5938_v12 = vcombine.high %v529_v5, %v533_v6  ;;  %v426_v29 = vld [vmem:[#allocation9 + $0x10] sm:$0xff] }
  0xa6   : > { %v5912_v44 = vcombine.high %v504_v41, %v508_v42  ;;  %v512_v45 = vld [vmem:[#allocation9 + $0x2c0] sm:$0xff]  ;;  %v5911_v47 = vcombine.low %v504_v41, %v508_v42  ;;  %v7297_v41 = vld [vmem:[%s7203_s19 + $0x30] ss:$8 sps:$4 sm:$0xff]  }
  0xa7   : > { %v516_v46 = vld [vmem:[#allocation9 + $0x2e0] sm:$0xff] }
  0xa8   : > { %1405 = vmatpush1.bf16.msra.mxu1 %v5871_v27  ;;  %v5920_v48 = vcombine.high %v512_v45, %v516_v46  ;;  %v520_v49 = vld [vmem:[#allocation9 + $0x300] sm:$0xff]  ;;  %v5919_v51 = vcombine.low %v512_v45, %v516_v46  ;;  %v5857_v27 = vcombine.low %v449_v19, %v453_v20  ;;  %v489_v45 = vld [vmem:[#allocation9 + $0x208] sm:$0xff]  ;;  %v5937_v19 = vcombine.low %v529_v5, %v533_v6  ;;  %v474_v5 = vld [vmem:[#allocation9 + $0x190] sm:$0xff] }
  0xa9   : > { %1406 = vmatprep.subr.bf16.mxu1 %v5880_v28  ;;  %v524_v50 = vld [vmem:[#allocation9 + $0x320] sm:$0xff]  ;;  %v5866_v28 = vcombine.high %v457_v25, %v461_v26  ;;  %v493_v46 = vld [vmem:[#allocation9 + $0x228] sm:$0xff]  ;;  %v7329_v25 = vld [vmem:[%s7203_s19 + $0x70] ss:$8 sps:$4 sm:$0xff]  }
  0xaa   : > { %v5928_v52 = vcombine.high %v520_v49, %v524_v50  ;;  %v528_v53 = vld [vmem:[#allocation9 + $0x340] sm:$0xff]  ;;  %v5927_v55 = vcombine.low %v520_v49, %v524_v50  ;;  %v497_v49 = vld [vmem:[#allocation9 + $0x248] sm:$0xff]  ;;  %v478_v6 = vld [vmem:[#allocation9 + $0x1b0] sm:$0xff] }
  0xab   : > { %v532_v54 = vld [vmem:[#allocation9 + $0x360] sm:$0xff]  ;;  %v501_v50 = vld [vmem:[#allocation9 + $0x268] sm:$0xff] }
  0xac   : > { %1407 = vmatpush1.bf16.msra.mxu1 %v5879_v31  ;;  %v5936_v56 = vcombine.high %v528_v53, %v532_v54  ;;  %v536_v57 = vld [vmem:[#allocation9 + $0x380] sm:$0xff]  ;;  %v5935_v59 = vcombine.low %v528_v53, %v532_v54  ;;  %v5897_v53 = vcombine.low %v489_v45, %v493_v46  ;;  %v5906_v54 = vcombine.high %v497_v49, %v501_v50 }
  0xad   : > { %1408 = vmatprep.subr.bf16.mxu1 %v5888_v32  ;;  %v540_v58 = vld [vmem:[#allocation9 + $0x3a0] sm:$0xff]  ;;  %v7292_v32 = vld [vmem:[%s7203_s19 + $0x34] ss:$8 sps:$4 sm:$0xff]  }
  0xae   : > { %v5944_v60 = vcombine.high %v536_v57, %v540_v58  ;;  %v544_v61 = vld [vmem:[#allocation9 + $0x3c0] sm:$0xff]  ;;  %v5943_v63 = vcombine.low %v536_v57, %v540_v58  ;;  %v5905_v57 = vcombine.low %v497_v49, %v501_v50  ;;  %v7347_v49 = vld [vmem:[%s7203_s19 + $0x90] ss:$8 sps:$4 sm:$0xff]  }
  0xaf   : > { %v548_v62 = vld [vmem:[#allocation9 + $0x3e0] sm:$0xff]  ;;  %v450_v50 = vld [vmem:[#allocation9 + $0xd0] sm:$0xff] }
  0xb0   : > { %1409 = vmatpush1.bf16.msra.mxu1 %v5887_v35  ;;  %v5952_v0 = vcombine.high %v544_v61, %v548_v62  ;;  %v5951_v3 = vcombine.low %v544_v61, %v548_v62  ;;  %v7284_v22 = vld [vmem:[%s7203_s19 + $0x24] ss:$8 sps:$4 sm:$0xff]   ;;  %v7289_v31 = vld [vmem:[%s7203_s19 + $0x20] ss:$8 sps:$4 sm:$0xff]   ;;  %v7313_v61 = vld [vmem:[%s7203_s19 + $0x50] ss:$8 sps:$4 sm:$0xff]  }
  0xb1   : > { %1410 = vmatprep.subr.bf16.mxu1 %v5896_v36  ;;  %v473_v35 = vld [vmem:[#allocation9 + $0x188] sm:$0xff] }
  0xb2   : > { %v477_v36 = vld [vmem:[#allocation9 + $0x1a8] sm:$0xff] }
  0xb3   : > { %v5882_v38 = vcombine.high %v473_v35, %v477_v36  ;;  %v7300_v42 = vld [vmem:[%s7203_s19 + $0x44] ss:$8 sps:$4 sm:$0xff]  }
  0xb4   : > { %1411 = vmatpush1.bf16.msra.mxu1 %v5895_v39  ;;  %v481_v39 = vld [vmem:[#allocation9 + $0x1c8] sm:$0xff] }
  0xb5   : > { %1412 = vmatprep.subr.bf16.mxu1 %v5904_v40  ;;  %v485_v40 = vld [vmem:[#allocation9 + $0x1e8] sm:$0xff] }
  0xb6   : > { %v7316_v62 = vld [vmem:[%s7203_s19 + $0x64] ss:$8 sps:$4 sm:$0xff]  }
  0xb7   : > { %v7332_v26 = vld [vmem:[%s7203_s19 + $0x84] ss:$8 sps:$4 sm:$0xff]  }
  0xb8   : > { %1413 = vmatpush1.bf16.msra.mxu1 %v5903_v43  ;;  %v5881_v43 = vcombine.low %v473_v35, %v477_v36 }
  0xb9   : > { %1414 = vmatprep.subr.bf16.mxu1 %v5912_v44  ;;  %v5890_v44 = vcombine.high %v481_v39, %v485_v40 }
  0xbc   : > { %1415 = vmatpush1.bf16.msra.mxu1 %v5911_v47  ;;  %v5889_v47 = vcombine.low %v481_v39, %v485_v40  ;;  %v438_v39 = vld [vmem:[#allocation9 + $0x70] sm:$0xff] }
  0xbd   : > { %1416 = vmatprep.subr.bf16.mxu1 %v5920_v48  ;;  %v5898_v48 = vcombine.high %v489_v45, %v493_v46  ;;  %v7342_v40 = vld [vmem:[%s7203_s19 + $0x94] ss:$8 sps:$4 sm:$0xff]  }
  0xbe   : > { %v442_v45 = vld [vmem:[#allocation9 + $0x90] sm:$0xff] }
  0xbf   : > { %v446_v46 = vld [vmem:[#allocation9 + $0xb0] sm:$0xff] }
  0xc0   : > { %1417 = vmatpush1.bf16.msra.mxu1 %v5919_v51  ;;  %v7305_v51 = vld [vmem:[%s7203_s19 + $0x40] ss:$8 sps:$4 sm:$0xff]  }
  0xc1   : > { %1418 = vmatprep.subr.bf16.mxu1 %v5928_v52  ;;  %v7308_v52 = vld [vmem:[%s7203_s19 + $0x54] ss:$8 sps:$4 sm:$0xff]  }
  0xc4   : > { %1419 = vmatpush1.bf16.msra.mxu1 %v5927_v55  ;;  %v505_v55 = vld [vmem:[#allocation9 + $0x288] sm:$0xff] }
  0xc5   : > { %1420 = vmatprep.subr.bf16.mxu1 %v5936_v56  ;;  %v509_v56 = vld [vmem:[#allocation9 + $0x2a8] sm:$0xff] }
  0xc6   : > { %v5914_v58 = vcombine.high %v505_v55, %v509_v56 }
  0xc8   : > { %1421 = vmatpush1.bf16.msra.mxu1 %v5935_v59  ;;  %v513_v59 = vld [vmem:[#allocation9 + $0x2c8] sm:$0xff] }
  0xc9   : > { %1422 = vmatprep.subr.bf16.mxu1 %v5944_v60  ;;  %v517_v60 = vld [vmem:[#allocation9 + $0x2e8] sm:$0xff] }
  0xcc   : > { %1423 = vmatpush1.bf16.msra.mxu1 %v5943_v63  ;;  %v5913_v63 = vcombine.low %v505_v55, %v509_v56 }
  0xcd   : > { %1424 = vmatprep.subr.bf16.mxu1 %v5952_v0  ;;  %v5922_v0 = vcombine.high %v513_v59, %v517_v60 }
  0xd0   : > { %1425 = vmatpush1.bf16.msra.mxu1 %v5951_v3  ;;  %v5921_v3 = vcombine.low %v513_v59, %v517_v60 }
  0xd1   : > { %1587 = vmatprep.subr.bf16.mxu1 %v5834_v4  ;;  %v5930_v4 = vcombine.high %v521_v1, %v525_v2  ;;  %v470_v1 = vld [vmem:[#allocation9 + $0x170] sm:$0xff] }
  0xd2   : > { %v7358_v2 = vld [vmem:[%s7203_s19 + $0xb4] ss:$8 sps:$4 sm:$0xff]  }
  0xd3   : > { %1427 = vmatmul.mubr.bf16.vlgmr.msra.gmra.mrb[0].mxu1 %v7267_v7 }
  0xd4   : > { %1588 = vmatpush1.bf16.msra.mxu1 %v5833_v8  ;;  %1436 = vmatprep.mubr.bf16.mxu1 %v7270_v9  ;;  %v7321_v8 = vld [vmem:[%s7203_s19 + $0x60] ss:$8 sps:$4 sm:$0xff]  }
  0xd5   : > { %1589 = vmatprep.subr.bf16.mxu1 %v5842_v10  ;;  %v7324_v10 = vld [vmem:[%s7203_s19 + $0x74] ss:$8 sps:$4 sm:$0xff]  }
  0xd8   : > { %1590 = vmatpush1.bf16.msra.mxu1 %v5841_v15  ;;  %v537_v15 = vld [vmem:[#allocation9 + $0x388] sm:$0xff] }
  0xd9   : > { %1591 = vmatprep.subr.bf16.mxu1 %v5850_v17  ;;  %v541_v17 = vld [vmem:[#allocation9 + $0x3a8] sm:$0xff] }
  0xda   : > { %v5946_v20 = vcombine.high %v537_v15, %v541_v17 }
  0xdb   : > { %1437 = vmatmul.mubr.bf16.gmra.mrb[4].mxu1 %v7281_v21 }
  0xdc   : > { %1446 = vmatprep.mubr.bf16.mxu1 %v7284_v22  ;;  %1592 = vmatpush1.bf16.msra.mxu1 %v5849_v23  ;;  %v545_v23 = vld [vmem:[#allocation9 + $0x3c8] sm:$0xff] }
  0xdd   : > { %1593 = vmatprep.subr.bf16.mxu1 %v5858_v24  ;;  %v549_v24 = vld [vmem:[#allocation9 + $0x3e8] sm:$0xff] }
  0xde   : > { %v5953_v30 = vcombine.low %v545_v23, %v549_v24 }
  0xe0   : > { %1594 = vmatpush1.bf16.msra.mxu1 %v5857_v27  ;;  %v5945_v27 = vcombine.low %v537_v15, %v541_v17  ;;  %v7363_v15 = vld [vmem:[%s7203_s19 + $0xb0] ss:$8 sps:$4 sm:$0xff]  }
  0xe1   : > { %1595 = vmatprep.subr.bf16.mxu1 %v5866_v28  ;;  %v5954_v28 = vcombine.high %v545_v23, %v549_v24  ;;  %v482_v17 = vld [vmem:[#allocation9 + $0x1d0] sm:$0xff] }
  0xe3   : > { %1447 = vmatmul.mubr.bf16.gmra.mrb[8].mxu1 %v7289_v31 }
  0xe4   : > { %1456 = vmatprep.mubr.bf16.mxu1 %v7292_v32  ;;  %1596 = vmatpush1.bf16.msra.mxu1 %v5865_v33  ;;  %v430_v33 = vld [vmem:[#allocation9 + $0x30] sm:$0xff] }
  0xe5   : > { %1597 = vmatprep.subr.bf16.mxu1 %v5874_v34  ;;  %v5838_v34 = vcombine.high %v7273_v13, %v7275_v14  ;;  %v5836_v35 = vcombine.high %v426_v29, %v430_v33  ;;  %v5835_v36 = vcombine.low %v426_v29, %v430_v33  ;;  %v7371_v33 = vld [vmem:[%s7203_s19 + $0xc0] ss:$8 sps:$4 sm:$0xff]  }
  0xe7   : > { %1780 = vmatprep.subr.bf16.mxu0 %v5836_v35  ;;  %v502_v35 = vld [vmem:[#allocation9 + $0x270] sm:$0xff] }
  0xe8   : > { %1598 = vmatpush1.bf16.msra.mxu1 %v5873_v37  ;;  %v7339_v37 = vld [vmem:[%s7203_s19 + $0x80] ss:$8 sps:$4 sm:$0xff]   ;;  %1781 = vmatpush1.bf16.msra.mxu0 %v5835_v36  ;;  %v7374_v36 = vld [vmem:[%s7203_s19 + $0xd4] ss:$8 sps:$4 sm:$0xff]  }
  0xe9   : > { %1599 = vmatprep.subr.bf16.mxu1 %v5882_v38  ;;  %v434_v38 = vld [vmem:[#allocation9 + $0x50] sm:$0xff] }
  0xeb   : > { %1457 = vmatmul.mubr.bf16.gmra.mrb[12].mxu1 %v7297_v41 }
  0xec   : > { %1466 = vmatprep.mubr.bf16.mxu1 %v7300_v42  ;;  %1600 = vmatpush1.bf16.msra.mxu1 %v5881_v43  ;;  %v5844_v43 = vcombine.high %v434_v38, %v438_v39 }
  0xed   : > { %1601 = vmatprep.subr.bf16.mxu1 %v5890_v44  ;;  %v5843_v44 = vcombine.low %v434_v38, %v438_v39 }
  0xee   : > { %1782 = vmatprep.subr.bf16.mxu0 %v5844_v43  ;;  %v506_v43 = vld [vmem:[#allocation9 + $0x290] sm:$0xff] }
  0xef   : > { %1783 = vmatpush1.bf16.msra.mxu0 %v5843_v44  ;;  %v510_v44 = vld [vmem:[#allocation9 + $0x2b0] sm:$0xff] }
  0xf0   : > { %1602 = vmatpush1.bf16.msra.mxu1 %v5889_v47  ;;  %v5852_v47 = vcombine.high %v442_v45, %v446_v46 }
  0xf1   : > { %1603 = vmatprep.subr.bf16.mxu1 %v5898_v48  ;;  %v5851_v48 = vcombine.low %v442_v45, %v446_v46  ;;  %v5916_v45 = vcombine.high %v506_v43, %v510_v44  ;;  %v5915_v46 = vcombine.low %v506_v43, %v510_v44  ;;  %v451_v44 = vld [vmem:[#allocation9 + $0xd8] sm:$0xff] }
  0xf2   : > { %1784 = vmatprep.subr.bf16.mxu0 %v5852_v47  ;;  %v7379_v47 = vld [vmem:[%s7203_s19 + $0xd0] ss:$8 sps:$4 sm:$0xff]  }
  0xf3   : > { %1467 = vmatmul.mubr.bf16.gmra.mrb[16].mxu1 %v7305_v51  ;;  %1785 = vmatpush1.bf16.msra.mxu0 %v5851_v48  ;;  %v514_v48 = vld [vmem:[#allocation9 + $0x2d0] sm:$0xff] }
  0xf4   : > { %1476 = vmatprep.mubr.bf16.mxu1 %v7308_v52  ;;  %1604 = vmatpush1.bf16.msra.mxu1 %v5897_v53  ;;  %v454_v53 = vld [vmem:[#allocation9 + $0xf0] sm:$0xff] }
  0xf5   : > { %1605 = vmatprep.subr.bf16.mxu1 %v5906_v54  ;;  %v7350_v54 = vld [vmem:[%s7203_s19 + $0xa4] ss:$8 sps:$4 sm:$0xff]   ;;  %v5860_v55 = vcombine.high %v450_v50, %v454_v53  ;;  %v5859_v56 = vcombine.low %v450_v50, %v454_v53  ;;  %v518_v50 = vld [vmem:[#allocation9 + $0x2f0] sm:$0xff] }
  0xf6   : > { %v7382_v53 = vld [vmem:[%s7203_s19 + $0xe4] ss:$8 sps:$4 sm:$0xff]  }
  0xf7   : > { %1786 = vmatprep.subr.bf16.mxu0 %v5860_v55  ;;  %v5924_v55 = vcombine.high %v514_v48, %v518_v50 }
  0xf8   : > { %1606 = vmatpush1.bf16.msra.mxu1 %v5905_v57  ;;  %v458_v57 = vld [vmem:[#allocation9 + $0x110] sm:$0xff]  ;;  %1787 = vmatpush1.bf16.msra.mxu0 %v5859_v56  ;;  %v5923_v56 = vcombine.low %v514_v48, %v518_v50  ;;  %v459_v50 = vld [vmem:[#allocation9 + $0x118] sm:$0xff] }
  0xf9   : > { %1607 = vmatprep.subr.bf16.mxu1 %v5914_v58  ;;  %v462_v58 = vld [vmem:[#allocation9 + $0x130] sm:$0xff] }
  0xfa   : > { %v5868_v59 = vcombine.high %v458_v57, %v462_v58  ;;  %v5867_v60 = vcombine.low %v458_v57, %v462_v58  ;;  %v522_v57 = vld [vmem:[#allocation9 + $0x310] sm:$0xff] }
  0xfb   : > { %1477 = vmatmul.mubr.bf16.gmra.mrb[20].mxu1 %v7313_v61  ;;  %v526_v58 = vld [vmem:[#allocation9 + $0x330] sm:$0xff] }
  0xfc   : > { %1486 = vmatprep.mubr.bf16.mxu1 %v7316_v62  ;;  %1608 = vmatpush1.bf16.msra.mxu1 %v5913_v63  ;;  %v7355_v63 = vld [vmem:[%s7203_s19 + $0xa0] ss:$8 sps:$4 sm:$0xff]  }
  0xfd   : > { %1609 = vmatprep.subr.bf16.mxu1 %v5922_v0  ;;  %1788 = vmatprep.subr.bf16.mxu0 %v5868_v59  ;;  %v466_v0 = vld [vmem:[#allocation9 + $0x150] sm:$0xff]  ;;  %v5932_v59 = vcombine.high %v522_v57, %v526_v58 }
  0xfe   : > { %1789 = vmatpush1.bf16.msra.mxu0 %v5867_v60  ;;  %v5931_v60 = vcombine.low %v522_v57, %v526_v58 }
 0x100   : > { %1610 = vmatpush1.bf16.msra.mxu1 %v5921_v3  ;;  %v5876_v3 = vcombine.high %v466_v0, %v470_v1 }
 0x101   : > { %1611 = vmatprep.subr.bf16.mxu1 %v5930_v4  ;;  %v5875_v4 = vcombine.low %v466_v0, %v470_v1  ;;  %v7387_v0 = vld [vmem:[%s7203_s19 + $0xe0] ss:$8 sps:$4 sm:$0xff]   ;;  %v530_v1 = vld [vmem:[#allocation9 + $0x350] sm:$0xff] }
 0x102   : > { %1790 = vmatprep.subr.bf16.mxu0 %v5876_v3  ;;  %v534_v3 = vld [vmem:[#allocation9 + $0x370] sm:$0xff] }
 0x103   : > { %1487 = vmatmul.mubr.bf16.gmra.mrb[24].mxu1 %v7321_v8  ;;  %1791 = vmatpush1.bf16.msra.mxu0 %v5875_v4  ;;  %v7390_v4 = vld [vmem:[%s7203_s19 + $0xf4] ss:$8 sps:$4 sm:$0xff]  }
 0x104   : > { %1496 = vmatprep.mubr.bf16.mxu1 %v7324_v10  ;;  %1612 = vmatpush1.bf16.msra.mxu1 %v5929_v11  ;;  %v5884_v11 = vcombine.high %v474_v5, %v478_v6 }
 0x105   : > { %1613 = vmatprep.subr.bf16.mxu1 %v5938_v12  ;;  %v5883_v12 = vcombine.low %v474_v5, %v478_v6  ;;  %v5940_v5 = vcombine.high %v530_v1, %v534_v3  ;;  %v5939_v6 = vcombine.low %v530_v1, %v534_v3 }
 0x106   : > { %1792 = vmatprep.subr.bf16.mxu0 %v5884_v11  ;;  %v538_v11 = vld [vmem:[#allocation9 + $0x390] sm:$0xff] }
 0x107   : > { %1793 = vmatpush1.bf16.msra.mxu0 %v5883_v12  ;;  %v542_v12 = vld [vmem:[#allocation9 + $0x3b0] sm:$0xff] }
 0x108   : > { %1614 = vmatpush1.bf16.msra.mxu1 %v5937_v19  ;;  %v486_v19 = vld [vmem:[#allocation9 + $0x1f0] sm:$0xff] }
 0x109   : > { %1615 = vmatprep.subr.bf16.mxu1 %v5946_v20  ;;  %v7366_v20 = vld [vmem:[%s7203_s19 + $0xc4] ss:$8 sps:$4 sm:$0xff]   ;;  %v5892_v23 = vcombine.high %v482_v17, %v486_v19  ;;  %v5891_v24 = vcombine.low %v482_v17, %v486_v19  ;;  %v5948_v17 = vcombine.high %v538_v11, %v542_v12  ;;  %v5947_v19 = vcombine.low %v538_v11, %v542_v12 }
 0x10b   : > { %1497 = vmatmul.mubr.bf16.gmra.mrb[28].mxu1 %v7329_v25  ;;  %1794 = vmatprep.subr.bf16.mxu0 %v5892_v23  ;;  %v7395_v23 = vld [vmem:[%s7203_s19 + $0xf0] ss:$8 sps:$4 sm:$0xff]  }
 0x10c   : > { %1506 = vmatprep.mubr.bf16.mxu1 %v7332_v26  ;;  %1616 = vmatpush1.bf16.msra.mxu1 %v5945_v27  ;;  %v490_v27 = vld [vmem:[#allocation9 + $0x210] sm:$0xff] }
 0x10d   : > { %1617 = vmatprep.subr.bf16.mxu1 %v5954_v28  ;;  %v494_v28 = vld [vmem:[#allocation9 + $0x230] sm:$0xff]  ;;  %1795 = vmatpush1.bf16.msra.mxu0 %v5891_v24 }
 0x10e   : > { %v5900_v29 = vcombine.high %v490_v27, %v494_v28  ;;  %v546_v24 = vld [vmem:[#allocation9 + $0x3d0] sm:$0xff] }
 0x110   : > { %1618 = vmatpush1.bf16.msra.mxu1 %v5953_v30  ;;  %v5899_v30 = vcombine.low %v490_v27, %v494_v28  ;;  %1796 = vmatprep.subr.bf16.mxu0 %v5900_v29  ;;  %v550_v27 = vld [vmem:[#allocation9 + $0x3f0] sm:$0xff] }
 0x111   : > { %1973 = vmatprep.subr.bf16.mxu1 %v5838_v34  ;;  %v498_v34 = vld [vmem:[#allocation9 + $0x250] sm:$0xff]  ;;  %v5956_v28 = vcombine.high %v546_v24, %v550_v27  ;;  %v5955_v29 = vcombine.low %v546_v24, %v550_v27  ;;  %v499_v27 = vld [vmem:[#allocation9 + $0x258] sm:$0xff] }
 0x112   : > { %1797 = vmatpush1.bf16.msra.mxu0 %v5899_v30  ;;  %v5908_v38 = vcombine.high %v498_v34, %v502_v35  ;;  %v5907_v39 = vcombine.low %v498_v34, %v502_v35  ;;  %v435_v30 = vld [vmem:[#allocation9 + $0x58] sm:$0xff] }
 0x113   : > { %1507 = vmatmul.mubr.bf16.gmra.mrb[32].mxu1 %v7339_v37  ;;  %v439_v34 = vld [vmem:[#allocation9 + $0x78] sm:$0xff] }
 0x114   : > { %1516 = vmatprep.mubr.bf16.mxu1 %v7342_v40  ;;  %1798 = vmatprep.subr.bf16.mxu0 %v5908_v38  ;;  %v5846_v35 = vcombine.high %v435_v30, %v439_v34  ;;  %v443_v38 = vld [vmem:[#allocation9 + $0x98] sm:$0xff]  ;;  %v5845_v43 = vcombine.low %v435_v30, %v439_v34 }
 0x115   : > { %v507_v34 = vld [vmem:[#allocation9 + $0x298] sm:$0xff] }
 0x116   : > { %1799 = vmatpush1.bf16.msra.mxu0 %v5907_v39  ;;  %v447_v39 = vld [vmem:[#allocation9 + $0xb8] sm:$0xff] }
 0x117   : > { %1800 = vmatprep.subr.bf16.mxu0 %v5916_v45  ;;  %v455_v45 = vld [vmem:[#allocation9 + $0xf8] sm:$0xff] }
 0x118   : > { %v5862_v48 = vcombine.high %v451_v44, %v455_v45  ;;  %v5861_v13 = vcombine.low %v451_v44, %v455_v45  ;;  %v523_v44 = vld [vmem:[#allocation9 + $0x318] sm:$0xff] }
 0x119   : > { %v527_v45 = vld [vmem:[#allocation9 + $0x338] sm:$0xff] }
 0x11a   : > { %1801 = vmatpush1.bf16.msra.mxu0 %v5915_v46  ;;  %v5853_v46 = vcombine.low %v443_v38, %v447_v39 }
 0x11b   : > { %1517 = vmatmul.mubr.bf16.gmra.mrb[36].mxu1 %v7347_v49  ;;  %1802 = vmatprep.subr.bf16.mxu0 %v5924_v55  ;;  %v463_v55 = vld [vmem:[#allocation9 + $0x138] sm:$0xff] }
 0x11c   : > { %1526 = vmatprep.mubr.bf16.mxu1 %v7350_v54  ;;  %v5870_v14 = vcombine.high %v459_v50, %v463_v55  ;;  %v5869_v57 = vcombine.low %v459_v50, %v463_v55  ;;  %v5933_v50 = vcombine.low %v523_v44, %v527_v45 }
 0x11e   : > { %1803 = vmatpush1.bf16.msra.mxu0 %v5923_v56  ;;  %v471_v56 = vld [vmem:[#allocation9 + $0x178] sm:$0xff] }
 0x11f   : > { %1804 = vmatprep.subr.bf16.mxu0 %v5932_v59  ;;  %v475_v59 = vld [vmem:[#allocation9 + $0x198] sm:$0xff] }
 0x122   : > { %1805 = vmatpush1.bf16.msra.mxu0 %v5931_v60  ;;  %v479_v60 = vld [vmem:[#allocation9 + $0x1b8] sm:$0xff] }
 0x123   : > { %1527 = vmatmul.mubr.bf16.gmra.mrb[40].mxu1 %v7355_v63  ;;  %1806 = vmatprep.subr.bf16.mxu0 %v5940_v5  ;;  %v5886_v3 = vcombine.high %v475_v59, %v479_v60  ;;  %v483_v5 = vld [vmem:[#allocation9 + $0x1d8] sm:$0xff]  ;;  %v5885_v11 = vcombine.low %v475_v59, %v479_v60 }
 0x124   : > { %1536 = vmatprep.mubr.bf16.mxu1 %v7358_v2 }
 0x126   : > { %1807 = vmatpush1.bf16.msra.mxu0 %v5939_v6  ;;  %v487_v6 = vld [vmem:[#allocation9 + $0x1f8] sm:$0xff] }
 0x127   : > { %1808 = vmatprep.subr.bf16.mxu0 %v5948_v17  ;;  %v5894_v12 = vcombine.high %v483_v5, %v487_v6  ;;  %v491_v17 = vld [vmem:[#allocation9 + $0x218] sm:$0xff] }
 0x12a   : > { %1809 = vmatpush1.bf16.msra.mxu0 %v5947_v19  ;;  %v495_v19 = vld [vmem:[#allocation9 + $0x238] sm:$0xff] }
 0x12b   : > { %1537 = vmatmul.mubr.bf16.gmra.mrb[44].mxu1 %v7363_v15  ;;  %1810 = vmatprep.subr.bf16.mxu0 %v5956_v28  ;;  %v5902_v24 = vcombine.high %v491_v17, %v495_v19  ;;  %v503_v28 = vld [vmem:[#allocation9 + $0x278] sm:$0xff] }
 0x12c   : > { %1546 = vmatprep.mubr.bf16.mxu1 %v7366_v20  ;;  %v5910_v30 = vcombine.high %v499_v27, %v503_v28 }
 0x12e   : > { %1811 = vmatpush1.bf16.msra.mxu0 %v5955_v29  ;;  %v5901_v29 = vcombine.low %v491_v17, %v495_v19 }
 0x131   : > { %1813 = vmatmul.mubr.bf16.vlgmr.msra.gmra.mrb[0].mxu0 %v7267_v7 }
 0x132   : > { %1822 = vmatprep.mubr.bf16.mxu0 %v7270_v9 }
 0x133   : > { %1547 = vmatmul.mubr.bf16.gmra.mrb[48].mxu1 %v7371_v33 }
 0x134   : > { %1556 = vmatprep.mubr.bf16.mxu1 %v7374_v36 }
 0x139   : > { %1823 = vmatmul.mubr.bf16.gmra.mrb[4].mxu0 %v7281_v21 }
 0x13a   : > { %1832 = vmatprep.mubr.bf16.mxu0 %v7284_v22 }
 0x13b   : > { %1557 = vmatmul.mubr.bf16.gmra.mrb[52].mxu1 %v7379_v47 }
 0x13c   : > { %1566 = vmatprep.mubr.bf16.mxu1 %v7382_v53 }
 0x141   : > { %1833 = vmatmul.mubr.bf16.gmra.mrb[8].mxu0 %v7289_v31 }
 0x142   : > { %1842 = vmatprep.mubr.bf16.mxu0 %v7292_v32 }
 0x143   : > { %1567 = vmatmul.mubr.bf16.gmra.mrb[56].mxu1 %v7387_v0 }
 0x144   : > { %1576 = vmatprep.mubr.bf16.mxu1 %v7390_v4 }
 0x149   : > { %1843 = vmatmul.mubr.bf16.gmra.mrb[12].mxu0 %v7297_v41 }
 0x14a   : > { %1852 = vmatprep.mubr.bf16.mxu0 %v7300_v42 }
 0x14b   : > { %1577 = vmatmul.mubr.bf16.gmra.mrb[60].mxu1 %v7395_v23 }
 0x14c   : > { %1619 = vmatprep.mubr.bf16.mxu1 %v7262_v18  ;;  %v5854_v18 = vcombine.high %v443_v38, %v447_v39  ;;  %v515_v38 = vld [vmem:[#allocation9 + $0x2d8] sm:$0xff] }
 0x14d   : > { %v519_v39 = vld [vmem:[#allocation9 + $0x2f8] sm:$0xff] }
 0x151   : > { %1853 = vmatmul.mubr.bf16.gmra.mrb[16].mxu0 %v7305_v51 }
 0x152   : > { %1862 = vmatprep.mubr.bf16.mxu0 %v7308_v52 }
 0x153   : > { %1620 = vmatmul.mubr.bf16.vlgmr.msra.gmra.mrb[64].mxu1 %v7267_v7 }
 0x154   : > { %1974 = vmatpush1.bf16.msra.mxu1 %v5837_v16  ;;  %1629 = vmatprep.mubr.bf16.mxu1 %v7270_v9  ;;  %v467_v16 = vld [vmem:[#allocation9 + $0x158] sm:$0xff] }
 0x155   : > { %1975 = vmatprep.subr.bf16.mxu1 %v5846_v35  ;;  %v5878_v58 = vcombine.high %v467_v16, %v471_v56  ;;  %v5877_v1 = vcombine.low %v467_v16, %v471_v56  ;;  %v511_v35 = vld [vmem:[#allocation9 + $0x2b8] sm:$0xff] }
 0x156   : > { %v547_v16 = vld [vmem:[#allocation9 + $0x3d8] sm:$0xff] }
 0x157   : > { %v551_v56 = vld [vmem:[#allocation9 + $0x3f8] sm:$0xff] }
 0x158   : > { %1976 = vmatpush1.bf16.msra.mxu1 %v5845_v43  ;;  %v5917_v43 = vcombine.low %v507_v34, %v511_v35 }
 0x159   : > { %1977 = vmatprep.subr.bf16.mxu1 %v5854_v18  ;;  %1863 = vmatmul.mubr.bf16.gmra.mrb[20].mxu0 %v7313_v61  ;;  %v5926_v18 = vcombine.high %v515_v38, %v519_v39 }
 0x15a   : > { %1872 = vmatprep.mubr.bf16.mxu0 %v7316_v62 }
 0x15b   : > { %1630 = vmatmul.mubr.bf16.gmra.mrb[68].mxu1 %v7281_v21 }
 0x15c   : > { %1639 = vmatprep.mubr.bf16.mxu1 %v7284_v22  ;;  %1978 = vmatpush1.bf16.msra.mxu1 %v5853_v46  ;;  %v531_v46 = vld [vmem:[#allocation9 + $0x358] sm:$0xff] }
 0x15d   : > { %1979 = vmatprep.subr.bf16.mxu1 %v5862_v48  ;;  %v535_v48 = vld [vmem:[#allocation9 + $0x378] sm:$0xff] }
 0x15e   : > { %v5942_v55 = vcombine.high %v531_v46, %v535_v48 }
 0x160   : > { %1980 = vmatpush1.bf16.msra.mxu1 %v5861_v13  ;;  %v539_v13 = vld [vmem:[#allocation9 + $0x398] sm:$0xff] }
 0x161   : > { %1981 = vmatprep.subr.bf16.mxu1 %v5870_v14  ;;  %1873 = vmatmul.mubr.bf16.gmra.mrb[24].mxu0 %v7321_v8  ;;  %v543_v14 = vld [vmem:[#allocation9 + $0x3b8] sm:$0xff] }
 0x162   : > { %1882 = vmatprep.mubr.bf16.mxu0 %v7324_v10 }
 0x163   : > { %1640 = vmatmul.mubr.bf16.gmra.mrb[72].mxu1 %v7289_v31 }
 0x164   : > { %1649 = vmatprep.mubr.bf16.mxu1 %v7292_v32  ;;  %1982 = vmatpush1.bf16.msra.mxu1 %v5869_v57  ;;  %v5893_v32 = vcombine.low %v483_v5, %v487_v6  ;;  %v5949_v57 = vcombine.low %v539_v13, %v543_v14 }
 0x165   : > { %1983 = vmatprep.subr.bf16.mxu1 %v5878_v58  ;;  %v5958_v58 = vcombine.high %v547_v16, %v551_v56 }
 0x168   : > { %1984 = vmatpush1.bf16.msra.mxu1 %v5877_v1 }
 0x169   : > { %1985 = vmatprep.subr.bf16.mxu1 %v5886_v3  ;;  %1883 = vmatmul.mubr.bf16.gmra.mrb[28].mxu0 %v7329_v25 }
 0x16a   : > { %1892 = vmatprep.mubr.bf16.mxu0 %v7332_v26 }
 0x16b   : > { %1650 = vmatmul.mubr.bf16.gmra.mrb[76].mxu1 %v7297_v41  ;;  %v5909_v41 = vcombine.low %v499_v27, %v503_v28 }
 0x16c   : > { %1659 = vmatprep.mubr.bf16.mxu1 %v7300_v42  ;;  %1986 = vmatpush1.bf16.msra.mxu1 %v5885_v11  ;;  %v5918_v42 = vcombine.high %v507_v34, %v511_v35 }
 0x16d   : > { %1987 = vmatprep.subr.bf16.mxu1 %v5894_v12 }
 0x170   : > { %1988 = vmatpush1.bf16.msra.mxu1 %v5893_v32 }
 0x171   : > { %1989 = vmatprep.subr.bf16.mxu1 %v5902_v24  ;;  %1893 = vmatmul.mubr.bf16.gmra.mrb[32].mxu0 %v7339_v37 }
 0x172   : > { %1902 = vmatprep.mubr.bf16.mxu0 %v7342_v40 }
 0x173   : > { %1660 = vmatmul.mubr.bf16.gmra.mrb[80].mxu1 %v7305_v51  ;;  %v5925_v51 = vcombine.low %v515_v38, %v519_v39 }
 0x174   : > { %1669 = vmatprep.mubr.bf16.mxu1 %v7308_v52  ;;  %1990 = vmatpush1.bf16.msra.mxu1 %v5901_v29  ;;  %v5934_v52 = vcombine.high %v523_v44, %v527_v45 }
 0x175   : > { %1991 = vmatprep.subr.bf16.mxu1 %v5910_v30 }
 0x178   : > { %1992 = vmatpush1.bf16.msra.mxu1 %v5909_v41 }
 0x179   : > { %1993 = vmatprep.subr.bf16.mxu1 %v5918_v42  ;;  %1903 = vmatmul.mubr.bf16.gmra.mrb[36].mxu0 %v7347_v49 }
 0x17a   : > { %1912 = vmatprep.mubr.bf16.mxu0 %v7350_v54 }
 0x17b   : > { %1670 = vmatmul.mubr.bf16.gmra.mrb[84].mxu1 %v7313_v61  ;;  %v5941_v61 = vcombine.low %v531_v46, %v535_v48 }
 0x17c   : > { %1679 = vmatprep.mubr.bf16.mxu1 %v7316_v62  ;;  %1994 = vmatpush1.bf16.msra.mxu1 %v5917_v43  ;;  %v5950_v62 = vcombine.high %v539_v13, %v543_v14 }
 0x17d   : > { %1995 = vmatprep.subr.bf16.mxu1 %v5926_v18 }
 0x180   : > { %1996 = vmatpush1.bf16.msra.mxu1 %v5925_v51 }
 0x181   : > { %1997 = vmatprep.subr.bf16.mxu1 %v5934_v52  ;;  %1913 = vmatmul.mubr.bf16.gmra.mrb[40].mxu0 %v7355_v63 }
 0x182   : > { %1922 = vmatprep.mubr.bf16.mxu0 %v7358_v2 }
 0x183   : > { %1680 = vmatmul.mubr.bf16.gmra.mrb[88].mxu1 %v7321_v8  ;;  %v5957_v8 = vcombine.low %v547_v16, %v551_v56 }
 0x184   : > { %1689 = vmatprep.mubr.bf16.mxu1 %v7324_v10  ;;  %1998 = vmatpush1.bf16.msra.mxu1 %v5933_v50  ;;  %v11929_v10 = vlaneseq }
 0x185   : > { %1999 = vmatprep.subr.bf16.mxu1 %v5942_v55 }
 0x188   : > { %2000 = vmatpush1.bf16.msra.mxu1 %v5941_v61 }
 0x189   : > { %2001 = vmatprep.subr.bf16.mxu1 %v5950_v62  ;;  %1923 = vmatmul.mubr.bf16.gmra.mrb[44].mxu0 %v7363_v15 }
 0x18a   : > { %1932 = vmatprep.mubr.bf16.mxu0 %v7366_v20 }
 0x18b   : > { %1690 = vmatmul.mubr.bf16.gmra.mrb[92].mxu1 %v7329_v25  ;;  %v7442_v25 = vshrl.u32 %v11929_v10, 7 }
 0x18c   : > { %1699 = vmatprep.mubr.bf16.mxu1 %v7332_v26  ;;  %2002 = vmatpush1.bf16.msra.mxu1 %v5949_v57  ;;  %v6776_v57 = vld [vmem:[%s7203_s19 + $0x4] ss:$8 sps:$4 sm:$0xff]  }
 0x18d   : > { %2003 = vmatprep.subr.bf16.mxu1 %v5958_v58  ;;  %12627 = vst [vmem:[#allocation23_spill] sm:$0xff] %v7442_v25  ;;  %v7446_v26 = vsub.s32 0, %v7442_v25 }
 0x18f   : > { %12628 = vst [vmem:[#allocation24_spill] sm:$0xff] %v7446_v26 }
 0x190   : > { %2004 = vmatpush1.bf16.msra.mxu1 %v5957_v8 }
 0x191   : > { %1933 = vmatmul.mubr.bf16.gmra.mrb[48].mxu0 %v7371_v33 }
 0x192   : > { %1942 = vmatprep.mubr.bf16.mxu0 %v7374_v36 }
 0x193   : > { %1700 = vmatmul.mubr.bf16.gmra.mrb[96].mxu1 %v7339_v37  ;;  %v7452_v37 = vld [vmem:[%s11918_s2] sm:$0xff] }
 0x194   : > { %1709 = vmatprep.mubr.bf16.mxu1 %v7342_v40  ;;  %v7455_v40 = vsub.s32 1, %v7442_v25 }
 0x196   : > { %12629 = vst [vmem:[#allocation25_spill] sm:$0xff] %v7455_v40 }
 0x199   : > { %1943 = vmatmul.mubr.bf16.gmra.mrb[52].mxu0 %v7379_v47 }
 0x19a   : > { %1952 = vmatprep.mubr.bf16.mxu0 %v7382_v53 }
 0x19b   : > { %1710 = vmatmul.mubr.bf16.gmra.mrb[100].mxu1 %v7347_v49  ;;  %v7461_v49 = vrot.slane %v7452_v37, %v7446_v26 }
 0x19c   : > { %1719 = vmatprep.mubr.bf16.mxu1 %v7350_v54  ;;  %v7465_v54 = vrot.slane %v7452_v37, %v7455_v40 }
 0x1a1   : > { %1953 = vmatmul.mubr.bf16.gmra.mrb[56].mxu0 %v7387_v0 }
 0x1a2   : > { %1962 = vmatprep.mubr.bf16.mxu0 %v7390_v4 }
 0x1a3   : > { %1720 = vmatmul.mubr.bf16.gmra.mrb[104].mxu1 %v7355_v63 }
 0x1a4   : > { %1729 = vmatprep.mubr.bf16.mxu1 %v7358_v2 }
 0x1a6   : > { %v1428_v59 = vpop.f32.mrb[0].mxu1 }
 0x1a7   : > { %v7469_v60 = vadd.f32 %v1428_v59, %v7461_v49  ;;  %v1430_v1 = vpop.f32.mrb[1].mxu1 }
 0x1a8   : > { %v7473_v3 = vadd.f32 %v1430_v1, %v7465_v54  ;;  %v1432_v63 = vpop.f32.mrb[2].mxu1 }
 0x1a9   : > { %v7477_v5 = vmul.f32 0.2, %v7469_v60  ;;  %v7480_v6 = vadd.f32 %v1432_v63, %v7461_v49  ;;  %v1434_v2 = vpop.f32.mrb[3].mxu1  ;;  %1963 = vmatmul.mubr.bf16.gmra.mrb[60].mxu0 %v7395_v23 }
 0x1aa   : > { %v7483_v11 = vmul.f32 0.2, %v7473_v3  ;;  %v7486_v12 = vadd.f32 %v1434_v2, %v7465_v54 }
 0x1ab   : > { %v7491_v19 = vmul.f32 0.2, %v7480_v6  ;;  %1730 = vmatmul.mubr.bf16.gmra.mrb[108].mxu1 %v7363_v15 }
 0x1ac   : > { %v7497_v24 = vmul.f32 0.2, %v7486_v12  ;;  %1739 = vmatprep.mubr.bf16.mxu1 %v7366_v20 }
 0x1ae   : > { %v1438_v29 = vpop.f32.mrb[4].mxu1 }
 0x1af   : > { %v7505_v30 = vadd.f32 %v1438_v29, %v7461_v49  ;;  %v1440_v34 = vpop.f32.mrb[5].mxu1 }
 0x1b0   : > { %v7509_v15 = vadd.f32 %v1440_v34, %v7465_v54  ;;  %v1442_v35 = vpop.f32.mrb[6].mxu1 }
 0x1b1   : > { %v7513_v20 = vmul.f32 0.2, %v7505_v30  ;;  %v7516_v41 = vadd.f32 %v1442_v35, %v7461_v49  ;;  %v1444_v42 = vpop.f32.mrb[7].mxu1 }
 0x1b2   : > { %v7519_v38 = vmul.f32 0.2, %v7509_v15  ;;  %v7522_v39 = vadd.f32 %v1444_v42, %v7465_v54 }
 0x1b3   : > { %v7527_v18 = vmul.f32 0.2, %v7516_v41  ;;  %1740 = vmatmul.mubr.bf16.gmra.mrb[112].mxu1 %v7371_v33 }
 0x1b4   : > { %v7533_v45 = vmul.f32 0.2, %v7522_v39  ;;  %1749 = vmatprep.mubr.bf16.mxu1 %v7374_v36 }
 0x1b6   : > { %v1448_v46 = vpop.f32.mrb[8].mxu1 }
 0x1b7   : > { %v7541_v48 = vadd.f32 %v1448_v46, %v7461_v49  ;;  %v1450_v50 = vpop.f32.mrb[9].mxu1 }
 0x1b8   : > { %v7545_v33 = vadd.f32 %v1450_v50, %v7465_v54  ;;  %v1452_v55 = vpop.f32.mrb[10].mxu1 }
 0x1b9   : > { %v7549_v36 = vmul.f32 0.2, %v7541_v48  ;;  %v7552_v13 = vadd.f32 %v1452_v55, %v7461_v49  ;;  %v1454_v14 = vpop.f32.mrb[11].mxu1 }
 0x1ba   : > { %v7555_v61 = vmul.f32 0.2, %v7545_v33  ;;  %v7558_v62 = vadd.f32 %v1454_v14, %v7465_v54 }
 0x1bb   : > { %v7563_v56 = vmul.f32 0.2, %v7552_v13  ;;  %1750 = vmatmul.mubr.bf16.gmra.mrb[116].mxu1 %v7379_v47 }
 0x1bc   : > { %v7569_v58 = vmul.f32 0.2, %v7558_v62  ;;  %1759 = vmatprep.mubr.bf16.mxu1 %v7382_v53 }
 0x1be   : > { %v1458_v1 = vpop.f32.mrb[12].mxu1 }
 0x1bf   : > { %v7577_v63 = vadd.f32 %v1458_v1, %v7461_v49  ;;  %v1460_v2 = vpop.f32.mrb[13].mxu1 }
 0x1c0   : > { %v7581_v47 = vadd.f32 %v1460_v2, %v7465_v54  ;;  %v1462_v29 = vpop.f32.mrb[14].mxu1 }
 0x1c1   : > { %v7585_v53 = vmul.f32 0.2, %v7577_v63  ;;  %v7588_v34 = vadd.f32 %v1462_v29, %v7461_v49  ;;  %v1464_v35 = vpop.f32.mrb[15].mxu1 }
 0x1c2   : > { %v7591_v42 = vmul.f32 0.2, %v7581_v47  ;;  %v7594_v46 = vadd.f32 %v1464_v35, %v7465_v54 }
 0x1c3   : > { %v7599_v55 = vmul.f32 0.2, %v7588_v34  ;;  %1760 = vmatmul.mubr.bf16.gmra.mrb[120].mxu1 %v7387_v0 }
 0x1c4   : > { %v7605_v1 = vmul.f32 0.2, %v7594_v46  ;;  %1769 = vmatprep.mubr.bf16.mxu1 %v7390_v4 }
 0x1c6   : > { %v1468_v35 = vpop.f32.mrb[16].mxu1 }
 0x1c7   : > { %v7613_v10 = vadd.f32 %v1468_v35, %v7461_v49  ;;  %v1470_v0 = vpop.f32.mrb[17].mxu1 }
 0x1c8   : > { %v7617_v50 = vadd.f32 %v1470_v0, %v7465_v54  ;;  %v1472_v14 = vpop.f32.mrb[18].mxu1 }
 0x1c9   : > { %v7620_v4 = vmul.f32 0.2, %v7613_v10  ;;  %v7623_v2 = vadd.f32 %v1472_v14, %v7461_v49  ;;  %v1474_v8 = vpop.f32.mrb[19].mxu1 }
 0x1ca   : > { %v7626_v29 = vmul.f32 0.2, %v7617_v50  ;;  %v7629_v35 = vadd.f32 %v1474_v8, %v7465_v54 }
 0x1cb   : > { %12630 = vst [vmem:[#allocation26_spill] sm:$0xff] %v7623_v2  ;;  %v7634_v0 = vmul.f32 0.2, %v7623_v2  ;;  %1770 = vmatmul.mubr.bf16.gmra.mrb[124].mxu1 %v7395_v23 }
 0x1cc   : > { %v7640_v14 = vmul.f32 0.2, %v7629_v35  ;;  %2005 = vmatprep.mubr.bf16.mxu1 %v6776_v57 }
 0x1cd   : > { %12631 = vst [vmem:[#allocation27_spill] sm:$0xff] %v7634_v0 }
 0x1ce   : > { %v1478_v16 = vpop.f32.mrb[20].mxu1 }
 0x1cf   : > { %v7648_v43 = vadd.f32 %v1478_v16, %v7461_v49  ;;  %v1480_v52 = vpop.f32.mrb[21].mxu1 }
 0x1d0   : > { %v7651_v23 = vadd.f32 %v1480_v52, %v7465_v54  ;;  %v1482_v59 = vpop.f32.mrb[22].mxu1 }
 0x1d1   : > { %12632 = vst [vmem:[#allocation28_spill] sm:$0xff] %v7648_v43  ;;  %v7654_v44 = vmul.f32 0.2, %v7648_v43  ;;  %v7657_v57 = vadd.f32 %v1482_v59, %v7461_v49  ;;  %v1484_v27 = vpop.f32.mrb[23].mxu1 }
 0x1d2   : > { %12633 = vst [vmem:[#allocation29_spill] sm:$0xff] %v7651_v23  ;;  %v7660_v8 = vmul.f32 0.2, %v7651_v23  ;;  %v7663_v51 = vadd.f32 %v1484_v27, %v7465_v54  ;;  %v6795_v23 = vld [vmem:[%s7203_s19 + $0xc4] ss:$8 sps:$4 sm:$0xff]  }
 0x1d3   : > { %12634 = vst [vmem:[#allocation30_spill] sm:$0xff] %v7654_v44  ;;  %12635 = vst [vmem:[#allocation31_spill] sm:$0xff] %v7657_v57  ;;  %v7668_v52 = vmul.f32 0.2, %v7657_v57  ;;  %2006 = vmatmul.mubr.bf16.vlgmr.msra.gmra.mrb[128].mxu1 %v7267_v7 }
 0x1d4   : > { %12636 = vst [vmem:[#allocation32_spill] sm:$0xff] %v7660_v8  ;;  %12637 = vst [vmem:[#allocation33_spill] sm:$0xff] %v7663_v51  ;;  %v7674_v59 = vmul.f32 0.2, %v7663_v51  ;;  %2015 = vmatprep.mubr.bf16.mxu1 %v7270_v9 }
 0x1d5   : > { %12638 = vst [vmem:[#allocation34_spill] sm:$0xff] %v7668_v52 }
 0x1d6   : > { %12639 = vst [vmem:[#allocation35_spill] sm:$0xff] %v7674_v59  ;;  %v1488_v16 = vpop.f32.mrb[24].mxu1 }
 0x1d7   : > { %v7682_v32 = vadd.f32 %v1488_v16, %v7461_v49  ;;  %v1490_v40 = vpop.f32.mrb[25].mxu1 }
 0x1d8   : > { %v7685_v7 = vadd.f32 %v1490_v40, %v7465_v54  ;;  %v1492_v17 = vpop.f32.mrb[26].mxu1 }
 0x1d9   : > { %12640 = vst [vmem:[#allocation36_spill] sm:$0xff] %v7682_v32  ;;  %v7688_v26 = vmul.f32 0.2, %v7682_v32  ;;  %v7691_v9 = vadd.f32 %v1492_v17, %v7461_v49  ;;  %v1494_v44 = vpop.f32.mrb[27].mxu1 }
 0x1da   : > { %12641 = vst [vmem:[#allocation37_spill] sm:$0xff] %v7685_v7  ;;  %v7694_v27 = vmul.f32 0.2, %v7685_v7  ;;  %v7697_v28 = vadd.f32 %v1494_v44, %v7465_v54 }
 0x1db   : > { %12642 = vst [vmem:[#allocation38_spill] sm:$0xff] %v7688_v26  ;;  %12643 = vst [vmem:[#allocation39_spill] sm:$0xff] %v7691_v9  ;;  %v7702_v40 = vmul.f32 0.2, %v7691_v9  ;;  %2016 = vmatmul.mubr.bf16.gmra.mrb[132].mxu1 %v7281_v21 }
 0x1dc   : > { %12644 = vst [vmem:[#allocation40_spill] sm:$0xff] %v7694_v27  ;;  %12645 = vst [vmem:[#allocation41_spill] sm:$0xff] %v7697_v28  ;;  %v7708_v17 = vmul.f32 0.2, %v7697_v28  ;;  %2025 = vmatprep.mubr.bf16.mxu1 %v7284_v22 }
 0x1dd   : > { %12646 = vst [vmem:[#allocation42_spill] sm:$0xff] %v7702_v40 }
 0x1de   : > { %12647 = vst [vmem:[#allocation43_spill] sm:$0xff] %v7708_v17  ;;  %v1498_v16 = vpop.f32.mrb[28].mxu1  ;;  %v6777_v17 = vld [vmem:[%s7203_s19 + $0x34] ss:$8 sps:$4 sm:$0xff]  }
 0x1df   : > { %v7716_v26 = vadd.f32 %v1498_v16, %v7461_v49  ;;  %v1500_v21 = vpop.f32.mrb[29].mxu1 }
 0x1e0   : > { %v7719_v32 = vadd.f32 %v1500_v21, %v7465_v54  ;;  %v1502_v52 = vpop.f32.mrb[30].mxu1 }
 0x1e1   : > { %12648 = vst [vmem:[#allocation44_spill] sm:$0xff] %v7716_v26  ;;  %v7722_v27 = vmul.f32 0.2, %v7716_v26  ;;  %v7725_v22 = vadd.f32 %v1502_v52, %v7461_v49  ;;  %v1504_v44 = vpop.f32.mrb[31].mxu1 }
 0x1e2   : > { %12649 = vst [vmem:[#allocation45_spill] sm:$0xff] %v7719_v32  ;;  %v7728_v40 = vmul.f32 0.2, %v7719_v32  ;;  %v7731_v57 = vadd.f32 %v1504_v44, %v7465_v54 }
 0x1e3   : > { %12650 = vst [vmem:[#allocation46_spill] sm:$0xff] %v7722_v27  ;;  %12651 = vst [vmem:[#allocation47_spill] sm:$0xff] %v7725_v22  ;;  %v7736_v21 = vmul.f32 0.2, %v7725_v22  ;;  %2026 = vmatmul.mubr.bf16.gmra.mrb[136].mxu1 %v7289_v31  ;;  %v6778_v22 = vld [vmem:[%s7203_s19 + $0x30] ss:$8 sps:$4 sm:$0xff]  }
 0x1e4   : > { %12652 = vst [vmem:[#allocation48_spill] sm:$0xff] %v7728_v40  ;;  %12653 = vst [vmem:[#allocation49_spill] sm:$0xff] %v7731_v57  ;;  %v7742_v52 = vmul.f32 0.2, %v7731_v57  ;;  %2035 = vmatprep.mubr.bf16.mxu1 %v6777_v17  ;;  %v6779_v57 = vld [vmem:[%s7203_s19 + $0x44] ss:$8 sps:$4 sm:$0xff]  }
 0x1e5   : > { %12654 = vst [vmem:[#allocation50_spill] sm:$0xff] %v7736_v21 }
 0x1e6   : > { %12655 = vst [vmem:[#allocation51_spill] sm:$0xff] %v7742_v52  ;;  %v1508_v27 = vpop.f32.mrb[32].mxu1 }
 0x1e7   : > { %v7750_v26 = vadd.f32 %v1508_v27, %v7461_v49  ;;  %v1510_v31 = vpop.f32.mrb[33].mxu1 }
 0x1e8   : > { %v7753_v9 = vadd.f32 %v1510_v31, %v7465_v54  ;;  %v1512_v40 = vpop.f32.mrb[34].mxu1 }
 0x1e9   : > { %12656 = vst [vmem:[#allocation52_spill] sm:$0xff] %v7750_v26  ;;  %v7756_v32 = vmul.f32 0.2, %v7750_v26  ;;  %v7759_v17 = vadd.f32 %v1512_v40, %v7461_v49  ;;  %v1514_v44 = vpop.f32.mrb[35].mxu1 }
 0x1ea   : > { %12657 = vst [vmem:[#allocation53_spill] sm:$0xff] %v7753_v9  ;;  %v7762_v21 = vmul.f32 0.2, %v7753_v9  ;;  %v7765_v16 = vadd.f32 %v1514_v44, %v7465_v54 }
 0x1eb   : > { %12658 = vst [vmem:[#allocation54_spill] sm:$0xff] %v7756_v32  ;;  %12659 = vst [vmem:[#allocation55_spill] sm:$0xff] %v7759_v17  ;;  %v7770_v31 = vmul.f32 0.2, %v7759_v17  ;;  %2036 = vmatmul.mubr.bf16.gmra.mrb[140].mxu1 %v6778_v22  ;;  %v6780_v17 = vld [vmem:[%s7203_s19 + $0x40] ss:$8 sps:$4 sm:$0xff]  }
 0x1ec   : > { %12660 = vst [vmem:[#allocation56_spill] sm:$0xff] %v7762_v21  ;;  %12661 = vst [vmem:[#allocation57_spill] sm:$0xff] %v7765_v16  ;;  %v7776_v40 = vmul.f32 0.2, %v7765_v16  ;;  %2045 = vmatprep.mubr.bf16.mxu1 %v6779_v57  ;;  %v6781_v16 = vld [vmem:[%s7203_s19 + $0x54] ss:$8 sps:$4 sm:$0xff]  }
 0x1ed   : > { %12662 = vst [vmem:[#allocation58_spill] sm:$0xff] %v7770_v31 }
 0x1ee   : > { %12663 = vst [vmem:[#allocation59_spill] sm:$0xff] %v7776_v40  ;;  %v1518_v32 = vpop.f32.mrb[36].mxu1 }
 0x1ef   : > { %v7784_v26 = vadd.f32 %v1518_v32, %v7461_v49  ;;  %v1520_v22 = vpop.f32.mrb[37].mxu1 }
 0x1f0   : > { %v7787_v52 = vadd.f32 %v1520_v22, %v7465_v54  ;;  %v1522_v21 = vpop.f32.mrb[38].mxu1 }
 0x1f1   : > { %12664 = vst [vmem:[#allocation60_spill] sm:$0xff] %v7784_v26  ;;  %v7790_v9 = vmul.f32 0.2, %v7784_v26  ;;  %v7793_v57 = vadd.f32 %v1522_v21, %v7461_v49  ;;  %v1524_v44 = vpop.f32.mrb[39].mxu1 }
 0x1f2   : > { %12665 = vst [vmem:[#allocation61_spill] sm:$0xff] %v7787_v52  ;;  %v7796_v31 = vmul.f32 0.2, %v7787_v52  ;;  %v7799_v27 = vadd.f32 %v1524_v44, %v7465_v54 }
 0x1f3   : > { %12666 = vst [vmem:[#allocation62_spill] sm:$0xff] %v7790_v9  ;;  %12667 = vst [vmem:[#allocation63_spill] sm:$0xff] %v7793_v57  ;;  %v7804_v22 = vmul.f32 0.2, %v7793_v57  ;;  %2046 = vmatmul.mubr.bf16.gmra.mrb[144].mxu1 %v6780_v17  ;;  %v6782_v57 = vld [vmem:[%s7203_s19 + $0x50] ss:$8 sps:$4 sm:$0xff]  }
 0x1f4   : > { %12668 = vst [vmem:[#allocation64_spill] sm:$0xff] %v7796_v31  ;;  %12669 = vst [vmem:[#allocation65_spill] sm:$0xff] %v7799_v27  ;;  %v7810_v21 = vmul.f32 0.2, %v7799_v27  ;;  %2055 = vmatprep.mubr.bf16.mxu1 %v6781_v16  ;;  %v6783_v27 = vld [vmem:[%s7203_s19 + $0x64] ss:$8 sps:$4 sm:$0xff]  }
 0x1f5   : > { %12670 = vst [vmem:[#allocation66_spill] sm:$0xff] %v7804_v22 }
 0x1f6   : > { %12671 = vst [vmem:[#allocation67_spill] sm:$0xff] %v7810_v21  ;;  %v1528_v9 = vpop.f32.mrb[40].mxu1 }
 0x1f7   : > { %v7818_v26 = vadd.f32 %v1528_v9, %v7461_v49  ;;  %v1530_v17 = vpop.f32.mrb[41].mxu1 }
 0x1f8   : > { %v7821_v40 = vadd.f32 %v1530_v17, %v7465_v54  ;;  %v1532_v31 = vpop.f32.mrb[42].mxu1 }
 0x1f9   : > { %12672 = vst [vmem:[#allocation68_spill] sm:$0xff] %v7818_v26  ;;  %v7824_v52 = vmul.f32 0.2, %v7818_v26  ;;  %v7827_v16 = vadd.f32 %v1532_v31, %v7461_v49  ;;  %v1534_v44 = vpop.f32.mrb[43].mxu1 }
 0x1fa   : > { %12673 = vst [vmem:[#allocation69_spill] sm:$0xff] %v7821_v40  ;;  %v7830_v22 = vmul.f32 0.2, %v7821_v40  ;;  %v7833_v32 = vadd.f32 %v1534_v44, %v7465_v54 }
 0x1fb   : > { %12674 = vst [vmem:[#allocation70_spill] sm:$0xff] %v7824_v52  ;;  %12675 = vst [vmem:[#allocation71_spill] sm:$0xff] %v7827_v16  ;;  %v7838_v17 = vmul.f32 0.2, %v7827_v16  ;;  %2056 = vmatmul.mubr.bf16.gmra.mrb[148].mxu1 %v6782_v57  ;;  %v6784_v16 = vld [vmem:[%s7203_s19 + $0x60] ss:$8 sps:$4 sm:$0xff]  }
 0x1fc   : > { %12676 = vst [vmem:[#allocation72_spill] sm:$0xff] %v7830_v22  ;;  %12677 = vst [vmem:[#allocation73_spill] sm:$0xff] %v7833_v32  ;;  %v7844_v31 = vmul.f32 0.2, %v7833_v32  ;;  %2065 = vmatprep.mubr.bf16.mxu1 %v6783_v27  ;;  %v6785_v32 = vld [vmem:[%s7203_s19 + $0x74] ss:$8 sps:$4 sm:$0xff]  }
 0x1fd   : > { %12678 = vst [vmem:[#allocation74_spill] sm:$0xff] %v7838_v17 }
 0x1fe   : > { %12679 = vst [vmem:[#allocation75_spill] sm:$0xff] %v7844_v31  ;;  %v1538_v52 = vpop.f32.mrb[44].mxu1 }
 0x1ff   : > { %v7852_v26 = vadd.f32 %v1538_v52, %v7461_v49  ;;  %v1540_v57 = vpop.f32.mrb[45].mxu1 }
 0x200   : > { %v7855_v21 = vadd.f32 %v1540_v57, %v7465_v54  ;;  %v1542_v22 = vpop.f32.mrb[46].mxu1 }
 0x201   : > { %12680 = vst [vmem:[#allocation76_spill] sm:$0xff] %v7852_v26  ;;  %v7858_v40 = vmul.f32 0.2, %v7852_v26  ;;  %v7861_v27 = vadd.f32 %v1542_v22, %v7461_v49  ;;  %v1544_v44 = vpop.f32.mrb[47].mxu1 }
 0x202   : > { %12681 = vst [vmem:[#allocation77_spill] sm:$0xff] %v7855_v21  ;;  %v7864_v17 = vmul.f32 0.2, %v7855_v21  ;;  %v7867_v9 = vadd.f32 %v1544_v44, %v7465_v54 }
 0x203   : > { %12682 = vst [vmem:[#allocation78_spill] sm:$0xff] %v7858_v40  ;;  %12683 = vst [vmem:[#allocation79_spill] sm:$0xff] %v7861_v27  ;;  %v7872_v57 = vmul.f32 0.2, %v7861_v27  ;;  %2066 = vmatmul.mubr.bf16.gmra.mrb[152].mxu1 %v6784_v16  ;;  %v6786_v27 = vld [vmem:[%s7203_s19 + $0x70] ss:$8 sps:$4 sm:$0xff]  }
 0x204   : > { %12684 = vst [vmem:[#allocation80_spill] sm:$0xff] %v7864_v17  ;;  %12685 = vst [vmem:[#allocation81_spill] sm:$0xff] %v7867_v9  ;;  %v7878_v22 = vmul.f32 0.2, %v7867_v9  ;;  %2075 = vmatprep.mubr.bf16.mxu1 %v6785_v32  ;;  %v6787_v9 = vld [vmem:[%s7203_s19 + $0x84] ss:$8 sps:$4 sm:$0xff]  }
 0x205   : > { %12686 = vst [vmem:[#allocation82_spill] sm:$0xff] %v7872_v57 }
 0x206   : > { %12687 = vst [vmem:[#allocation83_spill] sm:$0xff] %v7878_v22  ;;  %v1548_v40 = vpop.f32.mrb[48].mxu1 }
 0x207   : > { %v7886_v26 = vadd.f32 %v1548_v40, %v7461_v49  ;;  %v1550_v16 = vpop.f32.mrb[49].mxu1 }
 0x208   : > { %v7889_v31 = vadd.f32 %v1550_v16, %v7465_v54  ;;  %v1552_v17 = vpop.f32.mrb[50].mxu1 }
 0x209   : > { %12688 = vst [vmem:[#allocation84_spill] sm:$0xff] %v7886_v26  ;;  %v7892_v21 = vmul.f32 0.2, %v7886_v26  ;;  %v7895_v32 = vadd.f32 %v1552_v17, %v7461_v49  ;;  %v1554_v44 = vpop.f32.mrb[51].mxu1 }
 0x20a   : > { %12689 = vst [vmem:[#allocation85_spill] sm:$0xff] %v7889_v31  ;;  %v7898_v57 = vmul.f32 0.2, %v7889_v31  ;;  %v7901_v52 = vadd.f32 %v1554_v44, %v7465_v54 }
 0x20b   : > { %12690 = vst [vmem:[#allocation86_spill] sm:$0xff] %v7892_v21  ;;  %12691 = vst [vmem:[#allocation87_spill] sm:$0xff] %v7895_v32  ;;  %v7906_v16 = vmul.f32 0.2, %v7895_v32  ;;  %2076 = vmatmul.mubr.bf16.gmra.mrb[156].mxu1 %v6786_v27  ;;  %v6788_v32 = vld [vmem:[%s7203_s19 + $0x80] ss:$8 sps:$4 sm:$0xff]  }
 0x20c   : > { %12692 = vst [vmem:[#allocation88_spill] sm:$0xff] %v7898_v57  ;;  %12693 = vst [vmem:[#allocation89_spill] sm:$0xff] %v7901_v52  ;;  %v7912_v17 = vmul.f32 0.2, %v7901_v52  ;;  %2085 = vmatprep.mubr.bf16.mxu1 %v6787_v9  ;;  %v6789_v52 = vld [vmem:[%s7203_s19 + $0x94] ss:$8 sps:$4 sm:$0xff]  }
 0x20d   : > { %12694 = vst [vmem:[#allocation90_spill] sm:$0xff] %v7906_v16 }
 0x20e   : > { %12695 = vst [vmem:[#allocation91_spill] sm:$0xff] %v7912_v17  ;;  %v1558_v21 = vpop.f32.mrb[52].mxu1 }
 0x20f   : > { %v7920_v26 = vadd.f32 %v1558_v21, %v7461_v49  ;;  %v1560_v27 = vpop.f32.mrb[53].mxu1 }
 0x210   : > { %v7923_v22 = vadd.f32 %v1560_v27, %v7465_v54  ;;  %v1562_v57 = vpop.f32.mrb[54].mxu1 }
 0x211   : > { %12696 = vst [vmem:[#allocation92_spill] sm:$0xff] %v7920_v26  ;;  %v7926_v31 = vmul.f32 0.2, %v7920_v26  ;;  %v7929_v9 = vadd.f32 %v1562_v57, %v7461_v49  ;;  %v1564_v44 = vpop.f32.mrb[55].mxu1 }
 0x212   : > { %12697 = vst [vmem:[#allocation93_spill] sm:$0xff] %v7923_v22  ;;  %v7932_v16 = vmul.f32 0.2, %v7923_v22  ;;  %v7935_v40 = vadd.f32 %v1564_v44, %v7465_v54 }
 0x213   : > { %12698 = vst [vmem:[#allocation94_spill] sm:$0xff] %v7926_v31  ;;  %12699 = vst [vmem:[#allocation95_spill] sm:$0xff] %v7929_v9  ;;  %v7940_v27 = vmul.f32 0.2, %v7929_v9  ;;  %2086 = vmatmul.mubr.bf16.gmra.mrb[160].mxu1 %v6788_v32  ;;  %v6790_v9 = vld [vmem:[%s7203_s19 + $0x90] ss:$8 sps:$4 sm:$0xff]  }
 0x214   : > { %12700 = vst [vmem:[#allocation96_spill] sm:$0xff] %v7932_v16  ;;  %12701 = vst [vmem:[#allocation97_spill] sm:$0xff] %v7935_v40  ;;  %v7946_v57 = vmul.f32 0.2, %v7935_v40  ;;  %2095 = vmatprep.mubr.bf16.mxu1 %v6789_v52  ;;  %v6791_v40 = vld [vmem:[%s7203_s19 + $0xa4] ss:$8 sps:$4 sm:$0xff]  }
 0x215   : > { %12702 = vst [vmem:[#allocation98_spill] sm:$0xff] %v7940_v27 }
 0x216   : > { %12703 = vst [vmem:[#allocation99_spill] sm:$0xff] %v7946_v57  ;;  %v1568_v31 = vpop.f32.mrb[56].mxu1 }
 0x217   : > { %v7954_v26 = vadd.f32 %v1568_v31, %v7461_v49  ;;  %v1570_v32 = vpop.f32.mrb[57].mxu1 }
 0x218   : > { %v7957_v17 = vadd.f32 %v1570_v32, %v7465_v54  ;;  %v1572_v16 = vpop.f32.mrb[58].mxu1 }
 0x219   : > { %12704 = vst [vmem:[#allocation100_spill] sm:$0xff] %v7954_v26  ;;  %v7960_v22 = vmul.f32 0.2, %v7954_v26  ;;  %v7963_v52 = vadd.f32 %v1572_v16, %v7461_v49  ;;  %v1574_v44 = vpop.f32.mrb[59].mxu1 }
 0x21a   : > { %12705 = vst [vmem:[#allocation101_spill] sm:$0xff] %v7957_v17  ;;  %v7966_v27 = vmul.f32 0.2, %v7957_v17  ;;  %v7969_v21 = vadd.f32 %v1574_v44, %v7465_v54 }
 0x21b   : > { %12706 = vst [vmem:[#allocation102_spill] sm:$0xff] %v7960_v22  ;;  %12707 = vst [vmem:[#allocation103_spill] sm:$0xff] %v7963_v52  ;;  %v7974_v32 = vmul.f32 0.2, %v7963_v52  ;;  %2096 = vmatmul.mubr.bf16.gmra.mrb[164].mxu1 %v6790_v9  ;;  %v572_v22 = vsub.s32 4, %v7442_v25 }
 0x21c   : > { %12708 = vst [vmem:[#allocation104_spill] sm:$0xff] %v7966_v27  ;;  %12709 = vst [vmem:[#allocation105_spill] sm:$0xff] %v7969_v21  ;;  %v7980_v16 = vmul.f32 0.2, %v7969_v21  ;;  %2105 = vmatprep.mubr.bf16.mxu1 %v6791_v40  ;;  %v12718_v40 = vsub.s32 2, %v7442_v25 }
 0x21d   : > { %12710 = vst [vmem:[#allocation106_spill] sm:$0xff] %v7974_v32  ;;  %v6792_v21 = vld [vmem:[%s7203_s19 + $0xa0] ss:$8 sps:$4 sm:$0xff]   ;;  %v8021_v7 = vrot.slane %v7452_v37, %v572_v22 }
 0x21e   : > { %12711 = vst [vmem:[#allocation107_spill] sm:$0xff] %v7980_v16  ;;  %v1578_v31 = vpop.f32.mrb[60].mxu1  ;;  %v8012_v52 = vrot.slane %v7452_v37, %v12718_v40  ;;  %v1814_v16 = vpop.f32.mrb[0].mxu0 }
 0x21f   : > { %v7989_v26 = vadd.f32 %v1578_v31, %v7461_v49  ;;  %v1580_v9 = vpop.f32.mrb[61].mxu1  ;;  %v576_v31 = vsub.s32 5, %v7442_v25 }
 0x220   : > { %v7992_v57 = vadd.f32 %v1580_v9, %v7465_v54  ;;  %v1582_v27 = vpop.f32.mrb[62].mxu1 }
 0x221   : > { %12712 = vst [vmem:[#allocation108_spill] sm:$0xff] %v7989_v26  ;;  %v7996_v17 = vmul.f32 0.2, %v7989_v26  ;;  %v7999_v44 = vadd.f32 %v1582_v27, %v7461_v49  ;;  %v1584_v28 = vpop.f32.mrb[63].mxu1  ;;  %v12721_v49 = vsub.s32 3, %v7442_v25 }
 0x222   : > { %12713 = vst [vmem:[#allocation109_spill] sm:$0xff] %v7992_v57  ;;  %v8004_v32 = vmul.f32 0.2, %v7992_v57  ;;  %v8007_v9 = vadd.f32 %v1584_v28, %v7465_v54  ;;  %v8024_v54 = vrot.slane %v7452_v37, %v576_v31  ;;  %v1816_v28 = vpop.f32.mrb[1].mxu0  ;;  %v6793_v26 = vld [vmem:[%s7203_s19 + $0xb4] ss:$8 sps:$4 sm:$0xff]   ;;  %v8040_v31 = vadd.f32 %v1814_v16, %v8021_v7 }
 0x223   : > { %12714 = vst [vmem:[#allocation110_spill] sm:$0xff] %v7996_v17  ;;  %12715 = vst [vmem:[#allocation111_spill] sm:$0xff] %v7999_v44  ;;  %v8017_v27 = vmul.f32 0.2, %v7999_v44  ;;  %2106 = vmatmul.mubr.bf16.gmra.mrb[168].mxu1 %v6792_v21  ;;  %v8034_v17 = vrot.slane %v7452_v37, %v12721_v49  ;;  %v1818_v21 = vpop.f32.mrb[2].mxu0 }
 0x224   : > { %12716 = vst [vmem:[#allocation112_spill] sm:$0xff] %v8004_v32  ;;  %12717 = vst [vmem:[#allocation113_spill] sm:$0xff] %v8007_v9  ;;  %v8029_v43 = vmul.f32 0.2, %v8007_v9  ;;  %2115 = vmatprep.mubr.bf16.mxu1 %v6793_v26  ;;  %v8043_v59 = vadd.f32 %v1816_v28, %v8024_v54  ;;  %v8046_v40 = vadd.f32 %v1818_v21, %v8021_v7  ;;  %v1820_v32 = vpop.f32.mrb[3].mxu0 }
 0x225   : > { %12719 = vst [vmem:[#allocation114_spill] sm:$0xff] %v8017_v27  ;;  %12722 = vst [vmem:[#allocation116_spill] sm:$0xff] %v8040_v31  ;;  %v8051_v26 = vadd.f32 %v1820_v32, %v8024_v54  ;;  %v8057_v16 = vmul.f32 0.2, %v8040_v31  ;;  %v1824_v0 = vpop.f32.mrb[4].mxu0 }
 0x226   : > { %12720 = vst [vmem:[#allocation115_spill] sm:$0xff] %v8029_v43  ;;  %12723 = vst [vmem:[#allocation117_spill] sm:$0xff] %v8043_v59  ;;  %v1621_v49 = vpop.f32.mrb[64].mxu1  ;;  %v8060_v28 = vmul.f32 0.2, %v8043_v59  ;;  %v8106_v2 = vadd.f32 %v1824_v0, %v8021_v7 }
 0x227   : > { %12724 = vst [vmem:[#allocation118_spill] sm:$0xff] %v8046_v40  ;;  %12725 = vst [vmem:[#allocation119_spill] sm:$0xff] %v8051_v26  ;;  %v8054_v57 = vadd.f32 %v1621_v49, %v8012_v52  ;;  %v1623_v22 = vpop.f32.mrb[65].mxu1  ;;  %v8066_v37 = vmul.f32 0.2, %v8046_v40 }
 0x228   : > { %12727 = vst [vmem:[#allocation121_spill] sm:$0xff] %v8057_v16  ;;  %12728 = vst [vmem:[#allocation122_spill] sm:$0xff] %v8060_v28  ;;  %v8063_v21 = vadd.f32 %v1623_v22, %v8034_v17  ;;  %v1625_v27 = vpop.f32.mrb[66].mxu1  ;;  %v8069_v32 = vmul.f32 0.2, %v8051_v26  ;;  %v1826_v16 = vpop.f32.mrb[5].mxu0 }
 0x229   : > { %12726 = vst [vmem:[#allocation120_spill] sm:$0xff] %v8054_v57  ;;  %12730 = vst [vmem:[#allocation124_spill] sm:$0xff] %v8066_v37  ;;  %v8072_v49 = vmul.f32 0.2, %v8054_v57  ;;  %v8075_v44 = vadd.f32 %v1625_v27, %v8012_v52  ;;  %v1627_v43 = vpop.f32.mrb[67].mxu1  ;;  %v1828_v37 = vpop.f32.mrb[6].mxu0  ;;  %v8109_v40 = vadd.f32 %v1826_v16, %v8024_v54 }
 0x22a   : > { %12729 = vst [vmem:[#allocation123_spill] sm:$0xff] %v8063_v21  ;;  %12731 = vst [vmem:[#allocation125_spill] sm:$0xff] %v8069_v32  ;;  %v8082_v51 = vmul.f32 0.2, %v8063_v21  ;;  %v8085_v8 = vadd.f32 %v1627_v43, %v8034_v17  ;;  %v6794_v9 = vld [vmem:[%s7203_s19 + $0xb0] ss:$8 sps:$4 sm:$0xff]  }
 0x22b   : > { %12732 = vst [vmem:[#allocation126_spill] sm:$0xff] %v8072_v49  ;;  %12733 = vst [vmem:[#allocation127_spill] sm:$0xff] %v8075_v44  ;;  %v8094_v22 = vmul.f32 0.2, %v8075_v44  ;;  %2116 = vmatmul.mubr.bf16.gmra.mrb[172].mxu1 %v6794_v9  ;;  %v8112_v9 = vadd.f32 %v1828_v37, %v8021_v7  ;;  %v1830_v32 = vpop.f32.mrb[7].mxu0 }
 0x22c   : > { %12734 = vst [vmem:[#allocation128_spill] sm:$0xff] %v8082_v51  ;;  %12735 = vst [vmem:[#allocation129_spill] sm:$0xff] %v8085_v8  ;;  %v8100_v31 = vmul.f32 0.2, %v8085_v8  ;;  %2125 = vmatprep.mubr.bf16.mxu1 %v6795_v23  ;;  %v8117_v23 = vadd.f32 %v1830_v32, %v8024_v54  ;;  %v8123_v0 = vmul.f32 0.2, %v8106_v2 }
 0x22d   : > { %12736 = vst [vmem:[#allocation130_spill] sm:$0xff] %v8094_v22  ;;  %12738 = vst [vmem:[#allocation132_spill] sm:$0xff] %v8106_v2  ;;  %v8126_v16 = vmul.f32 0.2, %v8109_v40  ;;  %v8132_v43 = vmul.f32 0.2, %v8112_v9 }
 0x22e   : > { %12737 = vst [vmem:[#allocation131_spill] sm:$0xff] %v8100_v31  ;;  %12739 = vst [vmem:[#allocation133_spill] sm:$0xff] %v8109_v40  ;;  %v1631_v26 = vpop.f32.mrb[68].mxu1  ;;  %v8135_v32 = vmul.f32 0.2, %v8117_v23  ;;  %v1834_v51 = vpop.f32.mrb[8].mxu0 }
 0x22f   : > { %12740 = vst [vmem:[#allocation134_spill] sm:$0xff] %v8112_v9  ;;  %12741 = vst [vmem:[#allocation135_spill] sm:$0xff] %v8117_v23  ;;  %v8120_v28 = vadd.f32 %v1631_v26, %v8012_v52  ;;  %v1633_v27 = vpop.f32.mrb[69].mxu1  ;;  %v6796_v49 = vld [vmem:[%s7203_s19 + $0xc0] ss:$8 sps:$4 sm:$0xff]   ;;  %v8172_v21 = vadd.f32 %v1834_v51, %v8021_v7 }
 0x230   : > { %12743 = vst [vmem:[#allocation137_spill] sm:$0xff] %v8123_v0  ;;  %12744 = vst [vmem:[#allocation138_spill] sm:$0xff] %v8126_v16  ;;  %v8129_v37 = vadd.f32 %v1633_v27, %v8034_v17  ;;  %v1635_v59 = vpop.f32.mrb[70].mxu1  ;;  %v1836_v0 = vpop.f32.mrb[9].mxu0  ;;  %v6797_v8 = vld [vmem:[%s7203_s19 + $0xd4] ss:$8 sps:$4 sm:$0xff]  }
 0x231   : > { %12742 = vst [vmem:[#allocation136_spill] sm:$0xff] %v8120_v28  ;;  %12746 = vst [vmem:[#allocation140_spill] sm:$0xff] %v8132_v43  ;;  %v8138_v26 = vmul.f32 0.2, %v8120_v28  ;;  %v8141_v22 = vadd.f32 %v1635_v59, %v8012_v52  ;;  %v1637_v44 = vpop.f32.mrb[71].mxu1  ;;  %v1838_v43 = vpop.f32.mrb[10].mxu0  ;;  %v8175_v9 = vadd.f32 %v1836_v0, %v8024_v54 }
 0x232   : > { %12745 = vst [vmem:[#allocation139_spill] sm:$0xff] %v8129_v37  ;;  %12747 = vst [vmem:[#allocation141_spill] sm:$0xff] %v8135_v32  ;;  %v8148_v57 = vmul.f32 0.2, %v8129_v37  ;;  %v8151_v31 = vadd.f32 %v1637_v44, %v8034_v17  ;;  %v1840_v32 = vpop.f32.mrb[11].mxu0 }
 0x233   : > { %12748 = vst [vmem:[#allocation142_spill] sm:$0xff] %v8138_v26  ;;  %12749 = vst [vmem:[#allocation143_spill] sm:$0xff] %v8141_v22  ;;  %v8160_v27 = vmul.f32 0.2, %v8141_v22  ;;  %2126 = vmatmul.mubr.bf16.gmra.mrb[176].mxu1 %v6796_v49  ;;  %v8178_v49 = vadd.f32 %v1838_v43, %v8021_v7  ;;  %v8189_v51 = vmul.f32 0.2, %v8172_v21 }
 0x234   : > { %12750 = vst [vmem:[#allocation144_spill] sm:$0xff] %v8148_v57  ;;  %12751 = vst [vmem:[#allocation145_spill] sm:$0xff] %v8151_v31  ;;  %v8166_v2 = vmul.f32 0.2, %v8151_v31  ;;  %2135 = vmatprep.mubr.bf16.mxu1 %v6797_v8  ;;  %v8183_v8 = vadd.f32 %v1840_v32, %v8024_v54  ;;  %v8192_v0 = vmul.f32 0.2, %v8175_v9 }
 0x235   : > { %12752 = vst [vmem:[#allocation146_spill] sm:$0xff] %v8160_v27  ;;  %12754 = vst [vmem:[#allocation148_spill] sm:$0xff] %v8172_v21  ;;  %v8198_v44 = vmul.f32 0.2, %v8178_v49  ;;  %v1844_v57 = vpop.f32.mrb[12].mxu0 }
 0x236   : > { %12753 = vst [vmem:[#allocation147_spill] sm:$0xff] %v8166_v2  ;;  %12755 = vst [vmem:[#allocation149_spill] sm:$0xff] %v8175_v9  ;;  %v1641_v23 = vpop.f32.mrb[72].mxu1  ;;  %v8201_v32 = vmul.f32 0.2, %v8183_v8  ;;  %v8238_v37 = vadd.f32 %v1844_v57, %v8021_v7 }
 0x237   : > { %12756 = vst [vmem:[#allocation150_spill] sm:$0xff] %v8178_v49  ;;  %12757 = vst [vmem:[#allocation151_spill] sm:$0xff] %v8183_v8  ;;  %v8186_v16 = vadd.f32 %v1641_v23, %v8012_v52  ;;  %v1643_v59 = vpop.f32.mrb[73].mxu1  ;;  %v6798_v26 = vld [vmem:[%s7203_s19 + $0xd0] ss:$8 sps:$4 sm:$0xff]  }
 0x238   : > { %12759 = vst [vmem:[#allocation153_spill] sm:$0xff] %v8189_v51  ;;  %12760 = vst [vmem:[#allocation154_spill] sm:$0xff] %v8192_v0  ;;  %v8195_v43 = vadd.f32 %v1643_v59, %v8034_v17  ;;  %v1645_v40 = vpop.f32.mrb[74].mxu1  ;;  %v1846_v51 = vpop.f32.mrb[13].mxu0  ;;  %v6799_v31 = vld [vmem:[%s7203_s19 + $0xe4] ss:$8 sps:$4 sm:$0xff]  }
 0x239   : > { %12758 = vst [vmem:[#allocation152_spill] sm:$0xff] %v8186_v16  ;;  %12762 = vst [vmem:[#allocation156_spill] sm:$0xff] %v8198_v44  ;;  %v8204_v23 = vmul.f32 0.2, %v8186_v16  ;;  %v8207_v27 = vadd.f32 %v1645_v40, %v8012_v52  ;;  %v1647_v22 = vpop.f32.mrb[75].mxu1  ;;  %v1848_v44 = vpop.f32.mrb[14].mxu0  ;;  %v8241_v49 = vadd.f32 %v1846_v51, %v8024_v54 }
 0x23a   : > { %12761 = vst [vmem:[#allocation155_spill] sm:$0xff] %v8195_v43  ;;  %12763 = vst [vmem:[#allocation157_spill] sm:$0xff] %v8201_v32  ;;  %v8214_v28 = vmul.f32 0.2, %v8195_v43  ;;  %v8217_v2 = vadd.f32 %v1647_v22, %v8034_v17  ;;  %v1850_v32 = vpop.f32.mrb[15].mxu0 }
 0x23b   : > { %12764 = vst [vmem:[#allocation158_spill] sm:$0xff] %v8204_v23  ;;  %12765 = vst [vmem:[#allocation159_spill] sm:$0xff] %v8207_v27  ;;  %v8226_v59 = vmul.f32 0.2, %v8207_v27  ;;  %2136 = vmatmul.mubr.bf16.gmra.mrb[180].mxu1 %v6798_v26  ;;  %v8244_v26 = vadd.f32 %v1848_v44, %v8021_v7  ;;  %v8255_v57 = vmul.f32 0.2, %v8238_v37 }
 0x23c   : > { %12766 = vst [vmem:[#allocation160_spill] sm:$0xff] %v8214_v28  ;;  %12767 = vst [vmem:[#allocation161_spill] sm:$0xff] %v8217_v2  ;;  %v8232_v21 = vmul.f32 0.2, %v8217_v2  ;;  %2145 = vmatprep.mubr.bf16.mxu1 %v6799_v31  ;;  %v8249_v31 = vadd.f32 %v1850_v32, %v8024_v54  ;;  %v8258_v51 = vmul.f32 0.2, %v8241_v49 }
 0x23d   : > { %12768 = vst [vmem:[#allocation162_spill] sm:$0xff] %v8226_v59  ;;  %12770 = vst [vmem:[#allocation164_spill] sm:$0xff] %v8238_v37  ;;  %v8264_v22 = vmul.f32 0.2, %v8244_v26  ;;  %v1854_v28 = vpop.f32.mrb[16].mxu0 }
 0x23e   : > { %12769 = vst [vmem:[#allocation163_spill] sm:$0xff] %v8232_v21  ;;  %12771 = vst [vmem:[#allocation165_spill] sm:$0xff] %v8241_v49  ;;  %v1651_v8 = vpop.f32.mrb[76].mxu1  ;;  %v8267_v32 = vmul.f32 0.2, %v8249_v31  ;;  %v8304_v43 = vadd.f32 %v1854_v28, %v8021_v7 }
 0x23f   : > { %12772 = vst [vmem:[#allocation166_spill] sm:$0xff] %v8244_v26  ;;  %12773 = vst [vmem:[#allocation167_spill] sm:$0xff] %v8249_v31  ;;  %v8252_v0 = vadd.f32 %v1651_v8, %v8012_v52  ;;  %v1653_v40 = vpop.f32.mrb[77].mxu1  ;;  %v6800_v23 = vld [vmem:[%s7203_s19 + $0xe0] ss:$8 sps:$4 sm:$0xff]  }
 0x240   : > { %12775 = vst [vmem:[#allocation169_spill] sm:$0xff] %v8255_v57  ;;  %12776 = vst [vmem:[#allocation170_spill] sm:$0xff] %v8258_v51  ;;  %v8261_v44 = vadd.f32 %v1653_v40, %v8034_v17  ;;  %v1655_v9 = vpop.f32.mrb[78].mxu1  ;;  %v1856_v57 = vpop.f32.mrb[17].mxu0  ;;  %v6801_v2 = vld [vmem:[%s7203_s19 + $0xf4] ss:$8 sps:$4 sm:$0xff]  }
 0x241   : > { %12774 = vst [vmem:[#allocation168_spill] sm:$0xff] %v8252_v0  ;;  %12778 = vst [vmem:[#allocation172_spill] sm:$0xff] %v8264_v22  ;;  %v8270_v8 = vmul.f32 0.2, %v8252_v0  ;;  %v8273_v59 = vadd.f32 %v1655_v9, %v8012_v52  ;;  %v1657_v27 = vpop.f32.mrb[79].mxu1  ;;  %v1858_v22 = vpop.f32.mrb[18].mxu0  ;;  %v8307_v26 = vadd.f32 %v1856_v57, %v8024_v54 }
 0x242   : > { %12777 = vst [vmem:[#allocation171_spill] sm:$0xff] %v8261_v44  ;;  %12779 = vst [vmem:[#allocation173_spill] sm:$0xff] %v8267_v32  ;;  %v8280_v16 = vmul.f32 0.2, %v8261_v44  ;;  %v8283_v21 = vadd.f32 %v1657_v27, %v8034_v17  ;;  %v1860_v32 = vpop.f32.mrb[19].mxu0 }
 0x243   : > { %12780 = vst [vmem:[#allocation174_spill] sm:$0xff] %v8270_v8  ;;  %12781 = vst [vmem:[#allocation175_spill] sm:$0xff] %v8273_v59  ;;  %v8292_v40 = vmul.f32 0.2, %v8273_v59  ;;  %2146 = vmatmul.mubr.bf16.gmra.mrb[184].mxu1 %v6800_v23  ;;  %v8310_v23 = vadd.f32 %v1858_v22, %v8021_v7  ;;  %v8321_v28 = vmul.f32 0.2, %v8304_v43 }
 0x244   : > { %12782 = vst [vmem:[#allocation176_spill] sm:$0xff] %v8280_v16  ;;  %12783 = vst [vmem:[#allocation177_spill] sm:$0xff] %v8283_v21  ;;  %v8298_v37 = vmul.f32 0.2, %v8283_v21  ;;  %2155 = vmatprep.mubr.bf16.mxu1 %v6801_v2  ;;  %v8315_v2 = vadd.f32 %v1860_v32, %v8024_v54  ;;  %v8324_v57 = vmul.f32 0.2, %v8307_v26 }
 0x245   : > { %12784 = vst [vmem:[#allocation178_spill] sm:$0xff] %v8292_v40  ;;  %12786 = vst [vmem:[#allocation180_spill] sm:$0xff] %v8304_v43  ;;  %v8330_v27 = vmul.f32 0.2, %v8310_v23  ;;  %v1864_v16 = vpop.f32.mrb[20].mxu0 }
 0x246   : > { %12785 = vst [vmem:[#allocation179_spill] sm:$0xff] %v8298_v37  ;;  %12787 = vst [vmem:[#allocation181_spill] sm:$0xff] %v8307_v26  ;;  %v1661_v31 = vpop.f32.mrb[80].mxu1  ;;  %v8333_v32 = vmul.f32 0.2, %v8315_v2 }
 0x247   : > { %12788 = vst [vmem:[#allocation182_spill] sm:$0xff] %v8310_v23  ;;  %12789 = vst [vmem:[#allocation183_spill] sm:$0xff] %v8315_v2  ;;  %v8318_v51 = vadd.f32 %v1661_v31, %v8012_v52  ;;  %v1663_v9 = vpop.f32.mrb[81].mxu1 }
 0x248   : > { %12791 = vst [vmem:[#allocation185_spill] sm:$0xff] %v8321_v28  ;;  %12792 = vst [vmem:[#allocation186_spill] sm:$0xff] %v8324_v57  ;;  %v8327_v22 = vadd.f32 %v1663_v9, %v8034_v17  ;;  %v1665_v49 = vpop.f32.mrb[82].mxu1  ;;  %v6802_v9 = vld [vmem:[%s7203_s19 + $0xf0] ss:$8 sps:$4 sm:$0xff]   ;;  %v1866_v28 = vpop.f32.mrb[21].mxu0 }
 0x249   : > { %12790 = vst [vmem:[#allocation184_spill] sm:$0xff] %v8318_v51  ;;  %12794 = vst [vmem:[#allocation188_spill] sm:$0xff] %v8330_v27  ;;  %v8336_v31 = vmul.f32 0.2, %v8318_v51  ;;  %v8339_v40 = vadd.f32 %v1665_v49, %v8012_v52  ;;  %v1667_v59 = vpop.f32.mrb[83].mxu1  ;;  %v1868_v21 = vpop.f32.mrb[22].mxu0  ;;  %v8369_v27 = vadd.f32 %v1864_v16, %v8021_v7  ;;  %v8372_v44 = vadd.f32 %v1866_v28, %v8024_v54 }
 0x24a   : > { %12793 = vst [vmem:[#allocation187_spill] sm:$0xff] %v8327_v22  ;;  %12795 = vst [vmem:[#allocation189_spill] sm:$0xff] %v8333_v32  ;;  %v8346_v0 = vmul.f32 0.2, %v8327_v22  ;;  %v8349_v37 = vadd.f32 %v1667_v59, %v8034_v17  ;;  %v8375_v23 = vadd.f32 %v1868_v21, %v8021_v7 }
 0x24b   : > { %12796 = vst [vmem:[#allocation190_spill] sm:$0xff] %v8336_v31  ;;  %12797 = vst [vmem:[#allocation191_spill] sm:$0xff] %v8339_v40  ;;  %v8358_v8 = vmul.f32 0.2, %v8339_v40  ;;  %2156 = vmatmul.mubr.bf16.gmra.mrb[188].mxu1 %v6802_v9  ;;  %v1870_v9 = vpop.f32.mrb[23].mxu0 }
 0x24c   : > { %12798 = vst [vmem:[#allocation192_spill] sm:$0xff] %v8346_v0  ;;  %12799 = vst [vmem:[#allocation193_spill] sm:$0xff] %v8349_v37  ;;  %v8364_v43 = vmul.f32 0.2, %v8349_v37  ;;  %v8380_v2 = vadd.f32 %v1870_v9, %v8024_v54  ;;  %v8386_v16 = vmul.f32 0.2, %v8369_v27 }
 0x24d   : > { %12800 = vst [vmem:[#allocation194_spill] sm:$0xff] %v8358_v8  ;;  %12802 = vst [vmem:[#allocation196_spill] sm:$0xff] %v8369_v27  ;;  %v8389_v28 = vmul.f32 0.2, %v8372_v44  ;;  %v8395_v59 = vmul.f32 0.2, %v8375_v23 }
 0x24e   : > { %12801 = vst [vmem:[#allocation195_spill] sm:$0xff] %v8364_v43  ;;  %12803 = vst [vmem:[#allocation197_spill] sm:$0xff] %v8372_v44  ;;  %v1671_v32 = vpop.f32.mrb[84].mxu1  ;;  %v8398_v9 = vmul.f32 0.2, %v8380_v2  ;;  %v1874_v0 = vpop.f32.mrb[24].mxu0 }
 0x24f   : > { %12804 = vst [vmem:[#allocation198_spill] sm:$0xff] %v8375_v23  ;;  %12805 = vst [vmem:[#allocation199_spill] sm:$0xff] %v8380_v2  ;;  %v8383_v57 = vadd.f32 %v1671_v32, %v8012_v52  ;;  %v1673_v49 = vpop.f32.mrb[85].mxu1 }
 0x250   : > { %12807 = vst [vmem:[#allocation201_spill] sm:$0xff] %v8386_v16  ;;  %12808 = vst [vmem:[#allocation202_spill] sm:$0xff] %v8389_v28  ;;  %v8392_v21 = vadd.f32 %v1673_v49, %v8034_v17  ;;  %v1675_v26 = vpop.f32.mrb[86].mxu1  ;;  %v1876_v49 = vpop.f32.mrb[25].mxu0 }
 0x251   : > { %12806 = vst [vmem:[#allocation200_spill] sm:$0xff] %v8383_v57  ;;  %12810 = vst [vmem:[#allocation204_spill] sm:$0xff] %v8395_v59  ;;  %v8401_v32 = vmul.f32 0.2, %v8383_v57  ;;  %v8404_v8 = vadd.f32 %v1675_v26, %v8012_v52  ;;  %v1677_v40 = vpop.f32.mrb[87].mxu1  ;;  %v1878_v27 = vpop.f32.mrb[26].mxu0  ;;  %v8433_v26 = vadd.f32 %v1874_v0, %v8021_v7  ;;  %v8436_v59 = vadd.f32 %v1876_v49, %v8024_v54 }
 0x252   : > { %12809 = vst [vmem:[#allocation203_spill] sm:$0xff] %v8392_v21  ;;  %12811 = vst [vmem:[#allocation205_spill] sm:$0xff] %v8398_v9  ;;  %v8411_v51 = vmul.f32 0.2, %v8392_v21  ;;  %v8414_v43 = vadd.f32 %v1677_v40, %v8034_v17  ;;  %v8439_v22 = vadd.f32 %v1878_v27, %v8021_v7  ;;  %v1880_v23 = vpop.f32.mrb[27].mxu0 }
 0x253   : > { %12812 = vst [vmem:[#allocation206_spill] sm:$0xff] %v8401_v32  ;;  %12813 = vst [vmem:[#allocation207_spill] sm:$0xff] %v8404_v8  ;;  %v8423_v31 = vmul.f32 0.2, %v8404_v8  ;;  %v8444_v2 = vadd.f32 %v1880_v23, %v8024_v54  ;;  %v8450_v0 = vmul.f32 0.2, %v8433_v26 }
 0x254   : > { %12814 = vst [vmem:[#allocation208_spill] sm:$0xff] %v8411_v51  ;;  %12815 = vst [vmem:[#allocation209_spill] sm:$0xff] %v8414_v43  ;;  %v8428_v40 = vmul.f32 0.2, %v8414_v43  ;;  %v8453_v49 = vmul.f32 0.2, %v8436_v59 }
 0x255   : > { %12816 = vst [vmem:[#allocation210_spill] sm:$0xff] %v8423_v31  ;;  %12818 = vst [vmem:[#allocation212_spill] sm:$0xff] %v8433_v26  ;;  %v8459_v16 = vmul.f32 0.2, %v8439_v22  ;;  %v8462_v23 = vmul.f32 0.2, %v8444_v2 }
 0x256   : > { %12817 = vst [vmem:[#allocation211_spill] sm:$0xff] %v8428_v40  ;;  %12819 = vst [vmem:[#allocation213_spill] sm:$0xff] %v8436_v59  ;;  %v1681_v9 = vpop.f32.mrb[88].mxu1  ;;  %v1884_v51 = vpop.f32.mrb[28].mxu0 }
 0x257   : > { %12820 = vst [vmem:[#allocation214_spill] sm:$0xff] %v8439_v22  ;;  %12821 = vst [vmem:[#allocation215_spill] sm:$0xff] %v8444_v2  ;;  %v8447_v28 = vadd.f32 %v1681_v9, %v8012_v52  ;;  %v1683_v37 = vpop.f32.mrb[89].mxu1 }
 0x258   : > { %12823 = vst [vmem:[#allocation217_spill] sm:$0xff] %v8450_v0  ;;  %12824 = vst [vmem:[#allocation218_spill] sm:$0xff] %v8453_v49  ;;  %v8456_v27 = vadd.f32 %v1683_v37, %v8034_v17  ;;  %v1685_v44 = vpop.f32.mrb[90].mxu1  ;;  %v1886_v37 = vpop.f32.mrb[29].mxu0 }
 0x259   : > { %12822 = vst [vmem:[#allocation216_spill] sm:$0xff] %v8447_v28  ;;  %12826 = vst [vmem:[#allocation220_spill] sm:$0xff] %v8459_v16  ;;  %v8465_v9 = vmul.f32 0.2, %v8447_v28  ;;  %v8468_v31 = vadd.f32 %v1685_v44, %v8012_v52  ;;  %v1687_v8 = vpop.f32.mrb[91].mxu1  ;;  %v1888_v26 = vpop.f32.mrb[30].mxu0  ;;  %v8497_v44 = vadd.f32 %v1884_v51, %v8021_v7  ;;  %v8500_v16 = vadd.f32 %v1886_v37, %v8024_v54 }
 0x25a   : > { %12825 = vst [vmem:[#allocation219_spill] sm:$0xff] %v8456_v27  ;;  %12827 = vst [vmem:[#allocation221_spill] sm:$0xff] %v8462_v23  ;;  %v8475_v57 = vmul.f32 0.2, %v8456_v27  ;;  %v8478_v40 = vadd.f32 %v1687_v8, %v8034_v17  ;;  %v8503_v21 = vadd.f32 %v1888_v26, %v8021_v7  ;;  %v1890_v22 = vpop.f32.mrb[31].mxu0 }
 0x25b   : > { %12828 = vst [vmem:[#allocation222_spill] sm:$0xff] %v8465_v9  ;;  %12829 = vst [vmem:[#allocation223_spill] sm:$0xff] %v8468_v31  ;;  %v8487_v32 = vmul.f32 0.2, %v8468_v31  ;;  %v8508_v2 = vadd.f32 %v1890_v22, %v8024_v54  ;;  %v8514_v51 = vmul.f32 0.2, %v8497_v44 }
 0x25c   : > { %12830 = vst [vmem:[#allocation224_spill] sm:$0xff] %v8475_v57  ;;  %12831 = vst [vmem:[#allocation225_spill] sm:$0xff] %v8478_v40  ;;  %v8492_v8 = vmul.f32 0.2, %v8478_v40  ;;  %v8517_v37 = vmul.f32 0.2, %v8500_v16 }
 0x25d   : > { %12832 = vst [vmem:[#allocation226_spill] sm:$0xff] %v8487_v32  ;;  %12834 = vst [vmem:[#allocation228_spill] sm:$0xff] %v8497_v44  ;;  %v8523_v0 = vmul.f32 0.2, %v8503_v21  ;;  %v8526_v22 = vmul.f32 0.2, %v8508_v2 }
 0x25e   : > { %12833 = vst [vmem:[#allocation227_spill] sm:$0xff] %v8492_v8  ;;  %12835 = vst [vmem:[#allocation229_spill] sm:$0xff] %v8500_v16  ;;  %v1691_v23 = vpop.f32.mrb[92].mxu1  ;;  %v1894_v57 = vpop.f32.mrb[32].mxu0 }
 0x25f   : > { %12836 = vst [vmem:[#allocation230_spill] sm:$0xff] %v8503_v21  ;;  %12837 = vst [vmem:[#allocation231_spill] sm:$0xff] %v8508_v2  ;;  %v8511_v49 = vadd.f32 %v1691_v23, %v8012_v52  ;;  %v1693_v43 = vpop.f32.mrb[93].mxu1 }
 0x260   : > { %12839 = vst [vmem:[#allocation233_spill] sm:$0xff] %v8514_v51  ;;  %12840 = vst [vmem:[#allocation234_spill] sm:$0xff] %v8517_v37  ;;  %v8520_v26 = vadd.f32 %v1693_v43, %v8034_v17  ;;  %v1695_v59 = vpop.f32.mrb[94].mxu1  ;;  %v1896_v43 = vpop.f32.mrb[33].mxu0 }
 0x261   : > { %12838 = vst [vmem:[#allocation232_spill] sm:$0xff] %v8511_v49  ;;  %12842 = vst [vmem:[#allocation236_spill] sm:$0xff] %v8523_v0  ;;  %v8529_v23 = vmul.f32 0.2, %v8511_v49  ;;  %v8532_v32 = vadd.f32 %v1695_v59, %v8012_v52  ;;  %v1697_v31 = vpop.f32.mrb[95].mxu1  ;;  %v1898_v44 = vpop.f32.mrb[34].mxu0  ;;  %v8561_v59 = vadd.f32 %v1894_v57, %v8021_v7  ;;  %v8564_v0 = vadd.f32 %v1896_v43, %v8024_v54 }
 0x262   : > { %12841 = vst [vmem:[#allocation235_spill] sm:$0xff] %v8520_v26  ;;  %12843 = vst [vmem:[#allocation237_spill] sm:$0xff] %v8526_v22  ;;  %v8539_v28 = vmul.f32 0.2, %v8520_v26  ;;  %v8542_v8 = vadd.f32 %v1697_v31, %v8034_v17  ;;  %v8567_v27 = vadd.f32 %v1898_v44, %v8021_v7  ;;  %v1900_v21 = vpop.f32.mrb[35].mxu0 }
 0x263   : > { %12844 = vst [vmem:[#allocation238_spill] sm:$0xff] %v8529_v23  ;;  %12845 = vst [vmem:[#allocation239_spill] sm:$0xff] %v8532_v32  ;;  %v8551_v9 = vmul.f32 0.2, %v8532_v32  ;;  %v8572_v2 = vadd.f32 %v1900_v21, %v8024_v54  ;;  %v8578_v57 = vmul.f32 0.2, %v8561_v59 }
 0x264   : > { %12846 = vst [vmem:[#allocation240_spill] sm:$0xff] %v8539_v28  ;;  %12847 = vst [vmem:[#allocation241_spill] sm:$0xff] %v8542_v8  ;;  %v8556_v31 = vmul.f32 0.2, %v8542_v8  ;;  %v8581_v43 = vmul.f32 0.2, %v8564_v0 }
 0x265   : > { %12848 = vst [vmem:[#allocation242_spill] sm:$0xff] %v8551_v9  ;;  %12850 = vst [vmem:[#allocation244_spill] sm:$0xff] %v8561_v59  ;;  %v8587_v51 = vmul.f32 0.2, %v8567_v27  ;;  %v8590_v21 = vmul.f32 0.2, %v8572_v2 }
 0x266   : > { %12849 = vst [vmem:[#allocation243_spill] sm:$0xff] %v8556_v31  ;;  %12851 = vst [vmem:[#allocation245_spill] sm:$0xff] %v8564_v0  ;;  %v1701_v22 = vpop.f32.mrb[96].mxu1  ;;  %v1904_v28 = vpop.f32.mrb[36].mxu0 }
 0x267   : > { %12852 = vst [vmem:[#allocation246_spill] sm:$0xff] %v8567_v27  ;;  %12853 = vst [vmem:[#allocation247_spill] sm:$0xff] %v8572_v2  ;;  %v8575_v37 = vadd.f32 %v1701_v22, %v8012_v52  ;;  %v1703_v40 = vpop.f32.mrb[97].mxu1 }
 0x268   : > { %12855 = vst [vmem:[#allocation249_spill] sm:$0xff] %v8578_v57  ;;  %12856 = vst [vmem:[#allocation250_spill] sm:$0xff] %v8581_v43  ;;  %v8584_v44 = vadd.f32 %v1703_v40, %v8034_v17  ;;  %v1705_v16 = vpop.f32.mrb[98].mxu1  ;;  %v1906_v40 = vpop.f32.mrb[37].mxu0 }
 0x269   : > { %12854 = vst [vmem:[#allocation248_spill] sm:$0xff] %v8575_v37  ;;  %12858 = vst [vmem:[#allocation252_spill] sm:$0xff] %v8587_v51  ;;  %v8593_v22 = vmul.f32 0.2, %v8575_v37  ;;  %v8596_v9 = vadd.f32 %v1705_v16, %v8012_v52  ;;  %v1707_v32 = vpop.f32.mrb[99].mxu1  ;;  %v1908_v59 = vpop.f32.mrb[38].mxu0  ;;  %v8625_v16 = vadd.f32 %v1904_v28, %v8021_v7  ;;  %v8628_v51 = vadd.f32 %v1906_v40, %v8024_v54 }
 0x26a   : > { %12857 = vst [vmem:[#allocation251_spill] sm:$0xff] %v8584_v44  ;;  %12859 = vst [vmem:[#allocation253_spill] sm:$0xff] %v8590_v21  ;;  %v8603_v49 = vmul.f32 0.2, %v8584_v44  ;;  %v8606_v31 = vadd.f32 %v1707_v32, %v8034_v17  ;;  %v8631_v26 = vadd.f32 %v1908_v59, %v8021_v7  ;;  %v1910_v27 = vpop.f32.mrb[39].mxu0 }
 0x26b   : > { %12860 = vst [vmem:[#allocation254_spill] sm:$0xff] %v8593_v22  ;;  %12861 = vst [vmem:[#allocation255_spill] sm:$0xff] %v8596_v9  ;;  %v8615_v23 = vmul.f32 0.2, %v8596_v9  ;;  %v8636_v2 = vadd.f32 %v1910_v27, %v8024_v54  ;;  %v8642_v28 = vmul.f32 0.2, %v8625_v16 }
 0x26c   : > { %12862 = vst [vmem:[#allocation256_spill] sm:$0xff] %v8603_v49  ;;  %12863 = vst [vmem:[#allocation257_spill] sm:$0xff] %v8606_v31  ;;  %v8620_v32 = vmul.f32 0.2, %v8606_v31  ;;  %v8645_v40 = vmul.f32 0.2, %v8628_v51 }
 0x26d   : > { %12864 = vst [vmem:[#allocation258_spill] sm:$0xff] %v8615_v23  ;;  %12866 = vst [vmem:[#allocation260_spill] sm:$0xff] %v8625_v16  ;;  %v8651_v57 = vmul.f32 0.2, %v8631_v26  ;;  %v8654_v27 = vmul.f32 0.2, %v8636_v2 }
 0x26e   : > { %12865 = vst [vmem:[#allocation259_spill] sm:$0xff] %v8620_v32  ;;  %12867 = vst [vmem:[#allocation261_spill] sm:$0xff] %v8628_v51  ;;  %v1711_v21 = vpop.f32.mrb[100].mxu1  ;;  %v1914_v49 = vpop.f32.mrb[40].mxu0 }
 0x26f   : > { %12868 = vst [vmem:[#allocation262_spill] sm:$0xff] %v8631_v26  ;;  %12869 = vst [vmem:[#allocation263_spill] sm:$0xff] %v8636_v2  ;;  %v8639_v43 = vadd.f32 %v1711_v21, %v8012_v52  ;;  %v1713_v8 = vpop.f32.mrb[101].mxu1 }
 0x270   : > { %12871 = vst [vmem:[#allocation265_spill] sm:$0xff] %v8642_v28  ;;  %12872 = vst [vmem:[#allocation266_spill] sm:$0xff] %v8645_v40  ;;  %v8648_v59 = vadd.f32 %v1713_v8, %v8034_v17  ;;  %v1715_v0 = vpop.f32.mrb[102].mxu1  ;;  %v1916_v8 = vpop.f32.mrb[41].mxu0 }
 0x271   : > { %12870 = vst [vmem:[#allocation264_spill] sm:$0xff] %v8639_v43  ;;  %12874 = vst [vmem:[#allocation268_spill] sm:$0xff] %v8651_v57  ;;  %v8657_v21 = vmul.f32 0.2, %v8639_v43  ;;  %v8660_v23 = vadd.f32 %v1715_v0, %v8012_v52  ;;  %v1717_v9 = vpop.f32.mrb[103].mxu1  ;;  %v1918_v16 = vpop.f32.mrb[42].mxu0  ;;  %v8689_v0 = vadd.f32 %v1914_v49, %v8021_v7  ;;  %v8692_v57 = vadd.f32 %v1916_v8, %v8024_v54 }
 0x272   : > { %12873 = vst [vmem:[#allocation267_spill] sm:$0xff] %v8648_v59  ;;  %12875 = vst [vmem:[#allocation269_spill] sm:$0xff] %v8654_v27  ;;  %v8667_v37 = vmul.f32 0.2, %v8648_v59  ;;  %v8670_v32 = vadd.f32 %v1717_v9, %v8034_v17  ;;  %v8695_v44 = vadd.f32 %v1918_v16, %v8021_v7  ;;  %v1920_v26 = vpop.f32.mrb[43].mxu0 }
 0x273   : > { %12876 = vst [vmem:[#allocation270_spill] sm:$0xff] %v8657_v21  ;;  %12877 = vst [vmem:[#allocation271_spill] sm:$0xff] %v8660_v23  ;;  %v8679_v22 = vmul.f32 0.2, %v8660_v23  ;;  %v8700_v2 = vadd.f32 %v1920_v26, %v8024_v54  ;;  %v8706_v49 = vmul.f32 0.2, %v8689_v0 }
 0x274   : > { %12878 = vst [vmem:[#allocation272_spill] sm:$0xff] %v8667_v37  ;;  %12879 = vst [vmem:[#allocation273_spill] sm:$0xff] %v8670_v32  ;;  %v8684_v9 = vmul.f32 0.2, %v8670_v32  ;;  %v8709_v8 = vmul.f32 0.2, %v8692_v57 }
 0x275   : > { %12880 = vst [vmem:[#allocation274_spill] sm:$0xff] %v8679_v22  ;;  %12882 = vst [vmem:[#allocation276_spill] sm:$0xff] %v8689_v0  ;;  %v8715_v28 = vmul.f32 0.2, %v8695_v44  ;;  %v8718_v26 = vmul.f32 0.2, %v8700_v2 }
 0x276   : > { %12881 = vst [vmem:[#allocation275_spill] sm:$0xff] %v8684_v9  ;;  %12883 = vst [vmem:[#allocation277_spill] sm:$0xff] %v8692_v57  ;;  %v1721_v27 = vpop.f32.mrb[104].mxu1  ;;  %v1924_v37 = vpop.f32.mrb[44].mxu0 }
 0x277   : > { %12884 = vst [vmem:[#allocation278_spill] sm:$0xff] %v8695_v44  ;;  %12885 = vst [vmem:[#allocation279_spill] sm:$0xff] %v8700_v2  ;;  %v8703_v40 = vadd.f32 %v1721_v27, %v8012_v52  ;;  %v1723_v31 = vpop.f32.mrb[105].mxu1 }
 0x278   : > { %12887 = vst [vmem:[#allocation281_spill] sm:$0xff] %v8706_v49  ;;  %12888 = vst [vmem:[#allocation282_spill] sm:$0xff] %v8709_v8  ;;  %v8712_v16 = vadd.f32 %v1723_v31, %v8034_v17  ;;  %v1725_v51 = vpop.f32.mrb[106].mxu1  ;;  %v1926_v31 = vpop.f32.mrb[45].mxu0 }
 0x279   : > { %12886 = vst [vmem:[#allocation280_spill] sm:$0xff] %v8703_v40  ;;  %12890 = vst [vmem:[#allocation284_spill] sm:$0xff] %v8715_v28  ;;  %v8721_v27 = vmul.f32 0.2, %v8703_v40  ;;  %v8724_v22 = vadd.f32 %v1725_v51, %v8012_v52  ;;  %v1727_v23 = vpop.f32.mrb[107].mxu1  ;;  %v1928_v0 = vpop.f32.mrb[46].mxu0  ;;  %v8753_v51 = vadd.f32 %v1924_v37, %v8021_v7  ;;  %v8756_v28 = vadd.f32 %v1926_v31, %v8024_v54 }
 0x27a   : > { %12889 = vst [vmem:[#allocation283_spill] sm:$0xff] %v8712_v16  ;;  %12891 = vst [vmem:[#allocation285_spill] sm:$0xff] %v8718_v26  ;;  %v8731_v43 = vmul.f32 0.2, %v8712_v16  ;;  %v8734_v9 = vadd.f32 %v1727_v23, %v8034_v17  ;;  %v8759_v59 = vadd.f32 %v1928_v0, %v8021_v7  ;;  %v1930_v44 = vpop.f32.mrb[47].mxu0 }
 0x27b   : > { %12892 = vst [vmem:[#allocation286_spill] sm:$0xff] %v8721_v27  ;;  %12893 = vst [vmem:[#allocation287_spill] sm:$0xff] %v8724_v22  ;;  %v8743_v21 = vmul.f32 0.2, %v8724_v22  ;;  %v8764_v2 = vadd.f32 %v1930_v44, %v8024_v54  ;;  %v8770_v37 = vmul.f32 0.2, %v8753_v51 }
 0x27c   : > { %12894 = vst [vmem:[#allocation288_spill] sm:$0xff] %v8731_v43  ;;  %12895 = vst [vmem:[#allocation289_spill] sm:$0xff] %v8734_v9  ;;  %v8748_v23 = vmul.f32 0.2, %v8734_v9  ;;  %v8773_v31 = vmul.f32 0.2, %v8756_v28 }
 0x27d   : > { %12896 = vst [vmem:[#allocation290_spill] sm:$0xff] %v8743_v21  ;;  %12898 = vst [vmem:[#allocation292_spill] sm:$0xff] %v8753_v51  ;;  %v8779_v49 = vmul.f32 0.2, %v8759_v59  ;;  %v8782_v44 = vmul.f32 0.2, %v8764_v2 }
 0x27e   : > { %12897 = vst [vmem:[#allocation291_spill] sm:$0xff] %v8748_v23  ;;  %12899 = vst [vmem:[#allocation293_spill] sm:$0xff] %v8756_v28  ;;  %v1731_v26 = vpop.f32.mrb[108].mxu1  ;;  %v1934_v43 = vpop.f32.mrb[48].mxu0 }
 0x27f   : > { %12900 = vst [vmem:[#allocation294_spill] sm:$0xff] %v8759_v59  ;;  %12901 = vst [vmem:[#allocation295_spill] sm:$0xff] %v8764_v2  ;;  %v8767_v8 = vadd.f32 %v1731_v26, %v8012_v52  ;;  %v1733_v32 = vpop.f32.mrb[109].mxu1 }
 0x280   : > { %12903 = vst [vmem:[#allocation297_spill] sm:$0xff] %v8770_v37  ;;  %12904 = vst [vmem:[#allocation298_spill] sm:$0xff] %v8773_v31  ;;  %v8776_v0 = vadd.f32 %v1733_v32, %v8034_v17  ;;  %v1735_v57 = vpop.f32.mrb[110].mxu1  ;;  %v1936_v32 = vpop.f32.mrb[49].mxu0 }
 0x281   : > { %12902 = vst [vmem:[#allocation296_spill] sm:$0xff] %v8767_v8  ;;  %12906 = vst [vmem:[#allocation300_spill] sm:$0xff] %v8779_v49  ;;  %v8785_v26 = vmul.f32 0.2, %v8767_v8  ;;  %v8788_v21 = vadd.f32 %v1735_v57, %v8012_v52  ;;  %v1737_v22 = vpop.f32.mrb[111].mxu1  ;;  %v1938_v51 = vpop.f32.mrb[50].mxu0  ;;  %v8817_v57 = vadd.f32 %v1934_v43, %v8021_v7  ;;  %v8820_v49 = vadd.f32 %v1936_v32, %v8024_v54 }
 0x282   : > { %12905 = vst [vmem:[#allocation299_spill] sm:$0xff] %v8776_v0  ;;  %12907 = vst [vmem:[#allocation301_spill] sm:$0xff] %v8782_v44  ;;  %v8795_v40 = vmul.f32 0.2, %v8776_v0  ;;  %v8798_v23 = vadd.f32 %v1737_v22, %v8034_v17  ;;  %v8823_v16 = vadd.f32 %v1938_v51, %v8021_v7  ;;  %v1940_v59 = vpop.f32.mrb[51].mxu0 }
 0x283   : > { %12908 = vst [vmem:[#allocation302_spill] sm:$0xff] %v8785_v26  ;;  %12909 = vst [vmem:[#allocation303_spill] sm:$0xff] %v8788_v21  ;;  %v8807_v27 = vmul.f32 0.2, %v8788_v21  ;;  %v8828_v2 = vadd.f32 %v1940_v59, %v8024_v54  ;;  %v8834_v43 = vmul.f32 0.2, %v8817_v57 }
 0x284   : > { %12910 = vst [vmem:[#allocation304_spill] sm:$0xff] %v8795_v40  ;;  %12911 = vst [vmem:[#allocation305_spill] sm:$0xff] %v8798_v23  ;;  %v8812_v22 = vmul.f32 0.2, %v8798_v23  ;;  %v8837_v32 = vmul.f32 0.2, %v8820_v49 }
 0x285   : > { %12912 = vst [vmem:[#allocation306_spill] sm:$0xff] %v8807_v27  ;;  %12914 = vst [vmem:[#allocation308_spill] sm:$0xff] %v8817_v57  ;;  %v8843_v37 = vmul.f32 0.2, %v8823_v16  ;;  %v8846_v59 = vmul.f32 0.2, %v8828_v2 }
 0x286   : > { %12913 = vst [vmem:[#allocation307_spill] sm:$0xff] %v8812_v22  ;;  %12915 = vst [vmem:[#allocation309_spill] sm:$0xff] %v8820_v49  ;;  %v1741_v44 = vpop.f32.mrb[112].mxu1  ;;  %v1944_v40 = vpop.f32.mrb[52].mxu0 }
 0x287   : > { %12916 = vst [vmem:[#allocation310_spill] sm:$0xff] %v8823_v16  ;;  %12917 = vst [vmem:[#allocation311_spill] sm:$0xff] %v8828_v2  ;;  %v8831_v31 = vadd.f32 %v1741_v44, %v8012_v52  ;;  %v1743_v9 = vpop.f32.mrb[113].mxu1 }
 0x288   : > { %12919 = vst [vmem:[#allocation313_spill] sm:$0xff] %v8834_v43  ;;  %12920 = vst [vmem:[#allocation314_spill] sm:$0xff] %v8837_v32  ;;  %v8840_v51 = vadd.f32 %v1743_v9, %v8034_v17  ;;  %v1745_v28 = vpop.f32.mrb[114].mxu1  ;;  %v1946_v9 = vpop.f32.mrb[53].mxu0 }
 0x289   : > { %12918 = vst [vmem:[#allocation312_spill] sm:$0xff] %v8831_v31  ;;  %12922 = vst [vmem:[#allocation316_spill] sm:$0xff] %v8843_v37  ;;  %v8849_v44 = vmul.f32 0.2, %v8831_v31  ;;  %v8852_v27 = vadd.f32 %v1745_v28, %v8012_v52  ;;  %v1747_v21 = vpop.f32.mrb[115].mxu1  ;;  %v1948_v57 = vpop.f32.mrb[54].mxu0  ;;  %v8881_v28 = vadd.f32 %v1944_v40, %v8021_v7  ;;  %v8884_v37 = vadd.f32 %v1946_v9, %v8024_v54 }
 0x28a   : > { %12921 = vst [vmem:[#allocation315_spill] sm:$0xff] %v8840_v51  ;;  %12923 = vst [vmem:[#allocation317_spill] sm:$0xff] %v8846_v59  ;;  %v8859_v8 = vmul.f32 0.2, %v8840_v51  ;;  %v8862_v22 = vadd.f32 %v1747_v21, %v8034_v17  ;;  %v8887_v0 = vadd.f32 %v1948_v57, %v8021_v7  ;;  %v1950_v16 = vpop.f32.mrb[55].mxu0 }
 0x28b   : > { %12924 = vst [vmem:[#allocation318_spill] sm:$0xff] %v8849_v44  ;;  %12925 = vst [vmem:[#allocation319_spill] sm:$0xff] %v8852_v27  ;;  %v8871_v26 = vmul.f32 0.2, %v8852_v27  ;;  %v8892_v2 = vadd.f32 %v1950_v16, %v8024_v54  ;;  %v8898_v40 = vmul.f32 0.2, %v8881_v28 }
 0x28c   : > { %12926 = vst [vmem:[#allocation320_spill] sm:$0xff] %v8859_v8  ;;  %12927 = vst [vmem:[#allocation321_spill] sm:$0xff] %v8862_v22  ;;  %v8876_v21 = vmul.f32 0.2, %v8862_v22  ;;  %v8901_v9 = vmul.f32 0.2, %v8884_v37 }
 0x28d   : > { %12928 = vst [vmem:[#allocation322_spill] sm:$0xff] %v8871_v26  ;;  %12930 = vst [vmem:[#allocation324_spill] sm:$0xff] %v8881_v28  ;;  %v8907_v43 = vmul.f32 0.2, %v8887_v0  ;;  %v8910_v16 = vmul.f32 0.2, %v8892_v2 }
 0x28e   : > { %12929 = vst [vmem:[#allocation323_spill] sm:$0xff] %v8876_v21  ;;  %12931 = vst [vmem:[#allocation325_spill] sm:$0xff] %v8884_v37  ;;  %v1751_v59 = vpop.f32.mrb[116].mxu1  ;;  %v1954_v8 = vpop.f32.mrb[56].mxu0 }
 0x28f   : > { %12932 = vst [vmem:[#allocation326_spill] sm:$0xff] %v8887_v0  ;;  %12933 = vst [vmem:[#allocation327_spill] sm:$0xff] %v8892_v2  ;;  %v8895_v32 = vadd.f32 %v1751_v59, %v8012_v52  ;;  %v1753_v23 = vpop.f32.mrb[117].mxu1 }
 0x290   : > { %12935 = vst [vmem:[#allocation329_spill] sm:$0xff] %v8898_v40  ;;  %12936 = vst [vmem:[#allocation330_spill] sm:$0xff] %v8901_v9  ;;  %v8904_v57 = vadd.f32 %v1753_v23, %v8034_v17  ;;  %v1755_v49 = vpop.f32.mrb[118].mxu1  ;;  %v1956_v23 = vpop.f32.mrb[57].mxu0 }
 0x291   : > { %12934 = vst [vmem:[#allocation328_spill] sm:$0xff] %v8895_v32  ;;  %12938 = vst [vmem:[#allocation332_spill] sm:$0xff] %v8907_v43  ;;  %v8913_v59 = vmul.f32 0.2, %v8895_v32  ;;  %v8916_v26 = vadd.f32 %v1755_v49, %v8012_v52  ;;  %v1757_v27 = vpop.f32.mrb[119].mxu1  ;;  %v1958_v28 = vpop.f32.mrb[58].mxu0  ;;  %v8945_v49 = vadd.f32 %v1954_v8, %v8021_v7  ;;  %v8948_v43 = vadd.f32 %v1956_v23, %v8024_v54 }
 0x292   : > { %12937 = vst [vmem:[#allocation331_spill] sm:$0xff] %v8904_v57  ;;  %12939 = vst [vmem:[#allocation333_spill] sm:$0xff] %v8910_v16  ;;  %v8923_v31 = vmul.f32 0.2, %v8904_v57  ;;  %v8926_v21 = vadd.f32 %v1757_v27, %v8034_v17  ;;  %v8951_v51 = vadd.f32 %v1958_v28, %v8021_v7  ;;  %v1960_v0 = vpop.f32.mrb[59].mxu0 }
 0x293   : > { %12940 = vst [vmem:[#allocation334_spill] sm:$0xff] %v8913_v59  ;;  %12941 = vst [vmem:[#allocation335_spill] sm:$0xff] %v8916_v26  ;;  %v8935_v44 = vmul.f32 0.2, %v8916_v26  ;;  %v8956_v2 = vadd.f32 %v1960_v0, %v8024_v54  ;;  %v8962_v8 = vmul.f32 0.2, %v8945_v49 }
 0x294   : > { %12942 = vst [vmem:[#allocation336_spill] sm:$0xff] %v8923_v31  ;;  %12943 = vst [vmem:[#allocation337_spill] sm:$0xff] %v8926_v21  ;;  %v8940_v27 = vmul.f32 0.2, %v8926_v21  ;;  %v8965_v23 = vmul.f32 0.2, %v8948_v43 }
 0x295   : > { %12944 = vst [vmem:[#allocation338_spill] sm:$0xff] %v8935_v44  ;;  %12946 = vst [vmem:[#allocation340_spill] sm:$0xff] %v8945_v49  ;;  %v8971_v40 = vmul.f32 0.2, %v8951_v51  ;;  %v8974_v0 = vmul.f32 0.2, %v8956_v2 }
 0x296   : > { %12945 = vst [vmem:[#allocation339_spill] sm:$0xff] %v8940_v27  ;;  %12947 = vst [vmem:[#allocation341_spill] sm:$0xff] %v8948_v43  ;;  %v1761_v16 = vpop.f32.mrb[120].mxu1  ;;  %v1964_v31 = vpop.f32.mrb[60].mxu0  ;;  %v584_v43 = vsub.s32 7, %v7442_v25 }
 0x297   : > { %12948 = vst [vmem:[#allocation342_spill] sm:$0xff] %v8951_v51  ;;  %12949 = vst [vmem:[#allocation343_spill] sm:$0xff] %v8956_v2  ;;  %v8959_v9 = vadd.f32 %v1761_v16, %v8012_v52  ;;  %v1763_v22 = vpop.f32.mrb[121].mxu1 }
 0x298   : > { %12951 = vst [vmem:[#allocation345_spill] sm:$0xff] %v8962_v8  ;;  %12952 = vst [vmem:[#allocation346_spill] sm:$0xff] %v8965_v23  ;;  %v8968_v28 = vadd.f32 %v1763_v22, %v8034_v17  ;;  %v1765_v37 = vpop.f32.mrb[122].mxu1  ;;  %v1966_v22 = vpop.f32.mrb[61].mxu0 }
 0x299   : > { %12950 = vst [vmem:[#allocation344_spill] sm:$0xff] %v8959_v9  ;;  %12953 = vst [vmem:[#allocation347_spill] sm:$0xff] %v8971_v40  ;;  %v8977_v16 = vmul.f32 0.2, %v8959_v9  ;;  %v8980_v44 = vadd.f32 %v1765_v37, %v8012_v52  ;;  %v1767_v26 = vpop.f32.mrb[123].mxu1  ;;  %v1968_v49 = vpop.f32.mrb[62].mxu0  ;;  %v9009_v37 = vadd.f32 %v1964_v31, %v8021_v7  ;;  %v9012_v40 = vadd.f32 %v1966_v22, %v8024_v54 }
 0x29a   : > { %12954 = vst [vmem:[#allocation348_spill] sm:$0xff] %v8974_v0  ;;  %v8987_v32 = vmul.f32 0.2, %v8968_v28  ;;  %v8990_v27 = vadd.f32 %v1767_v26, %v8034_v17  ;;  %v9015_v57 = vadd.f32 %v1968_v49, %v8021_v7  ;;  %v1970_v51 = vpop.f32.mrb[63].mxu0  ;;  %v580_v31 = vsub.s32 6, %v7442_v25 }
 0x29b   : > { %12955 = vst [vmem:[#allocation349_spill] sm:$0xff] %v8977_v16  ;;  %12956 = vst [vmem:[#allocation350_spill] sm:$0xff] %v8980_v44  ;;  %v8999_v59 = vmul.f32 0.2, %v8980_v44  ;;  %v9020_v2 = vadd.f32 %v1970_v51, %v8024_v54  ;;  %v9027_v22 = vmul.f32 0.2, %v9009_v37 }
 0x29c   : > { %v9004_v26 = vmul.f32 0.2, %v8990_v27  ;;  %12959 = vst [vmem:[#allocation353_spill] sm:$0xff] %v9009_v37  ;;  %12960 = vst [vmem:[#allocation354_spill] sm:$0xff] %v9012_v40  ;;  %v9030_v7 = vmul.f32 0.2, %v9012_v40 }
 0x29d   : > { %12957 = vst [vmem:[#allocation351_spill] sm:$0xff] %v8999_v59  ;;  %12961 = vst [vmem:[#allocation355_spill] sm:$0xff] %v9015_v57  ;;  %v9037_v54 = vmul.f32 0.2, %v9015_v57  ;;  %v9040_v51 = vmul.f32 0.2, %v9020_v2 }
 0x29e   : > { %12958 = vst [vmem:[#allocation352_spill] sm:$0xff] %v9004_v26  ;;  %v1771_v0 = vpop.f32.mrb[124].mxu1  ;;  %12962 = vst [vmem:[#allocation356_spill] sm:$0xff] %v9020_v2  ;;  %v6803_v16 = vld [vmem:[%s11918_s2] sm:$0xff] }
 0x29f   : > { %v9023_v23 = vadd.f32 %v1771_v0, %v8012_v52  ;;  %v1773_v21 = vpop.f32.mrb[125].mxu1  ;;  %12963 = vst [vmem:[#allocation357_spill] sm:$0xff] %v9027_v22  ;;  %12964 = vst [vmem:[#allocation358_spill] sm:$0xff] %v9030_v7  ;;  %v9070_v22 = vrot.slane %v6803_v16, %v580_v31  ;;  %v9077_v26 = vrot.slane %v6803_v16, %v584_v43 }
 0x2a0   : > { %v9033_v49 = vadd.f32 %v1773_v21, %v8034_v17  ;;  %v1775_v8 = vpop.f32.mrb[126].mxu1  ;;  %12965 = vst [vmem:[#allocation359_spill] sm:$0xff] %v9037_v54  ;;  %12966 = vst [vmem:[#allocation360_spill] sm:$0xff] %v9040_v51 }
 0x2a1   : > { %v9043_v0 = vmul.f32 0.2, %v9023_v23  ;;  %v9046_v59 = vadd.f32 %v1775_v8, %v8012_v52  ;;  %v1777_v44 = vpop.f32.mrb[127].mxu1 }
 0x2a2   : > { %v9053_v25 = vmul.f32 0.2, %v9033_v49  ;;  %v9056_v9 = vadd.f32 %v1777_v44, %v8034_v17 }
 0x2a3   : > { %v9065_v21 = vmul.f32 0.2, %v9046_v59 }
 0x2a4   : > { %v9075_v44 = vmul.f32 0.2, %v9056_v9 }
 0x2a5   : > { %12967 = vst [vmem:[#allocation361_spill] sm:$0xff] %v9065_v21 }
 0x2a6   : > { %v2007_v54 = vpop.f32.mrb[128].mxu1 }
 0x2a7   : > { %v9084_v57 = vadd.f32 %v2007_v54, %v9070_v22  ;;  %v2009_v31 = vpop.f32.mrb[129].mxu1 }
 0x2a8   : > { %v9087_v37 = vadd.f32 %v2009_v31, %v9077_v26  ;;  %v2011_v17 = vpop.f32.mrb[130].mxu1 }
 0x2a9   : > { %12968 = vst [vmem:[#allocation362_spill] sm:$0xff] %v9084_v57  ;;  %v9090_v51 = vmul.f32 0.2, %v9084_v57  ;;  %v9093_v43 = vadd.f32 %v2011_v17, %v9070_v22  ;;  %v2013_v16 = vpop.f32.mrb[131].mxu1 }
 0x2aa   : > { %12969 = vst [vmem:[#allocation363_spill] sm:$0xff] %v9087_v37  ;;  %v9096_v52 = vmul.f32 0.2, %v9087_v37  ;;  %v9099_v8 = vadd.f32 %v2013_v16, %v9077_v26 }
 0x2ab   : > { %12970 = vst [vmem:[#allocation364_spill] sm:$0xff] %v9090_v51  ;;  %12971 = vst [vmem:[#allocation365_spill] sm:$0xff] %v9093_v43  ;;  %v9104_v31 = vmul.f32 0.2, %v9093_v43 }
 0x2ac   : > { %12972 = vst [vmem:[#allocation366_spill] sm:$0xff] %v9096_v52  ;;  %12973 = vst [vmem:[#allocation367_spill] sm:$0xff] %v9099_v8  ;;  %v9109_v7 = vmul.f32 0.2, %v9099_v8 }
 0x2ad   : > { %12974 = vst [vmem:[#allocation368_spill] sm:$0xff] %v9104_v31 }
 0x2ae   : > { %12975 = vst [vmem:[#allocation369_spill] sm:$0xff] %v9109_v7  ;;  %v2017_v16 = vpop.f32.mrb[132].mxu1 }
 0x2af   : > { %v9116_v21 = vadd.f32 %v2017_v16, %v9070_v22  ;;  %v2019_v54 = vpop.f32.mrb[133].mxu1 }
 0x2b0   : > { %v9119_v51 = vadd.f32 %v2019_v54, %v9077_v26  ;;  %v2021_v57 = vpop.f32.mrb[134].mxu1 }
 0x2b1   : > { %12976 = vst [vmem:[#allocation370_spill] sm:$0xff] %v9116_v21  ;;  %v9122_v2 = vmul.f32 0.2, %v9116_v21  ;;  %v9125_v52 = vadd.f32 %v2021_v57, %v9070_v22  ;;  %v2023_v37 = vpop.f32.mrb[135].mxu1 }
 0x2b2   : > { %12977 = vst [vmem:[#allocation371_spill] sm:$0xff] %v9119_v51  ;;  %v9128_v17 = vmul.f32 0.2, %v9119_v51  ;;  %v9131_v40 = vadd.f32 %v2023_v37, %v9077_v26 }
 0x2b3   : > { %12978 = vst [vmem:[#allocation372_spill] sm:$0xff] %v9122_v2  ;;  %12979 = vst [vmem:[#allocation373_spill] sm:$0xff] %v9125_v52  ;;  %v9136_v54 = vmul.f32 0.2, %v9125_v52 }
 0x2b4   : > { %12980 = vst [vmem:[#allocation374_spill] sm:$0xff] %v9128_v17  ;;  %12981 = vst [vmem:[#allocation375_spill] sm:$0xff] %v9131_v40  ;;  %v9141_v43 = vmul.f32 0.2, %v9131_v40 }
 0x2b5   : > { %12982 = vst [vmem:[#allocation376_spill] sm:$0xff] %v9136_v54 }
 0x2b6   : > { %12983 = vst [vmem:[#allocation377_spill] sm:$0xff] %v9141_v43  ;;  %v2027_v37 = vpop.f32.mrb[136].mxu1 }
 0x2b7   : > { %v9148_v8 = vadd.f32 %v2027_v37, %v9070_v22  ;;  %v2029_v16 = vpop.f32.mrb[137].mxu1 }
 0x2b8   : > { %v9151_v2 = vadd.f32 %v2029_v16, %v9077_v26  ;;  %v2031_v21 = vpop.f32.mrb[138].mxu1 }
 0x2b9   : > { %12984 = vst [vmem:[#allocation378_spill] sm:$0xff] %v9148_v8  ;;  %v9154_v31 = vmul.f32 0.2, %v9148_v8  ;;  %v9157_v17 = vadd.f32 %v2031_v21, %v9070_v22  ;;  %v2033_v51 = vpop.f32.mrb[139].mxu1 }
 0x2ba   : > { %12985 = vst [vmem:[#allocation379_spill] sm:$0xff] %v9151_v2  ;;  %v9160_v57 = vmul.f32 0.2, %v9151_v2  ;;  %v9163_v7 = vadd.f32 %v2033_v51, %v9077_v26 }
 0x2bb   : > { %12986 = vst [vmem:[#allocation380_spill] sm:$0xff] %v9154_v31  ;;  %12987 = vst [vmem:[#allocation381_spill] sm:$0xff] %v9157_v17  ;;  %v9168_v16 = vmul.f32 0.2, %v9157_v17 }
 0x2bc   : > { %12988 = vst [vmem:[#allocation382_spill] sm:$0xff] %v9160_v57  ;;  %12989 = vst [vmem:[#allocation383_spill] sm:$0xff] %v9163_v7  ;;  %v9173_v52 = vmul.f32 0.2, %v9163_v7 }
 0x2bd   : > { %12990 = vst [vmem:[#allocation384_spill] sm:$0xff] %v9168_v16 }
 0x2be   : > { %12991 = vst [vmem:[#allocation385_spill] sm:$0xff] %v9173_v52  ;;  %v2037_v51 = vpop.f32.mrb[140].mxu1 }
 0x2bf   : > { %v9180_v40 = vadd.f32 %v2037_v51, %v9070_v22  ;;  %v2039_v37 = vpop.f32.mrb[141].mxu1 }
 0x2c0   : > { %v9183_v31 = vadd.f32 %v2039_v37, %v9077_v26  ;;  %v2041_v8 = vpop.f32.mrb[142].mxu1 }
 0x2c1   : > { %12992 = vst [vmem:[#allocation386_spill] sm:$0xff] %v9180_v40  ;;  %v9186_v54 = vmul.f32 0.2, %v9180_v40  ;;  %v9189_v57 = vadd.f32 %v2041_v8, %v9070_v22  ;;  %v2043_v2 = vpop.f32.mrb[143].mxu1 }
 0x2c2   : > { %12993 = vst [vmem:[#allocation387_spill] sm:$0xff] %v9183_v31  ;;  %v9192_v21 = vmul.f32 0.2, %v9183_v31  ;;  %v9195_v43 = vadd.f32 %v2043_v2, %v9077_v26 }
 0x2c3   : > { %12994 = vst [vmem:[#allocation388_spill] sm:$0xff] %v9186_v54  ;;  %12995 = vst [vmem:[#allocation389_spill] sm:$0xff] %v9189_v57  ;;  %v9200_v37 = vmul.f32 0.2, %v9189_v57 }
 0x2c4   : > { %12996 = vst [vmem:[#allocation390_spill] sm:$0xff] %v9192_v21  ;;  %12997 = vst [vmem:[#allocation391_spill] sm:$0xff] %v9195_v43  ;;  %v9205_v17 = vmul.f32 0.2, %v9195_v43 }
 0x2c5   : > { %12998 = vst [vmem:[#allocation392_spill] sm:$0xff] %v9200_v37 }
 0x2c6   : > { %12999 = vst [vmem:[#allocation393_spill] sm:$0xff] %v9205_v17  ;;  %v2047_v2 = vpop.f32.mrb[144].mxu1 }
 0x2c7   : > { %v9212_v7 = vadd.f32 %v2047_v2, %v9070_v22  ;;  %v2049_v51 = vpop.f32.mrb[145].mxu1 }
 0x2c8   : > { %v9215_v54 = vadd.f32 %v2049_v51, %v9077_v26  ;;  %v2051_v40 = vpop.f32.mrb[146].mxu1 }
 0x2c9   : > { %13000 = vst [vmem:[#allocation394_spill] sm:$0xff] %v9212_v7  ;;  %v9218_v16 = vmul.f32 0.2, %v9212_v7  ;;  %v9221_v21 = vadd.f32 %v2051_v40, %v9070_v22  ;;  %v2053_v31 = vpop.f32.mrb[147].mxu1 }
 0x2ca   : > { %13001 = vst [vmem:[#allocation395_spill] sm:$0xff] %v9215_v54  ;;  %v9224_v8 = vmul.f32 0.2, %v9215_v54  ;;  %v9227_v52 = vadd.f32 %v2053_v31, %v9077_v26 }
 0x2cb   : > { %13002 = vst [vmem:[#allocation396_spill] sm:$0xff] %v9218_v16  ;;  %13003 = vst [vmem:[#allocation397_spill] sm:$0xff] %v9221_v21  ;;  %v9232_v51 = vmul.f32 0.2, %v9221_v21 }
 0x2cc   : > { %13004 = vst [vmem:[#allocation398_spill] sm:$0xff] %v9224_v8  ;;  %13005 = vst [vmem:[#allocation399_spill] sm:$0xff] %v9227_v52  ;;  %v9237_v57 = vmul.f32 0.2, %v9227_v52 }
 0x2cd   : > { %13006 = vst [vmem:[#allocation400_spill] sm:$0xff] %v9232_v51 }
 0x2ce   : > { %13007 = vst [vmem:[#allocation401_spill] sm:$0xff] %v9237_v57  ;;  %v2057_v31 = vpop.f32.mrb[148].mxu1 }
 0x2cf   : > { %v9244_v43 = vadd.f32 %v2057_v31, %v9070_v22  ;;  %v2059_v2 = vpop.f32.mrb[149].mxu1 }
 0x2d0   : > { %v9247_v16 = vadd.f32 %v2059_v2, %v9077_v26  ;;  %v2061_v7 = vpop.f32.mrb[150].mxu1 }
 0x2d1   : > { %13008 = vst [vmem:[#allocation402_spill] sm:$0xff] %v9244_v43  ;;  %v9250_v37 = vmul.f32 0.2, %v9244_v43  ;;  %v9253_v8 = vadd.f32 %v2061_v7, %v9070_v22  ;;  %v2063_v54 = vpop.f32.mrb[151].mxu1 }
 0x2d2   : > { %13009 = vst [vmem:[#allocation403_spill] sm:$0xff] %v9247_v16  ;;  %v9256_v40 = vmul.f32 0.2, %v9247_v16  ;;  %v9259_v17 = vadd.f32 %v2063_v54, %v9077_v26 }
 0x2d3   : > { %13010 = vst [vmem:[#allocation404_spill] sm:$0xff] %v9250_v37  ;;  %13011 = vst [vmem:[#allocation405_spill] sm:$0xff] %v9253_v8  ;;  %v9264_v2 = vmul.f32 0.2, %v9253_v8 }
 0x2d4   : > { %13012 = vst [vmem:[#allocation406_spill] sm:$0xff] %v9256_v40  ;;  %13013 = vst [vmem:[#allocation407_spill] sm:$0xff] %v9259_v17  ;;  %v9269_v21 = vmul.f32 0.2, %v9259_v17 }
 0x2d5   : > { %13014 = vst [vmem:[#allocation408_spill] sm:$0xff] %v9264_v2 }
 0x2d6   : > { %13015 = vst [vmem:[#allocation409_spill] sm:$0xff] %v9269_v21  ;;  %v2067_v54 = vpop.f32.mrb[152].mxu1 }
 0x2d7   : > { %v9276_v52 = vadd.f32 %v2067_v54, %v9070_v22  ;;  %v2069_v31 = vpop.f32.mrb[153].mxu1 }
 0x2d8   : > { %v9279_v37 = vadd.f32 %v2069_v31, %v9077_v26  ;;  %v2071_v43 = vpop.f32.mrb[154].mxu1 }
 0x2d9   : > { %13016 = vst [vmem:[#allocation410_spill] sm:$0xff] %v9276_v52  ;;  %v9282_v51 = vmul.f32 0.2, %v9276_v52  ;;  %v9285_v40 = vadd.f32 %v2071_v43, %v9070_v22  ;;  %v2073_v16 = vpop.f32.mrb[155].mxu1 }
 0x2da   : > { %13017 = vst [vmem:[#allocation411_spill] sm:$0xff] %v9279_v37  ;;  %v9288_v7 = vmul.f32 0.2, %v9279_v37  ;;  %v9291_v57 = vadd.f32 %v2073_v16, %v9077_v26 }
 0x2db   : > { %13018 = vst [vmem:[#allocation412_spill] sm:$0xff] %v9282_v51  ;;  %13019 = vst [vmem:[#allocation413_spill] sm:$0xff] %v9285_v40  ;;  %v9296_v31 = vmul.f32 0.2, %v9285_v40 }
 0x2dc   : > { %13020 = vst [vmem:[#allocation414_spill] sm:$0xff] %v9288_v7  ;;  %13021 = vst [vmem:[#allocation415_spill] sm:$0xff] %v9291_v57  ;;  %v9301_v8 = vmul.f32 0.2, %v9291_v57 }
 0x2dd   : > { %13022 = vst [vmem:[#allocation416_spill] sm:$0xff] %v9296_v31 }
 0x2de   : > { %13023 = vst [vmem:[#allocation417_spill] sm:$0xff] %v9301_v8  ;;  %v2077_v16 = vpop.f32.mrb[156].mxu1 }
 0x2df   : > { %v9308_v17 = vadd.f32 %v2077_v16, %v9070_v22  ;;  %v2079_v54 = vpop.f32.mrb[157].mxu1 }
 0x2e0   : > { %v9311_v51 = vadd.f32 %v2079_v54, %v9077_v26  ;;  %v2081_v52 = vpop.f32.mrb[158].mxu1 }
 0x2e1   : > { %13024 = vst [vmem:[#allocation418_spill] sm:$0xff] %v9308_v17  ;;  %v9314_v2 = vmul.f32 0.2, %v9308_v17  ;;  %v9317_v7 = vadd.f32 %v2081_v52, %v9070_v22  ;;  %v2083_v37 = vpop.f32.mrb[159].mxu1 }
 0x2e2   : > { %13025 = vst [vmem:[#allocation419_spill] sm:$0xff] %v9311_v51  ;;  %v9320_v43 = vmul.f32 0.2, %v9311_v51  ;;  %v9323_v21 = vadd.f32 %v2083_v37, %v9077_v26 }
 0x2e3   : > { %13026 = vst [vmem:[#allocation420_spill] sm:$0xff] %v9314_v2  ;;  %13027 = vst [vmem:[#allocation421_spill] sm:$0xff] %v9317_v7  ;;  %v9328_v54 = vmul.f32 0.2, %v9317_v7 }
 0x2e4   : > { %13028 = vst [vmem:[#allocation422_spill] sm:$0xff] %v9320_v43  ;;  %13029 = vst [vmem:[#allocation423_spill] sm:$0xff] %v9323_v21  ;;  %v9333_v40 = vmul.f32 0.2, %v9323_v21 }
 0x2e5   : > { %13030 = vst [vmem:[#allocation424_spill] sm:$0xff] %v9328_v54 }
 0x2e6   : > { %13031 = vst [vmem:[#allocation425_spill] sm:$0xff] %v9333_v40  ;;  %v2087_v37 = vpop.f32.mrb[160].mxu1 }
 0x2e7   : > { %v9340_v57 = vadd.f32 %v2087_v37, %v9070_v22  ;;  %v2089_v16 = vpop.f32.mrb[161].mxu1 }
 0x2e8   : > { %v9343_v2 = vadd.f32 %v2089_v16, %v9077_v26  ;;  %v2091_v17 = vpop.f32.mrb[162].mxu1 }
 0x2e9   : > { %13032 = vst [vmem:[#allocation426_spill] sm:$0xff] %v9340_v57  ;;  %v9346_v31 = vmul.f32 0.2, %v9340_v57  ;;  %v9349_v43 = vadd.f32 %v2091_v17, %v9070_v22  ;;  %v2093_v51 = vpop.f32.mrb[163].mxu1 }
 0x2ea   : > { %13033 = vst [vmem:[#allocation427_spill] sm:$0xff] %v9343_v2  ;;  %v9352_v52 = vmul.f32 0.2, %v9343_v2  ;;  %v9355_v8 = vadd.f32 %v2093_v51, %v9077_v26 }
 0x2eb   : > { %13034 = vst [vmem:[#allocation428_spill] sm:$0xff] %v9346_v31  ;;  %13035 = vst [vmem:[#allocation429_spill] sm:$0xff] %v9349_v43  ;;  %v9360_v16 = vmul.f32 0.2, %v9349_v43 }
 0x2ec   : > { %13036 = vst [vmem:[#allocation430_spill] sm:$0xff] %v9352_v52  ;;  %13037 = vst [vmem:[#allocation431_spill] sm:$0xff] %v9355_v8  ;;  %v9365_v7 = vmul.f32 0.2, %v9355_v8 }
 0x2ed   : > { %13038 = vst [vmem:[#allocation432_spill] sm:$0xff] %v9360_v16 }
 0x2ee   : > { %13039 = vst [vmem:[#allocation433_spill] sm:$0xff] %v9365_v7  ;;  %v2097_v51 = vpop.f32.mrb[164].mxu1 }
 0x2ef   : > { %v9372_v21 = vadd.f32 %v2097_v51, %v9070_v22  ;;  %v2099_v37 = vpop.f32.mrb[165].mxu1 }
 0x2f0   : > { %v9375_v31 = vadd.f32 %v2099_v37, %v9077_v26  ;;  %v2101_v57 = vpop.f32.mrb[166].mxu1 }
 0x2f1   : > { %13040 = vst [vmem:[#allocation434_spill] sm:$0xff] %v9372_v21  ;;  %v9378_v54 = vmul.f32 0.2, %v9372_v21  ;;  %v9381_v52 = vadd.f32 %v2101_v57, %v9070_v22  ;;  %v2103_v2 = vpop.f32.mrb[167].mxu1 }
 0x2f2   : > { %13041 = vst [vmem:[#allocation435_spill] sm:$0xff] %v9375_v31  ;;  %v9384_v17 = vmul.f32 0.2, %v9375_v31  ;;  %v9387_v40 = vadd.f32 %v2103_v2, %v9077_v26 }
 0x2f3   : > { %13042 = vst [vmem:[#allocation436_spill] sm:$0xff] %v9378_v54  ;;  %13043 = vst [vmem:[#allocation437_spill] sm:$0xff] %v9381_v52  ;;  %v9392_v37 = vmul.f32 0.2, %v9381_v52 }
 0x2f4   : > { %13044 = vst [vmem:[#allocation438_spill] sm:$0xff] %v9384_v17  ;;  %13045 = vst [vmem:[#allocation439_spill] sm:$0xff] %v9387_v40  ;;  %v9397_v43 = vmul.f32 0.2, %v9387_v40 }
 0x2f5   : > { %13046 = vst [vmem:[#allocation440_spill] sm:$0xff] %v9392_v37 }
 0x2f6   : > { %13047 = vst [vmem:[#allocation441_spill] sm:$0xff] %v9397_v43  ;;  %v2107_v2 = vpop.f32.mrb[168].mxu1 }
 0x2f7   : > { %v9404_v8 = vadd.f32 %v2107_v2, %v9070_v22  ;;  %v2109_v51 = vpop.f32.mrb[169].mxu1 }
 0x2f8   : > { %v9407_v54 = vadd.f32 %v2109_v51, %v9077_v26  ;;  %v2111_v21 = vpop.f32.mrb[170].mxu1 }
 0x2f9   : > { %13048 = vst [vmem:[#allocation442_spill] sm:$0xff] %v9404_v8  ;;  %v9410_v16 = vmul.f32 0.2, %v9404_v8  ;;  %v9413_v17 = vadd.f32 %v2111_v21, %v9070_v22  ;;  %v2113_v31 = vpop.f32.mrb[171].mxu1 }
 0x2fa   : > { %13049 = vst [vmem:[#allocation443_spill] sm:$0xff] %v9407_v54  ;;  %v9416_v57 = vmul.f32 0.2, %v9407_v54  ;;  %v9419_v7 = vadd.f32 %v2113_v31, %v9077_v26 }
 0x2fb   : > { %13050 = vst [vmem:[#allocation444_spill] sm:$0xff] %v9410_v16  ;;  %13051 = vst [vmem:[#allocation445_spill] sm:$0xff] %v9413_v17  ;;  %v9424_v51 = vmul.f32 0.2, %v9413_v17 }
 0x2fc   : > { %13052 = vst [vmem:[#allocation446_spill] sm:$0xff] %v9416_v57  ;;  %13053 = vst [vmem:[#allocation447_spill] sm:$0xff] %v9419_v7  ;;  %v9429_v52 = vmul.f32 0.2, %v9419_v7 }
 0x2fd   : > { %13054 = vst [vmem:[#allocation448_spill] sm:$0xff] %v9424_v51 }
 0x2fe   : > { %13055 = vst [vmem:[#allocation449_spill] sm:$0xff] %v9429_v52  ;;  %v2117_v31 = vpop.f32.mrb[172].mxu1 }
 0x2ff   : > { %v9436_v40 = vadd.f32 %v2117_v31, %v9070_v22  ;;  %v2119_v2 = vpop.f32.mrb[173].mxu1 }
 0x300   : > { %v9439_v16 = vadd.f32 %v2119_v2, %v9077_v26  ;;  %v2121_v8 = vpop.f32.mrb[174].mxu1 }
 0x301   : > { %13056 = vst [vmem:[#allocation450_spill] sm:$0xff] %v9436_v40  ;;  %v9442_v37 = vmul.f32 0.2, %v9436_v40  ;;  %v9445_v57 = vadd.f32 %v2121_v8, %v9070_v22  ;;  %v2123_v54 = vpop.f32.mrb[175].mxu1 }
 0x302   : > { %13057 = vst [vmem:[#allocation451_spill] sm:$0xff] %v9439_v16  ;;  %v9448_v21 = vmul.f32 0.2, %v9439_v16  ;;  %v9451_v43 = vadd.f32 %v2123_v54, %v9077_v26 }
 0x303   : > { %13058 = vst [vmem:[#allocation452_spill] sm:$0xff] %v9442_v37  ;;  %13059 = vst [vmem:[#allocation453_spill] sm:$0xff] %v9445_v57  ;;  %v9456_v2 = vmul.f32 0.2, %v9445_v57 }
 0x304   : > { %13060 = vst [vmem:[#allocation454_spill] sm:$0xff] %v9448_v21  ;;  %13061 = vst [vmem:[#allocation455_spill] sm:$0xff] %v9451_v43  ;;  %v9461_v17 = vmul.f32 0.2, %v9451_v43 }
 0x305   : > { %13062 = vst [vmem:[#allocation456_spill] sm:$0xff] %v9456_v2 }
 0x306   : > { %13063 = vst [vmem:[#allocation457_spill] sm:$0xff] %v9461_v17  ;;  %v2127_v54 = vpop.f32.mrb[176].mxu1 }
 0x307   : > { %v9468_v7 = vadd.f32 %v2127_v54, %v9070_v22  ;;  %v2129_v31 = vpop.f32.mrb[177].mxu1 }
 0x308   : > { %v9471_v37 = vadd.f32 %v2129_v31, %v9077_v26  ;;  %v2131_v40 = vpop.f32.mrb[178].mxu1 }
 0x309   : > { %13064 = vst [vmem:[#allocation458_spill] sm:$0xff] %v9468_v7  ;;  %v9474_v51 = vmul.f32 0.2, %v9468_v7  ;;  %v9477_v21 = vadd.f32 %v2131_v40, %v9070_v22  ;;  %v2133_v16 = vpop.f32.mrb[179].mxu1 }
 0x30a   : > { %13065 = vst [vmem:[#allocation459_spill] sm:$0xff] %v9471_v37  ;;  %v9480_v8 = vmul.f32 0.2, %v9471_v37  ;;  %v9483_v52 = vadd.f32 %v2133_v16, %v9077_v26 }
 0x30b   : > { %13066 = vst [vmem:[#allocation460_spill] sm:$0xff] %v9474_v51  ;;  %13067 = vst [vmem:[#allocation461_spill] sm:$0xff] %v9477_v21  ;;  %v9488_v31 = vmul.f32 0.2, %v9477_v21 }
 0x30c   : > { %13068 = vst [vmem:[#allocation462_spill] sm:$0xff] %v9480_v8  ;;  %13069 = vst [vmem:[#allocation463_spill] sm:$0xff] %v9483_v52  ;;  %v9493_v57 = vmul.f32 0.2, %v9483_v52 }
 0x30d   : > { %13070 = vst [vmem:[#allocation464_spill] sm:$0xff] %v9488_v31 }
 0x30e   : > { %13071 = vst [vmem:[#allocation465_spill] sm:$0xff] %v9493_v57  ;;  %v2137_v16 = vpop.f32.mrb[180].mxu1 }
 0x30f   : > { %v9500_v43 = vadd.f32 %v2137_v16, %v9070_v22  ;;  %v2139_v54 = vpop.f32.mrb[181].mxu1 }
 0x310   : > { %v9503_v51 = vadd.f32 %v2139_v54, %v9077_v26  ;;  %v2141_v7 = vpop.f32.mrb[182].mxu1 }
 0x311   : > { %13072 = vst [vmem:[#allocation466_spill] sm:$0xff] %v9500_v43  ;;  %v9506_v2 = vmul.f32 0.2, %v9500_v43  ;;  %v9509_v8 = vadd.f32 %v2141_v7, %v9070_v22  ;;  %v2143_v37 = vpop.f32.mrb[183].mxu1 }
 0x312   : > { %13073 = vst [vmem:[#allocation467_spill] sm:$0xff] %v9503_v51  ;;  %v9512_v40 = vmul.f32 0.2, %v9503_v51  ;;  %v9515_v17 = vadd.f32 %v2143_v37, %v9077_v26 }
 0x313   : > { %13074 = vst [vmem:[#allocation468_spill] sm:$0xff] %v9506_v2  ;;  %13075 = vst [vmem:[#allocation469_spill] sm:$0xff] %v9509_v8  ;;  %v9520_v54 = vmul.f32 0.2, %v9509_v8 }
 0x314   : > { %13076 = vst [vmem:[#allocation470_spill] sm:$0xff] %v9512_v40  ;;  %13077 = vst [vmem:[#allocation471_spill] sm:$0xff] %v9515_v17  ;;  %v9525_v21 = vmul.f32 0.2, %v9515_v17 }
 0x315   : > { %13078 = vst [vmem:[#allocation472_spill] sm:$0xff] %v9520_v54 }
 0x316   : > { %13079 = vst [vmem:[#allocation473_spill] sm:$0xff] %v9525_v21  ;;  %v2147_v37 = vpop.f32.mrb[184].mxu1 }
 0x317   : > { %v9532_v52 = vadd.f32 %v2147_v37, %v9070_v22  ;;  %v2149_v16 = vpop.f32.mrb[185].mxu1 }
 0x318   : > { %v9535_v2 = vadd.f32 %v2149_v16, %v9077_v26  ;;  %v2151_v43 = vpop.f32.mrb[186].mxu1 }
 0x319   : > { %13080 = vst [vmem:[#allocation474_spill] sm:$0xff] %v9532_v52  ;;  %v9538_v31 = vmul.f32 0.2, %v9532_v52  ;;  %v9541_v40 = vadd.f32 %v2151_v43, %v9070_v22  ;;  %v2153_v51 = vpop.f32.mrb[187].mxu1 }
 0x31a   : > { %v9544_v7 = vmul.f32 0.2, %v9535_v2  ;;  %v9547_v57 = vadd.f32 %v2153_v51, %v9077_v26 }
 0x31b   : > { %13081 = vst [vmem:[#allocation475_spill] sm:$0xff] %v9538_v31  ;;  %13082 = vst [vmem:[#allocation476_spill] sm:$0xff] %v9541_v40  ;;  %v9552_v16 = vmul.f32 0.2, %v9541_v40 }
 0x31c   : > { %13083 = vst [vmem:[#allocation477_spill] sm:$0xff] %v9544_v7  ;;  %v9557_v8 = vmul.f32 0.2, %v9547_v57 }
 0x31d   : > { %13084 = vst [vmem:[#allocation478_spill] sm:$0xff] %v9552_v16 }
 0x31e   : > { %13085 = vst [vmem:[#allocation479_spill] sm:$0xff] %v9557_v8  ;;  %v2157_v51 = vpop.f32.mrb[188].mxu1 }
 0x31f   : > { %v9564_v17 = vadd.f32 %v2157_v51, %v9070_v22  ;;  %v2159_v37 = vpop.f32.mrb[189].mxu1 }
 0x320   : > { %v9567_v31 = vadd.f32 %v2159_v37, %v9077_v26  ;;  %v2161_v52 = vpop.f32.mrb[190].mxu1 }
 0x321   : > { %13086 = vst [vmem:[#allocation480_spill] sm:$0xff] %v9564_v17  ;;  %v9570_v54 = vmul.f32 0.2, %v9564_v17  ;;  %v9573_v7 = vadd.f32 %v2161_v52, %v9070_v22  ;;  %v2163_v43 = vpop.f32.mrb[191].mxu1 }
 0x322   : > { %v9576_v16 = vmul.f32 0.2, %v9567_v31  ;;  %v9579_v21 = vadd.f32 %v2163_v43, %v9077_v26 }
 0x323   : > { %13087 = vst [vmem:[#allocation481_spill] sm:$0xff] %v9570_v54  ;;  %13088 = vst [vmem:[#allocation482_spill] sm:$0xff] %v9573_v7  ;;  %v9584_v37 = vmul.f32 0.2, %v9573_v7 }
 0x324   : > { %v9589_v8 = vmul.f32 0.2, %v9579_v21 }
 0x325   : > { %13089 = vst [vmem:[#allocation483_spill] sm:$0xff] %v9584_v37 }
 0x326   : > { %13090 = vst [vmem:[#allocation484_spill] sm:$0xff] %v9589_v8 }
 0x327   : > { %6952 = dma.done.wait (%p13091_p12), [#allocation4], 32768 }
 0x328   : > { %6954 = vsyncadd (%p12614_p0), [#allocation4], 4294934528  ;;  %v13092_v26 = vmax.f32 %v7473_v3, %v7483_v11  ;;  %v13093_v43 = vmax.f32 %v7486_v12, %v7497_v24  ;;  %v2814_v40 = vld [vmem:[#allocation2 + $0x8] sm:$0xff]  ;;  %v2816_v54 = vld [vmem:[#allocation2 + $0x18] sm:$0xff]  ;;  %p14014_p2 = pmov %p12614_p0 }
 0x329   : > { %v2813_v22 = vld [vmem:[#allocation2] sm:$0xff]  ;;  %3091 = vmatprep.subr.bf16.mxu0 %v2814_v40  ;;  %3863 = vmatprep.subr.bf16.mxu1 %v2816_v54  ;;  %v2815_v52 = vld [vmem:[#allocation2 + $0x10] sm:$0xff]  ;;  %v2818_v37 = vld [vmem:[#allocation2 + $0x28] sm:$0xff] }
 0x32a   : > { %v2686_v51 = vpack.c.bf16 %v13093_v43, %v13092_v26  ;;  %v2820_v7 = vld [vmem:[#allocation2 + $0x38] sm:$0xff]  ;;  %3092 = vmatpush1.bf16.msra.mxu0 %v2813_v22  ;;  %3864 = vmatpush1.bf16.msra.mxu1 %v2815_v52  ;;  %v2817_v17 = vld [vmem:[#allocation2 + $0x20] sm:$0xff]  ;;  %v2819_v3 = vld [vmem:[#allocation2 + $0x30] sm:$0xff] }
 0x32b   : > { %3093 = vmatprep.subr.bf16.mxu0 %v2818_v37  ;;  %3865 = vmatprep.subr.bf16.mxu1 %v2820_v7  ;;  %v2822_v11 = vld [vmem:[#allocation2 + $0x48] sm:$0xff]  ;;  %v2824_v8 = vld [vmem:[#allocation2 + $0x58] sm:$0xff]  ;;  %v2821_v12 = vld [vmem:[#allocation2 + $0x40] sm:$0xff] }
 0x32c   : > { %3123 = vmatprep.mubr.bf16.mxu0 %v2686_v51  ;;  %3895 = vmatprep.mubr.bf16.mxu1 %v2686_v51  ;;  %v2823_v24 = vld [vmem:[#allocation2 + $0x50] sm:$0xff]  ;;  %v2826_v51 = vld [vmem:[#allocation2 + $0x68] sm:$0xff]  ;;  %v2828_v40 = vld [vmem:[#allocation2 + $0x78] sm:$0xff] }
 0x32d   : > { %v2825_v54 = vld [vmem:[#allocation2 + $0x60] sm:$0xff]  ;;  %v2827_v22 = vld [vmem:[#allocation2 + $0x70] sm:$0xff]  ;;  %v2830_v37 = vld [vmem:[#allocation2 + $0x88] sm:$0xff] }
 0x32e   : > { %3094 = vmatpush1.bf16.msra.mxu0 %v2817_v17  ;;  %3866 = vmatpush1.bf16.msra.mxu1 %v2819_v3  ;;  %v2832_v7 = vld [vmem:[#allocation2 + $0x98] sm:$0xff]  ;;  %v2829_v17 = vld [vmem:[#allocation2 + $0x80] sm:$0xff]  ;;  %v2831_v52 = vld [vmem:[#allocation2 + $0x90] sm:$0xff] }
 0x32f   : > { %3095 = vmatprep.subr.bf16.mxu0 %v2822_v11  ;;  %3867 = vmatprep.subr.bf16.mxu1 %v2824_v8  ;;  %v2834_v26 = vld [vmem:[#allocation2 + $0xa8] sm:$0xff]  ;;  %v2836_v8 = vld [vmem:[#allocation2 + $0xb8] sm:$0xff]  ;;  %v2833_v43 = vld [vmem:[#allocation2 + $0xa0] sm:$0xff] }
 0x330   : > { %v2835_v3 = vld [vmem:[#allocation2 + $0xb0] sm:$0xff]  ;;  %v2838_v11 = vld [vmem:[#allocation2 + $0xc8] sm:$0xff] }
 0x332   : > { %3096 = vmatpush1.bf16.msra.mxu0 %v2821_v12  ;;  %3868 = vmatpush1.bf16.msra.mxu1 %v2823_v24  ;;  %v2840_v12 = vld [vmem:[#allocation2 + $0xd8] sm:$0xff]  ;;  %v2837_v24 = vld [vmem:[#allocation2 + $0xc0] sm:$0xff] }
 0x333   : > { %3097 = vmatprep.subr.bf16.mxu0 %v2826_v51  ;;  %3869 = vmatprep.subr.bf16.mxu1 %v2828_v40  ;;  %v2839_v51 = vld [vmem:[#allocation2 + $0xd0] sm:$0xff]  ;;  %v2842_v40 = vld [vmem:[#allocation2 + $0xe8] sm:$0xff] }
 0x336   : > { %3098 = vmatpush1.bf16.msra.mxu0 %v2825_v54  ;;  %3870 = vmatpush1.bf16.msra.mxu1 %v2827_v22  ;;  %v2844_v54 = vld [vmem:[#allocation2 + $0xf8] sm:$0xff]  ;;  %v2841_v22 = vld [vmem:[#allocation2 + $0xe0] sm:$0xff] }
 0x337   : > { %3099 = vmatprep.subr.bf16.mxu0 %v2830_v37  ;;  %3871 = vmatprep.subr.bf16.mxu1 %v2832_v7  ;;  %v2843_v37 = vld [vmem:[#allocation2 + $0xf0] sm:$0xff]  ;;  %v2846_v7 = vld [vmem:[#allocation2 + $0x108] sm:$0xff] }
 0x33a   : > { %3100 = vmatpush1.bf16.msra.mxu0 %v2829_v17  ;;  %3872 = vmatpush1.bf16.msra.mxu1 %v2831_v52  ;;  %v2848_v17 = vld [vmem:[#allocation2 + $0x118] sm:$0xff]  ;;  %v2845_v52 = vld [vmem:[#allocation2 + $0x100] sm:$0xff] }
 0x33b   : > { %3101 = vmatprep.subr.bf16.mxu0 %v2834_v26  ;;  %3873 = vmatprep.subr.bf16.mxu1 %v2836_v8  ;;  %v2847_v26 = vld [vmem:[#allocation2 + $0x110] sm:$0xff]  ;;  %v2850_v8 = vld [vmem:[#allocation2 + $0x128] sm:$0xff] }
 0x33e   : > { %3102 = vmatpush1.bf16.msra.mxu0 %v2833_v43  ;;  %3874 = vmatpush1.bf16.msra.mxu1 %v2835_v3  ;;  %v2852_v43 = vld [vmem:[#allocation2 + $0x138] sm:$0xff]  ;;  %v2849_v3 = vld [vmem:[#allocation2 + $0x120] sm:$0xff] }
 0x33f   : > { %3103 = vmatprep.subr.bf16.mxu0 %v2838_v11  ;;  %3875 = vmatprep.subr.bf16.mxu1 %v2840_v12  ;;  %v2851_v11 = vld [vmem:[#allocation2 + $0x130] sm:$0xff]  ;;  %v2854_v12 = vld [vmem:[#allocation2 + $0x148] sm:$0xff] }
 0x342   : > { %3104 = vmatpush1.bf16.msra.mxu0 %v2837_v24  ;;  %3876 = vmatpush1.bf16.msra.mxu1 %v2839_v51  ;;  %v2856_v24 = vld [vmem:[#allocation2 + $0x158] sm:$0xff]  ;;  %v2853_v51 = vld [vmem:[#allocation2 + $0x140] sm:$0xff] }
 0x343   : > { %3105 = vmatprep.subr.bf16.mxu0 %v2842_v40  ;;  %3877 = vmatprep.subr.bf16.mxu1 %v2844_v54  ;;  %v2855_v40 = vld [vmem:[#allocation2 + $0x150] sm:$0xff]  ;;  %v2858_v54 = vld [vmem:[#allocation2 + $0x168] sm:$0xff] }
 0x346   : > { %3106 = vmatpush1.bf16.msra.mxu0 %v2841_v22  ;;  %3878 = vmatpush1.bf16.msra.mxu1 %v2843_v37  ;;  %v2860_v22 = vld [vmem:[#allocation2 + $0x178] sm:$0xff]  ;;  %v2857_v37 = vld [vmem:[#allocation2 + $0x160] sm:$0xff] }
 0x347   : > { %3107 = vmatprep.subr.bf16.mxu0 %v2846_v7  ;;  %3879 = vmatprep.subr.bf16.mxu1 %v2848_v17  ;;  %v2859_v7 = vld [vmem:[#allocation2 + $0x170] sm:$0xff]  ;;  %v2862_v17 = vld [vmem:[#allocation2 + $0x188] sm:$0xff] }
 0x34a   : > { %3108 = vmatpush1.bf16.msra.mxu0 %v2845_v52  ;;  %3880 = vmatpush1.bf16.msra.mxu1 %v2847_v26  ;;  %v2864_v52 = vld [vmem:[#allocation2 + $0x198] sm:$0xff]  ;;  %v2861_v26 = vld [vmem:[#allocation2 + $0x180] sm:$0xff] }
 0x34b   : > { %3109 = vmatprep.subr.bf16.mxu0 %v2850_v8  ;;  %3881 = vmatprep.subr.bf16.mxu1 %v2852_v43  ;;  %v2863_v8 = vld [vmem:[#allocation2 + $0x190] sm:$0xff]  ;;  %v2866_v43 = vld [vmem:[#allocation2 + $0x1a8] sm:$0xff] }
 0x34e   : > { %3110 = vmatpush1.bf16.msra.mxu0 %v2849_v3  ;;  %3882 = vmatpush1.bf16.msra.mxu1 %v2851_v11  ;;  %v2868_v3 = vld [vmem:[#allocation2 + $0x1b8] sm:$0xff]  ;;  %v2865_v11 = vld [vmem:[#allocation2 + $0x1a0] sm:$0xff] }
 0x34f   : > { %3111 = vmatprep.subr.bf16.mxu0 %v2854_v12  ;;  %3883 = vmatprep.subr.bf16.mxu1 %v2856_v24  ;;  %v2867_v12 = vld [vmem:[#allocation2 + $0x1b0] sm:$0xff]  ;;  %v2870_v24 = vld [vmem:[#allocation2 + $0x1c8] sm:$0xff] }
 0x352   : > { %3112 = vmatpush1.bf16.msra.mxu0 %v2853_v51  ;;  %3884 = vmatpush1.bf16.msra.mxu1 %v2855_v40  ;;  %v2872_v51 = vld [vmem:[#allocation2 + $0x1d8] sm:$0xff]  ;;  %v2869_v40 = vld [vmem:[#allocation2 + $0x1c0] sm:$0xff] }
 0x353   : > { %3113 = vmatprep.subr.bf16.mxu0 %v2858_v54  ;;  %3885 = vmatprep.subr.bf16.mxu1 %v2860_v22  ;;  %v2871_v54 = vld [vmem:[#allocation2 + $0x1d0] sm:$0xff]  ;;  %v2874_v22 = vld [vmem:[#allocation2 + $0x1e8] sm:$0xff] }
 0x356   : > { %3114 = vmatpush1.bf16.msra.mxu0 %v2857_v37  ;;  %3886 = vmatpush1.bf16.msra.mxu1 %v2859_v7  ;;  %v2876_v37 = vld [vmem:[#allocation2 + $0x1f8] sm:$0xff]  ;;  %v2873_v7 = vld [vmem:[#allocation2 + $0x1e0] sm:$0xff] }
 0x357   : > { %3115 = vmatprep.subr.bf16.mxu0 %v2862_v17  ;;  %3887 = vmatprep.subr.bf16.mxu1 %v2864_v52  ;;  %v2875_v17 = vld [vmem:[#allocation2 + $0x1f0] sm:$0xff]  ;;  %v2878_v52 = vld [vmem:[#allocation2 + $0x208] sm:$0xff] }
 0x35a   : > { %3116 = vmatpush1.bf16.msra.mxu0 %v2861_v26  ;;  %3888 = vmatpush1.bf16.msra.mxu1 %v2863_v8  ;;  %v2880_v26 = vld [vmem:[#allocation2 + $0x218] sm:$0xff]  ;;  %v13094_v8 = vmax.f32 %v7469_v60, %v7477_v5  ;;  %v2882_v60 = vld [vmem:[#allocation2 + $0x228] sm:$0xff] }
 0x35b   : > { %3117 = vmatprep.subr.bf16.mxu0 %v2866_v43  ;;  %3889 = vmatprep.subr.bf16.mxu1 %v2868_v3  ;;  %v13095_v43 = vmax.f32 %v7480_v6, %v7491_v19  ;;  %v2884_v5 = vld [vmem:[#allocation2 + $0x238] sm:$0xff]  ;;  %v2881_v6 = vld [vmem:[#allocation2 + $0x220] sm:$0xff]  ;;  %v2883_v19 = vld [vmem:[#allocation2 + $0x230] sm:$0xff] }
 0x35d   : > { %v2685_v3 = vpack.c.bf16 %v13095_v43, %v13094_v8  ;;  %v13104_v8 = vmax.f32 %v7581_v47, %v7591_v42  ;;  %v13105_v43 = vmax.f32 %v7594_v46, %v7605_v1  ;;  %v13106_v47 = vmax.f32 %v7577_v63, %v7585_v53  ;;  %v2902_v1 = vld [vmem:[#allocation2 + $0x2c8] sm:$0xff]  ;;  %v2908_v53 = vld [vmem:[#allocation2 + $0x2f8] sm:$0xff] }
 0x35e   : > { %3118 = vmatpush1.bf16.msra.mxu0 %v2865_v11  ;;  %3890 = vmatpush1.bf16.msra.mxu1 %v2867_v12  ;;  %v2877_v11 = vld [vmem:[#allocation2 + $0x200] sm:$0xff]  ;;  %v2879_v12 = vld [vmem:[#allocation2 + $0x210] sm:$0xff]  ;;  %v13107_v42 = vmax.f32 %v7588_v34, %v7599_v55  ;;  %v2906_v63 = vld [vmem:[#allocation2 + $0x2e8] sm:$0xff]  ;;  %v13110_v55 = vmax.f32 %v7613_v10, %v7620_v4 }
 0x35f   : > { %3119 = vmatprep.subr.bf16.mxu0 %v2870_v24  ;;  %3891 = vmatprep.subr.bf16.mxu1 %v2872_v51  ;;  %v13096_v24 = vmax.f32 %v7509_v15, %v7519_v38  ;;  %v13097_v51 = vmax.f32 %v7522_v39, %v7533_v45  ;;  %v13098_v15 = vmax.f32 %v7505_v30, %v7513_v20  ;;  %v2890_v30 = vld [vmem:[#allocation2 + $0x268] sm:$0xff]  ;;  %v2892_v20 = vld [vmem:[#allocation2 + $0x278] sm:$0xff]  ;;  %v2905_v34 = vld [vmem:[#allocation2 + $0x2e0] sm:$0xff] }
 0x360   : > { %v13099_v38 = vmax.f32 %v7516_v41, %v7527_v18  ;;  %v13100_v45 = vmax.f32 %v7545_v33, %v7555_v61  ;;  %v2889_v41 = vld [vmem:[#allocation2 + $0x260] sm:$0xff]  ;;  %v2891_v18 = vld [vmem:[#allocation2 + $0x270] sm:$0xff]  ;;  %v13102_v33 = vmax.f32 %v7541_v48, %v7549_v36  ;;  %v13103_v61 = vmax.f32 %v7552_v13, %v7563_v56  ;;  %v2898_v48 = vld [vmem:[#allocation2 + $0x2a8] sm:$0xff] }
 0x361   : > { %v2900_v36 = vld [vmem:[#allocation2 + $0x2b8] sm:$0xff]  ;;  %v2897_v13 = vld [vmem:[#allocation2 + $0x2a0] sm:$0xff]  ;;  %v2899_v56 = vld [vmem:[#allocation2 + $0x2b0] sm:$0xff]  ;;  %v2709_v46 = vpack.c.bf16 %v13107_v42, %v13106_v47 }
 0x362   : > { %3120 = vmatpush1.bf16.msra.mxu0 %v2869_v40  ;;  %3892 = vmatpush1.bf16.msra.mxu1 %v2871_v54  ;;  %v2694_v40 = vpack.c.bf16 %v13097_v51, %v13096_v24  ;;  %v2886_v54 = vld [vmem:[#allocation2 + $0x248] sm:$0xff]  ;;  %v2693_v39 = vpack.c.bf16 %v13099_v38, %v13098_v15  ;;  %v2904_v24 = vld [vmem:[#allocation2 + $0x2d8] sm:$0xff]  ;;  %v13108_v51 = vmax.f32 %v7617_v50, %v7626_v29  ;;  %v2907_v50 = vld [vmem:[#allocation2 + $0x2f0] sm:$0xff] }
 0x363   : > { %3121 = vmatprep.subr.bf16.mxu0 %v2874_v22  ;;  %3893 = vmatprep.subr.bf16.mxu1 %v2876_v37  ;;  %v2888_v22 = vld [vmem:[#allocation2 + $0x258] sm:$0xff]  ;;  %v13101_v37 = vmax.f32 %v7558_v62, %v7569_v58  ;;  %v2701_v62 = vpack.c.bf16 %v13103_v61, %v13102_v33  ;;  %v2894_v58 = vld [vmem:[#allocation2 + $0x288] sm:$0xff]  ;;  %v2917_v42 = vld [vmem:[#allocation2 + $0x340] sm:$0xff] }
 0x364   : > { %v13111_v29 = vld [vmem:[#allocation26_spill] sm:$0xff]  ;;  %v13114_v15 = vld [vmem:[#allocation29_spill] sm:$0xff]  ;;  %v13115_v38 = vld [vmem:[#allocation32_spill] sm:$0xff] }
 0x365   : > { %v2914_v10 = vld [vmem:[#allocation2 + $0x328] sm:$0xff]  ;;  %v2916_v4 = vld [vmem:[#allocation2 + $0x338] sm:$0xff] }
 0x366   : > { %3122 = vmatpush1.bf16.msra.mxu0 %v2873_v7  ;;  %3894 = vmatpush1.bf16.msra.mxu1 %v2875_v17  ;;  %v2702_v7 = vpack.c.bf16 %v13101_v37, %v13100_v45  ;;  %v2885_v17 = vld [vmem:[#allocation2 + $0x240] sm:$0xff]  ;;  %v13118_v37 = vld [vmem:[#allocation35_spill] sm:$0xff] }
 0x367   : > { %3284 = vmatprep.subr.bf16.mxu0 %v2878_v52  ;;  %4056 = vmatprep.subr.bf16.mxu1 %v2880_v26  ;;  %v2887_v52 = vld [vmem:[#allocation2 + $0x250] sm:$0xff]  ;;  %v2896_v26 = vld [vmem:[#allocation2 + $0x298] sm:$0xff]  ;;  %v13121_v33 = vld [vmem:[#allocation30_spill] sm:$0xff] }
 0x368   : > { %v13117_v45 = vld [vmem:[#allocation33_spill] sm:$0xff] }
 0x369   : > { %3124 = vmatmul.mubr.bf16.vlgmr.msra.gmra.mrb[64].mxu0 %v2685_v3  ;;  %3896 = vmatmul.mubr.bf16.vlgmr.msra.gmra.mrb[192].mxu1 %v2685_v3  ;;  %v2710_v3 = vpack.c.bf16 %v13105_v43, %v13104_v8  ;;  %v2918_v43 = vld [vmem:[#allocation2 + $0x348] sm:$0xff] }
 0x36a   : > { %3285 = vmatpush1.bf16.msra.mxu0 %v2877_v11  ;;  %4057 = vmatpush1.bf16.msra.mxu1 %v2879_v12  ;;  %v2893_v11 = vld [vmem:[#allocation2 + $0x280] sm:$0xff]  ;;  %v2895_v12 = vld [vmem:[#allocation2 + $0x290] sm:$0xff] }
 0x36b   : > { %3133 = vmatprep.mubr.bf16.mxu0 %v2694_v40  ;;  %3905 = vmatprep.mubr.bf16.mxu1 %v2694_v40  ;;  %v13109_v40 = vmax.f32 %v7629_v35, %v7640_v14  ;;  %v13112_v35 = vld [vmem:[#allocation27_spill] sm:$0xff] }
 0x36c   : > { %3286 = vmatprep.subr.bf16.mxu0 %v2882_v60  ;;  %4058 = vmatprep.subr.bf16.mxu1 %v2884_v5  ;;  %v2901_v5 = vld [vmem:[#allocation2 + $0x2c0] sm:$0xff]  ;;  %v13113_v14 = vmax.f32 %v13111_v29, %v13112_v35  ;;  %v2928_v29 = vld [vmem:[#allocation2 + $0x398] sm:$0xff] }
 0x36d   : > { %v2718_v60 = vpack.c.bf16 %v13109_v40, %v13108_v51  ;;  %v2921_v51 = vld [vmem:[#allocation2 + $0x360] sm:$0xff]  ;;  %v2923_v40 = vld [vmem:[#allocation2 + $0x370] sm:$0xff] }
 0x36e   : > { %3287 = vmatpush1.bf16.msra.mxu0 %v2881_v6  ;;  %4059 = vmatpush1.bf16.msra.mxu1 %v2883_v19  ;;  %v2903_v6 = vld [vmem:[#allocation2 + $0x2d0] sm:$0xff]  ;;  %v2717_v19 = vpack.c.bf16 %v13113_v14, %v13110_v55  ;;  %v2926_v55 = vld [vmem:[#allocation2 + $0x388] sm:$0xff]  ;;  %v13138_v35 = vld [vmem:[#allocation45_spill] sm:$0xff] }
 0x36f   : > { %3288 = vmatprep.subr.bf16.mxu0 %v2886_v54  ;;  %4060 = vmatprep.subr.bf16.mxu1 %v2888_v22  ;;  %v2910_v54 = vld [vmem:[#allocation2 + $0x308] sm:$0xff]  ;;  %v2912_v22 = vld [vmem:[#allocation2 + $0x318] sm:$0xff] }
 0x370   : > { %v13139_v14 = vld [vmem:[#allocation48_spill] sm:$0xff] }
 0x371   : > { %3134 = vmatmul.mubr.bf16.gmra.mrb[68].mxu0 %v2693_v39  ;;  %3906 = vmatmul.mubr.bf16.gmra.mrb[196].mxu1 %v2693_v39  ;;  %v13116_v39 = vmax.f32 %v13114_v15, %v13115_v38 }
 0x372   : > { %3143 = vmatprep.mubr.bf16.mxu0 %v2702_v7  ;;  %3915 = vmatprep.mubr.bf16.mxu1 %v2702_v7  ;;  %v13119_v7 = vmax.f32 %v13117_v45, %v13118_v37  ;;  %v2927_v45 = vld [vmem:[#allocation2 + $0x390] sm:$0xff]  ;;  %v2930_v37 = vld [vmem:[#allocation2 + $0x3a8] sm:$0xff] }
 0x373   : > { %3289 = vmatpush1.bf16.msra.mxu0 %v2885_v17  ;;  %4061 = vmatpush1.bf16.msra.mxu1 %v2887_v52  ;;  %v2909_v52 = vld [vmem:[#allocation2 + $0x300] sm:$0xff] }
 0x374   : > { %3290 = vmatprep.subr.bf16.mxu0 %v2890_v30  ;;  %4062 = vmatprep.subr.bf16.mxu1 %v2892_v20  ;;  %v2726_v17 = vpack.c.bf16 %v13119_v7, %v13116_v39  ;;  %v2911_v30 = vld [vmem:[#allocation2 + $0x310] sm:$0xff]  ;;  %v2913_v20 = vld [vmem:[#allocation2 + $0x320] sm:$0xff]  ;;  %v2932_v7 = vld [vmem:[#allocation2 + $0x3b8] sm:$0xff] }
 0x375   : > { %v2925_v39 = vld [vmem:[#allocation2 + $0x380] sm:$0xff] }
 0x377   : > { %3291 = vmatpush1.bf16.msra.mxu0 %v2889_v41  ;;  %4063 = vmatpush1.bf16.msra.mxu1 %v2891_v18  ;;  %v2915_v41 = vld [vmem:[#allocation2 + $0x330] sm:$0xff] }
 0x378   : > { %3292 = vmatprep.subr.bf16.mxu0 %v2894_v58  ;;  %4064 = vmatprep.subr.bf16.mxu1 %v2896_v26  ;;  %v13120_v18 = vld [vmem:[#allocation28_spill] sm:$0xff]  ;;  %v13124_v58 = vld [vmem:[#allocation34_spill] sm:$0xff] }
 0x379   : > { %3144 = vmatmul.mubr.bf16.gmra.mrb[72].mxu0 %v2701_v62  ;;  %3916 = vmatmul.mubr.bf16.gmra.mrb[200].mxu1 %v2701_v62  ;;  %v13122_v61 = vmax.f32 %v13120_v18, %v13121_v33  ;;  %v13123_v62 = vld [vmem:[#allocation31_spill] sm:$0xff] }
 0x37a   : > { %3153 = vmatprep.mubr.bf16.mxu0 %v2710_v3  ;;  %3925 = vmatprep.mubr.bf16.mxu1 %v2710_v3  ;;  %v13125_v26 = vmax.f32 %v13123_v62, %v13124_v58  ;;  %v2920_v3 = vld [vmem:[#allocation2 + $0x358] sm:$0xff] }
 0x37b   : > { %3293 = vmatpush1.bf16.msra.mxu0 %v2893_v11  ;;  %4065 = vmatpush1.bf16.msra.mxu1 %v2895_v12  ;;  %v13126_v11 = vld [vmem:[#allocation37_spill] sm:$0xff]  ;;  %v13127_v12 = vld [vmem:[#allocation40_spill] sm:$0xff] }
 0x37c   : > { %3294 = vmatprep.subr.bf16.mxu0 %v2898_v48  ;;  %4066 = vmatprep.subr.bf16.mxu1 %v2900_v36  ;;  %v2725_v8 = vpack.c.bf16 %v13125_v26, %v13122_v61  ;;  %v13128_v48 = vmax.f32 %v13126_v11, %v13127_v12  ;;  %v13129_v36 = vld [vmem:[#allocation41_spill] sm:$0xff]  ;;  %v2934_v61 = vld [vmem:[#allocation2 + $0x3c8] sm:$0xff]  ;;  %v13151_v26 = vld [vmem:[#allocation56_spill] sm:$0xff] }
 0x37d   : > { %v2936_v62 = vld [vmem:[#allocation2 + $0x3d8] sm:$0xff] }
 0x37e   : > { %v13150_v58 = vld [vmem:[#allocation53_spill] sm:$0xff] }
 0x37f   : > { %3295 = vmatpush1.bf16.msra.mxu0 %v2897_v13  ;;  %4067 = vmatpush1.bf16.msra.mxu1 %v2899_v56  ;;  %v13130_v13 = vld [vmem:[#allocation43_spill] sm:$0xff] }
 0x380   : > { %3296 = vmatprep.subr.bf16.mxu0 %v2902_v1  ;;  %4068 = vmatprep.subr.bf16.mxu1 %v2904_v24  ;;  %v13131_v56 = vmax.f32 %v13129_v36, %v13130_v13  ;;  %v2922_v1 = vld [vmem:[#allocation2 + $0x368] sm:$0xff]  ;;  %v2924_v24 = vld [vmem:[#allocation2 + $0x378] sm:$0xff]  ;;  %v2935_v36 = vld [vmem:[#allocation2 + $0x3d0] sm:$0xff] }
 0x381   : > { %3154 = vmatmul.mubr.bf16.gmra.mrb[76].mxu0 %v2709_v46  ;;  %3926 = vmatmul.mubr.bf16.gmra.mrb[204].mxu1 %v2709_v46  ;;  %v2919_v46 = vld [vmem:[#allocation2 + $0x350] sm:$0xff]  ;;  %v2938_v13 = vld [vmem:[#allocation2 + $0x3e8] sm:$0xff] }
 0x382   : > { %3163 = vmatprep.mubr.bf16.mxu0 %v2718_v60  ;;  %3935 = vmatprep.mubr.bf16.mxu1 %v2718_v60  ;;  %v2734_v47 = vpack.c.bf16 %v13131_v56, %v13128_v48  ;;  %v13132_v60 = vld [vmem:[#allocation36_spill] sm:$0xff]  ;;  %v2933_v48 = vld [vmem:[#allocation2 + $0x3c0] sm:$0xff] }
 0x383   : > { %3297 = vmatpush1.bf16.msra.mxu0 %v2901_v5  ;;  %4069 = vmatpush1.bf16.msra.mxu1 %v2903_v6  ;;  %v13133_v5 = vld [vmem:[#allocation38_spill] sm:$0xff]  ;;  %v2940_v56 = vld [vmem:[#allocation2 + $0x3f8] sm:$0xff] }
 0x384   : > { %3298 = vmatprep.subr.bf16.mxu0 %v2906_v63  ;;  %4070 = vmatprep.subr.bf16.mxu1 %v2908_v53  ;;  %v13134_v6 = vmax.f32 %v13132_v60, %v13133_v5  ;;  %v13135_v63 = vld [vmem:[#allocation39_spill] sm:$0xff]  ;;  %v13136_v53 = vld [vmem:[#allocation42_spill] sm:$0xff] }
 0x387   : > { %3299 = vmatpush1.bf16.msra.mxu0 %v2905_v34  ;;  %4071 = vmatpush1.bf16.msra.mxu1 %v2907_v50  ;;  %v13137_v34 = vmax.f32 %v13135_v63, %v13136_v53  ;;  %v2944_v63 = vld [vmem:[#allocation2 + $0x418] sm:$0xff] }
 0x388   : > { %3300 = vmatprep.subr.bf16.mxu0 %v2910_v54  ;;  %4072 = vmatprep.subr.bf16.mxu1 %v2912_v22  ;;  %v13141_v54 = vld [vmem:[#allocation49_spill] sm:$0xff]  ;;  %v13142_v22 = vld [vmem:[#allocation51_spill] sm:$0xff] }
 0x389   : > { %3164 = vmatmul.mubr.bf16.gmra.mrb[80].mxu0 %v2717_v19  ;;  %3936 = vmatmul.mubr.bf16.gmra.mrb[208].mxu1 %v2717_v19  ;;  %v2733_v50 = vpack.c.bf16 %v13137_v34, %v13134_v6  ;;  %v13140_v19 = vmax.f32 %v13138_v35, %v13139_v14  ;;  %v13143_v15 = vmax.f32 %v13141_v54, %v13142_v22  ;;  %v2942_v6 = vld [vmem:[#allocation2 + $0x408] sm:$0xff]  ;;  %v13162_v53 = vld [vmem:[#allocation61_spill] sm:$0xff]  ;;  %v13163_v34 = vld [vmem:[#allocation64_spill] sm:$0xff] }
 0x38a   : > { %3173 = vmatprep.mubr.bf16.mxu0 %v2726_v17  ;;  %3945 = vmatprep.mubr.bf16.mxu1 %v2726_v17  ;;  %v2929_v17 = vld [vmem:[#allocation2 + $0x3a0] sm:$0xff] }
 0x38b   : > { %3301 = vmatpush1.bf16.msra.mxu0 %v2909_v52  ;;  %4073 = vmatpush1.bf16.msra.mxu1 %v2911_v30  ;;  %v2742_v38 = vpack.c.bf16 %v13143_v15, %v13140_v19  ;;  %v2931_v52 = vld [vmem:[#allocation2 + $0x3b0] sm:$0xff]  ;;  %v13169_v54 = vld [vmem:[#allocation62_spill] sm:$0xff] }
 0x38c   : > { %3302 = vmatprep.subr.bf16.mxu0 %v2914_v10  ;;  %4074 = vmatprep.subr.bf16.mxu1 %v2916_v4  ;;  %v13144_v30 = vld [vmem:[#allocation44_spill] sm:$0xff]  ;;  %v13145_v10 = vld [vmem:[#allocation46_spill] sm:$0xff]  ;;  %v13171_v15 = vld [vmem:[#allocation63_spill] sm:$0xff] }
 0x38d   : > { %v13146_v4 = vmax.f32 %v13144_v30, %v13145_v10  ;;  %v13168_v19 = vld [vmem:[#allocation60_spill] sm:$0xff]  ;;  %v13178_v30 = vld [vmem:[#allocation75_spill] sm:$0xff] }
 0x38e   : > { %v13170_v22 = vmax.f32 %v13168_v19, %v13169_v54  ;;  %v13210_v19 = vld [vmem:[#allocation93_spill] sm:$0xff]  ;;  %v13211_v54 = vld [vmem:[#allocation96_spill] sm:$0xff] }
 0x38f   : > { %3303 = vmatpush1.bf16.msra.mxu0 %v2913_v20  ;;  %4075 = vmatpush1.bf16.msra.mxu1 %v2915_v41  ;;  %v13147_v20 = vld [vmem:[#allocation47_spill] sm:$0xff]  ;;  %v13148_v41 = vld [vmem:[#allocation50_spill] sm:$0xff] }
 0x390   : > { %3304 = vmatprep.subr.bf16.mxu0 %v2918_v43  ;;  %4076 = vmatprep.subr.bf16.mxu1 %v2920_v3  ;;  %v13149_v18 = vmax.f32 %v13147_v20, %v13148_v41  ;;  %v13153_v43 = vld [vmem:[#allocation57_spill] sm:$0xff]  ;;  %v13154_v3 = vld [vmem:[#allocation59_spill] sm:$0xff]  ;;  %v13180_v20 = vld [vmem:[#allocation68_spill] sm:$0xff] }
 0x391   : > { %3174 = vmatmul.mubr.bf16.gmra.mrb[84].mxu0 %v2725_v8  ;;  %3946 = vmatmul.mubr.bf16.gmra.mrb[212].mxu1 %v2725_v8  ;;  %v13152_v8 = vmax.f32 %v13150_v58, %v13151_v26  ;;  %v13155_v11 = vmax.f32 %v13153_v43, %v13154_v3  ;;  %v13181_v41 = vld [vmem:[#allocation70_spill] sm:$0xff]  ;;  %v13186_v26 = vld [vmem:[#allocation77_spill] sm:$0xff] }
 0x392   : > { %3183 = vmatprep.mubr.bf16.mxu0 %v2734_v47  ;;  %3955 = vmatprep.mubr.bf16.mxu1 %v2734_v47  ;;  %v2741_v33 = vpack.c.bf16 %v13149_v18, %v13146_v4  ;;  %v2937_v47 = vld [vmem:[#allocation2 + $0x3e0] sm:$0xff]  ;;  %v13182_v18 = vmax.f32 %v13180_v20, %v13181_v41  ;;  %v13223_v41 = vld [vmem:[#allocation104_spill] sm:$0xff] }
 0x393   : > { %3305 = vmatpush1.bf16.msra.mxu0 %v2917_v42  ;;  %4077 = vmatpush1.bf16.msra.mxu1 %v2919_v46  ;;  %v2750_v12 = vpack.c.bf16 %v13155_v11, %v13152_v8  ;;  %v2939_v42 = vld [vmem:[#allocation2 + $0x3f0] sm:$0xff]  ;;  %v13189_v3 = vld [vmem:[#allocation81_spill] sm:$0xff] }
 0x394   : > { %3306 = vmatprep.subr.bf16.mxu0 %v2922_v1  ;;  %4078 = vmatprep.subr.bf16.mxu1 %v2924_v24  ;;  %v13156_v46 = vld [vmem:[#allocation52_spill] sm:$0xff]  ;;  %v13157_v1 = vld [vmem:[#allocation54_spill] sm:$0xff]  ;;  %v13190_v11 = vld [vmem:[#allocation83_spill] sm:$0xff] }
 0x395   : > { %v13158_v24 = vmax.f32 %v13156_v46, %v13157_v1  ;;  %v13187_v8 = vld [vmem:[#allocation80_spill] sm:$0xff]  ;;  %v13222_v20 = vld [vmem:[#allocation101_spill] sm:$0xff] }
 0x396   : > { %v13188_v43 = vmax.f32 %v13186_v26, %v13187_v8  ;;  %v13228_v26 = vld [vmem:[#allocation100_spill] sm:$0xff]  ;;  %v13229_v8 = vld [vmem:[#allocation102_spill] sm:$0xff] }
 0x397   : > { %3307 = vmatpush1.bf16.msra.mxu0 %v2921_v51  ;;  %4079 = vmatpush1.bf16.msra.mxu1 %v2923_v40  ;;  %v13159_v51 = vld [vmem:[#allocation55_spill] sm:$0xff]  ;;  %v13160_v40 = vld [vmem:[#allocation58_spill] sm:$0xff] }
 0x398   : > { %3308 = vmatprep.subr.bf16.mxu0 %v2926_v55  ;;  %4080 = vmatprep.subr.bf16.mxu1 %v2928_v29  ;;  %v13161_v60 = vmax.f32 %v13159_v51, %v13160_v40  ;;  %v13165_v55 = vld [vmem:[#allocation65_spill] sm:$0xff]  ;;  %v13166_v29 = vld [vmem:[#allocation67_spill] sm:$0xff]  ;;  %v13199_v51 = vld [vmem:[#allocation88_spill] sm:$0xff] }
 0x399   : > { %3184 = vmatmul.mubr.bf16.gmra.mrb[88].mxu0 %v2733_v50  ;;  %3956 = vmatmul.mubr.bf16.gmra.mrb[216].mxu1 %v2733_v50  ;;  %v13164_v50 = vmax.f32 %v13162_v53, %v13163_v34  ;;  %v13167_v35 = vmax.f32 %v13165_v55, %v13166_v29  ;;  %v13204_v53 = vld [vmem:[#allocation84_spill] sm:$0xff]  ;;  %v13205_v34 = vld [vmem:[#allocation86_spill] sm:$0xff]  ;;  %v13207_v55 = vld [vmem:[#allocation87_spill] sm:$0xff] }
 0x39a   : > { %3193 = vmatprep.mubr.bf16.mxu0 %v2742_v38  ;;  %3965 = vmatprep.mubr.bf16.mxu1 %v2742_v38  ;;  %v2749_v5 = vpack.c.bf16 %v13161_v60, %v13158_v24  ;;  %v13172_v38 = vld [vmem:[#allocation66_spill] sm:$0xff]  ;;  %v13198_v24 = vld [vmem:[#allocation85_spill] sm:$0xff] }
 0x39b   : > { %3309 = vmatpush1.bf16.msra.mxu0 %v2925_v39  ;;  %4081 = vmatpush1.bf16.msra.mxu1 %v2927_v45  ;;  %v2758_v14 = vpack.c.bf16 %v13167_v35, %v13164_v50  ;;  %v13173_v39 = vmax.f32 %v13171_v15, %v13172_v38  ;;  %v13200_v40 = vmax.f32 %v13198_v24, %v13199_v51  ;;  %v13201_v60 = vld [vmem:[#allocation89_spill] sm:$0xff]  ;;  %v13208_v29 = vld [vmem:[#allocation90_spill] sm:$0xff]  ;;  %v13214_v38 = vld [vmem:[#allocation99_spill] sm:$0xff] }
 0x39c   : > { %3310 = vmatprep.subr.bf16.mxu0 %v2930_v37  ;;  %4082 = vmatprep.subr.bf16.mxu1 %v2932_v7  ;;  %v13174_v37 = vld [vmem:[#allocation69_spill] sm:$0xff]  ;;  %v13175_v7 = vld [vmem:[#allocation72_spill] sm:$0xff]  ;;  %v13206_v50 = vmax.f32 %v13204_v53, %v13205_v34  ;;  %v13209_v35 = vmax.f32 %v13207_v55, %v13208_v29  ;;  %v13241_v51 = vld [vmem:[#allocation110_spill] sm:$0xff] }
 0x39d   : > { %v2757_v45 = vpack.c.bf16 %v13173_v39, %v13170_v22  ;;  %v13212_v22 = vmax.f32 %v13210_v19, %v13211_v54  ;;  %v13213_v15 = vld [vmem:[#allocation97_spill] sm:$0xff]  ;;  %v13240_v24 = vld [vmem:[#allocation108_spill] sm:$0xff]  ;;  %v13246_v53 = vld [vmem:[#allocation123_spill] sm:$0xff] }
 0x39e   : > { %v13215_v39 = vmax.f32 %v13213_v15, %v13214_v38  ;;  %v13247_v34 = vld [vmem:[#allocation128_spill] sm:$0xff]  ;;  %v13249_v55 = vld [vmem:[#allocation129_spill] sm:$0xff]  ;;  %v13250_v29 = vld [vmem:[#allocation131_spill] sm:$0xff] }
 0x39f   : > { %3311 = vmatpush1.bf16.msra.mxu0 %v2929_v17  ;;  %4083 = vmatpush1.bf16.msra.mxu1 %v2931_v52  ;;  %v13176_v17 = vmax.f32 %v13174_v37, %v13175_v7  ;;  %v13177_v52 = vld [vmem:[#allocation73_spill] sm:$0xff]  ;;  %v13216_v37 = vld [vmem:[#allocation92_spill] sm:$0xff]  ;;  %v13217_v7 = vld [vmem:[#allocation94_spill] sm:$0xff] }
 0x3a0   : > { %3312 = vmatprep.subr.bf16.mxu0 %v2934_v61  ;;  %4084 = vmatprep.subr.bf16.mxu1 %v2936_v62  ;;  %v13179_v10 = vmax.f32 %v13177_v52, %v13178_v30  ;;  %v13184_v61 = vld [vmem:[#allocation74_spill] sm:$0xff]  ;;  %v13219_v52 = vld [vmem:[#allocation95_spill] sm:$0xff]  ;;  %v13252_v19 = vld [vmem:[#allocation120_spill] sm:$0xff] }
 0x3a1   : > { %3194 = vmatmul.mubr.bf16.gmra.mrb[92].mxu0 %v2741_v33  ;;  %3966 = vmatmul.mubr.bf16.gmra.mrb[220].mxu1 %v2741_v33  ;;  %v13183_v33 = vld [vmem:[#allocation71_spill] sm:$0xff]  ;;  %v13220_v30 = vld [vmem:[#allocation98_spill] sm:$0xff] }
 0x3a2   : > { %3203 = vmatprep.mubr.bf16.mxu0 %v2750_v12  ;;  %3975 = vmatprep.mubr.bf16.mxu1 %v2750_v12  ;;  %v2766_v4 = vpack.c.bf16 %v13179_v10, %v13176_v17  ;;  %v13185_v62 = vmax.f32 %v13183_v33, %v13184_v61  ;;  %v13191_v12 = vmax.f32 %v13189_v3, %v13190_v11  ;;  %v13225_v33 = vld [vmem:[#allocation105_spill] sm:$0xff]  ;;  %v13226_v61 = vld [vmem:[#allocation107_spill] sm:$0xff]  ;;  %v13232_v11 = vld [vmem:[#allocation106_spill] sm:$0xff] }
 0x3a3   : > { %3313 = vmatpush1.bf16.msra.mxu0 %v2933_v48  ;;  %4085 = vmatpush1.bf16.msra.mxu1 %v2935_v36  ;;  %v13192_v36 = vld [vmem:[#allocation76_spill] sm:$0xff]  ;;  %v13218_v17 = vmax.f32 %v13216_v37, %v13217_v7  ;;  %v13221_v10 = vmax.f32 %v13219_v52, %v13220_v30  ;;  %v13231_v3 = vld [vmem:[#allocation103_spill] sm:$0xff]  ;;  %v13253_v54 = vld [vmem:[#allocation126_spill] sm:$0xff] }
 0x3a4   : > { %3314 = vmatprep.subr.bf16.mxu0 %v2938_v13  ;;  %4086 = vmatprep.subr.bf16.mxu1 %v2940_v56  ;;  %v2765_v58 = vpack.c.bf16 %v13185_v62, %v13182_v18  ;;  %v2774_v48 = vpack.c.bf16 %v13191_v12, %v13188_v43  ;;  %v13193_v13 = vld [vmem:[#allocation78_spill] sm:$0xff]  ;;  %v13224_v18 = vmax.f32 %v13222_v20, %v13223_v41  ;;  %v13255_v15 = vld [vmem:[#allocation127_spill] sm:$0xff]  ;;  %v13259_v52 = vld [vmem:[#allocation144_spill] sm:$0xff] }
 0x3a5   : > { %v13194_v56 = vmax.f32 %v13192_v36, %v13193_v13  ;;  %v13227_v62 = vmax.f32 %v13225_v33, %v13226_v61  ;;  %v13230_v43 = vmax.f32 %v13228_v26, %v13229_v8  ;;  %v13233_v12 = vmax.f32 %v13231_v3, %v13232_v11  ;;  %v13234_v36 = vld [vmem:[#allocation109_spill] sm:$0xff]  ;;  %v13235_v13 = vld [vmem:[#allocation112_spill] sm:$0xff]  ;;  %v13256_v38 = vld [vmem:[#allocation130_spill] sm:$0xff] }
 0x3a6   : > { %v2941_v37 = vld [vmem:[#allocation2 + $0x400] sm:$0xff]  ;;  %v2943_v7 = vld [vmem:[#allocation2 + $0x410] sm:$0xff]  ;;  %v2948_v33 = vld [vmem:[#allocation2 + $0x438] sm:$0xff] }
 0x3a7   : > { %3315 = vmatpush1.bf16.msra.mxu0 %v2937_v47  ;;  %4087 = vmatpush1.bf16.msra.mxu1 %v2939_v42  ;;  %v13195_v47 = vld [vmem:[#allocation79_spill] sm:$0xff]  ;;  %v13196_v42 = vld [vmem:[#allocation82_spill] sm:$0xff]  ;;  %v2952_v26 = vld [vmem:[#allocation2 + $0x458] sm:$0xff] }
 0x3a8   : > { %3477 = vmatprep.subr.bf16.mxu0 %v2942_v6  ;;  %4249 = vmatprep.subr.bf16.mxu1 %v2944_v63  ;;  %v13197_v46 = vmax.f32 %v13195_v47, %v13196_v42  ;;  %v13237_v47 = vld [vmem:[#allocation113_spill] sm:$0xff]  ;;  %v13238_v42 = vld [vmem:[#allocation115_spill] sm:$0xff]  ;;  %v13264_v8 = vld [vmem:[#allocation136_spill] sm:$0xff] }
 0x3a9   : > { %3204 = vmatmul.mubr.bf16.gmra.mrb[96].mxu0 %v2749_v5  ;;  %3976 = vmatmul.mubr.bf16.gmra.mrb[224].mxu1 %v2749_v5  ;;  %v13202_v5 = vld [vmem:[#allocation91_spill] sm:$0xff]  ;;  %v2945_v61 = vld [vmem:[#allocation2 + $0x420] sm:$0xff] }
 0x3aa   : > { %3213 = vmatprep.mubr.bf16.mxu0 %v2758_v14  ;;  %3985 = vmatprep.mubr.bf16.mxu1 %v2758_v14  ;;  %v2773_v1 = vpack.c.bf16 %v13197_v46, %v13194_v56  ;;  %v13203_v6 = vmax.f32 %v13201_v60, %v13202_v5  ;;  %v2781_v14 = vpack.c.bf16 %v13209_v35, %v13206_v50  ;;  %v13243_v60 = vld [vmem:[#allocation111_spill] sm:$0xff]  ;;  %v13244_v5 = vld [vmem:[#allocation114_spill] sm:$0xff] }
 0x3ab   : > { %v13236_v56 = vmax.f32 %v13234_v36, %v13235_v13  ;;  %v13239_v46 = vmax.f32 %v13237_v47, %v13238_v42  ;;  %v13248_v50 = vmax.f32 %v13246_v53, %v13247_v34  ;;  %v13251_v35 = vmax.f32 %v13249_v55, %v13250_v29  ;;  %v13267_v11 = vld [vmem:[#allocation143_spill] sm:$0xff]  ;;  %v13273_v42 = vld [vmem:[#allocation161_spill] sm:$0xff]  ;;  %v13276_v53 = vld [vmem:[#allocation152_spill] sm:$0xff] }
 0x3ac   : > { %v2782_v63 = vpack.c.bf16 %v13203_v6, %v13200_v40  ;;  %v13242_v40 = vmax.f32 %v13240_v24, %v13241_v51  ;;  %v13245_v6 = vmax.f32 %v13243_v60, %v13244_v5  ;;  %v13270_v13 = vld [vmem:[#allocation155_spill] sm:$0xff]  ;;  %v2949_v51 = vld [vmem:[#allocation2 + $0x440] sm:$0xff]  ;;  %v2956_v5 = vld [vmem:[#allocation2 + $0x478] sm:$0xff] }
 0x3ad   : > { %v2954_v60 = vld [vmem:[#allocation2 + $0x468] sm:$0xff] }
 0x3ae   : > { %v13277_v34 = vld [vmem:[#allocation158_spill] sm:$0xff]  ;;  %v13279_v55 = vld [vmem:[#allocation159_spill] sm:$0xff] }
 0x3af   : > { %v13280_v29 = vld [vmem:[#allocation162_spill] sm:$0xff] }
 0x3b1   : > { %3214 = vmatmul.mubr.bf16.gmra.mrb[100].mxu0 %v2757_v45  ;;  %3986 = vmatmul.mubr.bf16.gmra.mrb[228].mxu1 %v2757_v45  ;;  %v2790_v45 = vpack.c.bf16 %v13215_v39, %v13212_v22  ;;  %v13254_v22 = vmax.f32 %v13252_v19, %v13253_v54  ;;  %v13257_v39 = vmax.f32 %v13255_v15, %v13256_v38  ;;  %v2958_v19 = vld [vmem:[#allocation2 + $0x488] sm:$0xff]  ;;  %v2960_v54 = vld [vmem:[#allocation2 + $0x498] sm:$0xff] }
 0x3b2   : > { %3223 = vmatprep.mubr.bf16.mxu0 %v2766_v4  ;;  %3995 = vmatprep.mubr.bf16.mxu1 %v2766_v4  ;;  %v2789_v4 = vpack.c.bf16 %v13221_v10, %v13218_v17  ;;  %v13258_v17 = vld [vmem:[#allocation139_spill] sm:$0xff]  ;;  %v13261_v10 = vld [vmem:[#allocation145_spill] sm:$0xff]  ;;  %v13283_v15 = vld [vmem:[#allocation176_spill] sm:$0xff] }
 0x3b3   : > { %v13260_v30 = vmax.f32 %v13258_v17, %v13259_v52  ;;  %v2957_v17 = vld [vmem:[#allocation2 + $0x480] sm:$0xff]  ;;  %v2959_v52 = vld [vmem:[#allocation2 + $0x490] sm:$0xff] }
 0x3b9   : > { %3224 = vmatmul.mubr.bf16.gmra.mrb[104].mxu0 %v2765_v58  ;;  %3996 = vmatmul.mubr.bf16.gmra.mrb[232].mxu1 %v2765_v58  ;;  %v2798_v58 = vpack.c.bf16 %v13227_v62, %v13224_v18  ;;  %v2946_v18 = vld [vmem:[#allocation2 + $0x428] sm:$0xff]  ;;  %v2947_v62 = vld [vmem:[#allocation2 + $0x430] sm:$0xff] }
 0x3ba   : > { %3233 = vmatprep.mubr.bf16.mxu0 %v2774_v48  ;;  %4005 = vmatprep.mubr.bf16.mxu1 %v2774_v48  ;;  %v2797_v48 = vpack.c.bf16 %v13233_v12, %v13230_v43  ;;  %v13265_v43 = vld [vmem:[#allocation142_spill] sm:$0xff] }
 0x3bb   : > { %v13266_v3 = vmax.f32 %v13264_v8, %v13265_v43  ;;  %v13268_v12 = vld [vmem:[#allocation146_spill] sm:$0xff]  ;;  %v2968_v43 = vld [vmem:[#allocation2 + $0x4d8] sm:$0xff] }
 0x3bc   : > { %v2966_v8 = vld [vmem:[#allocation2 + $0x4c8] sm:$0xff] }
 0x3c1   : > { %3234 = vmatmul.mubr.bf16.gmra.mrb[108].mxu0 %v2773_v1  ;;  %4006 = vmatmul.mubr.bf16.gmra.mrb[236].mxu1 %v2773_v1  ;;  %v2806_v1 = vpack.c.bf16 %v13239_v46, %v13236_v56  ;;  %v13271_v56 = vld [vmem:[#allocation160_spill] sm:$0xff]  ;;  %v13274_v46 = vld [vmem:[#allocation163_spill] sm:$0xff] }
 0x3c2   : > { %3243 = vmatprep.mubr.bf16.mxu0 %v2782_v63  ;;  %4015 = vmatprep.mubr.bf16.mxu1 %v2782_v63  ;;  %v2805_v63 = vpack.c.bf16 %v13245_v6, %v13242_v40  ;;  %v13272_v47 = vmax.f32 %v13270_v13, %v13271_v56  ;;  %v2951_v40 = vld [vmem:[#allocation2 + $0x450] sm:$0xff]  ;;  %v2953_v6 = vld [vmem:[#allocation2 + $0x460] sm:$0xff] }
 0x3c9   : > { %3244 = vmatmul.mubr.bf16.gmra.mrb[112].mxu0 %v2781_v14  ;;  %4016 = vmatmul.mubr.bf16.gmra.mrb[240].mxu1 %v2781_v14  ;;  %v2688_v14 = vpack.c.bf16 %v13251_v35, %v13248_v50  ;;  %v13278_v50 = vmax.f32 %v13276_v53, %v13277_v34  ;;  %v13281_v35 = vmax.f32 %v13279_v55, %v13280_v29  ;;  %v2976_v55 = vld [vmem:[#allocation2 + $0x518] sm:$0xff]  ;;  %v13306_v29 = vld [vmem:[#allocation203_spill] sm:$0xff] }
 0x3ca   : > { %3253 = vmatprep.mubr.bf16.mxu0 %v2790_v45  ;;  %4025 = vmatprep.mubr.bf16.mxu1 %v2790_v45  ;;  %v2687_v45 = vpack.c.bf16 %v13257_v39, %v13254_v22  ;;  %v13282_v22 = vld [vmem:[#allocation171_spill] sm:$0xff]  ;;  %v13285_v39 = vld [vmem:[#allocation177_spill] sm:$0xff] }
 0x3cb   : > { %v13284_v38 = vmax.f32 %v13282_v22, %v13283_v15 }
 0x3d1   : > { %3254 = vmatmul.mubr.bf16.gmra.mrb[116].mxu0 %v2789_v4  ;;  %4026 = vmatmul.mubr.bf16.gmra.mrb[244].mxu1 %v2789_v4  ;;  %v13262_v4 = vld [vmem:[#allocation147_spill] sm:$0xff] }
 0x3d2   : > { %3263 = vmatprep.mubr.bf16.mxu0 %v2798_v58  ;;  %4035 = vmatprep.mubr.bf16.mxu1 %v2798_v58  ;;  %v13263_v20 = vmax.f32 %v13261_v10, %v13262_v4  ;;  %v2950_v58 = vld [vmem:[#allocation2 + $0x448] sm:$0xff]  ;;  %v2964_v10 = vld [vmem:[#allocation2 + $0x4b8] sm:$0xff]  ;;  %v2961_v4 = vld [vmem:[#allocation2 + $0x4a0] sm:$0xff] }
 0x3d4   : > { %v2696_v41 = vpack.c.bf16 %v13263_v20, %v13260_v30  ;;  %v2962_v30 = vld [vmem:[#allocation2 + $0x4a8] sm:$0xff]  ;;  %v2963_v20 = vld [vmem:[#allocation2 + $0x4b0] sm:$0xff] }
 0x3d9   : > { %3264 = vmatmul.mubr.bf16.gmra.mrb[120].mxu0 %v2797_v48  ;;  %4036 = vmatmul.mubr.bf16.gmra.mrb[248].mxu1 %v2797_v48  ;;  %v13269_v48 = vmax.f32 %v13267_v11, %v13268_v12  ;;  %v13295_v11 = vld [vmem:[#allocation192_spill] sm:$0xff] }
 0x3da   : > { %3273 = vmatprep.mubr.bf16.mxu0 %v2806_v1  ;;  %4045 = vmatprep.mubr.bf16.mxu1 %v2806_v1  ;;  %v13275_v1 = vmax.f32 %v13273_v42, %v13274_v46  ;;  %v2967_v42 = vld [vmem:[#allocation2 + $0x4d0] sm:$0xff]  ;;  %v2970_v46 = vld [vmem:[#allocation2 + $0x4e8] sm:$0xff] }
 0x3db   : > { %v2695_v36 = vpack.c.bf16 %v13269_v48, %v13266_v3  ;;  %v13294_v3 = vld [vmem:[#allocation187_spill] sm:$0xff]  ;;  %v13297_v48 = vld [vmem:[#allocation193_spill] sm:$0xff] }
 0x3dc   : > { %v2704_v24 = vpack.c.bf16 %v13275_v1, %v13272_v47  ;;  %v13296_v12 = vmax.f32 %v13294_v3, %v13295_v11  ;;  %v2965_v47 = vld [vmem:[#allocation2 + $0x4c0] sm:$0xff]  ;;  %v2972_v1 = vld [vmem:[#allocation2 + $0x4f8] sm:$0xff] }
 0x3e1   : > { %3274 = vmatmul.mubr.bf16.gmra.mrb[124].mxu0 %v2805_v63  ;;  %4046 = vmatmul.mubr.bf16.gmra.mrb[252].mxu1 %v2805_v63  ;;  %v2955_v63 = vld [vmem:[#allocation2 + $0x470] sm:$0xff] }
 0x3e2   : > { %3316 = vmatprep.mubr.bf16.mxu0 %v2688_v14  ;;  %4088 = vmatprep.mubr.bf16.mxu1 %v2688_v14  ;;  %v2703_v14 = vpack.c.bf16 %v13281_v35, %v13278_v50  ;;  %v2974_v50 = vld [vmem:[#allocation2 + $0x508] sm:$0xff]  ;;  %v13307_v35 = vld [vmem:[#allocation208_spill] sm:$0xff] }
 0x3e9   : > { %3317 = vmatmul.mubr.bf16.vlgmr.msra.gmra.mrb[64].mxu0 %v2687_v45  ;;  %4089 = vmatmul.mubr.bf16.vlgmr.msra.gmra.mrb[192].mxu1 %v2687_v45  ;;  %v13286_v45 = vld [vmem:[#allocation179_spill] sm:$0xff] }
 0x3ea   : > { %3478 = vmatpush1.bf16.msra.mxu0 %v2941_v37  ;;  %4250 = vmatpush1.bf16.msra.mxu1 %v2943_v7  ;;  %v13287_v37 = vmax.f32 %v13285_v39, %v13286_v45  ;;  %v2975_v39 = vld [vmem:[#allocation2 + $0x510] sm:$0xff]  ;;  %v2978_v45 = vld [vmem:[#allocation2 + $0x528] sm:$0xff] }
 0x3eb   : > { %3326 = vmatprep.mubr.bf16.mxu0 %v2696_v41  ;;  %4098 = vmatprep.mubr.bf16.mxu1 %v2696_v41  ;;  %v13288_v41 = vld [vmem:[#allocation168_spill] sm:$0xff] }
 0x3ec   : > { %3479 = vmatprep.subr.bf16.mxu0 %v2946_v18  ;;  %4251 = vmatprep.subr.bf16.mxu1 %v2948_v33  ;;  %v2712_v7 = vpack.c.bf16 %v13287_v37, %v13284_v38  ;;  %v13289_v18 = vld [vmem:[#allocation174_spill] sm:$0xff]  ;;  %v2980_v37 = vld [vmem:[#allocation2 + $0x538] sm:$0xff] }
 0x3ed   : > { %v13290_v33 = vmax.f32 %v13288_v41, %v13289_v18  ;;  %v2973_v38 = vld [vmem:[#allocation2 + $0x500] sm:$0xff] }
 0x3ee   : > { %3480 = vmatpush1.bf16.msra.mxu0 %v2945_v61  ;;  %4252 = vmatpush1.bf16.msra.mxu1 %v2947_v62  ;;  %v13291_v61 = vld [vmem:[#allocation175_spill] sm:$0xff]  ;;  %v13292_v62 = vld [vmem:[#allocation178_spill] sm:$0xff] }
 0x3ef   : > { %3481 = vmatprep.subr.bf16.mxu0 %v2950_v58  ;;  %4253 = vmatprep.subr.bf16.mxu1 %v2952_v26  ;;  %v13293_v58 = vmax.f32 %v13291_v61, %v13292_v62  ;;  %v2984_v61 = vld [vmem:[#allocation2 + $0x558] sm:$0xff]  ;;  %v13318_v62 = vld [vmem:[#allocation219_spill] sm:$0xff] }
 0x3f1   : > { %3327 = vmatmul.mubr.bf16.gmra.mrb[68].mxu0 %v2695_v36  ;;  %4099 = vmatmul.mubr.bf16.gmra.mrb[196].mxu1 %v2695_v36  ;;  %v2711_v26 = vpack.c.bf16 %v13293_v58, %v13290_v33  ;;  %v13298_v36 = vld [vmem:[#allocation195_spill] sm:$0xff]  ;;  %v13319_v58 = vld [vmem:[#allocation224_spill] sm:$0xff] }
 0x3f2   : > { %3336 = vmatprep.mubr.bf16.mxu0 %v2704_v24  ;;  %4108 = vmatprep.mubr.bf16.mxu1 %v2704_v24  ;;  %v13299_v13 = vmax.f32 %v13297_v48, %v13298_v36  ;;  %v2969_v24 = vld [vmem:[#allocation2 + $0x4e0] sm:$0xff]  ;;  %v2982_v33 = vld [vmem:[#allocation2 + $0x548] sm:$0xff]  ;;  %v2983_v48 = vld [vmem:[#allocation2 + $0x550] sm:$0xff] }
 0x3f3   : > { %3482 = vmatpush1.bf16.msra.mxu0 %v2949_v51  ;;  %4254 = vmatpush1.bf16.msra.mxu1 %v2951_v40  ;;  %v2971_v51 = vld [vmem:[#allocation2 + $0x4f0] sm:$0xff]  ;;  %v2986_v36 = vld [vmem:[#allocation2 + $0x568] sm:$0xff] }
 0x3f4   : > { %3483 = vmatprep.subr.bf16.mxu0 %v2954_v60  ;;  %4255 = vmatprep.subr.bf16.mxu1 %v2956_v5  ;;  %v2720_v56 = vpack.c.bf16 %v13299_v13, %v13296_v12  ;;  %v13300_v40 = vld [vmem:[#allocation184_spill] sm:$0xff]  ;;  %v13301_v60 = vld [vmem:[#allocation190_spill] sm:$0xff] }
 0x3f5   : > { %v13302_v5 = vmax.f32 %v13300_v40, %v13301_v60  ;;  %v2981_v12 = vld [vmem:[#allocation2 + $0x540] sm:$0xff]  ;;  %v2988_v13 = vld [vmem:[#allocation2 + $0x578] sm:$0xff] }
 0x3f7   : > { %3484 = vmatpush1.bf16.msra.mxu0 %v2953_v6  ;;  %4256 = vmatpush1.bf16.msra.mxu1 %v2955_v63  ;;  %v13303_v6 = vld [vmem:[#allocation191_spill] sm:$0xff]  ;;  %v13304_v63 = vld [vmem:[#allocation194_spill] sm:$0xff] }
 0x3f8   : > { %3485 = vmatprep.subr.bf16.mxu0 %v2958_v19  ;;  %4257 = vmatprep.subr.bf16.mxu1 %v2960_v54  ;;  %v13305_v53 = vmax.f32 %v13303_v6, %v13304_v63  ;;  %v13309_v19 = vld [vmem:[#allocation209_spill] sm:$0xff]  ;;  %v13310_v54 = vld [vmem:[#allocation211_spill] sm:$0xff] }
 0x3f9   : > { %3337 = vmatmul.mubr.bf16.gmra.mrb[72].mxu0 %v2703_v14  ;;  %4109 = vmatmul.mubr.bf16.gmra.mrb[200].mxu1 %v2703_v14  ;;  %v13308_v14 = vmax.f32 %v13306_v29, %v13307_v35  ;;  %v13311_v22 = vmax.f32 %v13309_v19, %v13310_v54  ;;  %v2992_v6 = vld [vmem:[#allocation2 + $0x598] sm:$0xff]  ;;  %v13330_v63 = vld [vmem:[#allocation235_spill] sm:$0xff] }
 0x3fa   : > { %3346 = vmatprep.mubr.bf16.mxu0 %v2712_v7  ;;  %4118 = vmatprep.mubr.bf16.mxu1 %v2712_v7  ;;  %v2719_v34 = vpack.c.bf16 %v13305_v53, %v13302_v5  ;;  %v2977_v7 = vld [vmem:[#allocation2 + $0x520] sm:$0xff]  ;;  %v2990_v5 = vld [vmem:[#allocation2 + $0x588] sm:$0xff]  ;;  %v13331_v53 = vld [vmem:[#allocation240_spill] sm:$0xff] }
 0x3fb   : > { %3486 = vmatpush1.bf16.msra.mxu0 %v2957_v17  ;;  %4258 = vmatpush1.bf16.msra.mxu1 %v2959_v52  ;;  %v2728_v15 = vpack.c.bf16 %v13311_v22, %v13308_v14  ;;  %v2979_v17 = vld [vmem:[#allocation2 + $0x530] sm:$0xff]  ;;  %v2989_v14 = vld [vmem:[#allocation2 + $0x580] sm:$0xff]  ;;  %v2994_v54 = vld [vmem:[#allocation2 + $0x5a8] sm:$0xff] }
 0x3fc   : > { %3487 = vmatprep.subr.bf16.mxu0 %v2962_v30  ;;  %4259 = vmatprep.subr.bf16.mxu1 %v2964_v10  ;;  %v13312_v52 = vld [vmem:[#allocation200_spill] sm:$0xff]  ;;  %v13313_v30 = vld [vmem:[#allocation206_spill] sm:$0xff] }
 0x3fd   : > { %v13314_v10 = vmax.f32 %v13312_v52, %v13313_v30  ;;  %v2991_v19 = vld [vmem:[#allocation2 + $0x590] sm:$0xff]  ;;  %v2996_v22 = vld [vmem:[#allocation2 + $0x5b8] sm:$0xff] }
 0x3ff   : > { %3488 = vmatpush1.bf16.msra.mxu0 %v2961_v4  ;;  %4260 = vmatpush1.bf16.msra.mxu1 %v2963_v20  ;;  %v13315_v4 = vld [vmem:[#allocation207_spill] sm:$0xff]  ;;  %v13316_v20 = vld [vmem:[#allocation210_spill] sm:$0xff] }
 0x400   : > { %3489 = vmatprep.subr.bf16.mxu0 %v2966_v8  ;;  %4261 = vmatprep.subr.bf16.mxu1 %v2968_v43  ;;  %v13317_v41 = vmax.f32 %v13315_v4, %v13316_v20  ;;  %v13321_v8 = vld [vmem:[#allocation225_spill] sm:$0xff]  ;;  %v13322_v43 = vld [vmem:[#allocation227_spill] sm:$0xff] }
 0x401   : > { %3347 = vmatmul.mubr.bf16.gmra.mrb[76].mxu0 %v2711_v26  ;;  %4119 = vmatmul.mubr.bf16.gmra.mrb[204].mxu1 %v2711_v26  ;;  %v13320_v26 = vmax.f32 %v13318_v62, %v13319_v58  ;;  %v13323_v3 = vmax.f32 %v13321_v8, %v13322_v43  ;;  %v3000_v4 = vld [vmem:[#allocation2 + $0x5d8] sm:$0xff]  ;;  %v13342_v20 = vld [vmem:[#allocation251_spill] sm:$0xff] }
 0x402   : > { %3356 = vmatprep.mubr.bf16.mxu0 %v2720_v56  ;;  %4128 = vmatprep.mubr.bf16.mxu1 %v2720_v56  ;;  %v2727_v18 = vpack.c.bf16 %v13317_v41, %v13314_v10  ;;  %v2985_v56 = vld [vmem:[#allocation2 + $0x560] sm:$0xff]  ;;  %v2998_v10 = vld [vmem:[#allocation2 + $0x5c8] sm:$0xff]  ;;  %v13343_v41 = vld [vmem:[#allocation256_spill] sm:$0xff] }
 0x403   : > { %3490 = vmatpush1.bf16.msra.mxu0 %v2965_v47  ;;  %4262 = vmatpush1.bf16.msra.mxu1 %v2967_v42  ;;  %v2736_v11 = vpack.c.bf16 %v13323_v3, %v13320_v26  ;;  %v2987_v47 = vld [vmem:[#allocation2 + $0x570] sm:$0xff]  ;;  %v2997_v26 = vld [vmem:[#allocation2 + $0x5c0] sm:$0xff]  ;;  %v3002_v43 = vld [vmem:[#allocation2 + $0x5e8] sm:$0xff] }
 0x404   : > { %3491 = vmatprep.subr.bf16.mxu0 %v2970_v46  ;;  %4263 = vmatprep.subr.bf16.mxu1 %v2972_v1  ;;  %v13324_v42 = vld [vmem:[#allocation216_spill] sm:$0xff]  ;;  %v13325_v46 = vld [vmem:[#allocation222_spill] sm:$0xff] }
 0x405   : > { %v13326_v1 = vmax.f32 %v13324_v42, %v13325_v46  ;;  %v2999_v8 = vld [vmem:[#allocation2 + $0x5d0] sm:$0xff]  ;;  %v3004_v3 = vld [vmem:[#allocation2 + $0x5f8] sm:$0xff] }
 0x407   : > { %3492 = vmatpush1.bf16.msra.mxu0 %v2969_v24  ;;  %4264 = vmatpush1.bf16.msra.mxu1 %v2971_v51  ;;  %v13327_v24 = vld [vmem:[#allocation223_spill] sm:$0xff]  ;;  %v13328_v51 = vld [vmem:[#allocation226_spill] sm:$0xff] }
 0x408   : > { %3493 = vmatprep.subr.bf16.mxu0 %v2974_v50  ;;  %4265 = vmatprep.subr.bf16.mxu1 %v2976_v55  ;;  %v13329_v40 = vmax.f32 %v13327_v24, %v13328_v51  ;;  %v13333_v50 = vld [vmem:[#allocation241_spill] sm:$0xff]  ;;  %v13334_v55 = vld [vmem:[#allocation243_spill] sm:$0xff] }
 0x409   : > { %3357 = vmatmul.mubr.bf16.gmra.mrb[80].mxu0 %v2719_v34  ;;  %4129 = vmatmul.mubr.bf16.gmra.mrb[208].mxu1 %v2719_v34  ;;  %v13332_v34 = vmax.f32 %v13330_v63, %v13331_v53  ;;  %v13335_v29 = vmax.f32 %v13333_v50, %v13334_v55  ;;  %v3008_v24 = vld [vmem:[#allocation2 + $0x618] sm:$0xff]  ;;  %v13354_v51 = vld [vmem:[#allocation267_spill] sm:$0xff]  ;;  %v13361_v50 = vld [vmem:[#allocation270_spill] sm:$0xff] }
 0x40a   : > { %3366 = vmatprep.mubr.bf16.mxu0 %v2728_v15  ;;  %4138 = vmatprep.mubr.bf16.mxu1 %v2728_v15  ;;  %v2735_v60 = vpack.c.bf16 %v13329_v40, %v13326_v1  ;;  %v2993_v15 = vld [vmem:[#allocation2 + $0x5a0] sm:$0xff]  ;;  %v3006_v1 = vld [vmem:[#allocation2 + $0x608] sm:$0xff]  ;;  %v13355_v40 = vld [vmem:[#allocation272_spill] sm:$0xff] }
 0x40b   : > { %3494 = vmatpush1.bf16.msra.mxu0 %v2973_v38  ;;  %4266 = vmatpush1.bf16.msra.mxu1 %v2975_v39  ;;  %v2744_v35 = vpack.c.bf16 %v13335_v29, %v13332_v34  ;;  %v2995_v38 = vld [vmem:[#allocation2 + $0x5b0] sm:$0xff] }
 0x40c   : > { %3495 = vmatprep.subr.bf16.mxu0 %v2978_v45  ;;  %4267 = vmatprep.subr.bf16.mxu1 %v2980_v37  ;;  %v13336_v39 = vld [vmem:[#allocation232_spill] sm:$0xff]  ;;  %v13337_v45 = vld [vmem:[#allocation238_spill] sm:$0xff]  ;;  %v13363_v29 = vld [vmem:[#allocation271_spill] sm:$0xff] }
 0x40d   : > { %v13338_v37 = vmax.f32 %v13336_v39, %v13337_v45  ;;  %v13360_v34 = vld [vmem:[#allocation264_spill] sm:$0xff]  ;;  %v13370_v39 = vld [vmem:[#allocation291_spill] sm:$0xff] }
 0x40e   : > { %v13362_v55 = vmax.f32 %v13360_v34, %v13361_v50  ;;  %v13402_v34 = vld [vmem:[#allocation331_spill] sm:$0xff]  ;;  %v13403_v50 = vld [vmem:[#allocation336_spill] sm:$0xff] }
 0x40f   : > { %3496 = vmatpush1.bf16.msra.mxu0 %v2977_v7  ;;  %4268 = vmatpush1.bf16.msra.mxu1 %v2979_v17  ;;  %v13339_v7 = vld [vmem:[#allocation239_spill] sm:$0xff]  ;;  %v13340_v17 = vld [vmem:[#allocation242_spill] sm:$0xff] }
 0x410   : > { %3497 = vmatprep.subr.bf16.mxu0 %v2982_v33  ;;  %4269 = vmatprep.subr.bf16.mxu1 %v2984_v61  ;;  %v13341_v52 = vmax.f32 %v13339_v7, %v13340_v17  ;;  %v13345_v33 = vld [vmem:[#allocation257_spill] sm:$0xff]  ;;  %v13346_v61 = vld [vmem:[#allocation259_spill] sm:$0xff]  ;;  %v13372_v7 = vld [vmem:[#allocation280_spill] sm:$0xff] }
 0x411   : > { %3367 = vmatmul.mubr.bf16.gmra.mrb[84].mxu0 %v2727_v18  ;;  %4139 = vmatmul.mubr.bf16.gmra.mrb[212].mxu1 %v2727_v18  ;;  %v13344_v18 = vmax.f32 %v13342_v20, %v13343_v41  ;;  %v13347_v62 = vmax.f32 %v13345_v33, %v13346_v61  ;;  %v13373_v17 = vld [vmem:[#allocation286_spill] sm:$0xff]  ;;  %v13378_v41 = vld [vmem:[#allocation299_spill] sm:$0xff]  ;;  %v13381_v61 = vld [vmem:[#allocation305_spill] sm:$0xff] }
 0x412   : > { %3376 = vmatprep.mubr.bf16.mxu0 %v2736_v11  ;;  %4148 = vmatprep.mubr.bf16.mxu1 %v2736_v11  ;;  %v2743_v30 = vpack.c.bf16 %v13341_v52, %v13338_v37  ;;  %v3001_v11 = vld [vmem:[#allocation2 + $0x5e0] sm:$0xff]  ;;  %v13374_v52 = vmax.f32 %v13372_v7, %v13373_v17  ;;  %v13414_v7 = vmax.f32 %v8968_v28, %v8987_v32  ;;  %v13415_v17 = vld [vmem:[#allocation352_spill] sm:$0xff] }
 0x413   : > { %3498 = vmatpush1.bf16.msra.mxu0 %v2981_v12  ;;  %4270 = vmatpush1.bf16.msra.mxu1 %v2983_v48  ;;  %v2752_v58 = vpack.c.bf16 %v13347_v62, %v13344_v18  ;;  %v3003_v12 = vld [vmem:[#allocation2 + $0x5f0] sm:$0xff]  ;;  %v13424_v32 = vmax.f32 %v9056_v9, %v9075_v44  ;;  %v13435_v44 = vld [vmem:[#allocation121_spill] sm:$0xff] }
 0x414   : > { %3499 = vmatprep.subr.bf16.mxu0 %v2986_v36  ;;  %4271 = vmatprep.subr.bf16.mxu1 %v2988_v13  ;;  %v13348_v48 = vld [vmem:[#allocation248_spill] sm:$0xff]  ;;  %v13349_v36 = vld [vmem:[#allocation254_spill] sm:$0xff]  ;;  %v13382_v62 = vld [vmem:[#allocation307_spill] sm:$0xff] }
 0x415   : > { %v13350_v13 = vmax.f32 %v13348_v48, %v13349_v36  ;;  %v13379_v18 = vld [vmem:[#allocation304_spill] sm:$0xff] }
 0x416   : > { %v13380_v33 = vmax.f32 %v13378_v41, %v13379_v18  ;;  %v13420_v41 = vld [vmem:[#allocation350_spill] sm:$0xff]  ;;  %v13421_v18 = vld [vmem:[#allocation351_spill] sm:$0xff]  ;;  %v13434_v9 = vld [vmem:[#allocation116_spill] sm:$0xff] }
 0x417   : > { %3500 = vmatpush1.bf16.msra.mxu0 %v2985_v56  ;;  %4272 = vmatpush1.bf16.msra.mxu1 %v2987_v47  ;;  %v13351_v56 = vld [vmem:[#allocation255_spill] sm:$0xff]  ;;  %v13352_v47 = vld [vmem:[#allocation258_spill] sm:$0xff] }
 0x418   : > { %3501 = vmatprep.subr.bf16.mxu0 %v2990_v5  ;;  %4273 = vmatprep.subr.bf16.mxu1 %v2992_v6  ;;  %v13353_v42 = vmax.f32 %v13351_v56, %v13352_v47  ;;  %v13357_v5 = vld [vmem:[#allocation273_spill] sm:$0xff]  ;;  %v13358_v6 = vld [vmem:[#allocation275_spill] sm:$0xff]  ;;  %v13391_v56 = vld [vmem:[#allocation320_spill] sm:$0xff] }
 0x419   : > { %3377 = vmatmul.mubr.bf16.gmra.mrb[88].mxu0 %v2735_v60  ;;  %4149 = vmatmul.mubr.bf16.gmra.mrb[216].mxu1 %v2735_v60  ;;  %v13356_v60 = vmax.f32 %v13354_v51, %v13355_v40  ;;  %v13359_v63 = vmax.f32 %v13357_v5, %v13358_v6  ;;  %v13396_v51 = vld [vmem:[#allocation312_spill] sm:$0xff]  ;;  %v13397_v40 = vld [vmem:[#allocation318_spill] sm:$0xff]  ;;  %v13399_v5 = vld [vmem:[#allocation319_spill] sm:$0xff] }
 0x41a   : > { %3386 = vmatprep.mubr.bf16.mxu0 %v2744_v35  ;;  %4158 = vmatprep.mubr.bf16.mxu1 %v2744_v35  ;;  %v2751_v46 = vpack.c.bf16 %v13353_v42, %v13350_v13  ;;  %v13364_v35 = vld [vmem:[#allocation274_spill] sm:$0xff]  ;;  %v13390_v13 = vld [vmem:[#allocation315_spill] sm:$0xff]  ;;  %v13393_v42 = vld [vmem:[#allocation321_spill] sm:$0xff] }
 0x41b   : > { %3502 = vmatpush1.bf16.msra.mxu0 %v2989_v14  ;;  %4274 = vmatpush1.bf16.msra.mxu1 %v2991_v19  ;;  %v2760_v53 = vpack.c.bf16 %v13359_v63, %v13356_v60  ;;  %v13365_v14 = vmax.f32 %v13363_v29, %v13364_v35  ;;  %v13392_v47 = vmax.f32 %v13390_v13, %v13391_v56  ;;  %v13400_v6 = vld [vmem:[#allocation322_spill] sm:$0xff]  ;;  %v13405_v29 = vld [vmem:[#allocation337_spill] sm:$0xff]  ;;  %v13406_v35 = vld [vmem:[#allocation339_spill] sm:$0xff] }
 0x41c   : > { %3503 = vmatprep.subr.bf16.mxu0 %v2994_v54  ;;  %4275 = vmatprep.subr.bf16.mxu1 %v2996_v22  ;;  %v13366_v54 = vld [vmem:[#allocation283_spill] sm:$0xff]  ;;  %v13367_v22 = vld [vmem:[#allocation288_spill] sm:$0xff]  ;;  %v13398_v60 = vmax.f32 %v13396_v51, %v13397_v40  ;;  %v13401_v63 = vmax.f32 %v13399_v5, %v13400_v6  ;;  %v13437_v13 = vld [vmem:[#allocation118_spill] sm:$0xff] }
 0x41d   : > { %v2759_v19 = vpack.c.bf16 %v13365_v14, %v13362_v55  ;;  %v13404_v55 = vmax.f32 %v13402_v34, %v13403_v50  ;;  %v13407_v14 = vmax.f32 %v13405_v29, %v13406_v35  ;;  %v13444_v51 = vld [vmem:[#allocation141_spill] sm:$0xff]  ;;  %v3010_v5 = vld [vmem:[#allocation2 + $0x628] sm:$0xff] }
 0x41e   : > { %v3012_v6 = vld [vmem:[#allocation2 + $0x638] sm:$0xff]  ;;  %v3014_v34 = vld [vmem:[#allocation2 + $0x648] sm:$0xff] }
 0x41f   : > { %3504 = vmatpush1.bf16.msra.mxu0 %v2993_v15  ;;  %4276 = vmatpush1.bf16.msra.mxu1 %v2995_v38  ;;  %v13368_v15 = vmax.f32 %v13366_v54, %v13367_v22  ;;  %v13369_v38 = vld [vmem:[#allocation289_spill] sm:$0xff]  ;;  %v13408_v54 = vld [vmem:[#allocation328_spill] sm:$0xff]  ;;  %v13409_v22 = vld [vmem:[#allocation334_spill] sm:$0xff] }
 0x420   : > { %3505 = vmatprep.subr.bf16.mxu0 %v2998_v10  ;;  %4277 = vmatprep.subr.bf16.mxu1 %v3000_v4  ;;  %v13371_v45 = vmax.f32 %v13369_v38, %v13370_v39  ;;  %v13376_v10 = vld [vmem:[#allocation290_spill] sm:$0xff]  ;;  %v13411_v38 = vld [vmem:[#allocation335_spill] sm:$0xff]  ;;  %v3016_v50 = vld [vmem:[#allocation2 + $0x658] sm:$0xff] }
 0x421   : > { %3387 = vmatmul.mubr.bf16.gmra.mrb[92].mxu0 %v2743_v30  ;;  %4159 = vmatmul.mubr.bf16.gmra.mrb[220].mxu1 %v2743_v30  ;;  %v13375_v30 = vld [vmem:[#allocation287_spill] sm:$0xff]  ;;  %v13412_v39 = vld [vmem:[#allocation338_spill] sm:$0xff]  ;;  %v13447_v29 = vld [vmem:[#allocation137_spill] sm:$0xff] }
 0x422   : > { %3396 = vmatprep.mubr.bf16.mxu0 %v2752_v58  ;;  %4168 = vmatprep.mubr.bf16.mxu1 %v2752_v58  ;;  %v2768_v37 = vpack.c.bf16 %v13371_v45, %v13368_v15  ;;  %v13377_v4 = vmax.f32 %v13375_v30, %v13376_v10  ;;  %v13383_v58 = vmax.f32 %v13381_v61, %v13382_v62  ;;  %v13417_v10 = vld [vmem:[#allocation344_spill] sm:$0xff] }
 0x423   : > { %3506 = vmatpush1.bf16.msra.mxu0 %v2997_v26  ;;  %4278 = vmatpush1.bf16.msra.mxu1 %v2999_v8  ;;  %v13384_v8 = vld [vmem:[#allocation296_spill] sm:$0xff]  ;;  %v13410_v15 = vmax.f32 %v13408_v54, %v13409_v22  ;;  %v13413_v45 = vmax.f32 %v13411_v38, %v13412_v39  ;;  %v13423_v62 = vmax.f32 %v9033_v49, %v9053_v25  ;;  %v13432_v25 = vld [vmem:[#allocation125_spill] sm:$0xff]  ;;  %v13453_v38 = vld [vmem:[#allocation154_spill] sm:$0xff] }
 0x424   : > { %3507 = vmatprep.subr.bf16.mxu0 %v3002_v43  ;;  %4279 = vmatprep.subr.bf16.mxu1 %v3004_v3  ;;  %v2767_v20 = vpack.c.bf16 %v13377_v4, %v13374_v52  ;;  %v2776_v26 = vpack.c.bf16 %v13383_v58, %v13380_v33  ;;  %v13385_v43 = vld [vmem:[#allocation302_spill] sm:$0xff]  ;;  %v13416_v52 = vmax.f32 %v8990_v27, %v13415_v17  ;;  %v13418_v4 = vld [vmem:[#allocation349_spill] sm:$0xff] }
 0x425   : > { %v13386_v3 = vmax.f32 %v13384_v8, %v13385_v43  ;;  %v13422_v33 = vmax.f32 %v13420_v41, %v13421_v18  ;;  %v2808_v28 = vpack.c.bf16 %v13424_v32, %v13423_v62  ;;  %v13425_v27 = vmax.f32 %v9023_v23, %v9043_v0  ;;  %v13426_v58 = vld [vmem:[#allocation361_spill] sm:$0xff]  ;;  %v13438_v23 = vld [vmem:[#allocation124_spill] sm:$0xff]  ;;  %v13461_v62 = vld [vmem:[#allocation150_spill] sm:$0xff] }
 0x426   : > { %v2800_v30 = vpack.c.bf16 %v13416_v52, %v13414_v7  ;;  %v13428_v43 = vld [vmem:[#allocation117_spill] sm:$0xff]  ;;  %v13439_v0 = vmax.f32 %v13437_v13, %v13438_v23  ;;  %v3019_v41 = vld [vmem:[#allocation2 + $0x670] sm:$0xff] }
 0x427   : > { %3508 = vmatpush1.bf16.msra.mxu0 %v3001_v11  ;;  %4280 = vmatpush1.bf16.msra.mxu1 %v3003_v12  ;;  %v13387_v11 = vld [vmem:[#allocation303_spill] sm:$0xff]  ;;  %v13388_v12 = vld [vmem:[#allocation306_spill] sm:$0xff]  ;;  %v13458_v18 = vld [vmem:[#allocation148_spill] sm:$0xff] }
 0x428   : > { %3670 = vmatprep.subr.bf16.mxu0 %v3006_v1  ;;  %4442 = vmatprep.subr.bf16.mxu1 %v3008_v24  ;;  %v13389_v48 = vmax.f32 %v13387_v11, %v13388_v12  ;;  %v13431_v12 = vld [vmem:[#allocation119_spill] sm:$0xff]  ;;  %v3013_v52 = vld [vmem:[#allocation2 + $0x640] sm:$0xff]  ;;  %v13462_v32 = vld [vmem:[#allocation156_spill] sm:$0xff] }
 0x429   : > { %3397 = vmatmul.mubr.bf16.gmra.mrb[96].mxu0 %v2751_v46  ;;  %4169 = vmatmul.mubr.bf16.gmra.mrb[224].mxu1 %v2751_v46  ;;  %v13394_v46 = vld [vmem:[#allocation323_spill] sm:$0xff]  ;;  %v13433_v49 = vmax.f32 %v13431_v12, %v13432_v25  ;;  %v13468_v12 = vld [vmem:[#allocation173_spill] sm:$0xff] }
 0x42a   : > { %3406 = vmatprep.mubr.bf16.mxu0 %v2760_v53  ;;  %4178 = vmatprep.mubr.bf16.mxu1 %v2760_v53  ;;  %v2775_v36 = vpack.c.bf16 %v13389_v48, %v13386_v3  ;;  %v13395_v1 = vmax.f32 %v13393_v42, %v13394_v46  ;;  %v2783_v53 = vpack.c.bf16 %v13401_v63, %v13398_v60  ;;  %v13429_v3 = vld [vmem:[#allocation122_spill] sm:$0xff]  ;;  %v13440_v42 = vld [vmem:[#allocation133_spill] sm:$0xff]  ;;  %v3027_v23 = vld [vmem:[#allocation2 + $0x6b0] sm:$0xff] }
 0x42b   : > { %v13430_v11 = vmax.f32 %v13428_v43, %v13429_v3  ;;  %v13441_v46 = vld [vmem:[#allocation138_spill] sm:$0xff] }
 0x42c   : > { %v2784_v24 = vpack.c.bf16 %v13395_v1, %v13392_v47  ;;  %v3007_v47 = vld [vmem:[#allocation2 + $0x610] sm:$0xff]  ;;  %v13442_v1 = vmax.f32 %v13440_v42, %v13441_v46  ;;  %v3009_v63 = vld [vmem:[#allocation2 + $0x620] sm:$0xff] }
 0x42d   : > { %v2690_v48 = vpack.c.bf16 %v13433_v49, %v13430_v11  ;;  %v13465_v43 = vld [vmem:[#allocation170_spill] sm:$0xff]  ;;  %v13467_v11 = vld [vmem:[#allocation167_spill] sm:$0xff]  ;;  %v13474_v42 = vld [vmem:[#allocation172_spill] sm:$0xff] }
 0x42e   : > { %v13469_v25 = vmax.f32 %v13467_v11, %v13468_v12  ;;  %v3025_v13 = vld [vmem:[#allocation2 + $0x6a0] sm:$0xff] }
 0x431   : > { %3407 = vmatmul.mubr.bf16.gmra.mrb[100].mxu0 %v2759_v19  ;;  %4179 = vmatmul.mubr.bf16.gmra.mrb[228].mxu1 %v2759_v19  ;;  %v2792_v19 = vpack.c.bf16 %v13407_v14, %v13404_v55  ;;  %v13446_v55 = vld [vmem:[#allocation132_spill] sm:$0xff]  ;;  %v13449_v14 = vld [vmem:[#allocation134_spill] sm:$0xff] }
 0x432   : > { %3416 = vmatprep.mubr.bf16.mxu0 %v2768_v37  ;;  %4188 = vmatprep.mubr.bf16.mxu1 %v2768_v37  ;;  %v2791_v37 = vpack.c.bf16 %v13413_v45, %v13410_v15  ;;  %v13448_v35 = vmax.f32 %v13446_v55, %v13447_v29  ;;  %v13452_v15 = vld [vmem:[#allocation149_spill] sm:$0xff]  ;;  %v13455_v45 = vld [vmem:[#allocation151_spill] sm:$0xff] }
 0x433   : > { %v13454_v39 = vmax.f32 %v13452_v15, %v13453_v38  ;;  %v3031_v55 = vld [vmem:[#allocation2 + $0x6d0] sm:$0xff]  ;;  %v3034_v29 = vld [vmem:[#allocation2 + $0x6e8] sm:$0xff] }
 0x434   : > { %v13485_v38 = vld [vmem:[#allocation182_spill] sm:$0xff] }
 0x439   : > { %3417 = vmatmul.mubr.bf16.gmra.mrb[104].mxu0 %v2767_v20  ;;  %4189 = vmatmul.mubr.bf16.gmra.mrb[232].mxu1 %v2767_v20  ;;  %v13419_v20 = vmax.f32 %v13417_v10, %v13418_v4  ;;  %v3018_v10 = vld [vmem:[#allocation2 + $0x668] sm:$0xff]  ;;  %v3020_v4 = vld [vmem:[#allocation2 + $0x678] sm:$0xff] }
 0x43a   : > { %3426 = vmatprep.mubr.bf16.mxu0 %v2776_v26  ;;  %4198 = vmatprep.mubr.bf16.mxu1 %v2776_v26  ;;  %v13427_v26 = vmax.f32 %v9046_v59, %v13426_v58  ;;  %v3005_v59 = vld [vmem:[#allocation2 + $0x600] sm:$0xff]  ;;  %v3022_v58 = vld [vmem:[#allocation2 + $0x688] sm:$0xff] }
 0x43b   : > { %v2799_v61 = vpack.c.bf16 %v13422_v33, %v13419_v20  ;;  %v3017_v20 = vld [vmem:[#allocation2 + $0x660] sm:$0xff] }
 0x43c   : > { %v2807_v8 = vpack.c.bf16 %v13427_v26, %v13425_v27  ;;  %v13459_v33 = vld [vmem:[#allocation153_spill] sm:$0xff] }
 0x43d   : > { %v3024_v26 = vld [vmem:[#allocation2 + $0x698] sm:$0xff] }
 0x441   : > { %3427 = vmatmul.mubr.bf16.gmra.mrb[108].mxu0 %v2775_v36  ;;  %4199 = vmatmul.mubr.bf16.gmra.mrb[236].mxu1 %v2775_v36  ;;  %v13436_v36 = vmax.f32 %v13434_v9, %v13435_v44  ;;  %v3023_v9 = vld [vmem:[#allocation2 + $0x690] sm:$0xff]  ;;  %v3026_v44 = vld [vmem:[#allocation2 + $0x6a8] sm:$0xff] }
 0x442   : > { %3436 = vmatprep.mubr.bf16.mxu0 %v2784_v24  ;;  %4208 = vmatprep.mubr.bf16.mxu1 %v2784_v24  ;;  %v13443_v24 = vld [vmem:[#allocation135_spill] sm:$0xff] }
 0x443   : > { %v2689_v56 = vpack.c.bf16 %v13439_v0, %v13436_v36  ;;  %v13445_v40 = vmax.f32 %v13443_v24, %v13444_v51  ;;  %v3028_v36 = vld [vmem:[#allocation2 + $0x6b8] sm:$0xff]  ;;  %v3030_v24 = vld [vmem:[#allocation2 + $0x6c8] sm:$0xff] }
 0x444   : > { %v13470_v0 = vld [vmem:[#allocation164_spill] sm:$0xff] }
 0x445   : > { %v2698_v60 = vpack.c.bf16 %v13445_v40, %v13442_v1  ;;  %v3032_v51 = vld [vmem:[#allocation2 + $0x6d8] sm:$0xff] }
 0x446   : > { %v13476_v40 = vld [vmem:[#allocation181_spill] sm:$0xff] }
 0x449   : > { %3437 = vmatmul.mubr.bf16.gmra.mrb[112].mxu0 %v2783_v53  ;;  %4209 = vmatmul.mubr.bf16.gmra.mrb[240].mxu1 %v2783_v53  ;;  %v3011_v53 = vld [vmem:[#allocation2 + $0x630] sm:$0xff] }
 0x44a   : > { %3446 = vmatprep.mubr.bf16.mxu0 %v2792_v19  ;;  %4218 = vmatprep.mubr.bf16.mxu1 %v2792_v19  ;;  %v13450_v19 = vld [vmem:[#allocation140_spill] sm:$0xff] }
 0x44b   : > { %v13451_v54 = vmax.f32 %v13449_v14, %v13450_v19  ;;  %v3033_v14 = vld [vmem:[#allocation2 + $0x6e0] sm:$0xff]  ;;  %v3035_v19 = vld [vmem:[#allocation2 + $0x6f0] sm:$0xff] }
 0x44d   : > { %v2697_v22 = vpack.c.bf16 %v13451_v54, %v13448_v35  ;;  %v3036_v35 = vld [vmem:[#allocation2 + $0x6f8] sm:$0xff] }
 0x44e   : > { %v13482_v54 = vld [vmem:[#allocation180_spill] sm:$0xff] }
 0x451   : > { %3447 = vmatmul.mubr.bf16.gmra.mrb[116].mxu0 %v2791_v37  ;;  %4219 = vmatmul.mubr.bf16.gmra.mrb[244].mxu1 %v2791_v37  ;;  %v13456_v37 = vld [vmem:[#allocation157_spill] sm:$0xff] }
 0x452   : > { %3456 = vmatprep.mubr.bf16.mxu0 %v2800_v30  ;;  %4228 = vmatprep.mubr.bf16.mxu1 %v2800_v30  ;;  %v13457_v7 = vmax.f32 %v13455_v45, %v13456_v37  ;;  %v3015_v30 = vld [vmem:[#allocation2 + $0x650] sm:$0xff] }
 0x454   : > { %v2706_v17 = vpack.c.bf16 %v13457_v7, %v13454_v39  ;;  %v13486_v39 = vld [vmem:[#allocation188_spill] sm:$0xff]  ;;  %v3038_v7 = vld [vmem:[#allocation2 + $0x708] sm:$0xff] }
 0x455   : > { %v13487_v45 = vmax.f32 %v13485_v38, %v13486_v39  ;;  %v3058_v38 = vld [vmem:[#allocation2 + $0x7a8] sm:$0xff]  ;;  %v3060_v39 = vld [vmem:[#allocation2 + $0x7b8] sm:$0xff] }
 0x459   : > { %3457 = vmatmul.mubr.bf16.gmra.mrb[120].mxu0 %v2799_v61  ;;  %4229 = vmatmul.mubr.bf16.gmra.mrb[248].mxu1 %v2799_v61  ;;  %v13460_v61 = vmax.f32 %v13458_v18, %v13459_v33  ;;  %v3037_v33 = vld [vmem:[#allocation2 + $0x700] sm:$0xff] }
 0x45a   : > { %3466 = vmatprep.mubr.bf16.mxu0 %v2808_v28  ;;  %4238 = vmatprep.mubr.bf16.mxu1 %v2808_v28  ;;  %v13463_v28 = vmax.f32 %v13461_v62, %v13462_v32  ;;  %v3042_v62 = vld [vmem:[#allocation2 + $0x728] sm:$0xff]  ;;  %v3044_v32 = vld [vmem:[#allocation2 + $0x738] sm:$0xff] }
 0x45c   : > { %v2705_v27 = vpack.c.bf16 %v13463_v28, %v13460_v61  ;;  %v3039_v61 = vld [vmem:[#allocation2 + $0x710] sm:$0xff]  ;;  %v3041_v28 = vld [vmem:[#allocation2 + $0x720] sm:$0xff] }
 0x461   : > { %3467 = vmatmul.mubr.bf16.gmra.mrb[124].mxu0 %v2807_v8  ;;  %4239 = vmatmul.mubr.bf16.gmra.mrb[252].mxu1 %v2807_v8  ;;  %v13464_v8 = vld [vmem:[#allocation165_spill] sm:$0xff] }
 0x462   : > { %3509 = vmatprep.mubr.bf16.mxu0 %v2690_v48  ;;  %4281 = vmatprep.mubr.bf16.mxu1 %v2690_v48  ;;  %v13466_v3 = vmax.f32 %v13464_v8, %v13465_v43  ;;  %v3021_v48 = vld [vmem:[#allocation2 + $0x680] sm:$0xff] }
 0x463   : > { %v13497_v43 = vld [vmem:[#allocation198_spill] sm:$0xff] }
 0x464   : > { %v2714_v49 = vpack.c.bf16 %v13469_v25, %v13466_v3  ;;  %v13498_v3 = vld [vmem:[#allocation204_spill] sm:$0xff]  ;;  %v3046_v25 = vld [vmem:[#allocation2 + $0x748] sm:$0xff] }
 0x465   : > { %v13499_v11 = vmax.f32 %v13497_v43, %v13498_v3  ;;  %v3066_v43 = vld [vmem:[#allocation2 + $0x7e8] sm:$0xff]  ;;  %v3068_v3 = vld [vmem:[#allocation2 + $0x7f8] sm:$0xff] }
 0x469   : > { %3510 = vmatmul.mubr.bf16.vlgmr.msra.gmra.mrb[64].mxu0 %v2689_v56  ;;  %4282 = vmatmul.mubr.bf16.vlgmr.msra.gmra.mrb[192].mxu1 %v2689_v56  ;;  %v13471_v56 = vld [vmem:[#allocation169_spill] sm:$0xff] }
 0x46a   : > { %3671 = vmatpush1.bf16.msra.mxu0 %v3005_v59  ;;  %4443 = vmatpush1.bf16.msra.mxu1 %v3007_v47  ;;  %v13472_v59 = vmax.f32 %v13470_v0, %v13471_v56  ;;  %v13473_v47 = vld [vmem:[#allocation166_spill] sm:$0xff] }
 0x46b   : > { %3519 = vmatprep.mubr.bf16.mxu0 %v2698_v60  ;;  %4291 = vmatprep.mubr.bf16.mxu1 %v2698_v60  ;;  %v13475_v46 = vmax.f32 %v13473_v47, %v13474_v42  ;;  %v13477_v60 = vld [vmem:[#allocation186_spill] sm:$0xff]  ;;  %v3052_v42 = vld [vmem:[#allocation2 + $0x778] sm:$0xff] }
 0x46c   : > { %3672 = vmatprep.subr.bf16.mxu0 %v3010_v5  ;;  %4444 = vmatprep.subr.bf16.mxu1 %v3012_v6  ;;  %v13478_v5 = vmax.f32 %v13476_v40, %v13477_v60  ;;  %v13479_v6 = vld [vmem:[#allocation183_spill] sm:$0xff]  ;;  %v3045_v56 = vld [vmem:[#allocation2 + $0x740] sm:$0xff] }
 0x46d   : > { %v2713_v1 = vpack.c.bf16 %v13475_v46, %v13472_v59  ;;  %v3047_v59 = vld [vmem:[#allocation2 + $0x750] sm:$0xff]  ;;  %v3050_v47 = vld [vmem:[#allocation2 + $0x768] sm:$0xff]  ;;  %v3049_v46 = vld [vmem:[#allocation2 + $0x760] sm:$0xff] }
 0x46e   : > { %3673 = vmatpush1.bf16.msra.mxu0 %v3009_v63  ;;  %4445 = vmatpush1.bf16.msra.mxu1 %v3011_v53  ;;  %v13480_v63 = vld [vmem:[#allocation189_spill] sm:$0xff]  ;;  %v13509_v60 = vld [vmem:[#allocation214_spill] sm:$0xff] }
 0x46f   : > { %3674 = vmatprep.subr.bf16.mxu0 %v3014_v34  ;;  %4446 = vmatprep.subr.bf16.mxu1 %v3016_v50  ;;  %v13481_v53 = vmax.f32 %v13479_v6, %v13480_v63  ;;  %v3029_v50 = vld [vmem:[#allocation2 + $0x6c0] sm:$0xff] }
 0x471   : > { %3520 = vmatmul.mubr.bf16.gmra.mrb[68].mxu0 %v2697_v22  ;;  %4292 = vmatmul.mubr.bf16.gmra.mrb[196].mxu1 %v2697_v22  ;;  %v2722_v34 = vpack.c.bf16 %v13481_v53, %v13478_v5  ;;  %v13483_v22 = vld [vmem:[#allocation185_spill] sm:$0xff]  ;;  %v13510_v5 = vld [vmem:[#allocation220_spill] sm:$0xff]  ;;  %v3054_v53 = vld [vmem:[#allocation2 + $0x788] sm:$0xff] }
 0x472   : > { %3529 = vmatprep.mubr.bf16.mxu0 %v2706_v17  ;;  %4301 = vmatprep.mubr.bf16.mxu1 %v2706_v17  ;;  %v13484_v15 = vmax.f32 %v13482_v54, %v13483_v22  ;;  %v3040_v17 = vld [vmem:[#allocation2 + $0x718] sm:$0xff]  ;;  %v13511_v6 = vmax.f32 %v13509_v60, %v13510_v5  ;;  %v3053_v22 = vld [vmem:[#allocation2 + $0x780] sm:$0xff] }
 0x473   : > { %3675 = vmatpush1.bf16.msra.mxu0 %v3013_v52  ;;  %4447 = vmatpush1.bf16.msra.mxu1 %v3015_v30  ;;  %v13488_v52 = vld [vmem:[#allocation197_spill] sm:$0xff]  ;;  %v13489_v30 = vld [vmem:[#allocation202_spill] sm:$0xff]  ;;  %v13546_v60 = vld [vmem:[#allocation268_spill] sm:$0xff] }
 0x474   : > { %3676 = vmatprep.subr.bf16.mxu0 %v3018_v10  ;;  %4448 = vmatprep.subr.bf16.mxu1 %v3020_v4  ;;  %v2721_v37 = vpack.c.bf16 %v13487_v45, %v13484_v15  ;;  %v13490_v10 = vmax.f32 %v13488_v52, %v13489_v30  ;;  %v13491_v4 = vld [vmem:[#allocation199_spill] sm:$0xff]  ;;  %v3057_v45 = vld [vmem:[#allocation2 + $0x7a0] sm:$0xff] }
 0x475   : > { %v3055_v15 = vld [vmem:[#allocation2 + $0x790] sm:$0xff]  ;;  %v13521_v30 = vld [vmem:[#allocation230_spill] sm:$0xff] }
 0x477   : > { %3677 = vmatpush1.bf16.msra.mxu0 %v3017_v20  ;;  %4449 = vmatpush1.bf16.msra.mxu1 %v3019_v41  ;;  %v13492_v20 = vld [vmem:[#allocation205_spill] sm:$0xff] }
 0x478   : > { %3678 = vmatprep.subr.bf16.mxu0 %v3022_v58  ;;  %4450 = vmatprep.subr.bf16.mxu1 %v3024_v26  ;;  %v13493_v41 = vmax.f32 %v13491_v4, %v13492_v20  ;;  %v13494_v58 = vld [vmem:[#allocation196_spill] sm:$0xff]  ;;  %v13495_v26 = vld [vmem:[#allocation201_spill] sm:$0xff] }
 0x479   : > { %3530 = vmatmul.mubr.bf16.gmra.mrb[72].mxu0 %v2705_v27  ;;  %4302 = vmatmul.mubr.bf16.gmra.mrb[200].mxu1 %v2705_v27  ;;  %v3043_v27 = vld [vmem:[#allocation2 + $0x730] sm:$0xff]  ;;  %v13496_v8 = vmax.f32 %v13494_v58, %v13495_v26  ;;  %v3061_v26 = vld [vmem:[#allocation2 + $0x7c0] sm:$0xff] }
 0x47a   : > { %3539 = vmatprep.mubr.bf16.mxu0 %v2714_v49  ;;  %4311 = vmatprep.mubr.bf16.mxu1 %v2714_v49  ;;  %v2730_v18 = vpack.c.bf16 %v13493_v41, %v13490_v10  ;;  %v3048_v49 = vld [vmem:[#allocation2 + $0x758] sm:$0xff]  ;;  %v3062_v41 = vld [vmem:[#allocation2 + $0x7c8] sm:$0xff] }
 0x47b   : > { %3679 = vmatpush1.bf16.msra.mxu0 %v3021_v48  ;;  %4451 = vmatpush1.bf16.msra.mxu1 %v3023_v9  ;;  %v2729_v12 = vpack.c.bf16 %v13499_v11, %v13496_v8  ;;  %v13500_v48 = vld [vmem:[#allocation213_spill] sm:$0xff]  ;;  %v13501_v9 = vld [vmem:[#allocation218_spill] sm:$0xff]  ;;  %v13522_v10 = vld [vmem:[#allocation236_spill] sm:$0xff] }
 0x47c   : > { %3680 = vmatprep.subr.bf16.mxu0 %v3026_v44  ;;  %4452 = vmatprep.subr.bf16.mxu1 %v3028_v36  ;;  %v13502_v44 = vmax.f32 %v13500_v48, %v13501_v9  ;;  %v13503_v36 = vld [vmem:[#allocation215_spill] sm:$0xff]  ;;  %v13523_v4 = vmax.f32 %v13521_v30, %v13522_v10  ;;  %v3065_v11 = vld [vmem:[#allocation2 + $0x7e0] sm:$0xff] }
 0x47d   : > { %v3063_v8 = vld [vmem:[#allocation2 + $0x7d0] sm:$0xff]  ;;  %v13533_v9 = vld [vmem:[#allocation246_spill] sm:$0xff] }
 0x47f   : > { %3681 = vmatpush1.bf16.msra.mxu0 %v3025_v13  ;;  %4453 = vmatpush1.bf16.msra.mxu1 %v3027_v23  ;;  %v13504_v13 = vld [vmem:[#allocation221_spill] sm:$0xff] }
 0x480   : > { %3682 = vmatprep.subr.bf16.mxu0 %v3030_v24  ;;  %4454 = vmatprep.subr.bf16.mxu1 %v3032_v51  ;;  %v13505_v23 = vmax.f32 %v13503_v36, %v13504_v13  ;;  %v13506_v24 = vld [vmem:[#allocation212_spill] sm:$0xff]  ;;  %v13507_v51 = vld [vmem:[#allocation217_spill] sm:$0xff] }
 0x481   : > { %3540 = vmatmul.mubr.bf16.gmra.mrb[76].mxu0 %v2713_v1  ;;  %4312 = vmatmul.mubr.bf16.gmra.mrb[204].mxu1 %v2713_v1  ;;  %v3051_v1 = vld [vmem:[#allocation2 + $0x770] sm:$0xff]  ;;  %v13508_v40 = vmax.f32 %v13506_v24, %v13507_v51  ;;  %v13543_v24 = vld [vmem:[#allocation265_spill] sm:$0xff] }
 0x482   : > { %3549 = vmatprep.mubr.bf16.mxu0 %v2722_v34  ;;  %4321 = vmatprep.mubr.bf16.mxu1 %v2722_v34  ;;  %v2738_v0 = vpack.c.bf16 %v13505_v23, %v13502_v44  ;;  %v3056_v34 = vld [vmem:[#allocation2 + $0x798] sm:$0xff] }
 0x483   : > { %3683 = vmatpush1.bf16.msra.mxu0 %v3029_v50  ;;  %4455 = vmatpush1.bf16.msra.mxu1 %v3031_v55  ;;  %v2737_v63 = vpack.c.bf16 %v13511_v6, %v13508_v40  ;;  %v13512_v50 = vld [vmem:[#allocation229_spill] sm:$0xff]  ;;  %v13513_v55 = vld [vmem:[#allocation234_spill] sm:$0xff]  ;;  %v13534_v44 = vld [vmem:[#allocation252_spill] sm:$0xff] }
 0x484   : > { %3684 = vmatprep.subr.bf16.mxu0 %v3034_v29  ;;  %4456 = vmatprep.subr.bf16.mxu1 %v3036_v35  ;;  %v13514_v29 = vmax.f32 %v13512_v50, %v13513_v55  ;;  %v13515_v35 = vld [vmem:[#allocation231_spill] sm:$0xff]  ;;  %v13535_v36 = vmax.f32 %v13533_v9, %v13534_v44  ;;  %v13536_v23 = vld [vmem:[#allocation261_spill] sm:$0xff]  ;;  %v13545_v40 = vld [vmem:[#allocation262_spill] sm:$0xff] }
 0x485   : > { %v13547_v5 = vmax.f32 %v13545_v40, %v13546_v60  ;;  %v13551_v50 = vld [vmem:[#allocation279_spill] sm:$0xff]  ;;  %v13552_v55 = vld [vmem:[#allocation285_spill] sm:$0xff] }
 0x486   : > { %v13584_v44 = vld [vmem:[#allocation325_spill] sm:$0xff] }
 0x487   : > { %3685 = vmatpush1.bf16.msra.mxu0 %v3033_v14  ;;  %4457 = vmatpush1.bf16.msra.mxu1 %v3035_v19  ;;  %v13516_v14 = vld [vmem:[#allocation237_spill] sm:$0xff] }
 0x488   : > { %3686 = vmatprep.subr.bf16.mxu0 %v3038_v7  ;;  %4458 = vmatprep.subr.bf16.mxu1 %v3040_v17  ;;  %v13517_v19 = vmax.f32 %v13515_v35, %v13516_v14  ;;  %v13518_v7 = vld [vmem:[#allocation228_spill] sm:$0xff]  ;;  %v13519_v17 = vld [vmem:[#allocation233_spill] sm:$0xff] }
 0x489   : > { %3550 = vmatmul.mubr.bf16.gmra.mrb[80].mxu0 %v2721_v37  ;;  %4322 = vmatmul.mubr.bf16.gmra.mrb[208].mxu1 %v2721_v37  ;;  %v3059_v37 = vld [vmem:[#allocation2 + $0x7b0] sm:$0xff]  ;;  %v13520_v52 = vmax.f32 %v13518_v7, %v13519_v17  ;;  %v13596_v60 = vld [vmem:[#allocation341_spill] sm:$0xff] }
 0x48a   : > { %3559 = vmatprep.mubr.bf16.mxu0 %v2730_v18  ;;  %4331 = vmatprep.mubr.bf16.mxu1 %v2730_v18  ;;  %v2746_v54 = vpack.c.bf16 %v13517_v19, %v13514_v29  ;;  %v3064_v18 = vld [vmem:[#allocation2 + $0x7d8] sm:$0xff]  ;;  %v13553_v29 = vmax.f32 %v13551_v50, %v13552_v55  ;;  %v13563_v17 = vld [vmem:[#allocation295_spill] sm:$0xff] }
 0x48b   : > { %3687 = vmatpush1.bf16.msra.mxu0 %v3037_v33  ;;  %4459 = vmatpush1.bf16.msra.mxu1 %v3039_v61  ;;  %v2745_v20 = vpack.c.bf16 %v13523_v4, %v13520_v52  ;;  %v13524_v33 = vld [vmem:[#allocation245_spill] sm:$0xff]  ;;  %v13525_v61 = vld [vmem:[#allocation250_spill] sm:$0xff]  ;;  %v13554_v14 = vld [vmem:[#allocation276_spill] sm:$0xff] }
 0x48c   : > { %3688 = vmatprep.subr.bf16.mxu0 %v3042_v62  ;;  %4460 = vmatprep.subr.bf16.mxu1 %v3044_v32  ;;  %v13526_v62 = vmax.f32 %v13524_v33, %v13525_v61  ;;  %v13527_v32 = vld [vmem:[#allocation247_spill] sm:$0xff]  ;;  %v13555_v19 = vld [vmem:[#allocation281_spill] sm:$0xff]  ;;  %v13566_v4 = vld [vmem:[#allocation292_spill] sm:$0xff] }
 0x48d   : > { %v13564_v52 = vld [vmem:[#allocation301_spill] sm:$0xff]  ;;  %v13570_v33 = vld [vmem:[#allocation300_spill] sm:$0xff] }
 0x48e   : > { %v13565_v30 = vmax.f32 %v13563_v17, %v13564_v52  ;;  %v13602_v55 = vld [vmem:[#allocation340_spill] sm:$0xff]  ;;  %v13614_v52 = vld [vmem:[#allocation353_spill] sm:$0xff] }
 0x48f   : > { %3689 = vmatpush1.bf16.msra.mxu0 %v3041_v28  ;;  %4461 = vmatpush1.bf16.msra.mxu1 %v3043_v27  ;;  %v13528_v28 = vld [vmem:[#allocation253_spill] sm:$0xff] }
 0x490   : > { %3690 = vmatprep.subr.bf16.mxu0 %v3046_v25  ;;  %4462 = vmatprep.subr.bf16.mxu1 %v3048_v49  ;;  %v13529_v27 = vmax.f32 %v13527_v32, %v13528_v28  ;;  %v13530_v25 = vld [vmem:[#allocation244_spill] sm:$0xff]  ;;  %v13531_v49 = vld [vmem:[#allocation249_spill] sm:$0xff]  ;;  %v13573_v28 = vld [vmem:[#allocation314_spill] sm:$0xff] }
 0x491   : > { %3560 = vmatmul.mubr.bf16.gmra.mrb[84].mxu0 %v2729_v12  ;;  %4332 = vmatmul.mubr.bf16.gmra.mrb[212].mxu1 %v2729_v12  ;;  %v3067_v12 = vld [vmem:[#allocation2 + $0x7f0] sm:$0xff]  ;;  %v13532_v48 = vmax.f32 %v13530_v25, %v13531_v49  ;;  %v13572_v32 = vld [vmem:[#allocation309_spill] sm:$0xff]  ;;  %v13581_v25 = vld [vmem:[#allocation310_spill] sm:$0xff] }
 0x492   : > { %3569 = vmatprep.mubr.bf16.mxu0 %v2738_v0  ;;  %4341 = vmatprep.mubr.bf16.mxu1 %v2738_v0  ;;  %v2754_v58 = vpack.c.bf16 %v13529_v27, %v13526_v62  ;;  %v13537_v0 = vld [vmem:[#allocation266_spill] sm:$0xff]  ;;  %v13574_v27 = vmax.f32 %v13572_v32, %v13573_v28  ;;  %v13582_v49 = vld [vmem:[#allocation316_spill] sm:$0xff]  ;;  %v13623_v32 = vld [vmem:[#allocation367_spill] sm:$0xff] }
 0x493   : > { %3691 = vmatpush1.bf16.msra.mxu0 %v3045_v56  ;;  %4463 = vmatpush1.bf16.msra.mxu1 %v3047_v59  ;;  %v2753_v13 = vpack.c.bf16 %v13535_v36, %v13532_v48  ;;  %v13538_v56 = vmax.f32 %v13536_v23, %v13537_v0  ;;  %v13539_v59 = vld [vmem:[#allocation263_spill] sm:$0xff]  ;;  %v13583_v48 = vmax.f32 %v13581_v25, %v13582_v49  ;;  %v13585_v36 = vld [vmem:[#allocation330_spill] sm:$0xff]  ;;  %v13588_v0 = vld [vmem:[#allocation333_spill] sm:$0xff] }
 0x494   : > { %3692 = vmatprep.subr.bf16.mxu0 %v3050_v47  ;;  %4464 = vmatprep.subr.bf16.mxu1 %v3052_v42  ;;  %v13540_v47 = vld [vmem:[#allocation269_spill] sm:$0xff]  ;;  %v13587_v23 = vld [vmem:[#allocation327_spill] sm:$0xff] }
 0x495   : > { %v13541_v42 = vmax.f32 %v13539_v59, %v13540_v47  ;;  %v13590_v47 = vld [vmem:[#allocation324_spill] sm:$0xff]  ;;  %v13624_v28 = vld [vmem:[#allocation369_spill] sm:$0xff]  ;;  %v13632_v49 = vld [vmem:[#allocation371_spill] sm:$0xff] }
 0x497   : > { %3693 = vmatpush1.bf16.msra.mxu0 %v3049_v46  ;;  %4465 = vmatpush1.bf16.msra.mxu1 %v3051_v1  ;;  %v2762_v46 = vpack.c.bf16 %v13541_v42, %v13538_v56  ;;  %v13542_v1 = vld [vmem:[#allocation260_spill] sm:$0xff]  ;;  %v13589_v56 = vmax.f32 %v13587_v23, %v13588_v0  ;;  %v13591_v42 = vld [vmem:[#allocation329_spill] sm:$0xff]  ;;  %v13638_v0 = vld [vmem:[#allocation370_spill] sm:$0xff] }
 0x498   : > { %3694 = vmatprep.subr.bf16.mxu0 %v3054_v53  ;;  %4466 = vmatprep.subr.bf16.mxu1 %v3056_v34  ;;  %v13544_v51 = vmax.f32 %v13542_v1, %v13543_v24  ;;  %v13549_v53 = vld [vmem:[#allocation282_spill] sm:$0xff]  ;;  %v13594_v24 = vld [vmem:[#allocation332_spill] sm:$0xff] }
 0x499   : > { %3570 = vmatmul.mubr.bf16.gmra.mrb[88].mxu0 %v2737_v63  ;;  %4342 = vmatmul.mubr.bf16.gmra.mrb[216].mxu1 %v2737_v63  ;;  %v13548_v63 = vld [vmem:[#allocation277_spill] sm:$0xff]  ;;  %v13593_v1 = vld [vmem:[#allocation326_spill] sm:$0xff] }
 0x49a   : > { %3579 = vmatprep.mubr.bf16.mxu0 %v2746_v54  ;;  %4351 = vmatprep.mubr.bf16.mxu1 %v2746_v54  ;;  %v2761_v6 = vpack.c.bf16 %v13547_v5, %v13544_v51  ;;  %v13550_v34 = vmax.f32 %v13548_v63, %v13549_v53  ;;  %v13556_v54 = vmax.f32 %v13554_v14, %v13555_v19  ;;  %v13597_v5 = vld [vmem:[#allocation346_spill] sm:$0xff]  ;;  %v13599_v63 = vld [vmem:[#allocation343_spill] sm:$0xff]  ;;  %v13600_v53 = vld [vmem:[#allocation348_spill] sm:$0xff] }
 0x49b   : > { %3695 = vmatpush1.bf16.msra.mxu0 %v3053_v22  ;;  %4467 = vmatpush1.bf16.msra.mxu1 %v3055_v15  ;;  %v13557_v22 = vld [vmem:[#allocation278_spill] sm:$0xff]  ;;  %v13558_v15 = vld [vmem:[#allocation284_spill] sm:$0xff]  ;;  %v13595_v51 = vmax.f32 %v13593_v1, %v13594_v24  ;;  %v13606_v19 = vld [vmem:[#allocation347_spill] sm:$0xff] }
 0x49c   : > { %3696 = vmatprep.subr.bf16.mxu0 %v3058_v38  ;;  %4468 = vmatprep.subr.bf16.mxu1 %v3060_v39  ;;  %v2770_v35 = vpack.c.bf16 %v13553_v29, %v13550_v34  ;;  %v13559_v38 = vmax.f32 %v13557_v22, %v13558_v15  ;;  %v13601_v34 = vmax.f32 %v13599_v63, %v13600_v53  ;;  %v13603_v29 = vld [vmem:[#allocation345_spill] sm:$0xff]  ;;  %v13605_v14 = vld [vmem:[#allocation342_spill] sm:$0xff]  ;;  %v13644_v24 = vld [vmem:[#allocation379_spill] sm:$0xff] }
 0x49d   : > { %v13608_v15 = vld [vmem:[#allocation354_spill] sm:$0xff] }
 0x49e   : > { %v2769_v39 = vpack.c.bf16 %v13559_v38, %v13556_v54  ;;  %v13607_v54 = vmax.f32 %v13605_v14, %v13606_v19  ;;  %v13609_v38 = vld [vmem:[#allocation358_spill] sm:$0xff]  ;;  %v13656_v19 = vld [vmem:[#allocation387_spill] sm:$0xff] }
 0x49f   : > { %3697 = vmatpush1.bf16.msra.mxu0 %v3057_v45  ;;  %4469 = vmatpush1.bf16.msra.mxu1 %v3059_v37  ;;  %v13560_v45 = vld [vmem:[#allocation293_spill] sm:$0xff]  ;;  %v13561_v37 = vld [vmem:[#allocation298_spill] sm:$0xff] }
 0x4a0   : > { %3698 = vmatprep.subr.bf16.mxu0 %v3062_v41  ;;  %4470 = vmatprep.subr.bf16.mxu1 %v3064_v18  ;;  %v13562_v7 = vmax.f32 %v13560_v45, %v13561_v37  ;;  %v13569_v18 = vld [vmem:[#allocation294_spill] sm:$0xff]  ;;  %v13611_v45 = vld [vmem:[#allocation356_spill] sm:$0xff] }
 0x4a1   : > { %3580 = vmatmul.mubr.bf16.gmra.mrb[92].mxu0 %v2745_v20  ;;  %4352 = vmatmul.mubr.bf16.gmra.mrb[220].mxu1 %v2745_v20  ;;  %v13567_v20 = vld [vmem:[#allocation297_spill] sm:$0xff]  ;;  %v13571_v61 = vmax.f32 %v13569_v18, %v13570_v33  ;;  %v13612_v37 = vld [vmem:[#allocation360_spill] sm:$0xff]  ;;  %v13620_v33 = vld [vmem:[#allocation363_spill] sm:$0xff] }
 0x4a2   : > { %3589 = vmatprep.mubr.bf16.mxu0 %v2754_v58  ;;  %4361 = vmatprep.mubr.bf16.mxu1 %v2754_v58  ;;  %v2778_v10 = vpack.c.bf16 %v13565_v30, %v13562_v7  ;;  %v13568_v41 = vmax.f32 %v13566_v4, %v13567_v20  ;;  %v13575_v58 = vld [vmem:[#allocation311_spill] sm:$0xff]  ;;  %v13613_v7 = vmax.f32 %v13611_v45, %v13612_v37  ;;  %v13615_v30 = vld [vmem:[#allocation357_spill] sm:$0xff]  ;;  %v13650_v53 = vld [vmem:[#allocation378_spill] sm:$0xff] }
 0x4a3   : > { %3699 = vmatpush1.bf16.msra.mxu0 %v3061_v26  ;;  %4471 = vmatpush1.bf16.msra.mxu1 %v3063_v8  ;;  %v13576_v26 = vld [vmem:[#allocation317_spill] sm:$0xff]  ;;  %v13617_v4 = vld [vmem:[#allocation355_spill] sm:$0xff]  ;;  %v13662_v37 = vld [vmem:[#allocation386_spill] sm:$0xff] }
 0x4a4   : > { %3700 = vmatprep.subr.bf16.mxu0 %v3066_v43  ;;  %4472 = vmatprep.subr.bf16.mxu1 %v3068_v3  ;;  %v2777_v62 = vpack.c.bf16 %v13571_v61, %v13568_v41  ;;  %v13577_v8 = vmax.f32 %v13575_v58, %v13576_v26  ;;  %v13578_v3 = vld [vmem:[#allocation308_spill] sm:$0xff]  ;;  %v13618_v20 = vld [vmem:[#allocation359_spill] sm:$0xff]  ;;  %v13621_v61 = vld [vmem:[#allocation366_spill] sm:$0xff] }
 0x4a5   : > { %v13619_v41 = vmax.f32 %v13617_v4, %v13618_v20  ;;  %v13626_v26 = vld [vmem:[#allocation362_spill] sm:$0xff]  ;;  %v13668_v20 = vld [vmem:[#allocation395_spill] sm:$0xff] }
 0x4a6   : > { %v2786_v43 = vpack.c.bf16 %v13577_v8, %v13574_v27  ;;  %v13625_v27 = vmax.f32 %v13623_v32, %v13624_v28  ;;  %v13627_v8 = vld [vmem:[#allocation364_spill] sm:$0xff]  ;;  %v13674_v28 = vld [vmem:[#allocation394_spill] sm:$0xff] }
 0x4a7   : > { %3701 = vmatpush1.bf16.msra.mxu0 %v3065_v11  ;;  %4473 = vmatpush1.bf16.msra.mxu1 %v3067_v12  ;;  %v13579_v11 = vld [vmem:[#allocation313_spill] sm:$0xff] }
 0x4a8   : > { %v13580_v12 = vmax.f32 %v13578_v3, %v13579_v11  ;;  %v13629_v3 = vld [vmem:[#allocation365_spill] sm:$0xff]  ;;  %v13630_v11 = vld [vmem:[#allocation368_spill] sm:$0xff] }
 0x4a9   : > { %3590 = vmatmul.mubr.bf16.gmra.mrb[96].mxu0 %v2753_v13  ;;  %4362 = vmatmul.mubr.bf16.gmra.mrb[224].mxu1 %v2753_v13  ;;  %v13586_v13 = vmax.f32 %v13584_v44, %v13585_v36  ;;  %v13635_v44 = vld [vmem:[#allocation375_spill] sm:$0xff]  ;;  %v13636_v36 = vld [vmem:[#allocation377_spill] sm:$0xff] }
 0x4aa   : > { %3599 = vmatprep.mubr.bf16.mxu0 %v2762_v46  ;;  %4371 = vmatprep.mubr.bf16.mxu1 %v2762_v46  ;;  %v2785_v9 = vpack.c.bf16 %v13583_v48, %v13580_v12  ;;  %v13592_v46 = vmax.f32 %v13590_v47, %v13591_v42  ;;  %v13631_v12 = vmax.f32 %v13629_v3, %v13630_v11  ;;  %v13633_v48 = vld [vmem:[#allocation374_spill] sm:$0xff]  ;;  %v13641_v47 = vld [vmem:[#allocation373_spill] sm:$0xff]  ;;  %v13642_v42 = vld [vmem:[#allocation376_spill] sm:$0xff] }
 0x4ab   : > { %v2794_v59 = vpack.c.bf16 %v13589_v56, %v13586_v13  ;;  %v13637_v13 = vmax.f32 %v13635_v44, %v13636_v36  ;;  %v13639_v56 = vld [vmem:[#allocation372_spill] sm:$0xff]  ;;  %v13680_v11 = vld [vmem:[#allocation403_spill] sm:$0xff]  ;;  %v13686_v36 = vld [vmem:[#allocation402_spill] sm:$0xff] }
 0x4ac   : > { %v2793_v40 = vpack.c.bf16 %v13595_v51, %v13592_v46  ;;  %v13643_v46 = vmax.f32 %v13641_v47, %v13642_v42  ;;  %v13645_v51 = vld [vmem:[#allocation382_spill] sm:$0xff]  ;;  %v13692_v42 = vld [vmem:[#allocation411_spill] sm:$0xff] }
 0x4b1   : > { %3600 = vmatmul.mubr.bf16.gmra.mrb[100].mxu0 %v2761_v6  ;;  %4372 = vmatmul.mubr.bf16.gmra.mrb[228].mxu1 %v2761_v6  ;;  %v13598_v6 = vmax.f32 %v13596_v60, %v13597_v5  ;;  %v13647_v60 = vld [vmem:[#allocation383_spill] sm:$0xff]  ;;  %v13648_v5 = vld [vmem:[#allocation385_spill] sm:$0xff] }
 0x4b2   : > { %3609 = vmatprep.mubr.bf16.mxu0 %v2770_v35  ;;  %4381 = vmatprep.mubr.bf16.mxu1 %v2770_v35  ;;  %v13604_v35 = vmax.f32 %v13602_v55, %v13603_v29  ;;  %v13653_v55 = vld [vmem:[#allocation381_spill] sm:$0xff]  ;;  %v13654_v29 = vld [vmem:[#allocation384_spill] sm:$0xff] }
 0x4b3   : > { %v2802_v50 = vpack.c.bf16 %v13601_v34, %v13598_v6  ;;  %v13649_v6 = vmax.f32 %v13647_v60, %v13648_v5  ;;  %v13651_v34 = vld [vmem:[#allocation380_spill] sm:$0xff]  ;;  %v13698_v5 = vld [vmem:[#allocation410_spill] sm:$0xff] }
 0x4b4   : > { %v2801_v22 = vpack.c.bf16 %v13607_v54, %v13604_v35  ;;  %v13655_v35 = vmax.f32 %v13653_v55, %v13654_v29  ;;  %v13657_v54 = vld [vmem:[#allocation390_spill] sm:$0xff]  ;;  %v13704_v29 = vld [vmem:[#allocation419_spill] sm:$0xff] }
 0x4b9   : > { %3610 = vmatmul.mubr.bf16.gmra.mrb[104].mxu0 %v2769_v39  ;;  %4382 = vmatmul.mubr.bf16.gmra.mrb[232].mxu1 %v2769_v39  ;;  %v13610_v39 = vmax.f32 %v13608_v15, %v13609_v38  ;;  %v13659_v15 = vld [vmem:[#allocation391_spill] sm:$0xff]  ;;  %v13660_v38 = vld [vmem:[#allocation393_spill] sm:$0xff] }
 0x4ba   : > { %3619 = vmatprep.mubr.bf16.mxu0 %v2778_v10  ;;  %4391 = vmatprep.mubr.bf16.mxu1 %v2778_v10  ;;  %v13616_v10 = vmax.f32 %v13614_v52, %v13615_v30  ;;  %v13665_v52 = vld [vmem:[#allocation389_spill] sm:$0xff]  ;;  %v13666_v30 = vld [vmem:[#allocation392_spill] sm:$0xff] }
 0x4bb   : > { %v2810_v17 = vpack.c.bf16 %v13613_v7, %v13610_v39  ;;  %v13661_v39 = vmax.f32 %v13659_v15, %v13660_v38  ;;  %v13663_v7 = vld [vmem:[#allocation388_spill] sm:$0xff]  ;;  %v13710_v38 = vld [vmem:[#allocation418_spill] sm:$0xff] }
 0x4bc   : > { %v2809_v18 = vpack.c.bf16 %v13619_v41, %v13616_v10  ;;  %v13667_v10 = vmax.f32 %v13665_v52, %v13666_v30  ;;  %v13669_v41 = vld [vmem:[#allocation398_spill] sm:$0xff]  ;;  %v13716_v30 = vld [vmem:[#allocation427_spill] sm:$0xff] }
 0x4c1   : > { %3620 = vmatmul.mubr.bf16.gmra.mrb[108].mxu0 %v2777_v62  ;;  %4392 = vmatmul.mubr.bf16.gmra.mrb[236].mxu1 %v2777_v62  ;;  %v13622_v62 = vmax.f32 %v13620_v33, %v13621_v61  ;;  %v13671_v33 = vld [vmem:[#allocation399_spill] sm:$0xff]  ;;  %v13672_v61 = vld [vmem:[#allocation401_spill] sm:$0xff] }
 0x4c2   : > { %3629 = vmatprep.mubr.bf16.mxu0 %v2786_v43  ;;  %4401 = vmatprep.mubr.bf16.mxu1 %v2786_v43  ;;  %v13628_v43 = vmax.f32 %v13626_v26, %v13627_v8  ;;  %v13677_v26 = vld [vmem:[#allocation397_spill] sm:$0xff]  ;;  %v13678_v8 = vld [vmem:[#allocation400_spill] sm:$0xff] }
 0x4c3   : > { %v2692_v58 = vpack.c.bf16 %v13625_v27, %v13622_v62  ;;  %v13673_v62 = vmax.f32 %v13671_v33, %v13672_v61  ;;  %v13675_v27 = vld [vmem:[#allocation396_spill] sm:$0xff]  ;;  %v13722_v61 = vld [vmem:[#allocation426_spill] sm:$0xff] }
 0x4c4   : > { %v2691_v25 = vpack.c.bf16 %v13631_v12, %v13628_v43  ;;  %v13679_v43 = vmax.f32 %v13677_v26, %v13678_v8  ;;  %v13681_v12 = vld [vmem:[#allocation406_spill] sm:$0xff]  ;;  %v13728_v8 = vld [vmem:[#allocation435_spill] sm:$0xff] }
 0x4c9   : > { %3630 = vmatmul.mubr.bf16.gmra.mrb[112].mxu0 %v2785_v9  ;;  %4402 = vmatmul.mubr.bf16.gmra.mrb[240].mxu1 %v2785_v9  ;;  %v13634_v9 = vmax.f32 %v13632_v49, %v13633_v48  ;;  %v13683_v49 = vld [vmem:[#allocation407_spill] sm:$0xff]  ;;  %v13684_v48 = vld [vmem:[#allocation409_spill] sm:$0xff] }
 0x4ca   : > { %3639 = vmatprep.mubr.bf16.mxu0 %v2794_v59  ;;  %4411 = vmatprep.mubr.bf16.mxu1 %v2794_v59  ;;  %v13640_v59 = vmax.f32 %v13638_v0, %v13639_v56  ;;  %v13689_v0 = vld [vmem:[#allocation405_spill] sm:$0xff]  ;;  %v13690_v56 = vld [vmem:[#allocation408_spill] sm:$0xff] }
 0x4cb   : > { %v2700_v23 = vpack.c.bf16 %v13637_v13, %v13634_v9  ;;  %v13685_v9 = vmax.f32 %v13683_v49, %v13684_v48  ;;  %v13687_v13 = vld [vmem:[#allocation404_spill] sm:$0xff]  ;;  %v13734_v48 = vld [vmem:[#allocation434_spill] sm:$0xff] }
 0x4cc   : > { %v2699_v1 = vpack.c.bf16 %v13643_v46, %v13640_v59  ;;  %v13691_v59 = vmax.f32 %v13689_v0, %v13690_v56  ;;  %v13693_v46 = vld [vmem:[#allocation414_spill] sm:$0xff]  ;;  %v13740_v56 = vld [vmem:[#allocation443_spill] sm:$0xff] }
 0x4d1   : > { %3640 = vmatmul.mubr.bf16.gmra.mrb[116].mxu0 %v2793_v40  ;;  %4412 = vmatmul.mubr.bf16.gmra.mrb[244].mxu1 %v2793_v40  ;;  %v13646_v40 = vmax.f32 %v13644_v24, %v13645_v51  ;;  %v13695_v24 = vld [vmem:[#allocation415_spill] sm:$0xff]  ;;  %v13696_v51 = vld [vmem:[#allocation417_spill] sm:$0xff] }
 0x4d2   : > { %3649 = vmatprep.mubr.bf16.mxu0 %v2802_v50  ;;  %4421 = vmatprep.mubr.bf16.mxu1 %v2802_v50  ;;  %v13652_v50 = vmax.f32 %v13650_v53, %v13651_v34  ;;  %v13701_v53 = vld [vmem:[#allocation413_spill] sm:$0xff]  ;;  %v13702_v34 = vld [vmem:[#allocation416_spill] sm:$0xff] }
 0x4d3   : > { %v2708_v63 = vpack.c.bf16 %v13649_v6, %v13646_v40  ;;  %v13697_v40 = vmax.f32 %v13695_v24, %v13696_v51  ;;  %v13699_v6 = vld [vmem:[#allocation412_spill] sm:$0xff]  ;;  %v13746_v51 = vld [vmem:[#allocation442_spill] sm:$0xff] }
 0x4d4   : > { %v2707_v14 = vpack.c.bf16 %v13655_v35, %v13652_v50  ;;  %v13703_v50 = vmax.f32 %v13701_v53, %v13702_v34  ;;  %v13705_v35 = vld [vmem:[#allocation422_spill] sm:$0xff]  ;;  %v13752_v34 = vld [vmem:[#allocation451_spill] sm:$0xff] }
 0x4d9   : > { %3650 = vmatmul.mubr.bf16.gmra.mrb[120].mxu0 %v2801_v22  ;;  %4422 = vmatmul.mubr.bf16.gmra.mrb[248].mxu1 %v2801_v22  ;;  %v13658_v22 = vmax.f32 %v13656_v19, %v13657_v54  ;;  %v13707_v19 = vld [vmem:[#allocation423_spill] sm:$0xff]  ;;  %v13708_v54 = vld [vmem:[#allocation425_spill] sm:$0xff] }
 0x4da   : > { %3659 = vmatprep.mubr.bf16.mxu0 %v2810_v17  ;;  %4431 = vmatprep.mubr.bf16.mxu1 %v2810_v17  ;;  %v13664_v17 = vmax.f32 %v13662_v37, %v13663_v7  ;;  %v13713_v37 = vld [vmem:[#allocation421_spill] sm:$0xff]  ;;  %v13714_v7 = vld [vmem:[#allocation424_spill] sm:$0xff] }
 0x4db   : > { %v2716_v45 = vpack.c.bf16 %v13661_v39, %v13658_v22  ;;  %v13709_v22 = vmax.f32 %v13707_v19, %v13708_v54  ;;  %v13711_v39 = vld [vmem:[#allocation420_spill] sm:$0xff]  ;;  %v13758_v54 = vld [vmem:[#allocation450_spill] sm:$0xff] }
 0x4dc   : > { %v2715_v4 = vpack.c.bf16 %v13667_v10, %v13664_v17  ;;  %v13715_v17 = vmax.f32 %v13713_v37, %v13714_v7  ;;  %v13717_v10 = vld [vmem:[#allocation430_spill] sm:$0xff]  ;;  %v13764_v7 = vld [vmem:[#allocation459_spill] sm:$0xff] }
 0x4e1   : > { %3660 = vmatmul.mubr.bf16.gmra.mrb[124].mxu0 %v2809_v18  ;;  %4432 = vmatmul.mubr.bf16.gmra.mrb[252].mxu1 %v2809_v18  ;;  %v13670_v18 = vmax.f32 %v13668_v20, %v13669_v41  ;;  %v13719_v20 = vld [vmem:[#allocation431_spill] sm:$0xff]  ;;  %v13720_v41 = vld [vmem:[#allocation433_spill] sm:$0xff] }
 0x4e2   : > { %3702 = vmatprep.mubr.bf16.mxu0 %v2692_v58  ;;  %4474 = vmatprep.mubr.bf16.mxu1 %v2692_v58  ;;  %v13676_v58 = vmax.f32 %v13674_v28, %v13675_v27  ;;  %v13725_v28 = vld [vmem:[#allocation429_spill] sm:$0xff]  ;;  %v13726_v27 = vld [vmem:[#allocation432_spill] sm:$0xff] }
 0x4e3   : > { %v2724_v32 = vpack.c.bf16 %v13673_v62, %v13670_v18  ;;  %v13721_v18 = vmax.f32 %v13719_v20, %v13720_v41  ;;  %v13723_v62 = vld [vmem:[#allocation428_spill] sm:$0xff]  ;;  %v13770_v41 = vld [vmem:[#allocation458_spill] sm:$0xff] }
 0x4e4   : > { %v2723_v3 = vpack.c.bf16 %v13679_v43, %v13676_v58  ;;  %v13727_v58 = vmax.f32 %v13725_v28, %v13726_v27  ;;  %v13729_v43 = vld [vmem:[#allocation438_spill] sm:$0xff]  ;;  %v13776_v27 = vld [vmem:[#allocation467_spill] sm:$0xff] }
 0x4e9   : > { %3703 = vmatmul.mubr.bf16.vlgmr.msra.gmra.mrb[64].mxu0 %v2691_v25  ;;  %4475 = vmatmul.mubr.bf16.vlgmr.msra.gmra.mrb[192].mxu1 %v2691_v25  ;;  %v13682_v25 = vmax.f32 %v13680_v11, %v13681_v12  ;;  %v13731_v11 = vld [vmem:[#allocation439_spill] sm:$0xff]  ;;  %v13732_v12 = vld [vmem:[#allocation441_spill] sm:$0xff] }
 0x4ea   : > { %3712 = vmatprep.mubr.bf16.mxu0 %v2700_v23  ;;  %4484 = vmatprep.mubr.bf16.mxu1 %v2700_v23  ;;  %v13688_v23 = vmax.f32 %v13686_v36, %v13687_v13  ;;  %v13737_v36 = vld [vmem:[#allocation437_spill] sm:$0xff]  ;;  %v13738_v13 = vld [vmem:[#allocation440_spill] sm:$0xff] }
 0x4eb   : > { %v2732_v44 = vpack.c.bf16 %v13685_v9, %v13682_v25  ;;  %v13733_v25 = vmax.f32 %v13731_v11, %v13732_v12  ;;  %v13735_v9 = vld [vmem:[#allocation436_spill] sm:$0xff]  ;;  %v13782_v12 = vld [vmem:[#allocation466_spill] sm:$0xff] }
 0x4ec   : > { %v2731_v47 = vpack.c.bf16 %v13691_v59, %v13688_v23  ;;  %v13739_v23 = vmax.f32 %v13737_v36, %v13738_v13  ;;  %v13741_v59 = vld [vmem:[#allocation446_spill] sm:$0xff]  ;;  %v13788_v13 = vld [vmem:[#allocation477_spill] sm:$0xff] }
 0x4f1   : > { %3713 = vmatmul.mubr.bf16.gmra.mrb[68].mxu0 %v2699_v1  ;;  %4485 = vmatmul.mubr.bf16.gmra.mrb[196].mxu1 %v2699_v1  ;;  %v13694_v1 = vmax.f32 %v13692_v42, %v13693_v46  ;;  %v13743_v42 = vld [vmem:[#allocation447_spill] sm:$0xff]  ;;  %v13744_v46 = vld [vmem:[#allocation449_spill] sm:$0xff] }
 0x4f2   : > { %3722 = vmatprep.mubr.bf16.mxu0 %v2708_v63  ;;  %4494 = vmatprep.mubr.bf16.mxu1 %v2708_v63  ;;  %v13700_v63 = vmax.f32 %v13698_v5, %v13699_v6  ;;  %v13749_v5 = vld [vmem:[#allocation445_spill] sm:$0xff]  ;;  %v13750_v6 = vld [vmem:[#allocation448_spill] sm:$0xff] }
 0x4f3   : > { %v2740_v60 = vpack.c.bf16 %v13697_v40, %v13694_v1  ;;  %v13745_v1 = vmax.f32 %v13743_v42, %v13744_v46  ;;  %v13747_v40 = vld [vmem:[#allocation444_spill] sm:$0xff]  ;;  %v13793_v42 = vld [vmem:[#allocation475_spill] sm:$0xff] }
 0x4f4   : > { %v2739_v55 = vpack.c.bf16 %v13703_v50, %v13700_v63  ;;  %v13751_v63 = vmax.f32 %v13749_v5, %v13750_v6  ;;  %v13753_v50 = vld [vmem:[#allocation454_spill] sm:$0xff] }
 0x4f9   : > { %3723 = vmatmul.mubr.bf16.gmra.mrb[72].mxu0 %v2707_v14  ;;  %4495 = vmatmul.mubr.bf16.gmra.mrb[200].mxu1 %v2707_v14  ;;  %v13706_v14 = vmax.f32 %v13704_v29, %v13705_v35  ;;  %v13755_v29 = vld [vmem:[#allocation455_spill] sm:$0xff]  ;;  %v13756_v35 = vld [vmem:[#allocation457_spill] sm:$0xff] }
 0x4fa   : > { %3732 = vmatprep.mubr.bf16.mxu0 %v2716_v45  ;;  %4504 = vmatprep.mubr.bf16.mxu1 %v2716_v45  ;;  %v13712_v45 = vmax.f32 %v13710_v38, %v13711_v39  ;;  %v13761_v38 = vld [vmem:[#allocation453_spill] sm:$0xff]  ;;  %v13762_v39 = vld [vmem:[#allocation456_spill] sm:$0xff] }
 0x4fb   : > { %v2748_v15 = vpack.c.bf16 %v13709_v22, %v13706_v14  ;;  %v13757_v14 = vmax.f32 %v13755_v29, %v13756_v35  ;;  %v13759_v22 = vld [vmem:[#allocation452_spill] sm:$0xff]  ;;  %v3069_v35 = vld [vmem:[#allocation11] sm:$0xf] }
 0x4fc   : > { %v2747_v52 = vpack.c.bf16 %v13715_v17, %v13712_v45  ;;  %v13763_v45 = vmax.f32 %v13761_v38, %v13762_v39  ;;  %v13765_v17 = vld [vmem:[#allocation462_spill] sm:$0xff] }
 0x501   : > { %3733 = vmatmul.mubr.bf16.gmra.mrb[76].mxu0 %v2715_v4  ;;  %4505 = vmatmul.mubr.bf16.gmra.mrb[204].mxu1 %v2715_v4  ;;  %v13718_v4 = vmax.f32 %v13716_v30, %v13717_v10  ;;  %v13767_v30 = vld [vmem:[#allocation463_spill] sm:$0xff]  ;;  %v13768_v10 = vld [vmem:[#allocation465_spill] sm:$0xff] }
 0x502   : > { %3742 = vmatprep.mubr.bf16.mxu0 %v2724_v32  ;;  %4514 = vmatprep.mubr.bf16.mxu1 %v2724_v32  ;;  %v13724_v32 = vmax.f32 %v13722_v61, %v13723_v62  ;;  %v13773_v61 = vld [vmem:[#allocation461_spill] sm:$0xff]  ;;  %v13774_v62 = vld [vmem:[#allocation464_spill] sm:$0xff] }
 0x503   : > { %v2756_v33 = vpack.c.bf16 %v13721_v18, %v13718_v4  ;;  %v13769_v4 = vmax.f32 %v13767_v30, %v13768_v10  ;;  %v13771_v18 = vld [vmem:[#allocation460_spill] sm:$0xff] }
 0x504   : > { %v2755_v26 = vpack.c.bf16 %v13727_v58, %v13724_v32  ;;  %v13775_v32 = vmax.f32 %v13773_v61, %v13774_v62  ;;  %v13777_v58 = vld [vmem:[#allocation470_spill] sm:$0xff] }
 0x509   : > { %3743 = vmatmul.mubr.bf16.gmra.mrb[80].mxu0 %v2723_v3  ;;  %4515 = vmatmul.mubr.bf16.gmra.mrb[208].mxu1 %v2723_v3  ;;  %v13730_v3 = vmax.f32 %v13728_v8, %v13729_v43  ;;  %v13779_v8 = vld [vmem:[#allocation471_spill] sm:$0xff]  ;;  %v13780_v43 = vld [vmem:[#allocation473_spill] sm:$0xff] }
 0x50a   : > { %3752 = vmatprep.mubr.bf16.mxu0 %v2732_v44  ;;  %4524 = vmatprep.mubr.bf16.mxu1 %v2732_v44  ;;  %v13736_v44 = vmax.f32 %v13734_v48, %v13735_v9  ;;  %v13785_v48 = vld [vmem:[#allocation469_spill] sm:$0xff]  ;;  %v13786_v9 = vld [vmem:[#allocation472_spill] sm:$0xff] }
 0x50b   : > { %v2764_v49 = vpack.c.bf16 %v13733_v25, %v13730_v3  ;;  %v13781_v3 = vmax.f32 %v13779_v8, %v13780_v43  ;;  %v13783_v25 = vld [vmem:[#allocation468_spill] sm:$0xff] }
 0x50c   : > { %v2763_v0 = vpack.c.bf16 %v13739_v23, %v13736_v44  ;;  %v13787_v44 = vmax.f32 %v13785_v48, %v13786_v9  ;;  %v13789_v23 = vmax.f32 %v9535_v2, %v13788_v13  ;;  %v13799_v2 = vld [vmem:[#allocation484_spill] sm:$0xff] }
 0x50d   : > { %v13800_v5 = vmax.f32 %v9579_v21, %v13799_v2 }
 0x511   : > { %3753 = vmatmul.mubr.bf16.gmra.mrb[84].mxu0 %v2731_v47  ;;  %4525 = vmatmul.mubr.bf16.gmra.mrb[212].mxu1 %v2731_v47  ;;  %v13742_v47 = vmax.f32 %v13740_v56, %v13741_v59 }
 0x512   : > { %3762 = vmatprep.mubr.bf16.mxu0 %v2740_v60  ;;  %4534 = vmatprep.mubr.bf16.mxu1 %v2740_v60  ;;  %v13748_v60 = vmax.f32 %v13746_v51, %v13747_v40 }
 0x513   : > { %v2772_v24 = vpack.c.bf16 %v13745_v1, %v13742_v47  ;;  %v13792_v47 = vld [vmem:[#allocation474_spill] sm:$0xff]  ;;  %v13795_v1 = vld [vmem:[#allocation476_spill] sm:$0xff] }
 0x514   : > { %v2771_v53 = vpack.c.bf16 %v13751_v63, %v13748_v60  ;;  %v13794_v46 = vmax.f32 %v13792_v47, %v13793_v42  ;;  %v13798_v60 = vmax.f32 %v9567_v31, %v9576_v16  ;;  %v13802_v63 = vld [vmem:[#allocation481_spill] sm:$0xff]  ;;  %v13808_v16 = vld [vmem:[#allocation23_spill] sm:$0xff] }
 0x515   : > { %v13809_v21 = vsub.s32 2, %v13808_v16 }
 0x516   : > { %v2812_v6 = vpack.c.bf16 %v13800_v5, %v13798_v60 }
 0x519   : > { %3763 = vmatmul.mubr.bf16.gmra.mrb[88].mxu0 %v2739_v55  ;;  %4535 = vmatmul.mubr.bf16.gmra.mrb[216].mxu1 %v2739_v55  ;;  %v13754_v55 = vmax.f32 %v13752_v34, %v13753_v50  ;;  %v13804_v34 = vld [vmem:[#allocation482_spill] sm:$0xff]  ;;  %v13805_v50 = vld [vmem:[#allocation483_spill] sm:$0xff] }
 0x51a   : > { %3772 = vmatprep.mubr.bf16.mxu0 %v2748_v15  ;;  %4544 = vmatprep.mubr.bf16.mxu1 %v2748_v15  ;;  %v13760_v15 = vmax.f32 %v13758_v54, %v13759_v22  ;;  %v13810_v54 = vld [vmem:[#allocation25_spill] sm:$0xff] }
 0x51b   : > { %v2780_v19 = vpack.c.bf16 %v13757_v14, %v13754_v55  ;;  %v13806_v55 = vmax.f32 %v13804_v34, %v13805_v50  ;;  %v13807_v14 = vld [vmem:[#allocation24_spill] sm:$0xff]  ;;  %v10375_v22 = vrot.slane %v3069_v35, %v13810_v54 }
 0x51c   : > { %v2779_v37 = vpack.c.bf16 %v13763_v45, %v13760_v15  ;;  %v10368_v31 = vrot.slane %v3069_v35, %v13807_v14  ;;  %v13811_v15 = vsub.s32 3, %v13808_v16 }
 0x51e   : > { %v10379_v38 = vrot.slane %v3069_v35, %v13811_v15 }
 0x521   : > { %3773 = vmatmul.mubr.bf16.gmra.mrb[92].mxu0 %v2747_v52  ;;  %4545 = vmatmul.mubr.bf16.gmra.mrb[220].mxu1 %v2747_v52  ;;  %v13766_v52 = vmax.f32 %v13764_v7, %v13765_v17 }
 0x522   : > { %3782 = vmatprep.mubr.bf16.mxu0 %v2756_v33  ;;  %4554 = vmatprep.mubr.bf16.mxu1 %v2756_v33  ;;  %v13772_v33 = vmax.f32 %v13770_v41, %v13771_v18 }
 0x523   : > { %v2788_v20 = vpack.c.bf16 %v13769_v4, %v13766_v52 }
 0x524   : > { %v2787_v28 = vpack.c.bf16 %v13775_v32, %v13772_v33 }
 0x529   : > { %3783 = vmatmul.mubr.bf16.gmra.mrb[96].mxu0 %v2755_v26  ;;  %4555 = vmatmul.mubr.bf16.gmra.mrb[224].mxu1 %v2755_v26  ;;  %v13778_v26 = vmax.f32 %v13776_v27, %v13777_v58 }
 0x52a   : > { %3792 = vmatprep.mubr.bf16.mxu0 %v2764_v49  ;;  %4564 = vmatprep.mubr.bf16.mxu1 %v2764_v49  ;;  %v13784_v49 = vmax.f32 %v13782_v12, %v13783_v25 }
 0x52b   : > { %v2796_v11 = vpack.c.bf16 %v13781_v3, %v13778_v26 }
 0x52c   : > { %v2795_v36 = vpack.c.bf16 %v13787_v44, %v13784_v49 }
 0x531   : > { %3793 = vmatmul.mubr.bf16.gmra.mrb[100].mxu0 %v2763_v0  ;;  %4565 = vmatmul.mubr.bf16.gmra.mrb[228].mxu1 %v2763_v0  ;;  %v13790_v0 = vld [vmem:[#allocation479_spill] sm:$0xff] }
 0x532   : > { %3802 = vmatprep.mubr.bf16.mxu0 %v2772_v24  ;;  %4574 = vmatprep.mubr.bf16.mxu1 %v2772_v24  ;;  %v13791_v56 = vmax.f32 %v9547_v57, %v13790_v0  ;;  %v13796_v24 = vld [vmem:[#allocation478_spill] sm:$0xff]  ;;  %v13801_v57 = vld [vmem:[#allocation480_spill] sm:$0xff] }
 0x533   : > { %v13797_v51 = vmax.f32 %v13795_v1, %v13796_v24 }
 0x534   : > { %v2804_v59 = vpack.c.bf16 %v13791_v56, %v13789_v23 }
 0x535   : > { %v2803_v40 = vpack.c.bf16 %v13797_v51, %v13794_v46 }
 0x539   : > { %3803 = vmatmul.mubr.bf16.gmra.mrb[104].mxu0 %v2771_v53  ;;  %4575 = vmatmul.mubr.bf16.gmra.mrb[232].mxu1 %v2771_v53  ;;  %v13803_v53 = vmax.f32 %v13801_v57, %v13802_v63 }
 0x53a   : > { %3812 = vmatprep.mubr.bf16.mxu0 %v2780_v19  ;;  %4584 = vmatprep.mubr.bf16.mxu1 %v2780_v19  ;;  %v10372_v19 = vrot.slane %v3069_v35, %v13809_v21 }
 0x53b   : > { %v2811_v29 = vpack.c.bf16 %v13806_v55, %v13803_v53 }
 0x541   : > { %3813 = vmatmul.mubr.bf16.gmra.mrb[108].mxu0 %v2779_v37  ;;  %4585 = vmatmul.mubr.bf16.gmra.mrb[236].mxu1 %v2779_v37 }
 0x542   : > { %3822 = vmatprep.mubr.bf16.mxu0 %v2788_v20  ;;  %4594 = vmatprep.mubr.bf16.mxu1 %v2788_v20 }
 0x549   : > { %3823 = vmatmul.mubr.bf16.gmra.mrb[112].mxu0 %v2787_v28  ;;  %4595 = vmatmul.mubr.bf16.gmra.mrb[240].mxu1 %v2787_v28 }
 0x54a   : > { %3832 = vmatprep.mubr.bf16.mxu0 %v2796_v11  ;;  %4604 = vmatprep.mubr.bf16.mxu1 %v2796_v11 }
 0x551   : > { %3833 = vmatmul.mubr.bf16.gmra.mrb[116].mxu0 %v2795_v36  ;;  %4605 = vmatmul.mubr.bf16.gmra.mrb[244].mxu1 %v2795_v36 }
 0x552   : > { %3842 = vmatprep.mubr.bf16.mxu0 %v2804_v59  ;;  %4614 = vmatprep.mubr.bf16.mxu1 %v2804_v59 }
 0x559   : > { %3843 = vmatmul.mubr.bf16.gmra.mrb[120].mxu0 %v2803_v40  ;;  %4615 = vmatmul.mubr.bf16.gmra.mrb[248].mxu1 %v2803_v40 }
 0x55a   : > { %3852 = vmatprep.mubr.bf16.mxu0 %v2812_v6  ;;  %4624 = vmatprep.mubr.bf16.mxu1 %v2812_v6 }
 0x561   : > { %3853 = vmatmul.mubr.bf16.gmra.mrb[124].mxu0 %v2811_v29  ;;  %4625 = vmatmul.mubr.bf16.gmra.mrb[252].mxu1 %v2811_v29 }
 0x5bc   : > { %v3704_v39 = vpop.f32.mrb[64].mxu0  ;;  %v4476_v45 = vpop.f32.mrb[192].mxu1 }
 0x5bd   : > { %v10382_v37 = vadd.f32 %v3704_v39, %v10368_v31  ;;  %v10385_v7 = vadd.f32 %v4476_v45, %v10372_v19  ;;  %v3706_v17 = vpop.f32.mrb[65].mxu0  ;;  %v4478_v52 = vpop.f32.mrb[193].mxu1 }
 0x5be   : > { %v10388_v30 = vadd.f32 %v3706_v17, %v10375_v22  ;;  %v10391_v10 = vadd.f32 %v4478_v52, %v10379_v38  ;;  %v3708_v4 = vpop.f32.mrb[66].mxu0  ;;  %v4480_v20 = vpop.f32.mrb[194].mxu1 }
 0x5bf   : > { %13812 = vst [vmem:[#allocation26_spill] sm:$0xff] %v10385_v7  ;;  %v10394_v41 = vmul.f32 0.2, %v10382_v37  ;;  %v10397_v18 = vmul.f32 0.2, %v10385_v7  ;;  %v10400_v33 = vadd.f32 %v3708_v4, %v10368_v31  ;;  %v10403_v61 = vadd.f32 %v4480_v20, %v10372_v19  ;;  %v3710_v62 = vpop.f32.mrb[67].mxu0 }
 0x5c0   : > { %13813 = vst [vmem:[#allocation27_spill] sm:$0xff] %v10391_v10  ;;  %v4482_v32 = vpop.f32.mrb[195].mxu1  ;;  %v10406_v28 = vmul.f32 0.2, %v10388_v30  ;;  %v10409_v27 = vmul.f32 0.2, %v10391_v10  ;;  %v10412_v58 = vadd.f32 %v3710_v62, %v10375_v22 }
 0x5c1   : > { %13814 = vst [vmem:[#allocation29_spill] sm:$0xff] %v10397_v18  ;;  %13815 = vst [vmem:[#allocation32_spill] sm:$0xff] %v10403_v61  ;;  %v10415_v26 = vadd.f32 %v4482_v32, %v10379_v38  ;;  %v10422_v3 = vmul.f32 0.2, %v10400_v33  ;;  %v10425_v11 = vmul.f32 0.2, %v10403_v61 }
 0x5c2   : > { %13816 = vst [vmem:[#allocation33_spill] sm:$0xff] %v10409_v27  ;;  %v10432_v49 = vmul.f32 0.2, %v10412_v58 }
 0x5c3   : > { %13817 = vst [vmem:[#allocation35_spill] sm:$0xff] %v10415_v26  ;;  %13818 = vst [vmem:[#allocation28_spill] sm:$0xff] %v10425_v11  ;;  %v10435_v48 = vmul.f32 0.2, %v10415_v26 }
 0x5c4   : > { %v3714_v23 = vpop.f32.mrb[68].mxu0  ;;  %v4486_v0 = vpop.f32.mrb[196].mxu1 }
 0x5c5   : > { %13819 = vst [vmem:[#allocation30_spill] sm:$0xff] %v10435_v48  ;;  %v10446_v56 = vadd.f32 %v3714_v23, %v10368_v31  ;;  %v10449_v59 = vadd.f32 %v4486_v0, %v10372_v19  ;;  %v3716_v47 = vpop.f32.mrb[69].mxu0  ;;  %v4488_v42 = vpop.f32.mrb[197].mxu1 }
 0x5c6   : > { %v10452_v46 = vadd.f32 %v3716_v47, %v10375_v22  ;;  %v10455_v1 = vadd.f32 %v4488_v42, %v10379_v38  ;;  %v3718_v24 = vpop.f32.mrb[70].mxu0  ;;  %v4490_v51 = vpop.f32.mrb[198].mxu1 }
 0x5c7   : > { %13820 = vst [vmem:[#allocation31_spill] sm:$0xff] %v10449_v59  ;;  %v10458_v40 = vmul.f32 0.2, %v10446_v56  ;;  %v10461_v60 = vmul.f32 0.2, %v10449_v59  ;;  %v10464_v2 = vadd.f32 %v3718_v24, %v10368_v31  ;;  %v10467_v5 = vadd.f32 %v4490_v51, %v10372_v19  ;;  %v3720_v6 = vpop.f32.mrb[71].mxu0 }
 0x5c8   : > { %13821 = vst [vmem:[#allocation34_spill] sm:$0xff] %v10455_v1  ;;  %v4492_v57 = vpop.f32.mrb[199].mxu1  ;;  %v10470_v63 = vmul.f32 0.2, %v10452_v46  ;;  %v10473_v53 = vmul.f32 0.2, %v10455_v1  ;;  %v10476_v34 = vadd.f32 %v3720_v6, %v10375_v22 }
 0x5c9   : > { %13822 = vst [vmem:[#allocation37_spill] sm:$0xff] %v10461_v60  ;;  %13823 = vst [vmem:[#allocation40_spill] sm:$0xff] %v10467_v5  ;;  %v10479_v50 = vadd.f32 %v4492_v57, %v10379_v38  ;;  %v10486_v35 = vmul.f32 0.2, %v10464_v2  ;;  %v10489_v21 = vmul.f32 0.2, %v10467_v5 }
 0x5ca   : > { %13824 = vst [vmem:[#allocation41_spill] sm:$0xff] %v10473_v53  ;;  %v10496_v45 = vmul.f32 0.2, %v10476_v34 }
 0x5cb   : > { %13825 = vst [vmem:[#allocation43_spill] sm:$0xff] %v10479_v50  ;;  %13826 = vst [vmem:[#allocation36_spill] sm:$0xff] %v10489_v21  ;;  %v10499_v17 = vmul.f32 0.2, %v10479_v50 }
 0x5cc   : > { %v3724_v32 = vpop.f32.mrb[72].mxu0  ;;  %v4496_v23 = vpop.f32.mrb[200].mxu1 }
 0x5cd   : > { %13827 = vst [vmem:[#allocation38_spill] sm:$0xff] %v10499_v17  ;;  %v10510_v0 = vadd.f32 %v3724_v32, %v10368_v31  ;;  %v10513_v47 = vadd.f32 %v4496_v23, %v10372_v19  ;;  %v3726_v42 = vpop.f32.mrb[73].mxu0  ;;  %v4498_v24 = vpop.f32.mrb[201].mxu1 }
 0x5ce   : > { %v10516_v51 = vadd.f32 %v3726_v42, %v10375_v22  ;;  %v10519_v6 = vadd.f32 %v4498_v24, %v10379_v38  ;;  %v3728_v57 = vpop.f32.mrb[74].mxu0  ;;  %v4500_v4 = vpop.f32.mrb[202].mxu1 }
 0x5cf   : > { %13828 = vst [vmem:[#allocation39_spill] sm:$0xff] %v10513_v47  ;;  %v10522_v29 = vmul.f32 0.2, %v10510_v0  ;;  %v10525_v62 = vmul.f32 0.2, %v10513_v47  ;;  %v10528_v32 = vadd.f32 %v3728_v57, %v10368_v31  ;;  %v10531_v23 = vadd.f32 %v4500_v4, %v10372_v19  ;;  %v3730_v39 = vpop.f32.mrb[75].mxu0 }
 0x5d0   : > { %13829 = vst [vmem:[#allocation42_spill] sm:$0xff] %v10519_v6  ;;  %v4502_v42 = vpop.f32.mrb[203].mxu1  ;;  %v10534_v44 = vmul.f32 0.2, %v10516_v51  ;;  %v10537_v24 = vmul.f32 0.2, %v10519_v6  ;;  %v10540_v43 = vadd.f32 %v3730_v39, %v10375_v22 }
 0x5d1   : > { %13830 = vst [vmem:[#allocation45_spill] sm:$0xff] %v10525_v62  ;;  %13831 = vst [vmem:[#allocation48_spill] sm:$0xff] %v10531_v23  ;;  %v10543_v13 = vadd.f32 %v4502_v42, %v10379_v38  ;;  %v10550_v25 = vmul.f32 0.2, %v10528_v32  ;;  %v10553_v52 = vmul.f32 0.2, %v10531_v23 }
 0x5d2   : > { %13832 = vst [vmem:[#allocation49_spill] sm:$0xff] %v10537_v24  ;;  %v10560_v42 = vmul.f32 0.2, %v10540_v43 }
 0x5d3   : > { %13833 = vst [vmem:[#allocation51_spill] sm:$0xff] %v10543_v13  ;;  %13834 = vst [vmem:[#allocation44_spill] sm:$0xff] %v10553_v52  ;;  %v10563_v57 = vmul.f32 0.2, %v10543_v13 }
 0x5d4   : > { %v3734_v9 = vpop.f32.mrb[76].mxu0  ;;  %v4506_v39 = vpop.f32.mrb[204].mxu1 }
 0x5d5   : > { %13835 = vst [vmem:[#allocation46_spill] sm:$0xff] %v10563_v57  ;;  %v10574_v8 = vadd.f32 %v3734_v9, %v10368_v31  ;;  %v10577_v36 = vadd.f32 %v4506_v39, %v10372_v19  ;;  %v3736_v12 = vpop.f32.mrb[77].mxu0  ;;  %v4508_v16 = vpop.f32.mrb[205].mxu1 }
 0x5d6   : > { %v10580_v4 = vadd.f32 %v3736_v12, %v10375_v22  ;;  %v10583_v20 = vadd.f32 %v4508_v16, %v10379_v38  ;;  %v3738_v15 = vpop.f32.mrb[78].mxu0  ;;  %v4510_v54 = vpop.f32.mrb[206].mxu1 }
 0x5d7   : > { %13836 = vst [vmem:[#allocation47_spill] sm:$0xff] %v10577_v36  ;;  %v10586_v55 = vmul.f32 0.2, %v10574_v8  ;;  %v10589_v14 = vmul.f32 0.2, %v10577_v36  ;;  %v10592_v9 = vadd.f32 %v3738_v15, %v10368_v31  ;;  %v10595_v39 = vadd.f32 %v4510_v54, %v10372_v19  ;;  %v3740_v52 = vpop.f32.mrb[79].mxu0 }
 0x5d8   : > { %13837 = vst [vmem:[#allocation50_spill] sm:$0xff] %v10583_v20  ;;  %v4512_v12 = vpop.f32.mrb[207].mxu1  ;;  %v10598_v23 = vmul.f32 0.2, %v10580_v4  ;;  %v10601_v16 = vmul.f32 0.2, %v10583_v20  ;;  %v10604_v62 = vadd.f32 %v3740_v52, %v10375_v22 }
 0x5d9   : > { %13838 = vst [vmem:[#allocation53_spill] sm:$0xff] %v10589_v14  ;;  %13839 = vst [vmem:[#allocation56_spill] sm:$0xff] %v10595_v39  ;;  %v10607_v47 = vadd.f32 %v4512_v12, %v10379_v38  ;;  %v10614_v57 = vmul.f32 0.2, %v10592_v9  ;;  %v10617_v13 = vmul.f32 0.2, %v10595_v39 }
 0x5da   : > { %13840 = vst [vmem:[#allocation57_spill] sm:$0xff] %v10601_v16  ;;  %v10624_v12 = vmul.f32 0.2, %v10604_v62 }
 0x5db   : > { %13841 = vst [vmem:[#allocation59_spill] sm:$0xff] %v10607_v47  ;;  %13842 = vst [vmem:[#allocation52_spill] sm:$0xff] %v10617_v13  ;;  %v10627_v15 = vmul.f32 0.2, %v10607_v47 }
 0x5dc   : > { %v3744_v6 = vpop.f32.mrb[80].mxu0  ;;  %v4516_v52 = vpop.f32.mrb[208].mxu1 }
 0x5dd   : > { %13843 = vst [vmem:[#allocation54_spill] sm:$0xff] %v10627_v15  ;;  %v10638_v16 = vadd.f32 %v3744_v6, %v10368_v31  ;;  %v10641_v20 = vadd.f32 %v4516_v52, %v10372_v19  ;;  %v3746_v21 = vpop.f32.mrb[81].mxu0  ;;  %v4518_v5 = vpop.f32.mrb[209].mxu1 }
 0x5de   : > { %v10644_v54 = vadd.f32 %v3746_v21, %v10375_v22  ;;  %v10647_v14 = vadd.f32 %v4518_v5, %v10379_v38  ;;  %v3748_v36 = vpop.f32.mrb[82].mxu0  ;;  %v4520_v13 = vpop.f32.mrb[210].mxu1 }
 0x5df   : > { %13844 = vst [vmem:[#allocation55_spill] sm:$0xff] %v10641_v20  ;;  %v10650_v24 = vmul.f32 0.2, %v10638_v16  ;;  %v10653_v39 = vmul.f32 0.2, %v10641_v20  ;;  %v10656_v6 = vadd.f32 %v3748_v36, %v10368_v31  ;;  %v10659_v52 = vadd.f32 %v4520_v13, %v10372_v19  ;;  %v3750_v15 = vpop.f32.mrb[83].mxu0 }
 0x5e0   : > { %13845 = vst [vmem:[#allocation58_spill] sm:$0xff] %v10647_v14  ;;  %v4522_v21 = vpop.f32.mrb[211].mxu1  ;;  %v10662_v47 = vmul.f32 0.2, %v10644_v54  ;;  %v10665_v5 = vmul.f32 0.2, %v10647_v14  ;;  %v10668_v60 = vadd.f32 %v3750_v15, %v10375_v22 }
 0x5e1   : > { %13846 = vst [vmem:[#allocation61_spill] sm:$0xff] %v10653_v39  ;;  %13847 = vst [vmem:[#allocation64_spill] sm:$0xff] %v10659_v52  ;;  %v10671_v59 = vadd.f32 %v4522_v21, %v10379_v38  ;;  %v10678_v17 = vmul.f32 0.2, %v10656_v6  ;;  %v10681_v50 = vmul.f32 0.2, %v10659_v52 }
 0x5e2   : > { %13848 = vst [vmem:[#allocation65_spill] sm:$0xff] %v10665_v5  ;;  %v10688_v21 = vmul.f32 0.2, %v10668_v60 }
 0x5e3   : > { %13849 = vst [vmem:[#allocation67_spill] sm:$0xff] %v10671_v59  ;;  %13850 = vst [vmem:[#allocation60_spill] sm:$0xff] %v10681_v50  ;;  %v10691_v36 = vmul.f32 0.2, %v10671_v59 }
 0x5e4   : > { %v3754_v1 = vpop.f32.mrb[84].mxu0  ;;  %v4526_v15 = vpop.f32.mrb[212].mxu1 }
 0x5e5   : > { %13851 = vst [vmem:[#allocation62_spill] sm:$0xff] %v10691_v36  ;;  %v10702_v5 = vadd.f32 %v3754_v1, %v10368_v31  ;;  %v10705_v14 = vadd.f32 %v4526_v15, %v10372_v19  ;;  %v3756_v11 = vpop.f32.mrb[85].mxu0  ;;  %v4528_v61 = vpop.f32.mrb[213].mxu1 }
 0x5e6   : > { %v10708_v13 = vadd.f32 %v3756_v11, %v10375_v22  ;;  %v10711_v39 = vadd.f32 %v4528_v61, %v10379_v38  ;;  %v3758_v20 = vpop.f32.mrb[86].mxu0  ;;  %v4530_v50 = vpop.f32.mrb[214].mxu1 }
 0x5e7   : > { %13852 = vst [vmem:[#allocation63_spill] sm:$0xff] %v10702_v5  ;;  %13853 = vst [vmem:[#allocation66_spill] sm:$0xff] %v10705_v14  ;;  %v10714_v53 = vmul.f32 0.2, %v10702_v5  ;;  %v10717_v52 = vmul.f32 0.2, %v10705_v14  ;;  %v10720_v1 = vadd.f32 %v3758_v20, %v10368_v31  ;;  %v10723_v15 = vadd.f32 %v4530_v50, %v10372_v19 }
 0x5e8   : > { %13854 = vst [vmem:[#allocation69_spill] sm:$0xff] %v10711_v39  ;;  %v3760_v36 = vpop.f32.mrb[87].mxu0  ;;  %v4532_v11 = vpop.f32.mrb[215].mxu1  ;;  %v10726_v59 = vmul.f32 0.2, %v10708_v13 }
 0x5e9   : > { %13855 = vst [vmem:[#allocation72_spill] sm:$0xff] %v10714_v53  ;;  %13856 = vst [vmem:[#allocation73_spill] sm:$0xff] %v10717_v52  ;;  %v10729_v61 = vmul.f32 0.2, %v10711_v39  ;;  %v10732_v18 = vadd.f32 %v3760_v36, %v10375_v22  ;;  %v10735_v7 = vadd.f32 %v4532_v11, %v10379_v38  ;;  %v10742_v48 = vmul.f32 0.2, %v10720_v1 }
 0x5ea   : > { %13857 = vst [vmem:[#allocation75_spill] sm:$0xff] %v10720_v1  ;;  %13858 = vst [vmem:[#allocation68_spill] sm:$0xff] %v10723_v15  ;;  %v10745_v26 = vmul.f32 0.2, %v10723_v15 }
 0x5eb   : > { %13859 = vst [vmem:[#allocation70_spill] sm:$0xff] %v10726_v59  ;;  %13860 = vst [vmem:[#allocation71_spill] sm:$0xff] %v10729_v61  ;;  %v10752_v11 = vmul.f32 0.2, %v10732_v18  ;;  %v10755_v20 = vmul.f32 0.2, %v10735_v7 }
 0x5ec   : > { %13861 = vst [vmem:[#allocation74_spill] sm:$0xff] %v10732_v18  ;;  %13862 = vst [vmem:[#allocation77_spill] sm:$0xff] %v10735_v7  ;;  %v3764_v10 = vpop.f32.mrb[88].mxu0  ;;  %v4536_v36 = vpop.f32.mrb[216].mxu1 }
 0x5ed   : > { %13863 = vst [vmem:[#allocation80_spill] sm:$0xff] %v10742_v48  ;;  %13864 = vst [vmem:[#allocation81_spill] sm:$0xff] %v10745_v26  ;;  %v10766_v61 = vadd.f32 %v3764_v10, %v10368_v31  ;;  %v10769_v39 = vadd.f32 %v4536_v36, %v10372_v19  ;;  %v3766_v53 = vpop.f32.mrb[89].mxu0  ;;  %v4538_v5 = vpop.f32.mrb[217].mxu1 }
 0x5ee   : > { %13865 = vst [vmem:[#allocation83_spill] sm:$0xff] %v10752_v11  ;;  %13866 = vst [vmem:[#allocation76_spill] sm:$0xff] %v10755_v20  ;;  %v10772_v50 = vadd.f32 %v3766_v53, %v10375_v22  ;;  %v10775_v52 = vadd.f32 %v4538_v5, %v10379_v38  ;;  %v3768_v14 = vpop.f32.mrb[90].mxu0  ;;  %v4540_v26 = vpop.f32.mrb[218].mxu1 }
 0x5ef   : > { %13867 = vst [vmem:[#allocation78_spill] sm:$0xff] %v10766_v61  ;;  %13868 = vst [vmem:[#allocation79_spill] sm:$0xff] %v10769_v39  ;;  %v10778_v27 = vmul.f32 0.2, %v10766_v61  ;;  %v10781_v15 = vmul.f32 0.2, %v10769_v39  ;;  %v10784_v10 = vadd.f32 %v3768_v14, %v10368_v31  ;;  %v10787_v36 = vadd.f32 %v4540_v26, %v10372_v19 }
 0x5f0   : > { %13869 = vst [vmem:[#allocation82_spill] sm:$0xff] %v10772_v50  ;;  %13870 = vst [vmem:[#allocation85_spill] sm:$0xff] %v10775_v52  ;;  %v3770_v20 = vpop.f32.mrb[91].mxu0  ;;  %v4542_v53 = vpop.f32.mrb[219].mxu1  ;;  %v10790_v7 = vmul.f32 0.2, %v10772_v50 }
 0x5f1   : > { %13871 = vst [vmem:[#allocation88_spill] sm:$0xff] %v10778_v27  ;;  %13872 = vst [vmem:[#allocation89_spill] sm:$0xff] %v10781_v15  ;;  %v10793_v5 = vmul.f32 0.2, %v10775_v52  ;;  %v10796_v48 = vadd.f32 %v3770_v20, %v10375_v22  ;;  %v10799_v1 = vadd.f32 %v4542_v53, %v10379_v38  ;;  %v10806_v11 = vmul.f32 0.2, %v10784_v10 }
 0x5f2   : > { %13873 = vst [vmem:[#allocation91_spill] sm:$0xff] %v10784_v10  ;;  %13874 = vst [vmem:[#allocation84_spill] sm:$0xff] %v10787_v36  ;;  %v10809_v18 = vmul.f32 0.2, %v10787_v36 }
 0x5f3   : > { %13875 = vst [vmem:[#allocation86_spill] sm:$0xff] %v10790_v7  ;;  %13876 = vst [vmem:[#allocation87_spill] sm:$0xff] %v10793_v5  ;;  %v10816_v53 = vmul.f32 0.2, %v10796_v48  ;;  %v10819_v14 = vmul.f32 0.2, %v10799_v1 }
 0x5f4   : > { %13877 = vst [vmem:[#allocation90_spill] sm:$0xff] %v10796_v48  ;;  %13878 = vst [vmem:[#allocation93_spill] sm:$0xff] %v10799_v1  ;;  %v3774_v27 = vpop.f32.mrb[92].mxu0  ;;  %v4546_v20 = vpop.f32.mrb[220].mxu1 }
 0x5f5   : > { %13879 = vst [vmem:[#allocation96_spill] sm:$0xff] %v10806_v11  ;;  %13880 = vst [vmem:[#allocation97_spill] sm:$0xff] %v10809_v18  ;;  %v10830_v5 = vadd.f32 %v3774_v27, %v10368_v31  ;;  %v10833_v52 = vadd.f32 %v4546_v20, %v10372_v19  ;;  %v3776_v61 = vpop.f32.mrb[93].mxu0  ;;  %v4548_v7 = vpop.f32.mrb[221].mxu1 }
 0x5f6   : > { %13881 = vst [vmem:[#allocation99_spill] sm:$0xff] %v10816_v53  ;;  %13882 = vst [vmem:[#allocation92_spill] sm:$0xff] %v10819_v14  ;;  %v10836_v26 = vadd.f32 %v3776_v61, %v10375_v22  ;;  %v10839_v15 = vadd.f32 %v4548_v7, %v10379_v38  ;;  %v3778_v39 = vpop.f32.mrb[94].mxu0  ;;  %v4550_v18 = vpop.f32.mrb[222].mxu1 }
 0x5f7   : > { %13883 = vst [vmem:[#allocation94_spill] sm:$0xff] %v10830_v5  ;;  %13884 = vst [vmem:[#allocation95_spill] sm:$0xff] %v10833_v52  ;;  %v10842_v59 = vmul.f32 0.2, %v10830_v5  ;;  %v10845_v36 = vmul.f32 0.2, %v10833_v52  ;;  %v10848_v27 = vadd.f32 %v3778_v39, %v10368_v31  ;;  %v10851_v20 = vadd.f32 %v4550_v18, %v10372_v19 }
 0x5f8   : > { %13885 = vst [vmem:[#allocation98_spill] sm:$0xff] %v10836_v26  ;;  %13886 = vst [vmem:[#allocation101_spill] sm:$0xff] %v10839_v15  ;;  %v3780_v14 = vpop.f32.mrb[95].mxu0  ;;  %v4552_v61 = vpop.f32.mrb[223].mxu1  ;;  %v10854_v1 = vmul.f32 0.2, %v10836_v26 }
 0x5f9   : > { %13887 = vst [vmem:[#allocation104_spill] sm:$0xff] %v10842_v59  ;;  %13888 = vst [vmem:[#allocation105_spill] sm:$0xff] %v10845_v36  ;;  %v10857_v7 = vmul.f32 0.2, %v10839_v15  ;;  %v10860_v11 = vadd.f32 %v3780_v14, %v10375_v22  ;;  %v10863_v10 = vadd.f32 %v4552_v61, %v10379_v38  ;;  %v10870_v53 = vmul.f32 0.2, %v10848_v27 }
 0x5fa   : > { %13889 = vst [vmem:[#allocation107_spill] sm:$0xff] %v10848_v27  ;;  %13890 = vst [vmem:[#allocation100_spill] sm:$0xff] %v10851_v20  ;;  %v10873_v48 = vmul.f32 0.2, %v10851_v20 }
 0x5fb   : > { %13891 = vst [vmem:[#allocation102_spill] sm:$0xff] %v10854_v1  ;;  %13892 = vst [vmem:[#allocation103_spill] sm:$0xff] %v10857_v7  ;;  %v10880_v61 = vmul.f32 0.2, %v10860_v11  ;;  %v10883_v39 = vmul.f32 0.2, %v10863_v10 }
 0x5fc   : > { %13893 = vst [vmem:[#allocation106_spill] sm:$0xff] %v10860_v11  ;;  %13894 = vst [vmem:[#allocation109_spill] sm:$0xff] %v10863_v10  ;;  %v3784_v59 = vpop.f32.mrb[96].mxu0  ;;  %v4556_v14 = vpop.f32.mrb[224].mxu1 }
 0x5fd   : > { %13895 = vst [vmem:[#allocation112_spill] sm:$0xff] %v10870_v53  ;;  %13896 = vst [vmem:[#allocation113_spill] sm:$0xff] %v10873_v48  ;;  %v10894_v7 = vadd.f32 %v3784_v59, %v10368_v31  ;;  %v10897_v15 = vadd.f32 %v4556_v14, %v10372_v19  ;;  %v3786_v5 = vpop.f32.mrb[97].mxu0  ;;  %v4558_v1 = vpop.f32.mrb[225].mxu1 }
 0x5fe   : > { %13897 = vst [vmem:[#allocation115_spill] sm:$0xff] %v10880_v61  ;;  %13898 = vst [vmem:[#allocation108_spill] sm:$0xff] %v10883_v39  ;;  %v10900_v18 = vadd.f32 %v3786_v5, %v10375_v22  ;;  %v10903_v36 = vadd.f32 %v4558_v1, %v10379_v38  ;;  %v3788_v52 = vpop.f32.mrb[98].mxu0  ;;  %v4560_v48 = vpop.f32.mrb[226].mxu1 }
 0x5ff   : > { %13899 = vst [vmem:[#allocation110_spill] sm:$0xff] %v10894_v7  ;;  %13900 = vst [vmem:[#allocation111_spill] sm:$0xff] %v10897_v15  ;;  %v10906_v50 = vmul.f32 0.2, %v10894_v7  ;;  %v10909_v20 = vmul.f32 0.2, %v10897_v15  ;;  %v10912_v59 = vadd.f32 %v3788_v52, %v10368_v31  ;;  %v10915_v14 = vadd.f32 %v4560_v48, %v10372_v19 }
 0x600   : > { %13901 = vst [vmem:[#allocation114_spill] sm:$0xff] %v10900_v18  ;;  %13902 = vst [vmem:[#allocation123_spill] sm:$0xff] %v10903_v36  ;;  %v3790_v39 = vpop.f32.mrb[99].mxu0  ;;  %v4562_v5 = vpop.f32.mrb[227].mxu1  ;;  %v10918_v10 = vmul.f32 0.2, %v10900_v18 }
 0x601   : > { %13903 = vst [vmem:[#allocation128_spill] sm:$0xff] %v10906_v50  ;;  %13904 = vst [vmem:[#allocation129_spill] sm:$0xff] %v10909_v20  ;;  %v10921_v1 = vmul.f32 0.2, %v10903_v36  ;;  %v10924_v53 = vadd.f32 %v3790_v39, %v10375_v22  ;;  %v10927_v27 = vadd.f32 %v4562_v5, %v10379_v38  ;;  %v10934_v61 = vmul.f32 0.2, %v10912_v59 }
 0x602   : > { %13905 = vst [vmem:[#allocation131_spill] sm:$0xff] %v10912_v59  ;;  %13906 = vst [vmem:[#allocation120_spill] sm:$0xff] %v10915_v14  ;;  %v10937_v11 = vmul.f32 0.2, %v10915_v14 }
 0x603   : > { %13907 = vst [vmem:[#allocation126_spill] sm:$0xff] %v10918_v10  ;;  %13908 = vst [vmem:[#allocation127_spill] sm:$0xff] %v10921_v1  ;;  %v10944_v5 = vmul.f32 0.2, %v10924_v53  ;;  %v10947_v52 = vmul.f32 0.2, %v10927_v27 }
 0x604   : > { %13909 = vst [vmem:[#allocation130_spill] sm:$0xff] %v10924_v53  ;;  %13910 = vst [vmem:[#allocation139_spill] sm:$0xff] %v10927_v27  ;;  %v3794_v50 = vpop.f32.mrb[100].mxu0  ;;  %v4566_v39 = vpop.f32.mrb[228].mxu1 }
 0x605   : > { %13911 = vst [vmem:[#allocation144_spill] sm:$0xff] %v10934_v61  ;;  %13912 = vst [vmem:[#allocation145_spill] sm:$0xff] %v10937_v11  ;;  %v10958_v1 = vadd.f32 %v3794_v50, %v10368_v31  ;;  %v10961_v36 = vadd.f32 %v4566_v39, %v10372_v19  ;;  %v3796_v7 = vpop.f32.mrb[101].mxu0  ;;  %v4568_v10 = vpop.f32.mrb[229].mxu1 }
 0x606   : > { %13913 = vst [vmem:[#allocation147_spill] sm:$0xff] %v10944_v5  ;;  %13914 = vst [vmem:[#allocation136_spill] sm:$0xff] %v10947_v52  ;;  %v10964_v48 = vadd.f32 %v3796_v7, %v10375_v22  ;;  %v10967_v20 = vadd.f32 %v4568_v10, %v10379_v38  ;;  %v3798_v15 = vpop.f32.mrb[102].mxu0  ;;  %v4570_v11 = vpop.f32.mrb[230].mxu1 }
 0x607   : > { %13915 = vst [vmem:[#allocation142_spill] sm:$0xff] %v10958_v1  ;;  %13916 = vst [vmem:[#allocation143_spill] sm:$0xff] %v10961_v36  ;;  %v10970_v26 = vmul.f32 0.2, %v10958_v1  ;;  %v10973_v14 = vmul.f32 0.2, %v10961_v36  ;;  %v10976_v50 = vadd.f32 %v3798_v15, %v10368_v31  ;;  %v10979_v39 = vadd.f32 %v4570_v11, %v10372_v19 }
 0x608   : > { %13917 = vst [vmem:[#allocation146_spill] sm:$0xff] %v10964_v48  ;;  %13918 = vst [vmem:[#allocation155_spill] sm:$0xff] %v10967_v20  ;;  %v3800_v52 = vpop.f32.mrb[103].mxu0  ;;  %v4572_v7 = vpop.f32.mrb[231].mxu1  ;;  %v10982_v27 = vmul.f32 0.2, %v10964_v48 }
 0x609   : > { %13919 = vst [vmem:[#allocation160_spill] sm:$0xff] %v10970_v26  ;;  %13920 = vst [vmem:[#allocation161_spill] sm:$0xff] %v10973_v14  ;;  %v10985_v10 = vmul.f32 0.2, %v10967_v20  ;;  %v10988_v61 = vadd.f32 %v3800_v52, %v10375_v22  ;;  %v10991_v59 = vadd.f32 %v4572_v7, %v10379_v38  ;;  %v10998_v5 = vmul.f32 0.2, %v10976_v50 }
 0x60a   : > { %13921 = vst [vmem:[#allocation163_spill] sm:$0xff] %v10976_v50  ;;  %13922 = vst [vmem:[#allocation152_spill] sm:$0xff] %v10979_v39  ;;  %v11001_v53 = vmul.f32 0.2, %v10979_v39 }
 0x60b   : > { %13923 = vst [vmem:[#allocation158_spill] sm:$0xff] %v10982_v27  ;;  %13924 = vst [vmem:[#allocation159_spill] sm:$0xff] %v10985_v10  ;;  %v11008_v7 = vmul.f32 0.2, %v10988_v61  ;;  %v11011_v15 = vmul.f32 0.2, %v10991_v59 }
 0x60c   : > { %13925 = vst [vmem:[#allocation162_spill] sm:$0xff] %v10988_v61  ;;  %13926 = vst [vmem:[#allocation171_spill] sm:$0xff] %v10991_v59  ;;  %v3804_v26 = vpop.f32.mrb[104].mxu0  ;;  %v4576_v52 = vpop.f32.mrb[232].mxu1 }
 0x60d   : > { %13927 = vst [vmem:[#allocation176_spill] sm:$0xff] %v10998_v5  ;;  %13928 = vst [vmem:[#allocation177_spill] sm:$0xff] %v11001_v53  ;;  %v11022_v10 = vadd.f32 %v3804_v26, %v10368_v31  ;;  %v11025_v20 = vadd.f32 %v4576_v52, %v10372_v19  ;;  %v3806_v1 = vpop.f32.mrb[105].mxu0  ;;  %v4578_v27 = vpop.f32.mrb[233].mxu1 }
 0x60e   : > { %13929 = vst [vmem:[#allocation179_spill] sm:$0xff] %v11008_v7  ;;  %13930 = vst [vmem:[#allocation168_spill] sm:$0xff] %v11011_v15  ;;  %v11028_v11 = vadd.f32 %v3806_v1, %v10375_v22  ;;  %v11031_v14 = vadd.f32 %v4578_v27, %v10379_v38  ;;  %v3808_v36 = vpop.f32.mrb[106].mxu0  ;;  %v4580_v53 = vpop.f32.mrb[234].mxu1 }
 0x60f   : > { %13931 = vst [vmem:[#allocation174_spill] sm:$0xff] %v11022_v10  ;;  %13932 = vst [vmem:[#allocation175_spill] sm:$0xff] %v11025_v20  ;;  %v11034_v18 = vmul.f32 0.2, %v11022_v10  ;;  %v11037_v39 = vmul.f32 0.2, %v11025_v20  ;;  %v11040_v26 = vadd.f32 %v3808_v36, %v10368_v31  ;;  %v11043_v52 = vadd.f32 %v4580_v53, %v10372_v19 }
 0x610   : > { %13933 = vst [vmem:[#allocation178_spill] sm:$0xff] %v11028_v11  ;;  %13934 = vst [vmem:[#allocation187_spill] sm:$0xff] %v11031_v14  ;;  %v3810_v15 = vpop.f32.mrb[107].mxu0  ;;  %v4582_v1 = vpop.f32.mrb[235].mxu1  ;;  %v11046_v59 = vmul.f32 0.2, %v11028_v11 }
 0x611   : > { %13935 = vst [vmem:[#allocation192_spill] sm:$0xff] %v11034_v18  ;;  %13936 = vst [vmem:[#allocation193_spill] sm:$0xff] %v11037_v39  ;;  %v11049_v27 = vmul.f32 0.2, %v11031_v14  ;;  %v11052_v5 = vadd.f32 %v3810_v15, %v10375_v22  ;;  %v11055_v50 = vadd.f32 %v4582_v1, %v10379_v38  ;;  %v11062_v7 = vmul.f32 0.2, %v11040_v26 }
 0x612   : > { %13937 = vst [vmem:[#allocation195_spill] sm:$0xff] %v11040_v26  ;;  %13938 = vst [vmem:[#allocation184_spill] sm:$0xff] %v11043_v52  ;;  %v11065_v61 = vmul.f32 0.2, %v11043_v52 }
 0x613   : > { %13939 = vst [vmem:[#allocation190_spill] sm:$0xff] %v11046_v59  ;;  %13940 = vst [vmem:[#allocation191_spill] sm:$0xff] %v11049_v27  ;;  %v11072_v1 = vmul.f32 0.2, %v11052_v5  ;;  %v11075_v36 = vmul.f32 0.2, %v11055_v50 }
 0x614   : > { %13941 = vst [vmem:[#allocation194_spill] sm:$0xff] %v11052_v5  ;;  %13942 = vst [vmem:[#allocation203_spill] sm:$0xff] %v11055_v50  ;;  %v3814_v18 = vpop.f32.mrb[108].mxu0  ;;  %v4586_v15 = vpop.f32.mrb[236].mxu1 }
 0x615   : > { %13943 = vst [vmem:[#allocation208_spill] sm:$0xff] %v11062_v7  ;;  %13944 = vst [vmem:[#allocation209_spill] sm:$0xff] %v11065_v61  ;;  %v11086_v27 = vadd.f32 %v3814_v18, %v10368_v31  ;;  %v11089_v14 = vadd.f32 %v4586_v15, %v10372_v19  ;;  %v3816_v10 = vpop.f32.mrb[109].mxu0  ;;  %v4588_v59 = vpop.f32.mrb[237].mxu1 }
 0x616   : > { %13945 = vst [vmem:[#allocation211_spill] sm:$0xff] %v11072_v1  ;;  %13946 = vst [vmem:[#allocation200_spill] sm:$0xff] %v11075_v36  ;;  %v11092_v53 = vadd.f32 %v3816_v10, %v10375_v22  ;;  %v11095_v39 = vadd.f32 %v4588_v59, %v10379_v38  ;;  %v3818_v20 = vpop.f32.mrb[110].mxu0  ;;  %v4590_v61 = vpop.f32.mrb[238].mxu1 }
 0x617   : > { %13947 = vst [vmem:[#allocation206_spill] sm:$0xff] %v11086_v27  ;;  %13948 = vst [vmem:[#allocation207_spill] sm:$0xff] %v11089_v14  ;;  %v11098_v48 = vmul.f32 0.2, %v11086_v27  ;;  %v11101_v52 = vmul.f32 0.2, %v11089_v14  ;;  %v11104_v18 = vadd.f32 %v3818_v20, %v10368_v31  ;;  %v11107_v15 = vadd.f32 %v4590_v61, %v10372_v19 }
 0x618   : > { %13949 = vst [vmem:[#allocation210_spill] sm:$0xff] %v11092_v53  ;;  %13950 = vst [vmem:[#allocation219_spill] sm:$0xff] %v11095_v39  ;;  %v3820_v36 = vpop.f32.mrb[111].mxu0  ;;  %v4592_v10 = vpop.f32.mrb[239].mxu1  ;;  %v11110_v50 = vmul.f32 0.2, %v11092_v53 }
 0x619   : > { %13951 = vst [vmem:[#allocation224_spill] sm:$0xff] %v11098_v48  ;;  %13952 = vst [vmem:[#allocation225_spill] sm:$0xff] %v11101_v52  ;;  %v11113_v59 = vmul.f32 0.2, %v11095_v39  ;;  %v11116_v7 = vadd.f32 %v3820_v36, %v10375_v22  ;;  %v11119_v26 = vadd.f32 %v4592_v10, %v10379_v38  ;;  %v11126_v1 = vmul.f32 0.2, %v11104_v18 }
 0x61a   : > { %13953 = vst [vmem:[#allocation227_spill] sm:$0xff] %v11104_v18  ;;  %13954 = vst [vmem:[#allocation216_spill] sm:$0xff] %v11107_v15  ;;  %v11129_v5 = vmul.f32 0.2, %v11107_v15 }
 0x61b   : > { %13955 = vst [vmem:[#allocation222_spill] sm:$0xff] %v11110_v50  ;;  %13956 = vst [vmem:[#allocation223_spill] sm:$0xff] %v11113_v59  ;;  %v11136_v10 = vmul.f32 0.2, %v11116_v7  ;;  %v11139_v20 = vmul.f32 0.2, %v11119_v26 }
 0x61c   : > { %13957 = vst [vmem:[#allocation226_spill] sm:$0xff] %v11116_v7  ;;  %13958 = vst [vmem:[#allocation235_spill] sm:$0xff] %v11119_v26  ;;  %v3824_v48 = vpop.f32.mrb[112].mxu0  ;;  %v4596_v36 = vpop.f32.mrb[240].mxu1 }
 0x61d   : > { %13959 = vst [vmem:[#allocation240_spill] sm:$0xff] %v11126_v1  ;;  %13960 = vst [vmem:[#allocation241_spill] sm:$0xff] %v11129_v5  ;;  %v11150_v59 = vadd.f32 %v3824_v48, %v10368_v31  ;;  %v11153_v39 = vadd.f32 %v4596_v36, %v10372_v19  ;;  %v3826_v27 = vpop.f32.mrb[113].mxu0  ;;  %v4598_v50 = vpop.f32.mrb[241].mxu1 }
 0x61e   : > { %13961 = vst [vmem:[#allocation243_spill] sm:$0xff] %v11136_v10  ;;  %13962 = vst [vmem:[#allocation232_spill] sm:$0xff] %v11139_v20  ;;  %v11156_v61 = vadd.f32 %v3826_v27, %v10375_v22  ;;  %v11159_v52 = vadd.f32 %v4598_v50, %v10379_v38  ;;  %v3828_v14 = vpop.f32.mrb[114].mxu0  ;;  %v4600_v5 = vpop.f32.mrb[242].mxu1 }
 0x61f   : > { %13963 = vst [vmem:[#allocation238_spill] sm:$0xff] %v11150_v59  ;;  %13964 = vst [vmem:[#allocation239_spill] sm:$0xff] %v11153_v39  ;;  %v11162_v11 = vmul.f32 0.2, %v11150_v59  ;;  %v11165_v15 = vmul.f32 0.2, %v11153_v39  ;;  %v11168_v48 = vadd.f32 %v3828_v14, %v10368_v31  ;;  %v11171_v36 = vadd.f32 %v4600_v5, %v10372_v19 }
 0x620   : > { %13965 = vst [vmem:[#allocation242_spill] sm:$0xff] %v11156_v61  ;;  %13966 = vst [vmem:[#allocation251_spill] sm:$0xff] %v11159_v52  ;;  %v3830_v20 = vpop.f32.mrb[115].mxu0  ;;  %v4602_v27 = vpop.f32.mrb[243].mxu1  ;;  %v11174_v26 = vmul.f32 0.2, %v11156_v61 }
 0x621   : > { %13967 = vst [vmem:[#allocation256_spill] sm:$0xff] %v11162_v11  ;;  %13968 = vst [vmem:[#allocation257_spill] sm:$0xff] %v11165_v15  ;;  %v11177_v50 = vmul.f32 0.2, %v11159_v52  ;;  %v11180_v1 = vadd.f32 %v3830_v20, %v10375_v22  ;;  %v11183_v18 = vadd.f32 %v4602_v27, %v10379_v38  ;;  %v11190_v10 = vmul.f32 0.2, %v11168_v48 }
 0x622   : > { %13969 = vst [vmem:[#allocation259_spill] sm:$0xff] %v11168_v48  ;;  %13970 = vst [vmem:[#allocation248_spill] sm:$0xff] %v11171_v36  ;;  %v11193_v7 = vmul.f32 0.2, %v11171_v36 }
 0x623   : > { %13971 = vst [vmem:[#allocation254_spill] sm:$0xff] %v11174_v26  ;;  %13972 = vst [vmem:[#allocation255_spill] sm:$0xff] %v11177_v50  ;;  %v11200_v27 = vmul.f32 0.2, %v11180_v1  ;;  %v11203_v14 = vmul.f32 0.2, %v11183_v18 }
 0x624   : > { %13973 = vst [vmem:[#allocation258_spill] sm:$0xff] %v11180_v1  ;;  %13974 = vst [vmem:[#allocation267_spill] sm:$0xff] %v11183_v18  ;;  %v3834_v11 = vpop.f32.mrb[116].mxu0  ;;  %v4606_v20 = vpop.f32.mrb[244].mxu1 }
 0x625   : > { %13975 = vst [vmem:[#allocation272_spill] sm:$0xff] %v11190_v10  ;;  %13976 = vst [vmem:[#allocation273_spill] sm:$0xff] %v11193_v7  ;;  %v11214_v50 = vadd.f32 %v3834_v11, %v10368_v31  ;;  %v11217_v52 = vadd.f32 %v4606_v20, %v10372_v19  ;;  %v3836_v59 = vpop.f32.mrb[117].mxu0  ;;  %v4608_v26 = vpop.f32.mrb[245].mxu1 }
 0x626   : > { %13977 = vst [vmem:[#allocation275_spill] sm:$0xff] %v11200_v27  ;;  %13978 = vst [vmem:[#allocation264_spill] sm:$0xff] %v11203_v14  ;;  %v11220_v5 = vadd.f32 %v3836_v59, %v10375_v22  ;;  %v11223_v15 = vadd.f32 %v4608_v26, %v10379_v38  ;;  %v3838_v39 = vpop.f32.mrb[118].mxu0  ;;  %v4610_v7 = vpop.f32.mrb[246].mxu1 }
 0x627   : > { %13979 = vst [vmem:[#allocation270_spill] sm:$0xff] %v11214_v50  ;;  %13980 = vst [vmem:[#allocation271_spill] sm:$0xff] %v11217_v52  ;;  %v11226_v53 = vmul.f32 0.2, %v11214_v50  ;;  %v11229_v36 = vmul.f32 0.2, %v11217_v52  ;;  %v11232_v11 = vadd.f32 %v3838_v39, %v10368_v31  ;;  %v11235_v20 = vadd.f32 %v4610_v7, %v10372_v19 }
 0x628   : > { %13981 = vst [vmem:[#allocation274_spill] sm:$0xff] %v11220_v5  ;;  %13982 = vst [vmem:[#allocation283_spill] sm:$0xff] %v11223_v15  ;;  %v3840_v14 = vpop.f32.mrb[119].mxu0  ;;  %v4612_v59 = vpop.f32.mrb[247].mxu1  ;;  %v11238_v18 = vmul.f32 0.2, %v11220_v5 }
 0x629   : > { %13983 = vst [vmem:[#allocation288_spill] sm:$0xff] %v11226_v53  ;;  %13984 = vst [vmem:[#allocation289_spill] sm:$0xff] %v11229_v36  ;;  %v11241_v26 = vmul.f32 0.2, %v11223_v15  ;;  %v11244_v10 = vadd.f32 %v3840_v14, %v10375_v22  ;;  %v11247_v48 = vadd.f32 %v4612_v59, %v10379_v38  ;;  %v11254_v27 = vmul.f32 0.2, %v11232_v11 }
 0x62a   : > { %13985 = vst [vmem:[#allocation291_spill] sm:$0xff] %v11232_v11  ;;  %13986 = vst [vmem:[#allocation280_spill] sm:$0xff] %v11235_v20  ;;  %v11257_v1 = vmul.f32 0.2, %v11235_v20 }
 0x62b   : > { %13987 = vst [vmem:[#allocation286_spill] sm:$0xff] %v11238_v18  ;;  %13988 = vst [vmem:[#allocation287_spill] sm:$0xff] %v11241_v26  ;;  %v11264_v59 = vmul.f32 0.2, %v11244_v10  ;;  %v11267_v39 = vmul.f32 0.2, %v11247_v48 }
 0x62c   : > { %13989 = vst [vmem:[#allocation290_spill] sm:$0xff] %v11244_v10  ;;  %13990 = vst [vmem:[#allocation299_spill] sm:$0xff] %v11247_v48  ;;  %v3844_v53 = vpop.f32.mrb[120].mxu0  ;;  %v4616_v14 = vpop.f32.mrb[248].mxu1 }
 0x62d   : > { %13991 = vst [vmem:[#allocation304_spill] sm:$0xff] %v11254_v27  ;;  %13992 = vst [vmem:[#allocation305_spill] sm:$0xff] %v11257_v1  ;;  %v11278_v26 = vadd.f32 %v3844_v53, %v10368_v31  ;;  %v11281_v15 = vadd.f32 %v4616_v14, %v10372_v19  ;;  %v3846_v50 = vpop.f32.mrb[121].mxu0  ;;  %v4618_v18 = vpop.f32.mrb[249].mxu1 }
 0x62e   : > { %13993 = vst [vmem:[#allocation307_spill] sm:$0xff] %v11264_v59  ;;  %13994 = vst [vmem:[#allocation296_spill] sm:$0xff] %v11267_v39  ;;  %v11284_v7 = vadd.f32 %v3846_v50, %v10375_v22  ;;  %v11287_v36 = vadd.f32 %v4618_v18, %v10379_v38  ;;  %v3848_v52 = vpop.f32.mrb[122].mxu0  ;;  %v4620_v1 = vpop.f32.mrb[250].mxu1 }
 0x62f   : > { %13995 = vst [vmem:[#allocation302_spill] sm:$0xff] %v11278_v26  ;;  %13996 = vst [vmem:[#allocation303_spill] sm:$0xff] %v11281_v15  ;;  %v11290_v61 = vmul.f32 0.2, %v11278_v26  ;;  %v11293_v20 = vmul.f32 0.2, %v11281_v15  ;;  %v11296_v53 = vadd.f32 %v3848_v52, %v10368_v31  ;;  %v11299_v14 = vadd.f32 %v4620_v1, %v10372_v19 }
 0x630   : > { %13997 = vst [vmem:[#allocation306_spill] sm:$0xff] %v11287_v36  ;;  %v3850_v39 = vpop.f32.mrb[123].mxu0  ;;  %v4622_v50 = vpop.f32.mrb[251].mxu1  ;;  %v11302_v48 = vmul.f32 0.2, %v11284_v7 }
 0x631   : > { %13998 = vst [vmem:[#allocation315_spill] sm:$0xff] %v11290_v61  ;;  %13999 = vst [vmem:[#allocation320_spill] sm:$0xff] %v11293_v20  ;;  %v11305_v18 = vmul.f32 0.2, %v11287_v36  ;;  %v11308_v27 = vadd.f32 %v3850_v39, %v10375_v22  ;;  %v11311_v11 = vadd.f32 %v4622_v50, %v10379_v38  ;;  %v11318_v59 = vmul.f32 0.2, %v11296_v53 }
 0x632   : > { %14000 = vst [vmem:[#allocation321_spill] sm:$0xff] %v11296_v53  ;;  %14001 = vst [vmem:[#allocation323_spill] sm:$0xff] %v11299_v14  ;;  %v11321_v10 = vmul.f32 0.2, %v11299_v14 }
 0x633   : > { %14002 = vst [vmem:[#allocation312_spill] sm:$0xff] %v11302_v48  ;;  %14003 = vst [vmem:[#allocation318_spill] sm:$0xff] %v11305_v18  ;;  %v11328_v50 = vmul.f32 0.2, %v11308_v27  ;;  %v11331_v52 = vmul.f32 0.2, %v11311_v11 }
 0x634   : > { %14004 = vst [vmem:[#allocation319_spill] sm:$0xff] %v11311_v11  ;;  %14005 = vst [vmem:[#allocation322_spill] sm:$0xff] %v11318_v59  ;;  %v3854_v61 = vpop.f32.mrb[124].mxu0  ;;  %v4626_v39 = vpop.f32.mrb[252].mxu1 }
 0x635   : > { %14006 = vst [vmem:[#allocation331_spill] sm:$0xff] %v11321_v10  ;;  %14007 = vst [vmem:[#allocation336_spill] sm:$0xff] %v11328_v50  ;;  %v11342_v18 = vadd.f32 %v3854_v61, %v10368_v31  ;;  %v11345_v36 = vadd.f32 %v4626_v39, %v10372_v19  ;;  %v3856_v26 = vpop.f32.mrb[125].mxu0  ;;  %v4628_v48 = vpop.f32.mrb[253].mxu1 }
 0x636   : > { %14008 = vst [vmem:[#allocation337_spill] sm:$0xff] %v11331_v52  ;;  %v11348_v1 = vadd.f32 %v3856_v26, %v10375_v22  ;;  %v11351_v20 = vadd.f32 %v4628_v48, %v10379_v38  ;;  %v3858_v15 = vpop.f32.mrb[126].mxu0  ;;  %v4630_v10 = vpop.f32.mrb[254].mxu1 }
 0x637   : > { %14009 = vst [vmem:[#allocation339_spill] sm:$0xff] %v11345_v36  ;;  %v11354_v5 = vmul.f32 0.2, %v11342_v18  ;;  %v11357_v14 = vmul.f32 0.2, %v11345_v36  ;;  %v11360_v61 = vadd.f32 %v3858_v15, %v10368_v31  ;;  %v11363_v39 = vadd.f32 %v4630_v10, %v10372_v19  ;;  %v3860_v52 = vpop.f32.mrb[127].mxu0 }
 0x638   : > { %v4632_v26 = vpop.f32.mrb[255].mxu1  ;;  %v11366_v11 = vmul.f32 0.2, %v11348_v1  ;;  %v11369_v48 = vmul.f32 0.2, %v11351_v20  ;;  %v11372_v59 = vadd.f32 %v3860_v52, %v10375_v22 }
 0x639   : > { %14010 = vst [vmem:[#allocation328_spill] sm:$0xff] %v11357_v14  ;;  %14011 = vst [vmem:[#allocation334_spill] sm:$0xff] %v11363_v39  ;;  %v11375_v53 = vadd.f32 %v4632_v26, %v10379_v38  ;;  %v11382_v15 = vmul.f32 0.2, %v11360_v61  ;;  %v11385_v10 = vmul.f32 0.2, %v11363_v39 }
 0x63a   : > { %v11392_v38 = vmul.f32 0.2, %v11372_v59 }
 0x63b   : > { %14012 = vst [vmem:[#allocation335_spill] sm:$0xff] %v11385_v10  ;;  %v11395_v52 = vmul.f32 0.2, %v11375_v53 }
 0x63d   : > { %14013 = vst [vmem:[#allocation338_spill] sm:$0xff] %v11395_v52 }
 0x63e   : > { %6956 = dma.done.wait (%p14014_p2), [#allocation4 + $0x1], 8192  ;;  %p14015_p11 = pmov %p12614_p0 }
 0x63f   : > { %v14016_v22 = vmax.f32 %v10388_v30, %v10406_v28  ;;  %v14017_v26 = vmax.f32 %v10412_v58, %v10432_v49  ;;  %v4964_v19 = vld [vmem:[#allocation3 + $0x8] sm:$0xff]  ;;  %v4963_v10 = vld [vmem:[#allocation3] sm:$0xff]  ;;  %v4966_v39 = vld [vmem:[#allocation3 + $0x18] sm:$0xff]  ;;  %s5680_s28 = sshra.s32 %s7073_s8, 1  ;;  %s5683_s29 = sand.u32 1, %s7073_s8 }
 0x640   : > { %6958 = vsyncadd (%p14015_p11), [#allocation4 + $0x1], 4294959104  ;;  %5039 = vmatprep.subr.bf16.mxu0 %v4964_v19  ;;  %v4965_v50 = vld [vmem:[#allocation3 + $0x10] sm:$0xff]  ;;  %v4968_v31 = vld [vmem:[#allocation3 + $0x28] sm:$0xff]  ;;  %s5973_s10 = sshll.u32 %s5680_s28, 2  ;;  %s7000_s25 = smov [#allocation12]  }
 0x641   : > { %v4900_v14 = vpack.c.bf16 %v14017_v26, %v14016_v22  ;;  %5040 = vmatpush1.bf16.msra.mxu0 %v4963_v10  ;;  %v4967_v36 = vld [vmem:[#allocation3 + $0x20] sm:$0xff]  ;;  %v4970_v52 = vld [vmem:[#allocation3 + $0x38] sm:$0xff]  ;;  %v4969_v30 = vld [vmem:[#allocation3 + $0x30] sm:$0xff]  ;;  %s5686_s16 = sadd.s32 %s5973_s10, %s5683_s29  ;;  %s5696_s26 = sshll.u32 %s7000_s25, 4  ;;  %s5697_s26 = int_to_ptr.vmem [resolvable:$true] %s5696_s26 }
 0x642   : > { %5041 = vmatprep.subr.bf16.mxu0 %v4966_v39  ;;  %v4972_v28 = vld [vmem:[#allocation3 + $0x48] sm:$0xff]  ;;  %v4971_v58 = vld [vmem:[#allocation3 + $0x40] sm:$0xff]  ;;  %v4974_v49 = vld [vmem:[#allocation3 + $0x58] sm:$0xff]  ;;  %p6673_p13 = scmp.eq.s32.totalorder %s7073_s8, 1  ;;  %s5687_s27 = scalar_lea.vmem [#allocation12], %s5686_s16 }
 0x643   : > { %5071 = vmatprep.mubr.bf16.mxu0 %v4900_v14  ;;  %v4973_v14 = vld [vmem:[#allocation3 + $0x50] sm:$0xff]  ;;  %v4976_v19 = vld [vmem:[#allocation3 + $0x68] sm:$0xff]  ;;  %v4975_v39 = vld [vmem:[#allocation3 + $0x60] sm:$0xff]  ;;  %s6901_s15 = scalar_lea.vmem %s5697_s26, 64  ;;  %p6908_p9 = scmp.lt.s32.totalorder %s5697_s26, %s5697_s26 }
 0x644   : > { %v4978_v10 = vld [vmem:[#allocation3 + $0x78] sm:$0xff]  ;;  %v4984_v26 = vld [vmem:[#allocation3 + $0xa8] sm:$0xff]  ;;  %p6902_p3 = scmp.ne.s32.totalorder %s5697_s26, %s6901_s15  ;;  %p6909_p8 = scmp.lt.s32.totalorder %s6901_s15, %s6901_s15 }
 0x645   : > { %5042 = vmatpush1.bf16.msra.mxu0 %v4965_v50  ;;  %v4977_v50 = vld [vmem:[#allocation3 + $0x70] sm:$0xff]  ;;  %v4982_v22 = vld [vmem:[#allocation3 + $0x98] sm:$0xff] }
 0x646   : > { %5043 = vmatprep.subr.bf16.mxu0 %v4968_v31  ;;  %v4980_v31 = vld [vmem:[#allocation3 + $0x88] sm:$0xff]  ;;  %p6903_p7 = pnand %p6902_p3, %p6673_p13  ;;  %p6910_p1 = por %p6909_p8, %p6908_p9 }
 0x648   : > { %p6904_p6 = pneg %p6903_p7 }
 0x649   : > { %5044 = vmatpush1.bf16.msra.mxu0 %v4967_v36  ;;  %v4979_v36 = vld [vmem:[#allocation3 + $0x80] sm:$0xff] }
 0x64a   : > { %5045 = vmatprep.subr.bf16.mxu0 %v4970_v52  ;;  %v4981_v52 = vld [vmem:[#allocation3 + $0x90] sm:$0xff]  ;;  %p6911_p4 = pnand %p6910_p1, %p6904_p6 }
 0x64d   : > { %5046 = vmatpush1.bf16.msra.mxu0 %v4969_v30  ;;  %v4983_v30 = vld [vmem:[#allocation3 + $0xa0] sm:$0xff] }
 0x64e   : > { %5047 = vmatprep.subr.bf16.mxu0 %v4972_v28  ;;  %v4986_v28 = vld [vmem:[#allocation3 + $0xb8] sm:$0xff] }
 0x651   : > { %5048 = vmatpush1.bf16.msra.mxu0 %v4971_v58  ;;  %v4985_v58 = vld [vmem:[#allocation3 + $0xb0] sm:$0xff] }
 0x652   : > { %5049 = vmatprep.subr.bf16.mxu0 %v4974_v49  ;;  %v4988_v49 = vld [vmem:[#allocation3 + $0xc8] sm:$0xff] }
 0x655   : > { %5050 = vmatpush1.bf16.msra.mxu0 %v4973_v14  ;;  %v4987_v14 = vld [vmem:[#allocation3 + $0xc0] sm:$0xff] }
 0x656   : > { %5051 = vmatprep.subr.bf16.mxu0 %v4976_v19  ;;  %v4990_v19 = vld [vmem:[#allocation3 + $0xd8] sm:$0xff] }
 0x659   : > { %5052 = vmatpush1.bf16.msra.mxu0 %v4975_v39  ;;  %v4989_v39 = vld [vmem:[#allocation3 + $0xd0] sm:$0xff] }
 0x65a   : > { %5053 = vmatprep.subr.bf16.mxu0 %v4978_v10  ;;  %v4992_v10 = vld [vmem:[#allocation3 + $0xe8] sm:$0xff] }
 0x65d   : > { %5054 = vmatpush1.bf16.msra.mxu0 %v4977_v50  ;;  %v4991_v50 = vld [vmem:[#allocation3 + $0xe0] sm:$0xff] }
 0x65e   : > { %5055 = vmatprep.subr.bf16.mxu0 %v4980_v31  ;;  %v4994_v31 = vld [vmem:[#allocation3 + $0xf8] sm:$0xff] }
 0x661   : > { %5056 = vmatpush1.bf16.msra.mxu0 %v4979_v36  ;;  %v4993_v36 = vld [vmem:[#allocation3 + $0xf0] sm:$0xff] }
 0x662   : > { %5057 = vmatprep.subr.bf16.mxu0 %v4982_v22  ;;  %v4996_v22 = vld [vmem:[#allocation3 + $0x108] sm:$0xff] }
 0x665   : > { %5058 = vmatpush1.bf16.msra.mxu0 %v4981_v52  ;;  %v14018_v52 = vmax.f32 %v10382_v37, %v10394_v41  ;;  %v4997_v37 = vld [vmem:[#allocation3 + $0x110] sm:$0xff]  ;;  %v5000_v41 = vld [vmem:[#allocation3 + $0x128] sm:$0xff] }
 0x666   : > { %5059 = vmatprep.subr.bf16.mxu0 %v4984_v26  ;;  %v14019_v26 = vmax.f32 %v10400_v33, %v10422_v3  ;;  %v14022_v33 = vmax.f32 %v10446_v56, %v10458_v40  ;;  %v14023_v3 = vmax.f32 %v10464_v2, %v10486_v35  ;;  %v5001_v56 = vld [vmem:[#allocation3 + $0x130] sm:$0xff]  ;;  %v5004_v40 = vld [vmem:[#allocation3 + $0x148] sm:$0xff]  ;;  %v14026_v2 = vmax.f32 %v10510_v0, %v10522_v29 }
 0x667   : > { %v14027_v35 = vmax.f32 %v10528_v32, %v10550_v25  ;;  %v5005_v29 = vld [vmem:[#allocation3 + $0x150] sm:$0xff]  ;;  %v5008_v0 = vld [vmem:[#allocation3 + $0x168] sm:$0xff]  ;;  %v14030_v25 = vmax.f32 %v10574_v8, %v10586_v55  ;;  %v14031_v32 = vmax.f32 %v10592_v9, %v10614_v57  ;;  %v14034_v57 = vmax.f32 %v10638_v16, %v10650_v24 }
 0x668   : > { %v5009_v8 = vld [vmem:[#allocation3 + $0x170] sm:$0xff]  ;;  %v5012_v55 = vld [vmem:[#allocation3 + $0x188] sm:$0xff] }
 0x669   : > { %5060 = vmatpush1.bf16.msra.mxu0 %v4983_v30  ;;  %v4899_v30 = vpack.c.bf16 %v14019_v26, %v14018_v52  ;;  %v14039_v52 = vld [vmem:[#allocation83_spill] sm:$0xff] }
 0x66a   : > { %5061 = vmatprep.subr.bf16.mxu0 %v4986_v28  ;;  %v14020_v28 = vmax.f32 %v10452_v46, %v10470_v63  ;;  %v4903_v46 = vpack.c.bf16 %v14023_v3, %v14022_v33  ;;  %v14024_v63 = vmax.f32 %v10516_v51, %v10534_v44  ;;  %v4907_v44 = vpack.c.bf16 %v14027_v35, %v14026_v2  ;;  %v5013_v24 = vld [vmem:[#allocation3 + $0x190] sm:$0xff]  ;;  %v5016_v16 = vld [vmem:[#allocation3 + $0x1a8] sm:$0xff] }
 0x66b   : > { %v14029_v51 = vmax.f32 %v10604_v62, %v10624_v12  ;;  %v14032_v62 = vmax.f32 %v10644_v54, %v10662_v47  ;;  %v14035_v47 = vmax.f32 %v10656_v6, %v10678_v17  ;;  %v14042_v17 = vld [vmem:[#allocation72_spill] sm:$0xff]  ;;  %v14048_v33 = vld [vmem:[#allocation86_spill] sm:$0xff] }
 0x66c   : > { %v14053_v2 = vld [vmem:[#allocation78_spill] sm:$0xff]  ;;  %v14054_v35 = vld [vmem:[#allocation88_spill] sm:$0xff] }
 0x66d   : > { %5062 = vmatpush1.bf16.msra.mxu0 %v4985_v58  ;;  %v14021_v58 = vmax.f32 %v10476_v34, %v10496_v45  ;;  %v14025_v34 = vmax.f32 %v10540_v43, %v10560_v42  ;;  %v14028_v43 = vmax.f32 %v10580_v4, %v10598_v23  ;;  %v4911_v23 = vpack.c.bf16 %v14031_v32, %v14030_v25  ;;  %v14062_v25 = vld [vmem:[#allocation106_spill] sm:$0xff]  ;;  %v14063_v32 = vld [vmem:[#allocation115_spill] sm:$0xff] }
 0x66e   : > { %5063 = vmatprep.subr.bf16.mxu0 %v4988_v49  ;;  %v14033_v4 = vmax.f32 %v10668_v60, %v10688_v21  ;;  %v4915_v9 = vpack.c.bf16 %v14035_v47, %v14034_v57  ;;  %v14036_v60 = vld [vmem:[#allocation70_spill] sm:$0xff]  ;;  %v14068_v47 = vld [vmem:[#allocation107_spill] sm:$0xff] }
 0x66f   : > { %v4904_v49 = vpack.c.bf16 %v14021_v58, %v14020_v28  ;;  %v4908_v45 = vpack.c.bf16 %v14025_v34, %v14024_v63  ;;  %v4912_v42 = vpack.c.bf16 %v14029_v51, %v14028_v43  ;;  %v14037_v54 = vmax.f32 %v10708_v13, %v14036_v60  ;;  %v14038_v21 = vld [vmem:[#allocation74_spill] sm:$0xff]  ;;  %v5014_v58 = vld [vmem:[#allocation3 + $0x198] sm:$0xff]  ;;  %v14051_v63 = vld [vmem:[#allocation99_spill] sm:$0xff] }
 0x670   : > { %v4916_v12 = vpack.c.bf16 %v14033_v4, %v14032_v62  ;;  %v14040_v26 = vmax.f32 %v14038_v21, %v14039_v52  ;;  %v5011_v28 = vld [vmem:[#allocation3 + $0x180] sm:$0xff]  ;;  %v14056_v43 = vld [vmem:[#allocation91_spill] sm:$0xff]  ;;  %v14057_v51 = vld [vmem:[#allocation96_spill] sm:$0xff] }
 0x671   : > { %5064 = vmatpush1.bf16.msra.mxu0 %v4987_v14  ;;  %v4995_v14 = vld [vmem:[#allocation3 + $0x100] sm:$0xff] }
 0x672   : > { %5065 = vmatprep.subr.bf16.mxu0 %v4990_v19  ;;  %v4998_v19 = vld [vmem:[#allocation3 + $0x118] sm:$0xff]  ;;  %v5019_v4 = vld [vmem:[#allocation3 + $0x1c0] sm:$0xff] }
 0x673   : > { %v14071_v21 = vld [vmem:[#allocation114_spill] sm:$0xff] }
 0x674   : > { %v14072_v52 = vld [vmem:[#allocation126_spill] sm:$0xff] }
 0x675   : > { %5066 = vmatpush1.bf16.msra.mxu0 %v4989_v39  ;;  %v4999_v39 = vld [vmem:[#allocation3 + $0x120] sm:$0xff] }
 0x676   : > { %5067 = vmatprep.subr.bf16.mxu0 %v4992_v10  ;;  %v5002_v10 = vld [vmem:[#allocation3 + $0x138] sm:$0xff] }
 0x679   : > { %5068 = vmatpush1.bf16.msra.mxu0 %v4991_v50  ;;  %v5003_v50 = vld [vmem:[#allocation3 + $0x140] sm:$0xff] }
 0x67a   : > { %5069 = vmatprep.subr.bf16.mxu0 %v4994_v31  ;;  %v5006_v31 = vld [vmem:[#allocation3 + $0x158] sm:$0xff] }
 0x67d   : > { %5070 = vmatpush1.bf16.msra.mxu0 %v4993_v36  ;;  %v5007_v36 = vld [vmem:[#allocation3 + $0x160] sm:$0xff] }
 0x67e   : > { %5232 = vmatprep.subr.bf16.mxu0 %v4996_v22  ;;  %v5010_v22 = vld [vmem:[#allocation3 + $0x178] sm:$0xff] }
 0x680   : > { %5072 = vmatmul.mubr.bf16.vlgmr.msra.gmra.mrb[128].mxu0 %v4899_v30  ;;  %v4920_v30 = vpack.c.bf16 %v14040_v26, %v14037_v54  ;;  %v14073_v26 = vmax.f32 %v14071_v21, %v14072_v52  ;;  %v14113_v52 = vld [vmem:[#allocation206_spill] sm:$0xff] }
 0x681   : > { %5233 = vmatpush1.bf16.msra.mxu0 %v4995_v14  ;;  %5081 = vmatprep.mubr.bf16.mxu0 %v4904_v49  ;;  %v14041_v49 = vld [vmem:[#allocation63_spill] sm:$0xff] }
 0x682   : > { %5234 = vmatprep.subr.bf16.mxu0 %v4998_v19  ;;  %v14043_v6 = vmax.f32 %v14041_v49, %v14042_v17  ;;  %v14044_v14 = vld [vmem:[#allocation75_spill] sm:$0xff]  ;;  %v14045_v19 = vld [vmem:[#allocation80_spill] sm:$0xff] }
 0x683   : > { %v14046_v13 = vmax.f32 %v14044_v14, %v14045_v19  ;;  %v5026_v49 = vld [vmem:[#allocation3 + $0x1f8] sm:$0xff]  ;;  %v5025_v17 = vld [vmem:[#allocation3 + $0x1f0] sm:$0xff] }
 0x684   : > { %v14078_v14 = vld [vmem:[#allocation128_spill] sm:$0xff] }
 0x685   : > { %5235 = vmatpush1.bf16.msra.mxu0 %v4997_v37  ;;  %v4919_v37 = vpack.c.bf16 %v14046_v13, %v14043_v6  ;;  %v14077_v6 = vld [vmem:[#allocation110_spill] sm:$0xff]  ;;  %v14080_v13 = vld [vmem:[#allocation131_spill] sm:$0xff] }
 0x686   : > { %5236 = vmatprep.subr.bf16.mxu0 %v5000_v41  ;;  %v14047_v41 = vld [vmem:[#allocation82_spill] sm:$0xff]  ;;  %v14079_v19 = vmax.f32 %v14077_v6, %v14078_v14 }
 0x687   : > { %v14049_v3 = vmax.f32 %v14047_v41, %v14048_v33  ;;  %v14122_v14 = vld [vmem:[#allocation258_spill] sm:$0xff] }
 0x688   : > { %5082 = vmatmul.mubr.bf16.gmra.mrb[132].mxu0 %v4903_v46  ;;  %v14050_v46 = vld [vmem:[#allocation90_spill] sm:$0xff] }
 0x689   : > { %5091 = vmatprep.mubr.bf16.mxu0 %v4908_v45  ;;  %5237 = vmatpush1.bf16.msra.mxu0 %v4999_v39  ;;  %v14052_v34 = vmax.f32 %v14050_v46, %v14051_v63  ;;  %v5015_v39 = vld [vmem:[#allocation3 + $0x1a0] sm:$0xff] }
 0x68a   : > { %5238 = vmatprep.subr.bf16.mxu0 %v5002_v10  ;;  %v5018_v10 = vld [vmem:[#allocation3 + $0x1b8] sm:$0xff]  ;;  %v14084_v46 = vld [vmem:[#allocation158_spill] sm:$0xff] }
 0x68b   : > { %v4924_v45 = vpack.c.bf16 %v14052_v34, %v14049_v3  ;;  %v14083_v3 = vld [vmem:[#allocation146_spill] sm:$0xff] }
 0x68c   : > { %v14085_v63 = vmax.f32 %v14083_v3, %v14084_v46  ;;  %v14086_v34 = vld [vmem:[#allocation162_spill] sm:$0xff]  ;;  %v14128_v46 = vld [vmem:[#allocation259_spill] sm:$0xff] }
 0x68d   : > { %5239 = vmatpush1.bf16.msra.mxu0 %v5001_v56  ;;  %v5017_v56 = vld [vmem:[#allocation3 + $0x1b0] sm:$0xff] }
 0x68e   : > { %5240 = vmatprep.subr.bf16.mxu0 %v5004_v40  ;;  %v5020_v40 = vld [vmem:[#allocation3 + $0x1c8] sm:$0xff] }
 0x690   : > { %5092 = vmatmul.mubr.bf16.gmra.mrb[136].mxu0 %v4907_v44  ;;  %v14055_v44 = vmax.f32 %v14053_v2, %v14054_v35  ;;  %v14092_v35 = vld [vmem:[#allocation163_spill] sm:$0xff] }
 0x691   : > { %5101 = vmatprep.mubr.bf16.mxu0 %v4912_v42  ;;  %5241 = vmatpush1.bf16.msra.mxu0 %v5003_v50  ;;  %v14058_v42 = vmax.f32 %v14056_v43, %v14057_v51 }
 0x692   : > { %5242 = vmatprep.subr.bf16.mxu0 %v5006_v31  ;;  %v14059_v31 = vld [vmem:[#allocation98_spill] sm:$0xff] }
 0x693   : > { %v4923_v50 = vpack.c.bf16 %v14058_v42, %v14055_v44  ;;  %v14093_v44 = vld [vmem:[#allocation176_spill] sm:$0xff]  ;;  %v14095_v42 = vld [vmem:[#allocation178_spill] sm:$0xff] }
 0x694   : > { %v14094_v43 = vmax.f32 %v14092_v35, %v14093_v44 }
 0x695   : > { %5243 = vmatpush1.bf16.msra.mxu0 %v5005_v29  ;;  %v14060_v29 = vld [vmem:[#allocation102_spill] sm:$0xff] }
 0x696   : > { %5244 = vmatprep.subr.bf16.mxu0 %v5008_v0  ;;  %v14061_v0 = vmax.f32 %v14059_v31, %v14060_v29  ;;  %v14098_v29 = vld [vmem:[#allocation194_spill] sm:$0xff] }
 0x698   : > { %5102 = vmatmul.mubr.bf16.gmra.mrb[140].mxu0 %v4911_v23  ;;  %v14064_v23 = vmax.f32 %v14062_v25, %v14063_v32 }
 0x699   : > { %5111 = vmatprep.mubr.bf16.mxu0 %v4916_v12  ;;  %5245 = vmatpush1.bf16.msra.mxu0 %v5007_v36  ;;  %v5022_v12 = vld [vmem:[#allocation3 + $0x1d8] sm:$0xff]  ;;  %v5021_v36 = vld [vmem:[#allocation3 + $0x1d0] sm:$0xff] }
 0x69a   : > { %5246 = vmatprep.subr.bf16.mxu0 %v5010_v22  ;;  %v4928_v62 = vpack.c.bf16 %v14064_v23, %v14061_v0  ;;  %v5024_v22 = vld [vmem:[#allocation3 + $0x1e8] sm:$0xff] }
 0x69b   : > { %v14099_v0 = vld [vmem:[#allocation211_spill] sm:$0xff]  ;;  %v14101_v23 = vld [vmem:[#allocation174_spill] sm:$0xff] }
 0x69c   : > { %v14100_v25 = vmax.f32 %v14098_v29, %v14099_v0 }
 0x69d   : > { %5247 = vmatpush1.bf16.msra.mxu0 %v5009_v8  ;;  %v14065_v8 = vld [vmem:[#allocation94_spill] sm:$0xff] }
 0x69e   : > { %5248 = vmatprep.subr.bf16.mxu0 %v5012_v55  ;;  %v14066_v55 = vld [vmem:[#allocation104_spill] sm:$0xff] }
 0x69f   : > { %v14067_v57 = vmax.f32 %v14065_v8, %v14066_v55  ;;  %v14107_v55 = vld [vmem:[#allocation210_spill] sm:$0xff] }
 0x6a0   : > { %5112 = vmatmul.mubr.bf16.gmra.mrb[144].mxu0 %v4915_v9  ;;  %v14069_v9 = vld [vmem:[#allocation112_spill] sm:$0xff] }
 0x6a1   : > { %5121 = vmatprep.mubr.bf16.mxu0 %v4920_v30  ;;  %5249 = vmatpush1.bf16.msra.mxu0 %v5011_v28  ;;  %v14070_v60 = vmax.f32 %v14068_v47, %v14069_v9  ;;  %v14074_v30 = vld [vmem:[#allocation130_spill] sm:$0xff]  ;;  %v14075_v28 = vld [vmem:[#allocation147_spill] sm:$0xff] }
 0x6a2   : > { %5250 = vmatprep.subr.bf16.mxu0 %v5014_v58  ;;  %v14076_v58 = vmax.f32 %v14074_v30, %v14075_v28  ;;  %v14110_v9 = vld [vmem:[#allocation226_spill] sm:$0xff]  ;;  %v14116_v28 = vld [vmem:[#allocation227_spill] sm:$0xff] }
 0x6a3   : > { %v4927_v54 = vpack.c.bf16 %v14070_v60, %v14067_v57  ;;  %v14108_v57 = vld [vmem:[#allocation222_spill] sm:$0xff]  ;;  %v14111_v60 = vld [vmem:[#allocation243_spill] sm:$0xff] }
 0x6a4   : > { %v14109_v47 = vmax.f32 %v14107_v55, %v14108_v57  ;;  %v14151_v55 = vld [vmem:[#allocation322_spill] sm:$0xff] }
 0x6a5   : > { %5251 = vmatpush1.bf16.msra.mxu0 %v5013_v24  ;;  %v4932_v24 = vpack.c.bf16 %v14076_v58, %v14073_v26  ;;  %v14114_v26 = vld [vmem:[#allocation224_spill] sm:$0xff] }
 0x6a6   : > { %5252 = vmatprep.subr.bf16.mxu0 %v5016_v16  ;;  %v5023_v16 = vld [vmem:[#allocation3 + $0x1e0] sm:$0xff]  ;;  %v14115_v30 = vmax.f32 %v14113_v52, %v14114_v26  ;;  %v14117_v58 = vld [vmem:[#allocation240_spill] sm:$0xff]  ;;  %v14157_v52 = vld [vmem:[#allocation27_spill] sm:$0xff] }
 0x6a7   : > { %v14158_v26 = vld [vmem:[#allocation33_spill] sm:$0xff] }
 0x6a8   : > { %5122 = vmatmul.mubr.bf16.gmra.mrb[148].mxu0 %v4919_v37  ;;  %v14081_v37 = vld [vmem:[#allocation144_spill] sm:$0xff] }
 0x6a9   : > { %5131 = vmatprep.mubr.bf16.mxu0 %v4924_v45  ;;  %5253 = vmatpush1.bf16.msra.mxu0 %v5015_v39  ;;  %v14082_v41 = vmax.f32 %v14080_v13, %v14081_v37  ;;  %v14087_v45 = vld [vmem:[#allocation179_spill] sm:$0xff] }
 0x6aa   : > { %5254 = vmatprep.subr.bf16.mxu0 %v5018_v10  ;;  %v14088_v39 = vmax.f32 %v14086_v34, %v14087_v45 }
 0x6ab   : > { %v4931_v33 = vpack.c.bf16 %v14082_v41, %v14079_v19  ;;  %v14123_v19 = vld [vmem:[#allocation275_spill] sm:$0xff]  ;;  %v14125_v41 = vld [vmem:[#allocation238_spill] sm:$0xff] }
 0x6ac   : > { %v4936_v10 = vpack.c.bf16 %v14088_v39, %v14085_v63  ;;  %v14124_v13 = vmax.f32 %v14122_v14, %v14123_v19  ;;  %v14129_v63 = vld [vmem:[#allocation272_spill] sm:$0xff]  ;;  %v14131_v39 = vld [vmem:[#allocation274_spill] sm:$0xff] }
 0x6ad   : > { %5255 = vmatpush1.bf16.msra.mxu0 %v5017_v56  ;;  %v14089_v56 = vld [vmem:[#allocation142_spill] sm:$0xff]  ;;  %v14130_v34 = vmax.f32 %v14128_v46, %v14129_v63  ;;  %v14179_v46 = vld [vmem:[#allocation36_spill] sm:$0xff] }
 0x6ae   : > { %5256 = vmatprep.subr.bf16.mxu0 %v5020_v40  ;;  %v14090_v40 = vld [vmem:[#allocation160_spill] sm:$0xff]  ;;  %v14173_v14 = vld [vmem:[#allocation38_spill] sm:$0xff] }
 0x6af   : > { %v14091_v2 = vmax.f32 %v14089_v56, %v14090_v40  ;;  %v14134_v40 = vld [vmem:[#allocation290_spill] sm:$0xff] }
 0x6b0   : > { %5132 = vmatmul.mubr.bf16.gmra.mrb[152].mxu0 %v4923_v50  ;;  %v14096_v50 = vld [vmem:[#allocation190_spill] sm:$0xff] }
 0x6b1   : > { %5141 = vmatprep.mubr.bf16.mxu0 %v4928_v62  ;;  %5257 = vmatpush1.bf16.msra.mxu0 %v5019_v4  ;;  %v4935_v51 = vpack.c.bf16 %v14094_v43, %v14091_v2  ;;  %v14097_v31 = vmax.f32 %v14095_v42, %v14096_v50  ;;  %v14102_v62 = vld [vmem:[#allocation192_spill] sm:$0xff]  ;;  %v14135_v2 = vld [vmem:[#allocation307_spill] sm:$0xff]  ;;  %v14137_v43 = vld [vmem:[#allocation270_spill] sm:$0xff] }
 0x6b2   : > { %5258 = vmatprep.subr.bf16.mxu0 %v5022_v12  ;;  %v14103_v4 = vmax.f32 %v14101_v23, %v14102_v62  ;;  %v14104_v12 = vld [vmem:[#allocation195_spill] sm:$0xff]  ;;  %v14136_v35 = vmax.f32 %v14134_v40, %v14135_v2  ;;  %v14145_v23 = vld [vmem:[#allocation336_spill] sm:$0xff]  ;;  %v14185_v40 = vld [vmem:[#allocation46_spill] sm:$0xff] }
 0x6b3   : > { %v4940_v32 = vpack.c.bf16 %v14100_v25, %v14097_v31  ;;  %v14140_v50 = vld [vmem:[#allocation291_spill] sm:$0xff]  ;;  %v14141_v31 = vld [vmem:[#allocation304_spill] sm:$0xff]  ;;  %v14146_v62 = vmax.f32 %v11308_v27, %v14145_v23  ;;  %v14155_v27 = vmax.f32 %v11342_v18, %v11354_v5  ;;  %v14169_v18 = vld [vmem:[#allocation34_spill] sm:$0xff] }
 0x6b4   : > { %v14142_v29 = vmax.f32 %v14140_v50, %v14141_v31  ;;  %v14143_v25 = vld [vmem:[#allocation312_spill] sm:$0xff]  ;;  %v14196_v23 = vld [vmem:[#allocation59_spill] sm:$0xff] }
 0x6b5   : > { %5259 = vmatpush1.bf16.msra.mxu0 %v5021_v36  ;;  %v14105_v36 = vld [vmem:[#allocation208_spill] sm:$0xff] }
 0x6b6   : > { %5260 = vmatprep.subr.bf16.mxu0 %v5024_v22  ;;  %v14106_v22 = vmax.f32 %v14104_v12, %v14105_v36  ;;  %v14147_v12 = vld [vmem:[#allocation302_spill] sm:$0xff]  ;;  %v14148_v36 = vld [vmem:[#allocation315_spill] sm:$0xff]  ;;  %v14191_v50 = vld [vmem:[#allocation44_spill] sm:$0xff] }
 0x6b8   : > { %5142 = vmatmul.mubr.bf16.gmra.mrb[156].mxu0 %v4927_v54  ;;  %v4939_v8 = vpack.c.bf16 %v14106_v22, %v14103_v4  ;;  %v14112_v54 = vmax.f32 %v14110_v9, %v14111_v60  ;;  %v14149_v22 = vmax.f32 %v14147_v12, %v14148_v36  ;;  %v14153_v9 = vmax.f32 %v11348_v1, %v11366_v11  ;;  %v14164_v1 = vld [vmem:[#allocation29_spill] sm:$0xff]  ;;  %v14199_v36 = vld [vmem:[#allocation47_spill] sm:$0xff] }
 0x6b9   : > { %5151 = vmatprep.mubr.bf16.mxu0 %v4932_v24  ;;  %5261 = vmatpush1.bf16.msra.mxu0 %v5023_v16  ;;  %v14118_v24 = vmax.f32 %v14116_v28, %v14117_v58  ;;  %v14154_v60 = vmax.f32 %v11372_v59, %v11392_v38  ;;  %v14160_v28 = vld [vmem:[#allocation35_spill] sm:$0xff]  ;;  %v14161_v58 = vld [vmem:[#allocation30_spill] sm:$0xff] }
 0x6ba   : > { %5262 = vmatprep.subr.bf16.mxu0 %v5026_v49  ;;  %v4944_v21 = vpack.c.bf16 %v14112_v54, %v14109_v47  ;;  %v14119_v49 = vld [vmem:[#allocation242_spill] sm:$0xff]  ;;  %v14156_v54 = vmax.f32 %v11360_v61, %v11382_v15  ;;  %v14172_v15 = vld [vmem:[#allocation43_spill] sm:$0xff] }
 0x6bb   : > { %v4943_v16 = vpack.c.bf16 %v14118_v24, %v14115_v30  ;;  %v14159_v30 = vmax.f32 %v14157_v52, %v14158_v26  ;;  %v14162_v24 = vmax.f32 %v14160_v28, %v14161_v58  ;;  %v14163_v59 = vld [vmem:[#allocation26_spill] sm:$0xff]  ;;  %v14174_v19 = vmax.f32 %v14172_v15, %v14173_v14  ;;  %v14212_v28 = vld [vmem:[#allocation61_spill] sm:$0xff] }
 0x6bc   : > { %v14165_v38 = vmax.f32 %v14163_v59, %v14164_v1  ;;  %v14224_v15 = vld [vmem:[#allocation73_spill] sm:$0xff] }
 0x6bd   : > { %5263 = vmatpush1.bf16.msra.mxu0 %v5025_v17  ;;  %v14120_v17 = vld [vmem:[#allocation254_spill] sm:$0xff]  ;;  %v4902_v11 = vpack.c.bf16 %v14162_v24, %v14159_v30  ;;  %v14211_v30 = vld [vmem:[#allocation55_spill] sm:$0xff]  ;;  %v14214_v24 = vld [vmem:[#allocation64_spill] sm:$0xff] }
 0x6be   : > { %v14121_v6 = vmax.f32 %v14119_v49, %v14120_v17  ;;  %v14167_v49 = vld [vmem:[#allocation28_spill] sm:$0xff]  ;;  %v14213_v58 = vmax.f32 %v14211_v30, %v14212_v28 }
 0x6c0   : > { %5152 = vmatmul.mubr.bf16.gmra.mrb[160].mxu0 %v4931_v33  ;;  %v4948_v37 = vpack.c.bf16 %v14124_v13, %v14121_v6  ;;  %v14126_v33 = vld [vmem:[#allocation256_spill] sm:$0xff]  ;;  %v14170_v6 = vld [vmem:[#allocation41_spill] sm:$0xff] }
 0x6c1   : > { %5161 = vmatprep.mubr.bf16.mxu0 %v4936_v10  ;;  %v14127_v3 = vmax.f32 %v14125_v41, %v14126_v33  ;;  %v14132_v10 = vld [vmem:[#allocation286_spill] sm:$0xff]  ;;  %v14171_v61 = vmax.f32 %v14169_v18, %v14170_v6  ;;  %v14176_v41 = vld [vmem:[#allocation37_spill] sm:$0xff] }
 0x6c2   : > { %v14133_v56 = vmax.f32 %v14131_v39, %v14132_v10  ;;  %v14182_v39 = vld [vmem:[#allocation49_spill] sm:$0xff] }
 0x6c3   : > { %v4947_v45 = vpack.c.bf16 %v14130_v34, %v14127_v3  ;;  %v4906_v13 = vpack.c.bf16 %v14174_v19, %v14171_v61  ;;  %v14178_v3 = vld [vmem:[#allocation40_spill] sm:$0xff]  ;;  %v14223_v61 = vld [vmem:[#allocation66_spill] sm:$0xff] }
 0x6c4   : > { %v4952_v44 = vpack.c.bf16 %v14136_v35, %v14133_v56  ;;  %v14180_v63 = vmax.f32 %v14178_v3, %v14179_v46  ;;  %v14184_v56 = vld [vmem:[#allocation51_spill] sm:$0xff]  ;;  %v14225_v14 = vmax.f32 %v14223_v61, %v14224_v15  ;;  %v14226_v19 = vld [vmem:[#allocation68_spill] sm:$0xff] }
 0x6c5   : > { %v14186_v2 = vmax.f32 %v14184_v56, %v14185_v40  ;;  %v14230_v3 = vld [vmem:[#allocation87_spill] sm:$0xff]  ;;  %v14236_v56 = vld [vmem:[#allocation89_spill] sm:$0xff] }
 0x6c8   : > { %5162 = vmatmul.mubr.bf16.gmra.mrb[164].mxu0 %v4935_v51  ;;  %v14138_v51 = vld [vmem:[#allocation288_spill] sm:$0xff] }
 0x6c9   : > { %5171 = vmatprep.mubr.bf16.mxu0 %v4940_v32  ;;  %v14139_v42 = vmax.f32 %v14137_v43, %v14138_v51  ;;  %v14144_v32 = vmax.f32 %v11284_v7, %v14143_v25  ;;  %v4960_v7 = vpack.c.bf16 %v14154_v60, %v14153_v9  ;;  %v14188_v43 = vld [vmem:[#allocation45_spill] sm:$0xff]  ;;  %v14205_v60 = vld [vmem:[#allocation58_spill] sm:$0xff] }
 0x6ca   : > { %v14194_v25 = vld [vmem:[#allocation57_spill] sm:$0xff] }
 0x6cb   : > { %v4951_v0 = vpack.c.bf16 %v14142_v29, %v14139_v42  ;;  %v4956_v4 = vpack.c.bf16 %v14146_v62, %v14144_v32  ;;  %v14190_v42 = vld [vmem:[#allocation48_spill] sm:$0xff]  ;;  %v14197_v62 = vld [vmem:[#allocation54_spill] sm:$0xff] }
 0x6cc   : > { %v14192_v31 = vmax.f32 %v14190_v42, %v14191_v50  ;;  %v14242_v42 = vld [vmem:[#allocation103_spill] sm:$0xff] }
 0x6d0   : > { %5172 = vmatmul.mubr.bf16.gmra.mrb[168].mxu0 %v4939_v8  ;;  %v14150_v8 = vld [vmem:[#allocation321_spill] sm:$0xff] }
 0x6d1   : > { %5181 = vmatprep.mubr.bf16.mxu0 %v4944_v21  ;;  %v14152_v57 = vmax.f32 %v14150_v8, %v14151_v55  ;;  %v4959_v21 = vpack.c.bf16 %v14156_v54, %v14155_v27  ;;  %v14202_v55 = vld [vmem:[#allocation56_spill] sm:$0xff]  ;;  %v14208_v54 = vld [vmem:[#allocation67_spill] sm:$0xff] }
 0x6d3   : > { %v4955_v47 = vpack.c.bf16 %v14152_v57, %v14149_v22  ;;  %v14200_v22 = vld [vmem:[#allocation53_spill] sm:$0xff]  ;;  %v14203_v57 = vld [vmem:[#allocation52_spill] sm:$0xff] }
 0x6d4   : > { %v14201_v8 = vmax.f32 %v14199_v36, %v14200_v22 }
 0x6d8   : > { %5182 = vmatmul.mubr.bf16.gmra.mrb[172].mxu0 %v4943_v16  ;;  %v14166_v16 = vld [vmem:[#allocation32_spill] sm:$0xff] }
 0x6d9   : > { %5191 = vmatprep.mubr.bf16.mxu0 %v4948_v37  ;;  %v14168_v17 = vmax.f32 %v14166_v16, %v14167_v49  ;;  %v14175_v37 = vld [vmem:[#allocation31_spill] sm:$0xff] }
 0x6da   : > { %v14177_v33 = vmax.f32 %v14175_v37, %v14176_v41  ;;  %v14218_v16 = vld [vmem:[#allocation71_spill] sm:$0xff] }
 0x6db   : > { %v4901_v5 = vpack.c.bf16 %v14168_v17, %v14165_v38  ;;  %v14217_v38 = vld [vmem:[#allocation69_spill] sm:$0xff] }
 0x6dc   : > { %v4905_v34 = vpack.c.bf16 %v14180_v63, %v14177_v33  ;;  %v14219_v49 = vmax.f32 %v14217_v38, %v14218_v16  ;;  %v14220_v17 = vld [vmem:[#allocation77_spill] sm:$0xff] }
 0x6dd   : > { %v14229_v33 = vld [vmem:[#allocation85_spill] sm:$0xff] }
 0x6de   : > { %v14231_v46 = vmax.f32 %v14229_v33, %v14230_v3  ;;  %v14232_v63 = vld [vmem:[#allocation93_spill] sm:$0xff] }
 0x6e0   : > { %5192 = vmatmul.mubr.bf16.gmra.mrb[176].mxu0 %v4947_v45  ;;  %v14181_v45 = vld [vmem:[#allocation42_spill] sm:$0xff] }
 0x6e1   : > { %5201 = vmatprep.mubr.bf16.mxu0 %v4952_v44  ;;  %v14183_v10 = vmax.f32 %v14181_v45, %v14182_v39  ;;  %v14187_v44 = vld [vmem:[#allocation39_spill] sm:$0xff] }
 0x6e2   : > { %v14189_v51 = vmax.f32 %v14187_v44, %v14188_v43 }
 0x6e3   : > { %v4910_v35 = vpack.c.bf16 %v14186_v2, %v14183_v10  ;;  %v14235_v10 = vld [vmem:[#allocation79_spill] sm:$0xff]  ;;  %v14238_v2 = vld [vmem:[#allocation84_spill] sm:$0xff] }
 0x6e4   : > { %v4909_v29 = vpack.c.bf16 %v14192_v31, %v14189_v51  ;;  %v14237_v40 = vmax.f32 %v14235_v10, %v14236_v56  ;;  %v14241_v51 = vld [vmem:[#allocation101_spill] sm:$0xff] }
 0x6e5   : > { %v14243_v50 = vmax.f32 %v14241_v51, %v14242_v42  ;;  %v14244_v31 = vld [vmem:[#allocation109_spill] sm:$0xff] }
 0x6e8   : > { %5202 = vmatmul.mubr.bf16.gmra.mrb[180].mxu0 %v4951_v0  ;;  %v14193_v0 = vld [vmem:[#allocation50_spill] sm:$0xff] }
 0x6e9   : > { %5211 = vmatprep.mubr.bf16.mxu0 %v4956_v4  ;;  %v14195_v32 = vmax.f32 %v14193_v0, %v14194_v25  ;;  %v14198_v4 = vmax.f32 %v14196_v23, %v14197_v62  ;;  %v14248_v23 = vld [vmem:[#allocation105_spill] sm:$0xff] }
 0x6eb   : > { %v4914_v12 = vpack.c.bf16 %v14198_v4, %v14195_v32  ;;  %v14247_v32 = vld [vmem:[#allocation95_spill] sm:$0xff]  ;;  %v14250_v4 = vld [vmem:[#allocation100_spill] sm:$0xff] }
 0x6ec   : > { %v14249_v62 = vmax.f32 %v14247_v32, %v14248_v23 }
 0x6f0   : > { %5212 = vmatmul.mubr.bf16.gmra.mrb[184].mxu0 %v4955_v47  ;;  %v14204_v47 = vmax.f32 %v14202_v55, %v14203_v57  ;;  %v14254_v55 = vld [vmem:[#allocation127_spill] sm:$0xff] }
 0x6f1   : > { %5221 = vmatprep.mubr.bf16.mxu0 %v4960_v7  ;;  %v14206_v7 = vld [vmem:[#allocation65_spill] sm:$0xff] }
 0x6f2   : > { %v4913_v9 = vpack.c.bf16 %v14204_v47, %v14201_v8  ;;  %v14207_v27 = vmax.f32 %v14205_v60, %v14206_v7  ;;  %v14253_v8 = vld [vmem:[#allocation123_spill] sm:$0xff] }
 0x6f3   : > { %v14255_v57 = vmax.f32 %v14253_v8, %v14254_v55  ;;  %v14256_v47 = vld [vmem:[#allocation139_spill] sm:$0xff] }
 0x6f8   : > { %5222 = vmatmul.mubr.bf16.gmra.mrb[188].mxu0 %v4959_v21  ;;  %v14209_v21 = vld [vmem:[#allocation62_spill] sm:$0xff] }
 0x6f9   : > { %5264 = vmatprep.mubr.bf16.mxu0 %v4902_v11  ;;  %v14210_v52 = vmax.f32 %v14208_v54, %v14209_v21  ;;  %v14215_v11 = vld [vmem:[#allocation60_spill] sm:$0xff]  ;;  %v14260_v54 = vld [vmem:[#allocation129_spill] sm:$0xff] }
 0x6fa   : > { %v14216_v59 = vmax.f32 %v14214_v24, %v14215_v11  ;;  %v14266_v24 = vld [vmem:[#allocation159_spill] sm:$0xff] }
 0x6fb   : > { %v4918_v26 = vpack.c.bf16 %v14210_v52, %v14207_v27  ;;  %v14259_v27 = vld [vmem:[#allocation111_spill] sm:$0xff]  ;;  %v14262_v52 = vld [vmem:[#allocation120_spill] sm:$0xff] }
 0x6fc   : > { %v4917_v1 = vpack.c.bf16 %v14216_v59, %v14213_v58  ;;  %v14261_v21 = vmax.f32 %v14259_v27, %v14260_v54  ;;  %v14265_v58 = vld [vmem:[#allocation155_spill] sm:$0xff] }
 0x6fd   : > { %v14267_v11 = vmax.f32 %v14265_v58, %v14266_v24  ;;  %v14268_v59 = vld [vmem:[#allocation171_spill] sm:$0xff] }
 0x700   : > { %5265 = vmatmul.mubr.bf16.vlgmr.msra.gmra.mrb[128].mxu0 %v4901_v5  ;;  %v14221_v5 = vld [vmem:[#allocation76_spill] sm:$0xff] }
 0x701   : > { %5274 = vmatprep.mubr.bf16.mxu0 %v4906_v13  ;;  %v14222_v18 = vmax.f32 %v14220_v17, %v14221_v5  ;;  %v14227_v13 = vld [vmem:[#allocation81_spill] sm:$0xff] }
 0x702   : > { %v14228_v37 = vmax.f32 %v14226_v19, %v14227_v13  ;;  %v14272_v17 = vld [vmem:[#allocation161_spill] sm:$0xff]  ;;  %v14278_v19 = vld [vmem:[#allocation191_spill] sm:$0xff] }
 0x703   : > { %v4922_v6 = vpack.c.bf16 %v14222_v18, %v14219_v49  ;;  %v14271_v49 = vld [vmem:[#allocation143_spill] sm:$0xff]  ;;  %v14274_v18 = vld [vmem:[#allocation152_spill] sm:$0xff] }
 0x704   : > { %v4921_v41 = vpack.c.bf16 %v14228_v37, %v14225_v14  ;;  %v14273_v5 = vmax.f32 %v14271_v49, %v14272_v17  ;;  %v14277_v14 = vld [vmem:[#allocation187_spill] sm:$0xff] }
 0x705   : > { %v14279_v13 = vmax.f32 %v14277_v14, %v14278_v19  ;;  %v14280_v37 = vld [vmem:[#allocation203_spill] sm:$0xff] }
 0x708   : > { %5275 = vmatmul.mubr.bf16.gmra.mrb[132].mxu0 %v4905_v34  ;;  %v14233_v34 = vld [vmem:[#allocation92_spill] sm:$0xff] }
 0x709   : > { %5284 = vmatprep.mubr.bf16.mxu0 %v4910_v35  ;;  %v14234_v45 = vmax.f32 %v14232_v63, %v14233_v34  ;;  %v14239_v35 = vld [vmem:[#allocation97_spill] sm:$0xff] }
 0x70a   : > { %v14240_v44 = vmax.f32 %v14238_v2, %v14239_v35  ;;  %v14284_v63 = vld [vmem:[#allocation193_spill] sm:$0xff]  ;;  %v14290_v2 = vld [vmem:[#allocation223_spill] sm:$0xff] }
 0x70b   : > { %v4926_v39 = vpack.c.bf16 %v14234_v45, %v14231_v46  ;;  %v14283_v46 = vld [vmem:[#allocation175_spill] sm:$0xff]  ;;  %v14286_v45 = vld [vmem:[#allocation184_spill] sm:$0xff] }
 0x70c   : > { %v4925_v43 = vpack.c.bf16 %v14240_v44, %v14237_v40  ;;  %v14285_v34 = vmax.f32 %v14283_v46, %v14284_v63  ;;  %v14289_v40 = vld [vmem:[#allocation219_spill] sm:$0xff] }
 0x70d   : > { %v14291_v35 = vmax.f32 %v14289_v40, %v14290_v2  ;;  %v14292_v44 = vld [vmem:[#allocation235_spill] sm:$0xff]  ;;  %v14341_v40 = vld [vmem:[#allocation328_spill] sm:$0xff] }
 0x710   : > { %5285 = vmatmul.mubr.bf16.gmra.mrb[136].mxu0 %v4909_v29  ;;  %v14245_v29 = vld [vmem:[#allocation108_spill] sm:$0xff] }
 0x711   : > { %5294 = vmatprep.mubr.bf16.mxu0 %v4914_v12  ;;  %v14246_v0 = vmax.f32 %v14244_v31, %v14245_v29  ;;  %v14251_v12 = vld [vmem:[#allocation113_spill] sm:$0xff] }
 0x712   : > { %v14252_v36 = vmax.f32 %v14250_v4, %v14251_v12  ;;  %v14296_v31 = vld [vmem:[#allocation225_spill] sm:$0xff]  ;;  %v14302_v4 = vld [vmem:[#allocation255_spill] sm:$0xff] }
 0x713   : > { %v4930_v25 = vpack.c.bf16 %v14246_v0, %v14243_v50  ;;  %v14295_v50 = vld [vmem:[#allocation207_spill] sm:$0xff]  ;;  %v14298_v0 = vld [vmem:[#allocation216_spill] sm:$0xff] }
 0x714   : > { %v4929_v22 = vpack.c.bf16 %v14252_v36, %v14249_v62  ;;  %v14297_v29 = vmax.f32 %v14295_v50, %v14296_v31  ;;  %v14301_v62 = vld [vmem:[#allocation251_spill] sm:$0xff]  ;;  %v14346_v50 = vld [vmem:[#allocation24_spill] sm:$0xff] }
 0x715   : > { %v14303_v12 = vmax.f32 %v14301_v62, %v14302_v4  ;;  %v14304_v36 = vld [vmem:[#allocation267_spill] sm:$0xff] }
 0x718   : > { %5295 = vmatmul.mubr.bf16.gmra.mrb[140].mxu0 %v4913_v9  ;;  %v14257_v9 = vld [vmem:[#allocation136_spill] sm:$0xff] }
 0x719   : > { %5304 = vmatprep.mubr.bf16.mxu0 %v4918_v26  ;;  %v14258_v60 = vmax.f32 %v14256_v47, %v14257_v9  ;;  %v14263_v26 = vld [vmem:[#allocation145_spill] sm:$0xff] }
 0x71a   : > { %v14264_v30 = vmax.f32 %v14262_v52, %v14263_v26  ;;  %v14308_v47 = vld [vmem:[#allocation257_spill] sm:$0xff]  ;;  %v14314_v52 = vld [vmem:[#allocation287_spill] sm:$0xff] }
 0x71b   : > { %v4934_v7 = vpack.c.bf16 %v14258_v60, %v14255_v57  ;;  %v14307_v57 = vld [vmem:[#allocation239_spill] sm:$0xff]  ;;  %v14310_v60 = vld [vmem:[#allocation248_spill] sm:$0xff] }
 0x71c   : > { %v4933_v28 = vpack.c.bf16 %v14264_v30, %v14261_v21  ;;  %v14309_v9 = vmax.f32 %v14307_v57, %v14308_v47  ;;  %v14313_v21 = vld [vmem:[#allocation283_spill] sm:$0xff] }
 0x71d   : > { %v14315_v26 = vmax.f32 %v14313_v21, %v14314_v52  ;;  %v14316_v30 = vld [vmem:[#allocation299_spill] sm:$0xff] }
 0x720   : > { %5305 = vmatmul.mubr.bf16.gmra.mrb[144].mxu0 %v4917_v1  ;;  %v14269_v1 = vld [vmem:[#allocation168_spill] sm:$0xff] }
 0x721   : > { %5314 = vmatprep.mubr.bf16.mxu0 %v4922_v6  ;;  %v14270_v38 = vmax.f32 %v14268_v59, %v14269_v1  ;;  %v14275_v6 = vld [vmem:[#allocation177_spill] sm:$0xff] }
 0x722   : > { %v14276_v61 = vmax.f32 %v14274_v18, %v14275_v6  ;;  %v14320_v59 = vld [vmem:[#allocation289_spill] sm:$0xff]  ;;  %v14326_v18 = vld [vmem:[#allocation318_spill] sm:$0xff] }
 0x723   : > { %v4938_v16 = vpack.c.bf16 %v14270_v38, %v14267_v11  ;;  %v14319_v11 = vld [vmem:[#allocation271_spill] sm:$0xff]  ;;  %v14322_v38 = vld [vmem:[#allocation280_spill] sm:$0xff] }
 0x724   : > { %v4937_v15 = vpack.c.bf16 %v14276_v61, %v14273_v5  ;;  %v14321_v1 = vmax.f32 %v14319_v11, %v14320_v59  ;;  %v14325_v5 = vld [vmem:[#allocation306_spill] sm:$0xff]  ;;  %v14328_v61 = vld [vmem:[#allocation319_spill] sm:$0xff] }
 0x725   : > { %v14327_v6 = vmax.f32 %v14325_v5, %v14326_v18 }
 0x728   : > { %5315 = vmatmul.mubr.bf16.gmra.mrb[148].mxu0 %v4921_v41  ;;  %v14281_v41 = vld [vmem:[#allocation200_spill] sm:$0xff] }
 0x729   : > { %5324 = vmatprep.mubr.bf16.mxu0 %v4926_v39  ;;  %v14282_v33 = vmax.f32 %v14280_v37, %v14281_v41  ;;  %v14287_v39 = vld [vmem:[#allocation209_spill] sm:$0xff]  ;;  %v14332_v37 = vld [vmem:[#allocation320_spill] sm:$0xff] }
 0x72a   : > { %v14288_v10 = vmax.f32 %v14286_v45, %v14287_v39  ;;  %v14338_v45 = vld [vmem:[#allocation338_spill] sm:$0xff] }
 0x72b   : > { %v4942_v3 = vpack.c.bf16 %v14282_v33, %v14279_v13  ;;  %v14331_v13 = vld [vmem:[#allocation303_spill] sm:$0xff]  ;;  %v14339_v39 = vmax.f32 %v11375_v53, %v14338_v45 }
 0x72c   : > { %v4941_v56 = vpack.c.bf16 %v14288_v10, %v14285_v34  ;;  %v14333_v41 = vmax.f32 %v14331_v13, %v14332_v37  ;;  %v14334_v33 = vld [vmem:[#allocation323_spill] sm:$0xff]  ;;  %v14337_v34 = vmax.f32 %v11351_v20, %v11369_v48  ;;  %v14347_v48 = vld [vmem:[#allocation25_spill] sm:$0xff] }
 0x72e   : > { %v4962_v10 = vpack.c.bf16 %v14339_v39, %v14337_v34 }
 0x730   : > { %5325 = vmatmul.mubr.bf16.gmra.mrb[152].mxu0 %v4925_v43  ;;  %v14293_v43 = vld [vmem:[#allocation232_spill] sm:$0xff] }
 0x731   : > { %5334 = vmatprep.mubr.bf16.mxu0 %v4930_v25  ;;  %v14294_v51 = vmax.f32 %v14292_v44, %v14293_v43  ;;  %v14299_v25 = vld [vmem:[#allocation241_spill] sm:$0xff]  ;;  %v14344_v44 = vld [vmem:[#allocation335_spill] sm:$0xff] }
 0x732   : > { %v14300_v32 = vmax.f32 %v14298_v0, %v14299_v25 }
 0x733   : > { %v4946_v42 = vpack.c.bf16 %v14294_v51, %v14291_v35  ;;  %v14343_v35 = vld [vmem:[#allocation334_spill] sm:$0xff] }
 0x734   : > { %v4945_v23 = vpack.c.bf16 %v14300_v32, %v14297_v29  ;;  %v14345_v43 = vmax.f32 %v14343_v35, %v14344_v44 }
 0x738   : > { %5335 = vmatmul.mubr.bf16.gmra.mrb[156].mxu0 %v4929_v22  ;;  %v14305_v22 = vld [vmem:[#allocation264_spill] sm:$0xff] }
 0x739   : > { %5344 = vmatprep.mubr.bf16.mxu0 %v4934_v7  ;;  %v14306_v8 = vmax.f32 %v14304_v36, %v14305_v22  ;;  %v14311_v7 = vld [vmem:[#allocation273_spill] sm:$0xff] }
 0x73a   : > { %v14312_v27 = vmax.f32 %v14310_v60, %v14311_v7 }
 0x73b   : > { %v4950_v55 = vpack.c.bf16 %v14306_v8, %v14303_v12  ;;  %v11809_v8 = vld [vmem:[%s11923_s7] sm:$0xff] }
 0x73c   : > { %v4949_v54 = vpack.c.bf16 %v14312_v27, %v14309_v9  ;;  %v5962_v57 = vcombine.high %v11809_v8, %v11809_v8 }
 0x73e   : > { %5625 = vmatprep.mubr.bf16.mxu1 %v5962_v57 }
 0x740   : > { %5345 = vmatmul.mubr.bf16.gmra.mrb[160].mxu0 %v4933_v28  ;;  %v14317_v28 = vld [vmem:[#allocation296_spill] sm:$0xff] }
 0x741   : > { %5354 = vmatprep.mubr.bf16.mxu0 %v4938_v16  ;;  %v14318_v58 = vmax.f32 %v14316_v30, %v14317_v28  ;;  %v14323_v16 = vld [vmem:[#allocation305_spill] sm:$0xff] }
 0x742   : > { %v14324_v49 = vmax.f32 %v14322_v38, %v14323_v16  ;;  %v5634_v38 = vld [vmem:[#allocation5] sm:$0x1] }
 0x743   : > { %v4954_v24 = vpack.c.bf16 %v14318_v58, %v14315_v26 }
 0x744   : > { %v4953_v17 = vpack.c.bf16 %v14324_v49, %v14321_v1  ;;  %v6998_v49 = vmov 0  }
 0x745   : > { %6804 = vset.pattern.permute.xlu0 %v6998_v49 }
 0x746   : > { %5637 = vperm.xlu0 %6804, %v5634_v38  }
 0x748   : > { %5355 = vmatmul.mubr.bf16.gmra.mrb[164].mxu0 %v4937_v15  ;;  %v14329_v15 = vld [vmem:[#allocation337_spill] sm:$0xff] }
 0x749   : > { %5364 = vmatprep.mubr.bf16.mxu0 %v4942_v3  ;;  %v14330_v14 = vmax.f32 %v14328_v61, %v14329_v15  ;;  %v14335_v3 = vld [vmem:[#allocation331_spill] sm:$0xff] }
 0x74a   : > { %v14336_v46 = vmax.f32 %v14334_v33, %v14335_v3 }
 0x74b   : > { %v4958_v19 = vpack.c.bf16 %v14330_v14, %v14327_v6 }
 0x74c   : > { %v4957_v63 = vpack.c.bf16 %v14336_v46, %v14333_v41 }
 0x750   : > { %5365 = vmatmul.mubr.bf16.gmra.mrb[168].mxu0 %v4941_v56  ;;  %v14340_v56 = vld [vmem:[#allocation339_spill] sm:$0xff] }
 0x751   : > { %5374 = vmatprep.mubr.bf16.mxu0 %v4946_v42  ;;  %v14342_v2 = vmax.f32 %v14340_v56, %v14341_v40  ;;  %v5027_v42 = vld [vmem:[%s11922_s6] sm:$0x3] }
 0x752   : > { %v11797_v20 = vrot.slane %v5027_v42, %v14346_v50  ;;  %v11800_v53 = vrot.slane %v5027_v42, %v14347_v48 }
 0x753   : > { %v4961_v51 = vpack.c.bf16 %v14345_v43, %v14342_v2 }
 0x758   : > { %5375 = vmatmul.mubr.bf16.gmra.mrb[172].mxu0 %v4945_v23 }
 0x759   : > { %5384 = vmatprep.mubr.bf16.mxu0 %v4950_v55 }
 0x760   : > { %5385 = vmatmul.mubr.bf16.gmra.mrb[176].mxu0 %v4949_v54 }
 0x761   : > { %5394 = vmatprep.mubr.bf16.mxu0 %v4954_v24 }
 0x768   : > { %5395 = vmatmul.mubr.bf16.gmra.mrb[180].mxu0 %v4953_v17 }
 0x769   : > { %5404 = vmatprep.mubr.bf16.mxu0 %v4958_v19 }
 0x770   : > { %5405 = vmatmul.mubr.bf16.gmra.mrb[184].mxu0 %v4957_v63 }
 0x771   : > { %5414 = vmatprep.mubr.bf16.mxu0 %v4962_v10 }
 0x778   : > { %5415 = vmatmul.mubr.bf16.gmra.mrb[188].mxu0 %v4961_v51 }
 0x7d3   : > { %v5266_v31 = vpop.f32.mrb[128].mxu0 }
 0x7d4   : > { %v6102_v29 = vadd.f32 %v5266_v31, %v11797_v20  ;;  %v5268_v0 = vpop.f32.mrb[129].mxu0 }
 0x7d5   : > { %v6103_v25 = vadd.f32 %v5268_v0, %v11800_v53  ;;  %v5270_v32 = vpop.f32.mrb[130].mxu0 }
 0x7d6   : > { %v5425_v23 = vmul.f32 0.2, %v6102_v29  ;;  %v6104_v62 = vadd.f32 %v5270_v32, %v11797_v20  ;;  %v5272_v4 = vpop.f32.mrb[131].mxu0 }
 0x7d7   : > { %v5426_v12 = vmul.f32 0.2, %v6103_v25  ;;  %v6105_v36 = vadd.f32 %v5272_v4, %v11800_v53 }
 0x7d8   : > { %v5427_v22 = vmul.f32 0.2, %v6104_v62  ;;  %v5489_v47 = vmax.f32 %v6102_v29, %v5425_v23 }
 0x7d9   : > { %v5428_v55 = vmul.f32 0.2, %v6105_v36  ;;  %v5490_v7 = vmax.f32 %v6103_v25, %v5426_v12 }
 0x7da   : > { %v5491_v9 = vmax.f32 %v6104_v62, %v5427_v22 }
 0x7db   : > { %v5276_v60 = vpop.f32.mrb[132].mxu0  ;;  %v5492_v27 = vmax.f32 %v6105_v36, %v5428_v55 }
 0x7dc   : > { %v6106_v54 = vadd.f32 %v5276_v60, %v11797_v20  ;;  %v5278_v21 = vpop.f32.mrb[133].mxu0  ;;  %v5554_v52 = vpack.c.bf16 %v5491_v9, %v5489_v47 }
 0x7dd   : > { %v6107_v26 = vadd.f32 %v5278_v21, %v11800_v53  ;;  %v5280_v30 = vpop.f32.mrb[134].mxu0  ;;  %v5555_v28 = vpack.c.bf16 %v5492_v27, %v5490_v7 }
 0x7de   : > { %v5429_v58 = vmul.f32 0.2, %v6106_v54  ;;  %v6108_v24 = vadd.f32 %v5280_v30, %v11797_v20  ;;  %v5282_v11 = vpop.f32.mrb[135].mxu0 }
 0x7df   : > { %v5430_v59 = vmul.f32 0.2, %v6107_v26  ;;  %v6109_v1 = vadd.f32 %v5282_v11, %v11800_v53  ;;  %5593 = vmatprep.subr.bf16.mxu1 %v5555_v28 }
 0x7e0   : > { %v5431_v16 = vmul.f32 0.2, %v6108_v24  ;;  %5594 = vmatpush1.bf16.xpose.msra.mxu1 %v5554_v52  ;;  %v5493_v5 = vmax.f32 %v6106_v54, %v5429_v58 }
 0x7e1   : > { %v5432_v17 = vmul.f32 0.2, %v6109_v1  ;;  %v5494_v6 = vmax.f32 %v6107_v26, %v5430_v59 }
 0x7e2   : > { %v5495_v18 = vmax.f32 %v6108_v24, %v5431_v16 }
 0x7e3   : > { %v5496_v61 = vmax.f32 %v6109_v1, %v5432_v17  ;;  %v5286_v15 = vpop.f32.mrb[136].mxu0 }
 0x7e4   : > { %v6110_v14 = vadd.f32 %v5286_v15, %v11797_v20  ;;  %v5288_v19 = vpop.f32.mrb[137].mxu0  ;;  %v5556_v13 = vpack.c.bf16 %v5495_v18, %v5493_v5 }
 0x7e5   : > { %v6111_v37 = vadd.f32 %v5288_v19, %v11800_v53  ;;  %v5290_v41 = vpop.f32.mrb[138].mxu0  ;;  %v5557_v33 = vpack.c.bf16 %v5496_v61, %v5494_v6 }
 0x7e6   : > { %v5433_v3 = vmul.f32 0.2, %v6110_v14  ;;  %v6112_v46 = vadd.f32 %v5290_v41, %v11797_v20  ;;  %v5292_v63 = vpop.f32.mrb[139].mxu0 }
 0x7e7   : > { %v5434_v34 = vmul.f32 0.2, %v6111_v37  ;;  %v6113_v45 = vadd.f32 %v5292_v63, %v11800_v53  ;;  %5595 = vmatprep.subr.bf16.mxu1 %v5557_v33 }
 0x7e8   : > { %v5435_v39 = vmul.f32 0.2, %v6112_v46  ;;  %5596 = vmatpush1.bf16.xpose.msra.mxu1 %v5556_v13  ;;  %v5497_v56 = vmax.f32 %v6110_v14, %v5433_v3 }
 0x7e9   : > { %v5436_v10 = vmul.f32 0.2, %v6113_v45  ;;  %v5498_v2 = vmax.f32 %v6111_v37, %v5434_v34 }
 0x7ea   : > { %v5499_v40 = vmax.f32 %v6112_v46, %v5435_v39 }
 0x7eb   : > { %v5500_v35 = vmax.f32 %v6113_v45, %v5436_v10  ;;  %v5296_v44 = vpop.f32.mrb[140].mxu0 }
 0x7ec   : > { %v6114_v43 = vadd.f32 %v5296_v44, %v11797_v20  ;;  %v5298_v51 = vpop.f32.mrb[141].mxu0  ;;  %v5558_v42 = vpack.c.bf16 %v5499_v40, %v5497_v56 }
 0x7ed   : > { %v6115_v48 = vadd.f32 %v5298_v51, %v11800_v53  ;;  %v5300_v31 = vpop.f32.mrb[142].mxu0  ;;  %v5559_v29 = vpack.c.bf16 %v5500_v35, %v5498_v2 }
 0x7ee   : > { %v5437_v0 = vmul.f32 0.2, %v6114_v43  ;;  %v6116_v25 = vadd.f32 %v5300_v31, %v11797_v20  ;;  %v5302_v32 = vpop.f32.mrb[143].mxu0 }
 0x7ef   : > { %v5438_v23 = vmul.f32 0.2, %v6115_v48  ;;  %v6117_v62 = vadd.f32 %v5302_v32, %v11800_v53  ;;  %5597 = vmatprep.subr.bf16.mxu1 %v5559_v29 }
 0x7f0   : > { %v5439_v4 = vmul.f32 0.2, %v6116_v25  ;;  %5598 = vmatpush1.bf16.xpose.msra.mxu1 %v5558_v42  ;;  %v5501_v36 = vmax.f32 %v6114_v43, %v5437_v0 }
 0x7f1   : > { %v5440_v12 = vmul.f32 0.2, %v6117_v62  ;;  %v5502_v55 = vmax.f32 %v6115_v48, %v5438_v23 }
 0x7f2   : > { %v5503_v22 = vmax.f32 %v6116_v25, %v5439_v4 }
 0x7f3   : > { %v5504_v57 = vmax.f32 %v6117_v62, %v5440_v12  ;;  %v5306_v47 = vpop.f32.mrb[144].mxu0 }
 0x7f4   : > { %v6118_v9 = vadd.f32 %v5306_v47, %v11797_v20  ;;  %v5308_v60 = vpop.f32.mrb[145].mxu0  ;;  %v5560_v7 = vpack.c.bf16 %v5503_v22, %v5501_v36 }
 0x7f5   : > { %v6119_v27 = vadd.f32 %v5308_v60, %v11800_v53  ;;  %v5310_v54 = vpop.f32.mrb[146].mxu0  ;;  %v5561_v21 = vpack.c.bf16 %v5504_v57, %v5502_v55 }
 0x7f6   : > { %v5441_v52 = vmul.f32 0.2, %v6118_v9  ;;  %v6120_v26 = vadd.f32 %v5310_v54, %v11797_v20  ;;  %v5312_v30 = vpop.f32.mrb[147].mxu0 }
 0x7f7   : > { %v5442_v28 = vmul.f32 0.2, %v6119_v27  ;;  %v6121_v58 = vadd.f32 %v5312_v30, %v11800_v53  ;;  %5599 = vmatprep.subr.bf16.mxu1 %v5561_v21 }
 0x7f8   : > { %v5443_v24 = vmul.f32 0.2, %v6120_v26  ;;  %5600 = vmatpush1.bf16.xpose.msra.mxu1 %v5560_v7  ;;  %v5505_v59 = vmax.f32 %v6118_v9, %v5441_v52 }
 0x7f9   : > { %v5444_v11 = vmul.f32 0.2, %v6121_v58  ;;  %v5506_v38 = vmax.f32 %v6119_v27, %v5442_v28 }
 0x7fa   : > { %v5507_v1 = vmax.f32 %v6120_v26, %v5443_v24 }
 0x7fb   : > { %v5508_v16 = vmax.f32 %v6121_v58, %v5444_v11  ;;  %v5316_v49 = vpop.f32.mrb[148].mxu0 }
 0x7fc   : > { %v6122_v17 = vadd.f32 %v5316_v49, %v11797_v20  ;;  %v5318_v5 = vpop.f32.mrb[149].mxu0  ;;  %v5562_v18 = vpack.c.bf16 %v5507_v1, %v5505_v59 }
 0x7fd   : > { %v6123_v6 = vadd.f32 %v5318_v5, %v11800_v53  ;;  %v5320_v61 = vpop.f32.mrb[150].mxu0  ;;  %v5563_v15 = vpack.c.bf16 %v5508_v16, %v5506_v38 }
 0x7fe   : > { %v5445_v14 = vmul.f32 0.2, %v6122_v17  ;;  %v6124_v19 = vadd.f32 %v5320_v61, %v11797_v20  ;;  %v5322_v13 = vpop.f32.mrb[151].mxu0 }
 0x7ff   : > { %v5446_v37 = vmul.f32 0.2, %v6123_v6  ;;  %v6125_v41 = vadd.f32 %v5322_v13, %v11800_v53  ;;  %5601 = vmatprep.subr.bf16.mxu1 %v5563_v15 }
 0x800   : > { %v5447_v33 = vmul.f32 0.2, %v6124_v19  ;;  %5602 = vmatpush1.bf16.xpose.msra.mxu1 %v5562_v18  ;;  %v5509_v46 = vmax.f32 %v6122_v17, %v5445_v14 }
 0x801   : > { %v5448_v3 = vmul.f32 0.2, %v6125_v41  ;;  %v5510_v34 = vmax.f32 %v6123_v6, %v5446_v37 }
 0x802   : > { %v5511_v63 = vmax.f32 %v6124_v19, %v5447_v33 }
 0x803   : > { %v5512_v45 = vmax.f32 %v6125_v41, %v5448_v3  ;;  %v5326_v39 = vpop.f32.mrb[152].mxu0 }
 0x804   : > { %v6126_v10 = vadd.f32 %v5326_v39, %v11797_v20  ;;  %v5328_v56 = vpop.f32.mrb[153].mxu0  ;;  %v5564_v40 = vpack.c.bf16 %v5511_v63, %v5509_v46 }
 0x805   : > { %v6127_v2 = vadd.f32 %v5328_v56, %v11800_v53  ;;  %v5330_v35 = vpop.f32.mrb[154].mxu0  ;;  %v5565_v44 = vpack.c.bf16 %v5512_v45, %v5510_v34 }
 0x806   : > { %v5449_v43 = vmul.f32 0.2, %v6126_v10  ;;  %v6128_v51 = vadd.f32 %v5330_v35, %v11797_v20  ;;  %v5332_v42 = vpop.f32.mrb[155].mxu0 }
 0x807   : > { %v5450_v48 = vmul.f32 0.2, %v6127_v2  ;;  %v6129_v31 = vadd.f32 %v5332_v42, %v11800_v53  ;;  %5603 = vmatprep.subr.bf16.mxu1 %v5565_v44 }
 0x808   : > { %v5451_v29 = vmul.f32 0.2, %v6128_v51  ;;  %5604 = vmatpush1.bf16.xpose.msra.mxu1 %v5564_v40  ;;  %v5513_v25 = vmax.f32 %v6126_v10, %v5449_v43 }
 0x809   : > { %v5452_v0 = vmul.f32 0.2, %v6129_v31  ;;  %v5514_v23 = vmax.f32 %v6127_v2, %v5450_v48 }
 0x80a   : > { %v5515_v32 = vmax.f32 %v6128_v51, %v5451_v29 }
 0x80b   : > { %v5516_v62 = vmax.f32 %v6129_v31, %v5452_v0  ;;  %v5336_v4 = vpop.f32.mrb[156].mxu0 }
 0x80c   : > { %v6130_v12 = vadd.f32 %v5336_v4, %v11797_v20  ;;  %v5338_v36 = vpop.f32.mrb[157].mxu0  ;;  %v5566_v22 = vpack.c.bf16 %v5515_v32, %v5513_v25 }
 0x80d   : > { %v6131_v55 = vadd.f32 %v5338_v36, %v11800_v53  ;;  %v5340_v57 = vpop.f32.mrb[158].mxu0  ;;  %v5567_v47 = vpack.c.bf16 %v5516_v62, %v5514_v23 }
 0x80e   : > { %v5453_v9 = vmul.f32 0.2, %v6130_v12  ;;  %v6132_v60 = vadd.f32 %v5340_v57, %v11797_v20  ;;  %v5342_v7 = vpop.f32.mrb[159].mxu0 }
 0x80f   : > { %v5454_v27 = vmul.f32 0.2, %v6131_v55  ;;  %v6133_v54 = vadd.f32 %v5342_v7, %v11800_v53  ;;  %5605 = vmatprep.subr.bf16.mxu1 %v5567_v47 }
 0x810   : > { %v5455_v21 = vmul.f32 0.2, %v6132_v60  ;;  %5606 = vmatpush1.bf16.xpose.msra.mxu1 %v5566_v22  ;;  %v5517_v26 = vmax.f32 %v6130_v12, %v5453_v9 }
 0x811   : > { %v5456_v52 = vmul.f32 0.2, %v6133_v54  ;;  %v5518_v28 = vmax.f32 %v6131_v55, %v5454_v27 }
 0x812   : > { %v5519_v30 = vmax.f32 %v6132_v60, %v5455_v21 }
 0x813   : > { %v5520_v58 = vmax.f32 %v6133_v54, %v5456_v52  ;;  %v5346_v24 = vpop.f32.mrb[160].mxu0 }
 0x814   : > { %v6134_v11 = vadd.f32 %v5346_v24, %v11797_v20  ;;  %v5348_v59 = vpop.f32.mrb[161].mxu0  ;;  %v5568_v1 = vpack.c.bf16 %v5519_v30, %v5517_v26 }
 0x815   : > { %v6135_v38 = vadd.f32 %v5348_v59, %v11800_v53  ;;  %v5350_v16 = vpop.f32.mrb[162].mxu0  ;;  %v5569_v49 = vpack.c.bf16 %v5520_v58, %v5518_v28 }
 0x816   : > { %v5457_v17 = vmul.f32 0.2, %v6134_v11  ;;  %v6136_v5 = vadd.f32 %v5350_v16, %v11797_v20  ;;  %v5352_v18 = vpop.f32.mrb[163].mxu0 }
 0x817   : > { %v5458_v6 = vmul.f32 0.2, %v6135_v38  ;;  %v6137_v61 = vadd.f32 %v5352_v18, %v11800_v53  ;;  %5607 = vmatprep.subr.bf16.mxu1 %v5569_v49 }
 0x818   : > { %v5459_v15 = vmul.f32 0.2, %v6136_v5  ;;  %5608 = vmatpush1.bf16.xpose.msra.mxu1 %v5568_v1  ;;  %v5521_v19 = vmax.f32 %v6134_v11, %v5457_v17 }
 0x819   : > { %v5460_v14 = vmul.f32 0.2, %v6137_v61  ;;  %v5522_v37 = vmax.f32 %v6135_v38, %v5458_v6 }
 0x81a   : > { %v5523_v13 = vmax.f32 %v6136_v5, %v5459_v15 }
 0x81b   : > { %v5524_v41 = vmax.f32 %v6137_v61, %v5460_v14  ;;  %v5356_v33 = vpop.f32.mrb[164].mxu0 }
 0x81c   : > { %v6138_v3 = vadd.f32 %v5356_v33, %v11797_v20  ;;  %v5358_v46 = vpop.f32.mrb[165].mxu0  ;;  %v5570_v63 = vpack.c.bf16 %v5523_v13, %v5521_v19 }
 0x81d   : > { %v6139_v34 = vadd.f32 %v5358_v46, %v11800_v53  ;;  %v5360_v45 = vpop.f32.mrb[166].mxu0  ;;  %v5571_v39 = vpack.c.bf16 %v5524_v41, %v5522_v37 }
 0x81e   : > { %v5461_v10 = vmul.f32 0.2, %v6138_v3  ;;  %v6140_v56 = vadd.f32 %v5360_v45, %v11797_v20  ;;  %v5362_v40 = vpop.f32.mrb[167].mxu0 }
 0x81f   : > { %v5462_v2 = vmul.f32 0.2, %v6139_v34  ;;  %v6141_v35 = vadd.f32 %v5362_v40, %v11800_v53  ;;  %5609 = vmatprep.subr.bf16.mxu1 %v5571_v39 }
 0x820   : > { %v5463_v44 = vmul.f32 0.2, %v6140_v56  ;;  %5610 = vmatpush1.bf16.xpose.msra.mxu1 %v5570_v63  ;;  %v5525_v51 = vmax.f32 %v6138_v3, %v5461_v10 }
 0x821   : > { %v5464_v43 = vmul.f32 0.2, %v6141_v35  ;;  %v5526_v48 = vmax.f32 %v6139_v34, %v5462_v2 }
 0x822   : > { %v5527_v42 = vmax.f32 %v6140_v56, %v5463_v44 }
 0x823   : > { %v5528_v31 = vmax.f32 %v6141_v35, %v5464_v43  ;;  %v5366_v29 = vpop.f32.mrb[168].mxu0 }
 0x824   : > { %v6142_v0 = vadd.f32 %v5366_v29, %v11797_v20  ;;  %v5368_v25 = vpop.f32.mrb[169].mxu0  ;;  %v5572_v32 = vpack.c.bf16 %v5527_v42, %v5525_v51 }
 0x825   : > { %v6143_v23 = vadd.f32 %v5368_v25, %v11800_v53  ;;  %v5370_v62 = vpop.f32.mrb[170].mxu0  ;;  %v5573_v4 = vpack.c.bf16 %v5528_v31, %v5526_v48 }
 0x826   : > { %v5465_v12 = vmul.f32 0.2, %v6142_v0  ;;  %v6144_v36 = vadd.f32 %v5370_v62, %v11797_v20  ;;  %v5372_v22 = vpop.f32.mrb[171].mxu0 }
 0x827   : > { %v5466_v55 = vmul.f32 0.2, %v6143_v23  ;;  %v6145_v57 = vadd.f32 %v5372_v22, %v11800_v53  ;;  %5611 = vmatprep.subr.bf16.mxu1 %v5573_v4 }
 0x828   : > { %v5467_v47 = vmul.f32 0.2, %v6144_v36  ;;  %5612 = vmatpush1.bf16.xpose.msra.mxu1 %v5572_v32  ;;  %v5529_v60 = vmax.f32 %v6142_v0, %v5465_v12 }
 0x829   : > { %v5468_v9 = vmul.f32 0.2, %v6145_v57  ;;  %v5530_v27 = vmax.f32 %v6143_v23, %v5466_v55 }
 0x82a   : > { %v5531_v7 = vmax.f32 %v6144_v36, %v5467_v47 }
 0x82b   : > { %v5532_v54 = vmax.f32 %v6145_v57, %v5468_v9  ;;  %v5376_v21 = vpop.f32.mrb[172].mxu0 }
 0x82c   : > { %v6146_v52 = vadd.f32 %v5376_v21, %v11797_v20  ;;  %v5378_v26 = vpop.f32.mrb[173].mxu0  ;;  %v5574_v30 = vpack.c.bf16 %v5531_v7, %v5529_v60 }
 0x82d   : > { %v6147_v28 = vadd.f32 %v5378_v26, %v11800_v53  ;;  %v5380_v58 = vpop.f32.mrb[174].mxu0  ;;  %v5575_v24 = vpack.c.bf16 %v5532_v54, %v5530_v27 }
 0x82e   : > { %v5469_v11 = vmul.f32 0.2, %v6146_v52  ;;  %v6148_v59 = vadd.f32 %v5380_v58, %v11797_v20  ;;  %v5382_v1 = vpop.f32.mrb[175].mxu0 }
 0x82f   : > { %v5470_v38 = vmul.f32 0.2, %v6147_v28  ;;  %v6149_v16 = vadd.f32 %v5382_v1, %v11800_v53  ;;  %5613 = vmatprep.subr.bf16.mxu1 %v5575_v24 }
 0x830   : > { %v5471_v49 = vmul.f32 0.2, %v6148_v59  ;;  %5614 = vmatpush1.bf16.xpose.msra.mxu1 %v5574_v30  ;;  %v5533_v5 = vmax.f32 %v6146_v52, %v5469_v11 }
 0x831   : > { %v5472_v17 = vmul.f32 0.2, %v6149_v16  ;;  %v5534_v6 = vmax.f32 %v6147_v28, %v5470_v38 }
 0x832   : > { %v5535_v18 = vmax.f32 %v6148_v59, %v5471_v49 }
 0x833   : > { %v5536_v61 = vmax.f32 %v6149_v16, %v5472_v17  ;;  %v5386_v15 = vpop.f32.mrb[176].mxu0 }
 0x834   : > { %v6150_v14 = vadd.f32 %v5386_v15, %v11797_v20  ;;  %v5388_v19 = vpop.f32.mrb[177].mxu0  ;;  %v5576_v13 = vpack.c.bf16 %v5535_v18, %v5533_v5 }
 0x835   : > { %v6151_v37 = vadd.f32 %v5388_v19, %v11800_v53  ;;  %v5390_v41 = vpop.f32.mrb[178].mxu0  ;;  %v5577_v33 = vpack.c.bf16 %v5536_v61, %v5534_v6 }
 0x836   : > { %v5473_v3 = vmul.f32 0.2, %v6150_v14  ;;  %v6152_v46 = vadd.f32 %v5390_v41, %v11797_v20  ;;  %v5392_v63 = vpop.f32.mrb[179].mxu0 }
 0x837   : > { %v5474_v34 = vmul.f32 0.2, %v6151_v37  ;;  %v6153_v45 = vadd.f32 %v5392_v63, %v11800_v53  ;;  %5615 = vmatprep.subr.bf16.mxu1 %v5577_v33 }
 0x838   : > { %v5475_v39 = vmul.f32 0.2, %v6152_v46  ;;  %5616 = vmatpush1.bf16.xpose.msra.mxu1 %v5576_v13  ;;  %v5537_v56 = vmax.f32 %v6150_v14, %v5473_v3 }
 0x839   : > { %v5476_v10 = vmul.f32 0.2, %v6153_v45  ;;  %v5538_v2 = vmax.f32 %v6151_v37, %v5474_v34 }
 0x83a   : > { %v5539_v40 = vmax.f32 %v6152_v46, %v5475_v39 }
 0x83b   : > { %v5540_v35 = vmax.f32 %v6153_v45, %v5476_v10  ;;  %v5396_v44 = vpop.f32.mrb[180].mxu0 }
 0x83c   : > { %v6154_v43 = vadd.f32 %v5396_v44, %v11797_v20  ;;  %v5398_v51 = vpop.f32.mrb[181].mxu0  ;;  %v5578_v42 = vpack.c.bf16 %v5539_v40, %v5537_v56  ;;  %v5961_v56 = vcombine.low %v11809_v8, %v11809_v8 }
 0x83d   : > { %v6155_v48 = vadd.f32 %v5398_v51, %v11800_v53  ;;  %v5400_v31 = vpop.f32.mrb[182].mxu0  ;;  %v5579_v29 = vpack.c.bf16 %v5540_v35, %v5538_v2 }
 0x83e   : > { %v5477_v0 = vmul.f32 0.2, %v6154_v43  ;;  %v6156_v25 = vadd.f32 %v5400_v31, %v11797_v20  ;;  %v5402_v32 = vpop.f32.mrb[183].mxu0 }
 0x83f   : > { %v5478_v23 = vmul.f32 0.2, %v6155_v48  ;;  %v6157_v62 = vadd.f32 %v5402_v32, %v11800_v53  ;;  %5617 = vmatprep.subr.bf16.mxu1 %v5579_v29 }
 0x840   : > { %v5479_v4 = vmul.f32 0.2, %v6156_v25  ;;  %5618 = vmatpush1.bf16.xpose.msra.mxu1 %v5578_v42  ;;  %v5541_v36 = vmax.f32 %v6154_v43, %v5477_v0 }
 0x841   : > { %v5480_v12 = vmul.f32 0.2, %v6157_v62  ;;  %v5542_v55 = vmax.f32 %v6155_v48, %v5478_v23 }
 0x842   : > { %v5543_v22 = vmax.f32 %v6156_v25, %v5479_v4 }
 0x843   : > { %v5544_v57 = vmax.f32 %v6157_v62, %v5480_v12  ;;  %v5406_v47 = vpop.f32.mrb[184].mxu0  ;;  %v14348_v12 = vld [vmem:[#allocation23_spill] sm:$0xff] }
 0x844   : > { %v6158_v9 = vadd.f32 %v5406_v47, %v11797_v20  ;;  %v5408_v60 = vpop.f32.mrb[185].mxu0  ;;  %v5580_v7 = vpack.c.bf16 %v5543_v22, %v5541_v36  ;;  %v14349_v47 = vlaneseq }
 0x845   : > { %v6159_v27 = vadd.f32 %v5408_v60, %v11800_v53  ;;  %v5410_v54 = vpop.f32.mrb[186].mxu0  ;;  %v5581_v21 = vpack.c.bf16 %v5544_v57, %v5542_v55 }
 0x846   : > { %v5481_v52 = vmul.f32 0.2, %v6158_v9  ;;  %v6160_v26 = vadd.f32 %v5410_v54, %v11797_v20  ;;  %v5412_v30 = vpop.f32.mrb[187].mxu0  ;;  %vm5678_vm0 = vcmp.lt.s32.totalorder %v14349_v47, 256 }
 0x847   : > { %v5482_v28 = vmul.f32 0.2, %v6159_v27  ;;  %v6161_v58 = vadd.f32 %v5412_v30, %v11800_v53  ;;  %5619 = vmatprep.subr.bf16.mxu1 %v5581_v21 }
 0x848   : > { %v5483_v24 = vmul.f32 0.2, %v6160_v26  ;;  %5620 = vmatpush1.bf16.xpose.msra.mxu1 %v5580_v7  ;;  %v5545_v59 = vmax.f32 %v6158_v9, %v5481_v52 }
 0x849   : > { %v5484_v11 = vmul.f32 0.2, %v6161_v58  ;;  %v5546_v38 = vmax.f32 %v6159_v27, %v5482_v28 }
 0x84a   : > { %v5547_v1 = vmax.f32 %v6160_v26, %v5483_v24 }
 0x84b   : > { %v5548_v16 = vmax.f32 %v6161_v58, %v5484_v11  ;;  %v5416_v49 = vpop.f32.mrb[188].mxu0 }
 0x84c   : > { %v6162_v17 = vadd.f32 %v5416_v49, %v11797_v20  ;;  %v5418_v5 = vpop.f32.mrb[189].mxu0  ;;  %v5582_v18 = vpack.c.bf16 %v5547_v1, %v5545_v59 }
 0x84d   : > { %v6163_v6 = vadd.f32 %v5418_v5, %v11800_v53  ;;  %v5420_v61 = vpop.f32.mrb[190].mxu0  ;;  %v5583_v15 = vpack.c.bf16 %v5548_v16, %v5546_v38 }
 0x84e   : > { %v5485_v14 = vmul.f32 0.2, %v6162_v17  ;;  %v6164_v19 = vadd.f32 %v5420_v61, %v11797_v20  ;;  %v5422_v13 = vpop.f32.mrb[191].mxu0  ;;  %v5638_v20 = vpop.permute.xlu0 %5637 }
 0x84f   : > { %v5486_v37 = vmul.f32 0.2, %v6163_v6  ;;  %v6165_v41 = vadd.f32 %v5422_v13, %v11800_v53  ;;  %5621 = vmatprep.subr.bf16.mxu1 %v5583_v15  ;;  %v5643_v40 = vrot.slane %v5638_v20, %v14346_v50  ;;  %v6999_v50 = vmov 1966171168  }
 0x850   : > { %v5487_v33 = vmul.f32 0.2, %v6164_v19  ;;  %5622 = vmatpush1.bf16.xpose.msra.mxu1 %v5582_v18  ;;  %v5549_v46 = vmax.f32 %v6162_v17, %v5485_v14  ;;  %v5662_v23 = vunpack.c.l.s4 %v6999_v50 }
 0x851   : > { %v5488_v3 = vmul.f32 0.2, %v6165_v41  ;;  %v5550_v34 = vmax.f32 %v6163_v6, %v5486_v37 }
 0x852   : > { %v5551_v63 = vmax.f32 %v6164_v19, %v5487_v33  ;;  %v5663_v62 = vunpack.c.0.s8 %v5662_v23 }
 0x853   : > { %v5552_v45 = vmax.f32 %v6165_v41, %v5488_v3 }
 0x854   : > { %v5584_v39 = vpack.c.bf16 %v5551_v63, %v5549_v46  ;;  %v5666_v36 = vsub.s32 %v5663_v62, %v14348_v12 }
 0x855   : > { %v5585_v10 = vpack.c.bf16 %v5552_v45, %v5550_v34 }
 0x857   : > { %5623 = vmatprep.subr.bf16.mxu1 %v5585_v10 }
 0x858   : > { %5624 = vmatpush1.bf16.xpose.msra.mxu1 %v5584_v39 }
 0x85f   : > { %5626 = vmatmul.mubr.bf16.vlgmr.msra.gmra.mrb[0].mxu1 %v5961_v56 }
 0x932   : > { %v5627_v53 = vpop.f32.mrb[0].mxu1 }
 0x933   : > { %v5644_v2 = vadd.f32 %v5643_v40, %v5627_v53  ;;  %v5629_v35 = vpop.f32.mrb[1].mxu1 }
 0x934   : > { %v5645_v44 = vadd.f32 %v5643_v40, %v5629_v35  ;;  %v5631_v43 = vpop.f32.mrb[2].mxu1 }
 0x935   : > { %v5646_v51 = vsub.f32 0.0, %v5644_v2  ;;  %v5632_v42 = vpop.f32.mrb[3].mxu1 }
 0x936   : > { %v5647_v48 = vsub.f32 0.0, %v5645_v44 }
 0x937   : > { %v5648_v31 = vmul.f32 1.442695, %v5646_v51 }
 0x938   : > { %v5650_v29 = vmul.f32 1.442695, %v5647_v48 }
 0x939   : > { %6807 = vpow2.f32 %v5648_v31 }
 0x93a   : > { %6809 = vpow2.f32 %v5650_v29 }
 0x943   : > { %v6808_v0 = vpop.eup %6807 }
 0x944   : > { %v6810_v8 = vpop.eup %6809  ;;  %v5652_v25 = vadd.f32 1.0, %v6808_v0 }
 0x945   : > { %v5653_v32 = vadd.f32 1.0, %v6810_v8 }
 0x946   : > { %6811 = vrcp.f32 %v5652_v25 }
 0x947   : > { %6813 = vrcp.f32 %v5653_v32 }
 0x950   : > { %v6812_v4 = vpop.eup %6811 }
 0x951   : > { %v6814_v22 = vpop.eup %6813 }
 0x952   : > { %v5660_v55 = vcombine.low %v6812_v4, %v6814_v22 }
 0x954   : > { %v5667_v57 = vrot.slane %v5660_v55, %v5666_v36 }
 0x956   : > { %v5674_v9 = vrot.slane %v5667_v57, %v5666_v36 }
 0x958   : > { %5688 = vst.msk [vmem:[%s5687_s27] ss:$2 sm:$0x3] %vm5678_vm0, %v5674_v9 }
 0x959   : > { %6914 = shalt.err (!%p6911_p4)
}
 0x95a   : > { %s6915_s20 = scalar_lea.hbm %s11925_s9, 64 }
 0x95b   : > { %p6916_p5 = scmp.ne.s32.totalorder %s11925_s9, %s6915_s20  ;;  %p6921_p0 = scmp.lt.u32.totalorder %s6915_s20, %s11925_s9 }
 0x95d   : > { %p6917_p10 = pnand %p6916_p5, %p6673_p13 }
 0x95f   : > { %p6918_p12 = pneg %p6917_p10 }
 0x961   : > { %p6923_p2 = pnand %p6921_p0, %p6918_p12 }
 0x963   : > { %6926 = shalt.err (!%p6923_p2)
}
 0x964   : > { %6651 = dma.vmem_to_hbm [thread:$0]  (%p6673_p13), %s5697_s26, 64, %s11925_s9, [#allocation8]  }
 0x965   : > { %6960 = dma.done.wait (%p6673_p13), [#allocation8], 64  }
 0x966   : > { %6962 = vsyncadd (%p6673_p13), [#allocation8], 4294967232 }
 0x967 PF: > { %p23_p11 = scmp.ge.s32.totalorder %s7147_s30, 4   ;;  %s14350_s11 = smov %s6969_s12 }
 0x968   : > { %s14351_s12 = smov %s6973_s13  ;;  %s14352_s13 = smov %s7158_s17 }
 0x969   : > { %s14353_s14 = smov %s7147_s30  ;;  %25 = sbr.rel (!%p23_p11) target bundleno = 8 (0x8), region = 125 }
 0x970   :  { %5709 = vsyncpa [#allocation7], 1 }
 0x971   :  { %5711 = vsyncpa [#allocation7 + $0x1], 1 }
 0x972   :  { %5712 = vsyncpa [#allocation10], 1 }
 0x973   :  { %5713 = vsyncpa [#allocation8], 1 }
 0x974   :  { %5715 = vsyncpa [#allocation8 + $0x1], 1 }
 0x975   :  { %5716 = vsyncmov [#allocation4] }
 0x978   :  { %s5717_s8 = vpop.sfrf %5716 }
 0x979   :  { %p5969_p13 = scmp.ne.s32.totalorder %s5717_s8, 0 }
 0x97b   :  { %5721 = shalt.err (%p5969_p13)  }
 0x97c   :  { %5723 = vsyncmov [#allocation4 + $0x1] }
 0x97f   :  { %s5724_s28 = vpop.sfrf %5723 }
 0x980   :  { %p5970_p3 = scmp.ne.s32.totalorder %s5724_s28, 0 }
 0x982   :  { %5728 = shalt.err (%p5970_p3)  }

</bundles_post_ra>
